<compile_context>
chip_gen: v5e
topology: v5e:2x2
jax: 0.10.0
libtpu: 0.0.40
codegen_flags: <defaults>
</compile_context>

<pallas_src>
import functools

import jax
import jax.numpy as jnp
from jax import lax
from jax.experimental import pallas as pl
from jax.experimental.pallas import tpu as pltpu

BN_EPS = 1e-3  # nn.BatchNorm2d(out_channels, eps=0.001)


# ------------------------------ fused kernel -------------------------------

def _intensive_layer_kernel(x_ref, m_ref,
                            wf_ref, bf_ref,
                            w52_ref, b52_ref,
                            w32_ref, b32_ref,
                            w33_ref, b33_ref,
                            wp_ref, bp_ref,
                            wo_ref, bo_ref,
                            o_ref, *, W, G, BG):
    """Whole IntensiveLayer; activations laid out (C, N*H*W), batch on lanes."""
    L = x_ref.shape[-1]          # N * H * W  (lane-dense minor dim)
    EXT = 2 * W + 2              # max |flat shift| of the 5x5 conv (pad=2)

    x = x_ref[...]               # (Cin, L) f32

    def mask(dh, dw):
        i = (dh + 2) * 5 + (dw + 2)
        return m_ref[i:i + 1, :]                          # (1, L) f32

    def extend(a):
        # Zero-extend along lanes so every tap shift is a plain static slice.
        z = jnp.zeros((a.shape[0], EXT), jnp.float32)
        return jnp.concatenate([z, a, z], axis=1)         # (C, L + 2*EXT)

    def tap(ae, dh, dw):
        s = dh * W + dw
        return ae[:, EXT + s: EXT + s + L] * mask(dh, dw)  # (C, L) f32

    def relu(y):
        return jnp.maximum(y, 0.0)

    def cbr_kxk(a, K, w_ref, b_ref):
        # Per-kh chunked im2col: K MXU dots of contraction K*Cin accumulated in
        # f32 (no full-patch concat, no vreg spills); chunks + weights are bf16.
        P = (K - 1) // 2
        ae = extend(a)
        acc = jnp.zeros((w_ref.shape[1], L), jnp.float32)
        for kh in range(K):
            dh = kh - P
            chunk = jnp.concatenate(
                [tap(ae, dh, kw - P).astype(jnp.bfloat16) for kw in range(K)],
                axis=0)                                   # (K*Cin, L) bf16
            acc = acc + jnp.dot(w_ref[kh], chunk,
                                preferred_element_type=jnp.float32)
        return relu(acc + b_ref[...])

    # Fused 1x1 convs on x: rows [0:G]=branch1x1, [G:G+BG]=branch5x5_1,
    # [G+BG:G+2BG]=branch3x3dbl_1 (BN folded; one bias+ReLU epilogue).
    yf = relu(jnp.dot(wf_ref[...], x, preferred_element_type=jnp.float32)
              + bf_ref[...])                              # (G+2BG, L)

    branch1x1 = yf[0:G]
    branch5x5 = cbr_kxk(yf[G:G + BG], 5, w52_ref, b52_ref)
    b3 = cbr_kxk(yf[G + BG:G + 2 * BG], 3, w32_ref, b32_ref)
    branch3x3dbl = cbr_kxk(b3, 3, w33_ref, b33_ref)

    # 3x3 avg pool (stride 1, pad 1, count_include_pad); 1/9 folded into wp.
    xe = extend(x)
    pool = jnp.zeros_like(x)
    for dh in range(-1, 2):
        for dw in range(-1, 2):
            pool = pool + tap(xe, dh, dw)
    branch_pool = relu(jnp.dot(wp_ref[...], pool,
                               preferred_element_type=jnp.float32)
                       + bp_ref[...])

    cat = jnp.concatenate([branch1x1, branch5x5, branch3x3dbl, branch_pool],
                          axis=0)                         # (4G, L)
    # TODO(synk): F.dropout training-mode random mask not implemented; identity
    # (inference / drop_rate=0) semantics are used.
    out = relu(jnp.dot(wo_ref[...], cat, preferred_element_type=jnp.float32)
               + bo_ref[...])                             # (G, L)

    # torch.cat([x, outputs], 1): one lane-dense store of the full result.
    o_ref[...] = jnp.concatenate([x, out], axis=0).astype(o_ref.dtype)


# -------------------------------- wrapper -----------------------------------

def _fold_conv_bn(p, *, pre_scale=1.0, w_dtype=jnp.float32):
    """Fold eval-mode BN (and an optional input pre-scale) into the conv.

    Returns:
      1x1 conv : weight (Cout, Cin)
      KxK conv : weight (K, Cout, K*Cin) laid out [kh, o, kw*Cin + ci]
      bias     : (Cout, 1) float32
    """
    w = p["w"].astype(jnp.float32)                     # (Cout, Cin, K, K) OIHW
    cout, cin, K, _ = w.shape
    bn_scale = p["gamma"] / jnp.sqrt(p["var"] + BN_EPS)
    wf = w * bn_scale[:, None, None, None] * pre_scale
    b = (p["beta"] - p["mean"] * bn_scale).reshape(cout, 1).astype(jnp.float32)
    if K == 1:
        w2 = wf.reshape(cout, cin)
    else:
        w2 = jnp.transpose(wf, (2, 0, 3, 1)).reshape(K, cout, K * cin)
    return w2.astype(w_dtype), b


def _full_spec(a):
    nd = a.ndim
    return pl.BlockSpec(a.shape, lambda i: (0,) * nd)


def intensive_layer_forward(params, x_nchw, drop_rate=0.0):
    """IntensiveLayer.forward (eval-mode BN / dropout). NCHW in, NCHW out."""
    N, cin, H, W = x_nchw.shape
    L = N * H * W
    G = params["branch1x1"]["w"].shape[0]              # growth_rate
    BG = params["branch5x5_1"]["w"].shape[0]           # bn_size * growth_rate

    # Batch stacked on lanes: NCHW -> (C, N*H*W).
    x = jnp.transpose(x_nchw.astype(jnp.float32), (1, 0, 2, 3)).reshape(cin, L)

    # Per-(dh,dw) tap-validity masks (image borders + cross-image bleed),
    # built once here and kept VMEM-resident inside the kernel.
    idx = jnp.arange(L, dtype=jnp.int32)
    row = (idx % (H * W)) // W
    col = idx % W
    masks = jnp.stack(
        [((row + dh >= 0) & (row + dh < H) & (col + dw >= 0) & (col + dw < W))
         for dh in range(-2, 3) for dw in range(-2, 3)],
        axis=0).astype(jnp.float32)                    # (25, L)

    w1, b1 = _fold_conv_bn(params["branch1x1"])
    w51, b51 = _fold_conv_bn(params["branch5x5_1"])
    w31, b31 = _fold_conv_bn(params["branch3x3dbl_1"])
    wf = jnp.concatenate([w1, w51, w31], axis=0)       # (G + 2*BG, Cin)
    bf = jnp.concatenate([b1, b51, b31], axis=0)       # (G + 2*BG, 1)

    w52, b52 = _fold_conv_bn(params["branch5x5_2"], w_dtype=jnp.bfloat16)
    w32, b32 = _fold_conv_bn(params["branch3x3dbl_2"], w_dtype=jnp.bfloat16)
    w33, b33 = _fold_conv_bn(params["branch3x3dbl_3"], w_dtype=jnp.bfloat16)
    wp, bp = _fold_conv_bn(params["branch_pool"], pre_scale=1.0 / 9.0)
    wo, bo = _fold_conv_bn(params["branch_1x1_output"])

    args = [x, masks, wf, bf, w52, b52, w32, b32, w33, b33, wp, bp, wo, bo]

    kernel = functools.partial(_intensive_layer_kernel, W=W, G=G, BG=BG)
    out = pl.pallas_call(
        kernel,
        out_shape=jax.ShapeDtypeStruct((cin + G, L), jnp.float32),
        grid=(1,),
        in_specs=[_full_spec(a) for a in args],
        out_specs=pl.BlockSpec((cin + G, L), lambda i: (0, 0)),
        compiler_params=pltpu.CompilerParams(
            dimension_semantics=("arbitrary",)),
    )(*args)

    # (Cin+G, N*H*W) -> NCHW (already includes torch.cat([x, outputs], 1)).
    return jnp.transpose(out.reshape(cin + G, N, H, W), (1, 0, 2, 3))


# ------------------------- parameter construction ---------------------------

def init_conv_bn(key, cin, cout, ksize):
    """Deterministic synthetic params for one ConvBnRelu block (OIHW weight)."""
    kw_, kg, kb, km, kv = jax.random.split(key, 5)
    fan_in = cin * ksize * ksize
    return {
        "w": jax.random.normal(kw_, (cout, cin, ksize, ksize), jnp.float32)
             / jnp.sqrt(float(fan_in)),
        "gamma": 1.0 + 0.1 * jax.random.normal(kg, (cout,), jnp.float32),
        "beta": 0.1 * jax.random.normal(kb, (cout,), jnp.float32),
        "mean": 0.1 * jax.random.normal(km, (cout,), jnp.float32),
        "var": jax.random.uniform(kv, (cout,), jnp.float32,
                                  minval=0.5, maxval=1.5),
        "pad": (ksize - 1) // 2,
    }


def make_intensive_layer_params(key, in_channels, growth_rate, bn_size):
    ks = jax.random.split(key, 8)
    g, bg = growth_rate, bn_size * growth_rate
    return {
        "branch1x1":         init_conv_bn(ks[0], in_channels, g, 1),
        "branch5x5_1":       init_conv_bn(ks[1], in_channels, bg, 1),
        "branch5x5_2":       init_conv_bn(ks[2], bg, g, 5),
        "branch3x3dbl_1":    init_conv_bn(ks[3], in_channels, bg, 1),
        "branch3x3dbl_2":    init_conv_bn(ks[4], bg, g, 3),
        "branch3x3dbl_3":    init_conv_bn(ks[5], g, g, 3),
        "branch_pool":       init_conv_bn(ks[6], in_channels, g, 1),
        "branch_1x1_output": init_conv_bn(ks[7], 4 * g, g, 1),
    }


# ---------------------------- pure-JAX reference ----------------------------

def _conv_bn_relu_ref(x, p):
    y = lax.conv_general_dilated(
        x, p["w"], window_strides=(1, 1),
        padding=[(p["pad"], p["pad"]), (p["pad"], p["pad"])],
        dimension_numbers=("NCHW", "OIHW", "NCHW"),
        precision=lax.Precision.HIGHEST)
    scale = p["gamma"] / jnp.sqrt(p["var"] + BN_EPS)
    bias = p["beta"] - p["mean"] * scale
    y = y * scale[None, :, None, None] + bias[None, :, None, None]
    return jnp.maximum(y, 0.0)


def intensive_layer_reference(params, x):
    cbr = lambda name, t: _conv_bn_relu_ref(t, params[name])
    b1 = cbr("branch1x1", x)
    b5 = cbr("branch5x5_2", cbr("branch5x5_1", x))
    b3 = cbr("branch3x3dbl_3", cbr("branch3x3dbl_2", cbr("branch3x3dbl_1", x)))
    pool = lax.reduce_window(x, 0.0, lax.add, (1, 1, 3, 3), (1, 1, 1, 1),
                             [(0, 0), (0, 0), (1, 1), (1, 1)]) / 9.0
    bp = cbr("branch_pool", pool)
    outs = jnp.concatenate([b1, b5, b3, bp], axis=1)
    outs = cbr("branch_1x1_output", outs)
    return jnp.concatenate([x, outs], axis=1)


# ----------------------------------- main ------------------------------------

if __name__ == "__main__":
    in_channels, growth_rate, bn_size, drop_rate = 4, 8, 2, 0.0
    N, H, W = 2, 16, 16

    pkey, xkey = jax.random.split(jax.random.PRNGKey(0))
    params = make_intensive_layer_params(pkey, in_channels, growth_rate, bn_size)
    x = jax.random.normal(xkey, (N, in_channels, H, W), jnp.float32)  # NCHW

    out = jax.block_until_ready(intensive_layer_forward(params, x, drop_rate))
    assert out.shape == (N, in_channels + growth_rate, H, W), out.shape
    assert out.dtype == jnp.float32

    ref = jax.block_until_ready(intensive_layer_reference(params, x))
    err = float(jnp.max(jnp.abs(out - ref)))
    # KxK im2col chunks + weights are bf16 (f32 accumulation), hence 2e-2.
    assert err < 2e-2, f"max abs err {err}"

    print("KERNEL_OK")
</pallas_src>

<mosaic_0001>
module attributes {stable_mosaic.version = 11 : i64} {
  func.func @_intensive_layer_kernel(%arg0: i32, %arg1: memref<4x512xf32, #tpu.memory_space<vmem>>, %arg2: memref<25x512xf32, #tpu.memory_space<vmem>>, %arg3: memref<40x4xf32, #tpu.memory_space<vmem>>, %arg4: memref<40x1xf32, #tpu.memory_space<vmem>>, %arg5: memref<5x8x80xbf16, #tpu.memory_space<vmem>>, %arg6: memref<8x1xf32, #tpu.memory_space<vmem>>, %arg7: memref<3x8x48xbf16, #tpu.memory_space<vmem>>, %arg8: memref<8x1xf32, #tpu.memory_space<vmem>>, %arg9: memref<3x8x24xbf16, #tpu.memory_space<vmem>>, %arg10: memref<8x1xf32, #tpu.memory_space<vmem>>, %arg11: memref<8x4xf32, #tpu.memory_space<vmem>>, %arg12: memref<8x1xf32, #tpu.memory_space<vmem>>, %arg13: memref<8x32xf32, #tpu.memory_space<vmem>>, %arg14: memref<8x1xf32, #tpu.memory_space<vmem>>, %arg15: memref<12x512xf32, #tpu.memory_space<vmem>>) attributes {dimension_semantics = [#tpu.dimension_semantics<arbitrary>], iteration_bounds = array<i64: 1>, scalar_prefetch = 0 : i64, scratch_operands = 0 : i64, tpu.core_type = #tpu.core_type<tc>, window_params = [{pipeline_mode = #tpu.pipeline_mode<synchronous>, transform_indices = @transform_0, window_bounds = array<i64: 4, 512>}, {pipeline_mode = #tpu.pipeline_mode<synchronous>, transform_indices = @transform_1, window_bounds = array<i64: 25, 512>}, {pipeline_mode = #tpu.pipeline_mode<synchronous>, transform_indices = @transform_2, window_bounds = array<i64: 40, 4>}, {pipeline_mode = #tpu.pipeline_mode<synchronous>, transform_indices = @transform_3, window_bounds = array<i64: 40, 1>}, {pipeline_mode = #tpu.pipeline_mode<synchronous>, transform_indices = @transform_4, window_bounds = array<i64: 5, 8, 80>}, {pipeline_mode = #tpu.pipeline_mode<synchronous>, transform_indices = @transform_5, window_bounds = array<i64: 8, 1>}, {pipeline_mode = #tpu.pipeline_mode<synchronous>, transform_indices = @transform_6, window_bounds = array<i64: 3, 8, 48>}, {pipeline_mode = #tpu.pipeline_mode<synchronous>, transform_indices = @transform_7, window_bounds = array<i64: 8, 1>}, {pipeline_mode = #tpu.pipeline_mode<synchronous>, transform_indices = @transform_8, window_bounds = array<i64: 3, 8, 24>}, {pipeline_mode = #tpu.pipeline_mode<synchronous>, transform_indices = @transform_9, window_bounds = array<i64: 8, 1>}, {pipeline_mode = #tpu.pipeline_mode<synchronous>, transform_indices = @transform_10, window_bounds = array<i64: 8, 4>}, {pipeline_mode = #tpu.pipeline_mode<synchronous>, transform_indices = @transform_11, window_bounds = array<i64: 8, 1>}, {pipeline_mode = #tpu.pipeline_mode<synchronous>, transform_indices = @transform_12, window_bounds = array<i64: 8, 32>}, {pipeline_mode = #tpu.pipeline_mode<synchronous>, transform_indices = @transform_13, window_bounds = array<i64: 8, 1>}, {pipeline_mode = #tpu.pipeline_mode<synchronous>, transform_indices = @transform_14, window_bounds = array<i64: 12, 512>}]} {
    %c0 = arith.constant 0 : index
    %c0_0 = arith.constant 0 : index
    %0 = vector.load %arg1[%c0, %c0_0] : memref<4x512xf32, #tpu.memory_space<vmem>>, vector<4x512xf32>
    %c0_1 = arith.constant 0 : index
    %c0_2 = arith.constant 0 : index
    %1 = vector.load %arg3[%c0_1, %c0_2] : memref<40x4xf32, #tpu.memory_space<vmem>>, vector<40x4xf32>
    %cst = arith.constant dense<0.000000e+00> : vector<40x512xf32>
    %2 = tpu.matmul %1, %0, %cst {dimension_numbers = #tpu.dot_dimension_numbers<[1], [0], [0], [1], [0, 0, 1, 1], [], []>} : vector<40x4xf32>, vector<4x512xf32>, vector<40x512xf32> -> vector<40x512xf32>
    %c0_3 = arith.constant 0 : index
    %c0_4 = arith.constant 0 : index
    %3 = vector.load %arg4[%c0_3, %c0_4] : memref<40x1xf32, #tpu.memory_space<vmem>>, vector<40x1xf32>
    %4 = vector.broadcast %3 : vector<40x1xf32> to vector<40x512xf32>
    %5 = arith.addf %2, %4 : vector<40x512xf32>
    %cst_5 = arith.constant 0.000000e+00 : f32
    %6 = vector.broadcast %cst_5 : f32 to vector<40x512xf32>
    %7 = arith.maximumf %5, %6 : vector<40x512xf32>
    %8 = vector.extract_strided_slice %7 {offsets = [0, 0], sizes = [8, 512], strides = [1, 1]} : vector<40x512xf32> to vector<8x512xf32>
    %9 = vector.extract_strided_slice %7 {offsets = [8, 0], sizes = [16, 512], strides = [1, 1]} : vector<40x512xf32> to vector<16x512xf32>
    %cst_6 = arith.constant 0.000000e+00 : f32
    %10 = vector.broadcast %cst_6 : f32 to vector<16x34xf32>
    %11 = tpu.concatenate %10, %9, %10 in 1 : vector<16x34xf32>, vector<16x512xf32>, vector<16x34xf32> -> vector<16x580xf32>
    %cst_7 = arith.constant 0.000000e+00 : f32
    %12 = vector.broadcast %cst_7 : f32 to vector<8x512xf32>
    %13 = vector.extract_strided_slice %11 {offsets = [0, 0], sizes = [16, 512], strides = [1, 1]} : vector<16x580xf32> to vector<16x512xf32>
    %c0_8 = arith.constant 0 : index
    %c0_9 = arith.constant 0 : index
    %14 = vector.load %arg2[%c0_8, %c0_9] : memref<25x512xf32, #tpu.memory_space<vmem>>, vector<1x512xf32>
    %15 = vector.broadcast %14 : vector<1x512xf32> to vector<16x512xf32>
    %16 = arith.mulf %13, %15 : vector<16x512xf32>
    %17 = arith.truncf %16 : vector<16x512xf32> to vector<16x512xbf16>
    %18 = vector.extract_strided_slice %11 {offsets = [0, 1], sizes = [16, 512], strides = [1, 1]} : vector<16x580xf32> to vector<16x512xf32>
    %c1 = arith.constant 1 : index
    %c0_10 = arith.constant 0 : index
    %19 = vector.load %arg2[%c1, %c0_10] : memref<25x512xf32, #tpu.memory_space<vmem>>, vector<1x512xf32>
    %20 = vector.broadcast %19 : vector<1x512xf32> to vector<16x512xf32>
    %21 = arith.mulf %18, %20 : vector<16x512xf32>
    %22 = arith.truncf %21 : vector<16x512xf32> to vector<16x512xbf16>
    %23 = vector.extract_strided_slice %11 {offsets = [0, 2], sizes = [16, 512], strides = [1, 1]} : vector<16x580xf32> to vector<16x512xf32>
    %c2 = arith.constant 2 : index
    %c0_11 = arith.constant 0 : index
    %24 = vector.load %arg2[%c2, %c0_11] : memref<25x512xf32, #tpu.memory_space<vmem>>, vector<1x512xf32>
    %25 = vector.broadcast %24 : vector<1x512xf32> to vector<16x512xf32>
    %26 = arith.mulf %23, %25 : vector<16x512xf32>
    %27 = arith.truncf %26 : vector<16x512xf32> to vector<16x512xbf16>
    %28 = vector.extract_strided_slice %11 {offsets = [0, 3], sizes = [16, 512], strides = [1, 1]} : vector<16x580xf32> to vector<16x512xf32>
    %c3 = arith.constant 3 : index
    %c0_12 = arith.constant 0 : index
    %29 = vector.load %arg2[%c3, %c0_12] : memref<25x512xf32, #tpu.memory_space<vmem>>, vector<1x512xf32>
    %30 = vector.broadcast %29 : vector<1x512xf32> to vector<16x512xf32>
    %31 = arith.mulf %28, %30 : vector<16x512xf32>
    %32 = arith.truncf %31 : vector<16x512xf32> to vector<16x512xbf16>
    %33 = vector.extract_strided_slice %11 {offsets = [0, 4], sizes = [16, 512], strides = [1, 1]} : vector<16x580xf32> to vector<16x512xf32>
    %c4 = arith.constant 4 : index
    %c0_13 = arith.constant 0 : index
    %34 = vector.load %arg2[%c4, %c0_13] : memref<25x512xf32, #tpu.memory_space<vmem>>, vector<1x512xf32>
    %35 = vector.broadcast %34 : vector<1x512xf32> to vector<16x512xf32>
    %36 = arith.mulf %33, %35 : vector<16x512xf32>
    %37 = arith.truncf %36 : vector<16x512xf32> to vector<16x512xbf16>
    %38 = tpu.concatenate %17, %22, %27, %32, %37 in 0 : vector<16x512xbf16>, vector<16x512xbf16>, vector<16x512xbf16>, vector<16x512xbf16>, vector<16x512xbf16> -> vector<80x512xbf16>
    %c0_14 = arith.constant 0 : index
    %c0_15 = arith.constant 0 : index
    %c0_16 = arith.constant 0 : index
    %39 = vector.load %arg5[%c0_14, %c0_15, %c0_16] : memref<5x8x80xbf16, #tpu.memory_space<vmem>>, vector<1x8x80xbf16>
    %40 = vector.shape_cast %39 : vector<1x8x80xbf16> to vector<8x80xbf16>
    %cst_17 = arith.constant dense<0.000000e+00> : vector<8x512xf32>
    %41 = tpu.matmul %40, %38, %cst_17 {dimension_numbers = #tpu.dot_dimension_numbers<[1], [0], [0], [1], [0, 0, 1, 1], [], []>} : vector<8x80xbf16>, vector<80x512xbf16>, vector<8x512xf32> -> vector<8x512xf32>
    %42 = arith.addf %12, %41 : vector<8x512xf32>
    %43 = vector.extract_strided_slice %11 {offsets = [0, 16], sizes = [16, 512], strides = [1, 1]} : vector<16x580xf32> to vector<16x512xf32>
    %c5 = arith.constant 5 : index
    %c0_18 = arith.constant 0 : index
    %44 = vector.load %arg2[%c5, %c0_18] : memref<25x512xf32, #tpu.memory_space<vmem>>, vector<1x512xf32>
    %45 = vector.broadcast %44 : vector<1x512xf32> to vector<16x512xf32>
    %46 = arith.mulf %43, %45 : vector<16x512xf32>
    %47 = arith.truncf %46 : vector<16x512xf32> to vector<16x512xbf16>
    %48 = vector.extract_strided_slice %11 {offsets = [0, 17], sizes = [16, 512], strides = [1, 1]} : vector<16x580xf32> to vector<16x512xf32>
    %c6 = arith.constant 6 : index
    %c0_19 = arith.constant 0 : index
    %49 = vector.load %arg2[%c6, %c0_19] : memref<25x512xf32, #tpu.memory_space<vmem>>, vector<1x512xf32>
    %50 = vector.broadcast %49 : vector<1x512xf32> to vector<16x512xf32>
    %51 = arith.mulf %48, %50 : vector<16x512xf32>
    %52 = arith.truncf %51 : vector<16x512xf32> to vector<16x512xbf16>
    %53 = vector.extract_strided_slice %11 {offsets = [0, 18], sizes = [16, 512], strides = [1, 1]} : vector<16x580xf32> to vector<16x512xf32>
    %c7 = arith.constant 7 : index
    %c0_20 = arith.constant 0 : index
    %54 = vector.load %arg2[%c7, %c0_20] : memref<25x512xf32, #tpu.memory_space<vmem>>, vector<1x512xf32>
    %55 = vector.broadcast %54 : vector<1x512xf32> to vector<16x512xf32>
    %56 = arith.mulf %53, %55 : vector<16x512xf32>
    %57 = arith.truncf %56 : vector<16x512xf32> to vector<16x512xbf16>
    %58 = vector.extract_strided_slice %11 {offsets = [0, 19], sizes = [16, 512], strides = [1, 1]} : vector<16x580xf32> to vector<16x512xf32>
    %c8 = arith.constant 8 : index
    %c0_21 = arith.constant 0 : index
    %59 = vector.load %arg2[%c8, %c0_21] : memref<25x512xf32, #tpu.memory_space<vmem>>, vector<1x512xf32>
    %60 = vector.broadcast %59 : vector<1x512xf32> to vector<16x512xf32>
    %61 = arith.mulf %58, %60 : vector<16x512xf32>
    %62 = arith.truncf %61 : vector<16x512xf32> to vector<16x512xbf16>
    %63 = vector.extract_strided_slice %11 {offsets = [0, 20], sizes = [16, 512], strides = [1, 1]} : vector<16x580xf32> to vector<16x512xf32>
    %c9 = arith.constant 9 : index
    %c0_22 = arith.constant 0 : index
    %64 = vector.load %arg2[%c9, %c0_22] : memref<25x512xf32, #tpu.memory_space<vmem>>, vector<1x512xf32>
    %65 = vector.broadcast %64 : vector<1x512xf32> to vector<16x512xf32>
    %66 = arith.mulf %63, %65 : vector<16x512xf32>
    %67 = arith.truncf %66 : vector<16x512xf32> to vector<16x512xbf16>
    %68 = tpu.concatenate %47, %52, %57, %62, %67 in 0 : vector<16x512xbf16>, vector<16x512xbf16>, vector<16x512xbf16>, vector<16x512xbf16>, vector<16x512xbf16> -> vector<80x512xbf16>
    %c1_23 = arith.constant 1 : index
    %c0_24 = arith.constant 0 : index
    %c0_25 = arith.constant 0 : index
    %69 = vector.load %arg5[%c1_23, %c0_24, %c0_25] : memref<5x8x80xbf16, #tpu.memory_space<vmem>>, vector<1x8x80xbf16>
    %70 = vector.shape_cast %69 : vector<1x8x80xbf16> to vector<8x80xbf16>
    %cst_26 = arith.constant dense<0.000000e+00> : vector<8x512xf32>
    %71 = tpu.matmul %70, %68, %cst_26 {dimension_numbers = #tpu.dot_dimension_numbers<[1], [0], [0], [1], [0, 0, 1, 1], [], []>} : vector<8x80xbf16>, vector<80x512xbf16>, vector<8x512xf32> -> vector<8x512xf32>
    %72 = arith.addf %42, %71 : vector<8x512xf32>
    %73 = vector.extract_strided_slice %11 {offsets = [0, 32], sizes = [16, 512], strides = [1, 1]} : vector<16x580xf32> to vector<16x512xf32>
    %c10 = arith.constant 10 : index
    %c0_27 = arith.constant 0 : index
    %74 = vector.load %arg2[%c10, %c0_27] : memref<25x512xf32, #tpu.memory_space<vmem>>, vector<1x512xf32>
    %75 = vector.broadcast %74 : vector<1x512xf32> to vector<16x512xf32>
    %76 = arith.mulf %73, %75 : vector<16x512xf32>
    %77 = arith.truncf %76 : vector<16x512xf32> to vector<16x512xbf16>
    %78 = vector.extract_strided_slice %11 {offsets = [0, 33], sizes = [16, 512], strides = [1, 1]} : vector<16x580xf32> to vector<16x512xf32>
    %c11 = arith.constant 11 : index
    %c0_28 = arith.constant 0 : index
    %79 = vector.load %arg2[%c11, %c0_28] : memref<25x512xf32, #tpu.memory_space<vmem>>, vector<1x512xf32>
    %80 = vector.broadcast %79 : vector<1x512xf32> to vector<16x512xf32>
    %81 = arith.mulf %78, %80 : vector<16x512xf32>
    %82 = arith.truncf %81 : vector<16x512xf32> to vector<16x512xbf16>
    %83 = vector.extract_strided_slice %11 {offsets = [0, 34], sizes = [16, 512], strides = [1, 1]} : vector<16x580xf32> to vector<16x512xf32>
    %c12 = arith.constant 12 : index
    %c0_29 = arith.constant 0 : index
    %84 = vector.load %arg2[%c12, %c0_29] : memref<25x512xf32, #tpu.memory_space<vmem>>, vector<1x512xf32>
    %85 = vector.broadcast %84 : vector<1x512xf32> to vector<16x512xf32>
    %86 = arith.mulf %83, %85 : vector<16x512xf32>
    %87 = arith.truncf %86 : vector<16x512xf32> to vector<16x512xbf16>
    %88 = vector.extract_strided_slice %11 {offsets = [0, 35], sizes = [16, 512], strides = [1, 1]} : vector<16x580xf32> to vector<16x512xf32>
    %c13 = arith.constant 13 : index
    %c0_30 = arith.constant 0 : index
    %89 = vector.load %arg2[%c13, %c0_30] : memref<25x512xf32, #tpu.memory_space<vmem>>, vector<1x512xf32>
    %90 = vector.broadcast %89 : vector<1x512xf32> to vector<16x512xf32>
    %91 = arith.mulf %88, %90 : vector<16x512xf32>
    %92 = arith.truncf %91 : vector<16x512xf32> to vector<16x512xbf16>
    %93 = vector.extract_strided_slice %11 {offsets = [0, 36], sizes = [16, 512], strides = [1, 1]} : vector<16x580xf32> to vector<16x512xf32>
    %c14 = arith.constant 14 : index
    %c0_31 = arith.constant 0 : index
    %94 = vector.load %arg2[%c14, %c0_31] : memref<25x512xf32, #tpu.memory_space<vmem>>, vector<1x512xf32>
    %95 = vector.broadcast %94 : vector<1x512xf32> to vector<16x512xf32>
    %96 = arith.mulf %93, %95 : vector<16x512xf32>
    %97 = arith.truncf %96 : vector<16x512xf32> to vector<16x512xbf16>
    %98 = tpu.concatenate %77, %82, %87, %92, %97 in 0 : vector<16x512xbf16>, vector<16x512xbf16>, vector<16x512xbf16>, vector<16x512xbf16>, vector<16x512xbf16> -> vector<80x512xbf16>
    %c2_32 = arith.constant 2 : index
    %c0_33 = arith.constant 0 : index
    %c0_34 = arith.constant 0 : index
    %99 = vector.load %arg5[%c2_32, %c0_33, %c0_34] : memref<5x8x80xbf16, #tpu.memory_space<vmem>>, vector<1x8x80xbf16>
    %100 = vector.shape_cast %99 : vector<1x8x80xbf16> to vector<8x80xbf16>
    %cst_35 = arith.constant dense<0.000000e+00> : vector<8x512xf32>
    %101 = tpu.matmul %100, %98, %cst_35 {dimension_numbers = #tpu.dot_dimension_numbers<[1], [0], [0], [1], [0, 0, 1, 1], [], []>} : vector<8x80xbf16>, vector<80x512xbf16>, vector<8x512xf32> -> vector<8x512xf32>
    %102 = arith.addf %72, %101 : vector<8x512xf32>
    %103 = vector.extract_strided_slice %11 {offsets = [0, 48], sizes = [16, 512], strides = [1, 1]} : vector<16x580xf32> to vector<16x512xf32>
    %c15 = arith.constant 15 : index
    %c0_36 = arith.constant 0 : index
    %104 = vector.load %arg2[%c15, %c0_36] : memref<25x512xf32, #tpu.memory_space<vmem>>, vector<1x512xf32>
    %105 = vector.broadcast %104 : vector<1x512xf32> to vector<16x512xf32>
    %106 = arith.mulf %103, %105 : vector<16x512xf32>
    %107 = arith.truncf %106 : vector<16x512xf32> to vector<16x512xbf16>
    %108 = vector.extract_strided_slice %11 {offsets = [0, 49], sizes = [16, 512], strides = [1, 1]} : vector<16x580xf32> to vector<16x512xf32>
    %c16 = arith.constant 16 : index
    %c0_37 = arith.constant 0 : index
    %109 = vector.load %arg2[%c16, %c0_37] : memref<25x512xf32, #tpu.memory_space<vmem>>, vector<1x512xf32>
    %110 = vector.broadcast %109 : vector<1x512xf32> to vector<16x512xf32>
    %111 = arith.mulf %108, %110 : vector<16x512xf32>
    %112 = arith.truncf %111 : vector<16x512xf32> to vector<16x512xbf16>
    %113 = vector.extract_strided_slice %11 {offsets = [0, 50], sizes = [16, 512], strides = [1, 1]} : vector<16x580xf32> to vector<16x512xf32>
    %c17 = arith.constant 17 : index
    %c0_38 = arith.constant 0 : index
    %114 = vector.load %arg2[%c17, %c0_38] : memref<25x512xf32, #tpu.memory_space<vmem>>, vector<1x512xf32>
    %115 = vector.broadcast %114 : vector<1x512xf32> to vector<16x512xf32>
    %116 = arith.mulf %113, %115 : vector<16x512xf32>
    %117 = arith.truncf %116 : vector<16x512xf32> to vector<16x512xbf16>
    %118 = vector.extract_strided_slice %11 {offsets = [0, 51], sizes = [16, 512], strides = [1, 1]} : vector<16x580xf32> to vector<16x512xf32>
    %c18 = arith.constant 18 : index
    %c0_39 = arith.constant 0 : index
    %119 = vector.load %arg2[%c18, %c0_39] : memref<25x512xf32, #tpu.memory_space<vmem>>, vector<1x512xf32>
    %120 = vector.broadcast %119 : vector<1x512xf32> to vector<16x512xf32>
    %121 = arith.mulf %118, %120 : vector<16x512xf32>
    %122 = arith.truncf %121 : vector<16x512xf32> to vector<16x512xbf16>
    %123 = vector.extract_strided_slice %11 {offsets = [0, 52], sizes = [16, 512], strides = [1, 1]} : vector<16x580xf32> to vector<16x512xf32>
    %c19 = arith.constant 19 : index
    %c0_40 = arith.constant 0 : index
    %124 = vector.load %arg2[%c19, %c0_40] : memref<25x512xf32, #tpu.memory_space<vmem>>, vector<1x512xf32>
    %125 = vector.broadcast %124 : vector<1x512xf32> to vector<16x512xf32>
    %126 = arith.mulf %123, %125 : vector<16x512xf32>
    %127 = arith.truncf %126 : vector<16x512xf32> to vector<16x512xbf16>
    %128 = tpu.concatenate %107, %112, %117, %122, %127 in 0 : vector<16x512xbf16>, vector<16x512xbf16>, vector<16x512xbf16>, vector<16x512xbf16>, vector<16x512xbf16> -> vector<80x512xbf16>
    %c3_41 = arith.constant 3 : index
    %c0_42 = arith.constant 0 : index
    %c0_43 = arith.constant 0 : index
    %129 = vector.load %arg5[%c3_41, %c0_42, %c0_43] : memref<5x8x80xbf16, #tpu.memory_space<vmem>>, vector<1x8x80xbf16>
    %130 = vector.shape_cast %129 : vector<1x8x80xbf16> to vector<8x80xbf16>
    %cst_44 = arith.constant dense<0.000000e+00> : vector<8x512xf32>
    %131 = tpu.matmul %130, %128, %cst_44 {dimension_numbers = #tpu.dot_dimension_numbers<[1], [0], [0], [1], [0, 0, 1, 1], [], []>} : vector<8x80xbf16>, vector<80x512xbf16>, vector<8x512xf32> -> vector<8x512xf32>
    %132 = arith.addf %102, %131 : vector<8x512xf32>
    %133 = vector.extract_strided_slice %11 {offsets = [0, 64], sizes = [16, 512], strides = [1, 1]} : vector<16x580xf32> to vector<16x512xf32>
    %c20 = arith.constant 20 : index
    %c0_45 = arith.constant 0 : index
    %134 = vector.load %arg2[%c20, %c0_45] : memref<25x512xf32, #tpu.memory_space<vmem>>, vector<1x512xf32>
    %135 = vector.broadcast %134 : vector<1x512xf32> to vector<16x512xf32>
    %136 = arith.mulf %133, %135 : vector<16x512xf32>
    %137 = arith.truncf %136 : vector<16x512xf32> to vector<16x512xbf16>
    %138 = vector.extract_strided_slice %11 {offsets = [0, 65], sizes = [16, 512], strides = [1, 1]} : vector<16x580xf32> to vector<16x512xf32>
    %c21 = arith.constant 21 : index
    %c0_46 = arith.constant 0 : index
    %139 = vector.load %arg2[%c21, %c0_46] : memref<25x512xf32, #tpu.memory_space<vmem>>, vector<1x512xf32>
    %140 = vector.broadcast %139 : vector<1x512xf32> to vector<16x512xf32>
    %141 = arith.mulf %138, %140 : vector<16x512xf32>
    %142 = arith.truncf %141 : vector<16x512xf32> to vector<16x512xbf16>
    %143 = vector.extract_strided_slice %11 {offsets = [0, 66], sizes = [16, 512], strides = [1, 1]} : vector<16x580xf32> to vector<16x512xf32>
    %c22 = arith.constant 22 : index
    %c0_47 = arith.constant 0 : index
    %144 = vector.load %arg2[%c22, %c0_47] : memref<25x512xf32, #tpu.memory_space<vmem>>, vector<1x512xf32>
    %145 = vector.broadcast %144 : vector<1x512xf32> to vector<16x512xf32>
    %146 = arith.mulf %143, %145 : vector<16x512xf32>
    %147 = arith.truncf %146 : vector<16x512xf32> to vector<16x512xbf16>
    %148 = vector.extract_strided_slice %11 {offsets = [0, 67], sizes = [16, 512], strides = [1, 1]} : vector<16x580xf32> to vector<16x512xf32>
    %c23 = arith.constant 23 : index
    %c0_48 = arith.constant 0 : index
    %149 = vector.load %arg2[%c23, %c0_48] : memref<25x512xf32, #tpu.memory_space<vmem>>, vector<1x512xf32>
    %150 = vector.broadcast %149 : vector<1x512xf32> to vector<16x512xf32>
    %151 = arith.mulf %148, %150 : vector<16x512xf32>
    %152 = arith.truncf %151 : vector<16x512xf32> to vector<16x512xbf16>
    %153 = vector.extract_strided_slice %11 {offsets = [0, 68], sizes = [16, 512], strides = [1, 1]} : vector<16x580xf32> to vector<16x512xf32>
    %c24 = arith.constant 24 : index
    %c0_49 = arith.constant 0 : index
    %154 = vector.load %arg2[%c24, %c0_49] : memref<25x512xf32, #tpu.memory_space<vmem>>, vector<1x512xf32>
    %155 = vector.broadcast %154 : vector<1x512xf32> to vector<16x512xf32>
    %156 = arith.mulf %153, %155 : vector<16x512xf32>
    %157 = arith.truncf %156 : vector<16x512xf32> to vector<16x512xbf16>
    %158 = tpu.concatenate %137, %142, %147, %152, %157 in 0 : vector<16x512xbf16>, vector<16x512xbf16>, vector<16x512xbf16>, vector<16x512xbf16>, vector<16x512xbf16> -> vector<80x512xbf16>
    %c4_50 = arith.constant 4 : index
    %c0_51 = arith.constant 0 : index
    %c0_52 = arith.constant 0 : index
    %159 = vector.load %arg5[%c4_50, %c0_51, %c0_52] : memref<5x8x80xbf16, #tpu.memory_space<vmem>>, vector<1x8x80xbf16>
    %160 = vector.shape_cast %159 : vector<1x8x80xbf16> to vector<8x80xbf16>
    %cst_53 = arith.constant dense<0.000000e+00> : vector<8x512xf32>
    %161 = tpu.matmul %160, %158, %cst_53 {dimension_numbers = #tpu.dot_dimension_numbers<[1], [0], [0], [1], [0, 0, 1, 1], [], []>} : vector<8x80xbf16>, vector<80x512xbf16>, vector<8x512xf32> -> vector<8x512xf32>
    %162 = arith.addf %132, %161 : vector<8x512xf32>
    %c0_54 = arith.constant 0 : index
    %c0_55 = arith.constant 0 : index
    %163 = vector.load %arg6[%c0_54, %c0_55] : memref<8x1xf32, #tpu.memory_space<vmem>>, vector<8x1xf32>
    %164 = vector.broadcast %163 : vector<8x1xf32> to vector<8x512xf32>
    %165 = arith.addf %162, %164 : vector<8x512xf32>
    %cst_56 = arith.constant 0.000000e+00 : f32
    %166 = vector.broadcast %cst_56 : f32 to vector<8x512xf32>
    %167 = arith.maximumf %165, %166 : vector<8x512xf32>
    %168 = vector.extract_strided_slice %7 {offsets = [24, 0], sizes = [16, 512], strides = [1, 1]} : vector<40x512xf32> to vector<16x512xf32>
    %cst_57 = arith.constant 0.000000e+00 : f32
    %169 = vector.broadcast %cst_57 : f32 to vector<16x34xf32>
    %170 = tpu.concatenate %169, %168, %169 in 1 : vector<16x34xf32>, vector<16x512xf32>, vector<16x34xf32> -> vector<16x580xf32>
    %cst_58 = arith.constant 0.000000e+00 : f32
    %171 = vector.broadcast %cst_58 : f32 to vector<8x512xf32>
    %172 = vector.extract_strided_slice %170 {offsets = [0, 17], sizes = [16, 512], strides = [1, 1]} : vector<16x580xf32> to vector<16x512xf32>
    %c6_59 = arith.constant 6 : index
    %c0_60 = arith.constant 0 : index
    %173 = vector.load %arg2[%c6_59, %c0_60] : memref<25x512xf32, #tpu.memory_space<vmem>>, vector<1x512xf32>
    %174 = vector.broadcast %173 : vector<1x512xf32> to vector<16x512xf32>
    %175 = arith.mulf %172, %174 : vector<16x512xf32>
    %176 = arith.truncf %175 : vector<16x512xf32> to vector<16x512xbf16>
    %177 = vector.extract_strided_slice %170 {offsets = [0, 18], sizes = [16, 512], strides = [1, 1]} : vector<16x580xf32> to vector<16x512xf32>
    %c7_61 = arith.constant 7 : index
    %c0_62 = arith.constant 0 : index
    %178 = vector.load %arg2[%c7_61, %c0_62] : memref<25x512xf32, #tpu.memory_space<vmem>>, vector<1x512xf32>
    %179 = vector.broadcast %178 : vector<1x512xf32> to vector<16x512xf32>
    %180 = arith.mulf %177, %179 : vector<16x512xf32>
    %181 = arith.truncf %180 : vector<16x512xf32> to vector<16x512xbf16>
    %182 = vector.extract_strided_slice %170 {offsets = [0, 19], sizes = [16, 512], strides = [1, 1]} : vector<16x580xf32> to vector<16x512xf32>
    %c8_63 = arith.constant 8 : index
    %c0_64 = arith.constant 0 : index
    %183 = vector.load %arg2[%c8_63, %c0_64] : memref<25x512xf32, #tpu.memory_space<vmem>>, vector<1x512xf32>
    %184 = vector.broadcast %183 : vector<1x512xf32> to vector<16x512xf32>
    %185 = arith.mulf %182, %184 : vector<16x512xf32>
    %186 = arith.truncf %185 : vector<16x512xf32> to vector<16x512xbf16>
    %187 = tpu.concatenate %176, %181, %186 in 0 : vector<16x512xbf16>, vector<16x512xbf16>, vector<16x512xbf16> -> vector<48x512xbf16>
    %c0_65 = arith.constant 0 : index
    %c0_66 = arith.constant 0 : index
    %c0_67 = arith.constant 0 : index
    %188 = vector.load %arg7[%c0_65, %c0_66, %c0_67] : memref<3x8x48xbf16, #tpu.memory_space<vmem>>, vector<1x8x48xbf16>
    %189 = vector.shape_cast %188 : vector<1x8x48xbf16> to vector<8x48xbf16>
    %cst_68 = arith.constant dense<0.000000e+00> : vector<8x512xf32>
    %190 = tpu.matmul %189, %187, %cst_68 {dimension_numbers = #tpu.dot_dimension_numbers<[1], [0], [0], [1], [0, 0, 1, 1], [], []>} : vector<8x48xbf16>, vector<48x512xbf16>, vector<8x512xf32> -> vector<8x512xf32>
    %191 = arith.addf %171, %190 : vector<8x512xf32>
    %192 = vector.extract_strided_slice %170 {offsets = [0, 33], sizes = [16, 512], strides = [1, 1]} : vector<16x580xf32> to vector<16x512xf32>
    %c11_69 = arith.constant 11 : index
    %c0_70 = arith.constant 0 : index
    %193 = vector.load %arg2[%c11_69, %c0_70] : memref<25x512xf32, #tpu.memory_space<vmem>>, vector<1x512xf32>
    %194 = vector.broadcast %193 : vector<1x512xf32> to vector<16x512xf32>
    %195 = arith.mulf %192, %194 : vector<16x512xf32>
    %196 = arith.truncf %195 : vector<16x512xf32> to vector<16x512xbf16>
    %197 = vector.extract_strided_slice %170 {offsets = [0, 34], sizes = [16, 512], strides = [1, 1]} : vector<16x580xf32> to vector<16x512xf32>
    %c12_71 = arith.constant 12 : index
    %c0_72 = arith.constant 0 : index
    %198 = vector.load %arg2[%c12_71, %c0_72] : memref<25x512xf32, #tpu.memory_space<vmem>>, vector<1x512xf32>
    %199 = vector.broadcast %198 : vector<1x512xf32> to vector<16x512xf32>
    %200 = arith.mulf %197, %199 : vector<16x512xf32>
    %201 = arith.truncf %200 : vector<16x512xf32> to vector<16x512xbf16>
    %202 = vector.extract_strided_slice %170 {offsets = [0, 35], sizes = [16, 512], strides = [1, 1]} : vector<16x580xf32> to vector<16x512xf32>
    %c13_73 = arith.constant 13 : index
    %c0_74 = arith.constant 0 : index
    %203 = vector.load %arg2[%c13_73, %c0_74] : memref<25x512xf32, #tpu.memory_space<vmem>>, vector<1x512xf32>
    %204 = vector.broadcast %203 : vector<1x512xf32> to vector<16x512xf32>
    %205 = arith.mulf %202, %204 : vector<16x512xf32>
    %206 = arith.truncf %205 : vector<16x512xf32> to vector<16x512xbf16>
    %207 = tpu.concatenate %196, %201, %206 in 0 : vector<16x512xbf16>, vector<16x512xbf16>, vector<16x512xbf16> -> vector<48x512xbf16>
    %c1_75 = arith.constant 1 : index
    %c0_76 = arith.constant 0 : index
    %c0_77 = arith.constant 0 : index
    %208 = vector.load %arg7[%c1_75, %c0_76, %c0_77] : memref<3x8x48xbf16, #tpu.memory_space<vmem>>, vector<1x8x48xbf16>
    %209 = vector.shape_cast %208 : vector<1x8x48xbf16> to vector<8x48xbf16>
    %cst_78 = arith.constant dense<0.000000e+00> : vector<8x512xf32>
    %210 = tpu.matmul %209, %207, %cst_78 {dimension_numbers = #tpu.dot_dimension_numbers<[1], [0], [0], [1], [0, 0, 1, 1], [], []>} : vector<8x48xbf16>, vector<48x512xbf16>, vector<8x512xf32> -> vector<8x512xf32>
    %211 = arith.addf %191, %210 : vector<8x512xf32>
    %212 = vector.extract_strided_slice %170 {offsets = [0, 49], sizes = [16, 512], strides = [1, 1]} : vector<16x580xf32> to vector<16x512xf32>
    %c16_79 = arith.constant 16 : index
    %c0_80 = arith.constant 0 : index
    %213 = vector.load %arg2[%c16_79, %c0_80] : memref<25x512xf32, #tpu.memory_space<vmem>>, vector<1x512xf32>
    %214 = vector.broadcast %213 : vector<1x512xf32> to vector<16x512xf32>
    %215 = arith.mulf %212, %214 : vector<16x512xf32>
    %216 = arith.truncf %215 : vector<16x512xf32> to vector<16x512xbf16>
    %217 = vector.extract_strided_slice %170 {offsets = [0, 50], sizes = [16, 512], strides = [1, 1]} : vector<16x580xf32> to vector<16x512xf32>
    %c17_81 = arith.constant 17 : index
    %c0_82 = arith.constant 0 : index
    %218 = vector.load %arg2[%c17_81, %c0_82] : memref<25x512xf32, #tpu.memory_space<vmem>>, vector<1x512xf32>
    %219 = vector.broadcast %218 : vector<1x512xf32> to vector<16x512xf32>
    %220 = arith.mulf %217, %219 : vector<16x512xf32>
    %221 = arith.truncf %220 : vector<16x512xf32> to vector<16x512xbf16>
    %222 = vector.extract_strided_slice %170 {offsets = [0, 51], sizes = [16, 512], strides = [1, 1]} : vector<16x580xf32> to vector<16x512xf32>
    %c18_83 = arith.constant 18 : index
    %c0_84 = arith.constant 0 : index
    %223 = vector.load %arg2[%c18_83, %c0_84] : memref<25x512xf32, #tpu.memory_space<vmem>>, vector<1x512xf32>
    %224 = vector.broadcast %223 : vector<1x512xf32> to vector<16x512xf32>
    %225 = arith.mulf %222, %224 : vector<16x512xf32>
    %226 = arith.truncf %225 : vector<16x512xf32> to vector<16x512xbf16>
    %227 = tpu.concatenate %216, %221, %226 in 0 : vector<16x512xbf16>, vector<16x512xbf16>, vector<16x512xbf16> -> vector<48x512xbf16>
    %c2_85 = arith.constant 2 : index
    %c0_86 = arith.constant 0 : index
    %c0_87 = arith.constant 0 : index
    %228 = vector.load %arg7[%c2_85, %c0_86, %c0_87] : memref<3x8x48xbf16, #tpu.memory_space<vmem>>, vector<1x8x48xbf16>
    %229 = vector.shape_cast %228 : vector<1x8x48xbf16> to vector<8x48xbf16>
    %cst_88 = arith.constant dense<0.000000e+00> : vector<8x512xf32>
    %230 = tpu.matmul %229, %227, %cst_88 {dimension_numbers = #tpu.dot_dimension_numbers<[1], [0], [0], [1], [0, 0, 1, 1], [], []>} : vector<8x48xbf16>, vector<48x512xbf16>, vector<8x512xf32> -> vector<8x512xf32>
    %231 = arith.addf %211, %230 : vector<8x512xf32>
    %c0_89 = arith.constant 0 : index
    %c0_90 = arith.constant 0 : index
    %232 = vector.load %arg8[%c0_89, %c0_90] : memref<8x1xf32, #tpu.memory_space<vmem>>, vector<8x1xf32>
    %233 = vector.broadcast %232 : vector<8x1xf32> to vector<8x512xf32>
    %234 = arith.addf %231, %233 : vector<8x512xf32>
    %cst_91 = arith.constant 0.000000e+00 : f32
    %235 = vector.broadcast %cst_91 : f32 to vector<8x512xf32>
    %236 = arith.maximumf %234, %235 : vector<8x512xf32>
    %cst_92 = arith.constant 0.000000e+00 : f32
    %237 = vector.broadcast %cst_92 : f32 to vector<8x34xf32>
    %238 = tpu.concatenate %237, %236, %237 in 1 : vector<8x34xf32>, vector<8x512xf32>, vector<8x34xf32> -> vector<8x580xf32>
    %cst_93 = arith.constant 0.000000e+00 : f32
    %239 = vector.broadcast %cst_93 : f32 to vector<8x512xf32>
    %240 = vector.extract_strided_slice %238 {offsets = [0, 17], sizes = [8, 512], strides = [1, 1]} : vector<8x580xf32> to vector<8x512xf32>
    %c6_94 = arith.constant 6 : index
    %c0_95 = arith.constant 0 : index
    %241 = vector.load %arg2[%c6_94, %c0_95] : memref<25x512xf32, #tpu.memory_space<vmem>>, vector<1x512xf32>
    %242 = vector.broadcast %241 : vector<1x512xf32> to vector<8x512xf32>
    %243 = arith.mulf %240, %242 : vector<8x512xf32>
    %244 = arith.truncf %243 : vector<8x512xf32> to vector<8x512xbf16>
    %245 = vector.extract_strided_slice %238 {offsets = [0, 18], sizes = [8, 512], strides = [1, 1]} : vector<8x580xf32> to vector<8x512xf32>
    %c7_96 = arith.constant 7 : index
    %c0_97 = arith.constant 0 : index
    %246 = vector.load %arg2[%c7_96, %c0_97] : memref<25x512xf32, #tpu.memory_space<vmem>>, vector<1x512xf32>
    %247 = vector.broadcast %246 : vector<1x512xf32> to vector<8x512xf32>
    %248 = arith.mulf %245, %247 : vector<8x512xf32>
    %249 = arith.truncf %248 : vector<8x512xf32> to vector<8x512xbf16>
    %250 = vector.extract_strided_slice %238 {offsets = [0, 19], sizes = [8, 512], strides = [1, 1]} : vector<8x580xf32> to vector<8x512xf32>
    %c8_98 = arith.constant 8 : index
    %c0_99 = arith.constant 0 : index
    %251 = vector.load %arg2[%c8_98, %c0_99] : memref<25x512xf32, #tpu.memory_space<vmem>>, vector<1x512xf32>
    %252 = vector.broadcast %251 : vector<1x512xf32> to vector<8x512xf32>
    %253 = arith.mulf %250, %252 : vector<8x512xf32>
    %254 = arith.truncf %253 : vector<8x512xf32> to vector<8x512xbf16>
    %255 = tpu.concatenate %244, %249, %254 in 0 : vector<8x512xbf16>, vector<8x512xbf16>, vector<8x512xbf16> -> vector<24x512xbf16>
    %c0_100 = arith.constant 0 : index
    %c0_101 = arith.constant 0 : index
    %c0_102 = arith.constant 0 : index
    %256 = vector.load %arg9[%c0_100, %c0_101, %c0_102] : memref<3x8x24xbf16, #tpu.memory_space<vmem>>, vector<1x8x24xbf16>
    %257 = vector.shape_cast %256 : vector<1x8x24xbf16> to vector<8x24xbf16>
    %cst_103 = arith.constant dense<0.000000e+00> : vector<8x512xf32>
    %258 = tpu.matmul %257, %255, %cst_103 {dimension_numbers = #tpu.dot_dimension_numbers<[1], [0], [0], [1], [0, 0, 1, 1], [], []>} : vector<8x24xbf16>, vector<24x512xbf16>, vector<8x512xf32> -> vector<8x512xf32>
    %259 = arith.addf %239, %258 : vector<8x512xf32>
    %260 = vector.extract_strided_slice %238 {offsets = [0, 33], sizes = [8, 512], strides = [1, 1]} : vector<8x580xf32> to vector<8x512xf32>
    %c11_104 = arith.constant 11 : index
    %c0_105 = arith.constant 0 : index
    %261 = vector.load %arg2[%c11_104, %c0_105] : memref<25x512xf32, #tpu.memory_space<vmem>>, vector<1x512xf32>
    %262 = vector.broadcast %261 : vector<1x512xf32> to vector<8x512xf32>
    %263 = arith.mulf %260, %262 : vector<8x512xf32>
    %264 = arith.truncf %263 : vector<8x512xf32> to vector<8x512xbf16>
    %265 = vector.extract_strided_slice %238 {offsets = [0, 34], sizes = [8, 512], strides = [1, 1]} : vector<8x580xf32> to vector<8x512xf32>
    %c12_106 = arith.constant 12 : index
    %c0_107 = arith.constant 0 : index
    %266 = vector.load %arg2[%c12_106, %c0_107] : memref<25x512xf32, #tpu.memory_space<vmem>>, vector<1x512xf32>
    %267 = vector.broadcast %266 : vector<1x512xf32> to vector<8x512xf32>
    %268 = arith.mulf %265, %267 : vector<8x512xf32>
    %269 = arith.truncf %268 : vector<8x512xf32> to vector<8x512xbf16>
    %270 = vector.extract_strided_slice %238 {offsets = [0, 35], sizes = [8, 512], strides = [1, 1]} : vector<8x580xf32> to vector<8x512xf32>
    %c13_108 = arith.constant 13 : index
    %c0_109 = arith.constant 0 : index
    %271 = vector.load %arg2[%c13_108, %c0_109] : memref<25x512xf32, #tpu.memory_space<vmem>>, vector<1x512xf32>
    %272 = vector.broadcast %271 : vector<1x512xf32> to vector<8x512xf32>
    %273 = arith.mulf %270, %272 : vector<8x512xf32>
    %274 = arith.truncf %273 : vector<8x512xf32> to vector<8x512xbf16>
    %275 = tpu.concatenate %264, %269, %274 in 0 : vector<8x512xbf16>, vector<8x512xbf16>, vector<8x512xbf16> -> vector<24x512xbf16>
    %c1_110 = arith.constant 1 : index
    %c0_111 = arith.constant 0 : index
    %c0_112 = arith.constant 0 : index
    %276 = vector.load %arg9[%c1_110, %c0_111, %c0_112] : memref<3x8x24xbf16, #tpu.memory_space<vmem>>, vector<1x8x24xbf16>
    %277 = vector.shape_cast %276 : vector<1x8x24xbf16> to vector<8x24xbf16>
    %cst_113 = arith.constant dense<0.000000e+00> : vector<8x512xf32>
    %278 = tpu.matmul %277, %275, %cst_113 {dimension_numbers = #tpu.dot_dimension_numbers<[1], [0], [0], [1], [0, 0, 1, 1], [], []>} : vector<8x24xbf16>, vector<24x512xbf16>, vector<8x512xf32> -> vector<8x512xf32>
    %279 = arith.addf %259, %278 : vector<8x512xf32>
    %280 = vector.extract_strided_slice %238 {offsets = [0, 49], sizes = [8, 512], strides = [1, 1]} : vector<8x580xf32> to vector<8x512xf32>
    %c16_114 = arith.constant 16 : index
    %c0_115 = arith.constant 0 : index
    %281 = vector.load %arg2[%c16_114, %c0_115] : memref<25x512xf32, #tpu.memory_space<vmem>>, vector<1x512xf32>
    %282 = vector.broadcast %281 : vector<1x512xf32> to vector<8x512xf32>
    %283 = arith.mulf %280, %282 : vector<8x512xf32>
    %284 = arith.truncf %283 : vector<8x512xf32> to vector<8x512xbf16>
    %285 = vector.extract_strided_slice %238 {offsets = [0, 50], sizes = [8, 512], strides = [1, 1]} : vector<8x580xf32> to vector<8x512xf32>
    %c17_116 = arith.constant 17 : index
    %c0_117 = arith.constant 0 : index
    %286 = vector.load %arg2[%c17_116, %c0_117] : memref<25x512xf32, #tpu.memory_space<vmem>>, vector<1x512xf32>
    %287 = vector.broadcast %286 : vector<1x512xf32> to vector<8x512xf32>
    %288 = arith.mulf %285, %287 : vector<8x512xf32>
    %289 = arith.truncf %288 : vector<8x512xf32> to vector<8x512xbf16>
    %290 = vector.extract_strided_slice %238 {offsets = [0, 51], sizes = [8, 512], strides = [1, 1]} : vector<8x580xf32> to vector<8x512xf32>
    %c18_118 = arith.constant 18 : index
    %c0_119 = arith.constant 0 : index
    %291 = vector.load %arg2[%c18_118, %c0_119] : memref<25x512xf32, #tpu.memory_space<vmem>>, vector<1x512xf32>
    %292 = vector.broadcast %291 : vector<1x512xf32> to vector<8x512xf32>
    %293 = arith.mulf %290, %292 : vector<8x512xf32>
    %294 = arith.truncf %293 : vector<8x512xf32> to vector<8x512xbf16>
    %295 = tpu.concatenate %284, %289, %294 in 0 : vector<8x512xbf16>, vector<8x512xbf16>, vector<8x512xbf16> -> vector<24x512xbf16>
    %c2_120 = arith.constant 2 : index
    %c0_121 = arith.constant 0 : index
    %c0_122 = arith.constant 0 : index
    %296 = vector.load %arg9[%c2_120, %c0_121, %c0_122] : memref<3x8x24xbf16, #tpu.memory_space<vmem>>, vector<1x8x24xbf16>
    %297 = vector.shape_cast %296 : vector<1x8x24xbf16> to vector<8x24xbf16>
    %cst_123 = arith.constant dense<0.000000e+00> : vector<8x512xf32>
    %298 = tpu.matmul %297, %295, %cst_123 {dimension_numbers = #tpu.dot_dimension_numbers<[1], [0], [0], [1], [0, 0, 1, 1], [], []>} : vector<8x24xbf16>, vector<24x512xbf16>, vector<8x512xf32> -> vector<8x512xf32>
    %299 = arith.addf %279, %298 : vector<8x512xf32>
    %c0_124 = arith.constant 0 : index
    %c0_125 = arith.constant 0 : index
    %300 = vector.load %arg10[%c0_124, %c0_125] : memref<8x1xf32, #tpu.memory_space<vmem>>, vector<8x1xf32>
    %301 = vector.broadcast %300 : vector<8x1xf32> to vector<8x512xf32>
    %302 = arith.addf %299, %301 : vector<8x512xf32>
    %cst_126 = arith.constant 0.000000e+00 : f32
    %303 = vector.broadcast %cst_126 : f32 to vector<8x512xf32>
    %304 = arith.maximumf %302, %303 : vector<8x512xf32>
    %cst_127 = arith.constant 0.000000e+00 : f32
    %305 = vector.broadcast %cst_127 : f32 to vector<4x34xf32>
    %306 = tpu.concatenate %305, %0, %305 in 1 : vector<4x34xf32>, vector<4x512xf32>, vector<4x34xf32> -> vector<4x580xf32>
    %cst_128 = arith.constant 0.000000e+00 : f32
    %307 = vector.broadcast %cst_128 : f32 to vector<4x512xf32>
    %308 = vector.extract_strided_slice %306 {offsets = [0, 17], sizes = [4, 512], strides = [1, 1]} : vector<4x580xf32> to vector<4x512xf32>
    %c6_129 = arith.constant 6 : index
    %c0_130 = arith.constant 0 : index
    %309 = vector.load %arg2[%c6_129, %c0_130] : memref<25x512xf32, #tpu.memory_space<vmem>>, vector<1x512xf32>
    %310 = vector.broadcast %309 : vector<1x512xf32> to vector<4x512xf32>
    %311 = arith.mulf %308, %310 : vector<4x512xf32>
    %312 = arith.addf %307, %311 : vector<4x512xf32>
    %313 = vector.extract_strided_slice %306 {offsets = [0, 18], sizes = [4, 512], strides = [1, 1]} : vector<4x580xf32> to vector<4x512xf32>
    %c7_131 = arith.constant 7 : index
    %c0_132 = arith.constant 0 : index
    %314 = vector.load %arg2[%c7_131, %c0_132] : memref<25x512xf32, #tpu.memory_space<vmem>>, vector<1x512xf32>
    %315 = vector.broadcast %314 : vector<1x512xf32> to vector<4x512xf32>
    %316 = arith.mulf %313, %315 : vector<4x512xf32>
    %317 = arith.addf %312, %316 : vector<4x512xf32>
    %318 = vector.extract_strided_slice %306 {offsets = [0, 19], sizes = [4, 512], strides = [1, 1]} : vector<4x580xf32> to vector<4x512xf32>
    %c8_133 = arith.constant 8 : index
    %c0_134 = arith.constant 0 : index
    %319 = vector.load %arg2[%c8_133, %c0_134] : memref<25x512xf32, #tpu.memory_space<vmem>>, vector<1x512xf32>
    %320 = vector.broadcast %319 : vector<1x512xf32> to vector<4x512xf32>
    %321 = arith.mulf %318, %320 : vector<4x512xf32>
    %322 = arith.addf %317, %321 : vector<4x512xf32>
    %323 = vector.extract_strided_slice %306 {offsets = [0, 33], sizes = [4, 512], strides = [1, 1]} : vector<4x580xf32> to vector<4x512xf32>
    %c11_135 = arith.constant 11 : index
    %c0_136 = arith.constant 0 : index
    %324 = vector.load %arg2[%c11_135, %c0_136] : memref<25x512xf32, #tpu.memory_space<vmem>>, vector<1x512xf32>
    %325 = vector.broadcast %324 : vector<1x512xf32> to vector<4x512xf32>
    %326 = arith.mulf %323, %325 : vector<4x512xf32>
    %327 = arith.addf %322, %326 : vector<4x512xf32>
    %328 = vector.extract_strided_slice %306 {offsets = [0, 34], sizes = [4, 512], strides = [1, 1]} : vector<4x580xf32> to vector<4x512xf32>
    %c12_137 = arith.constant 12 : index
    %c0_138 = arith.constant 0 : index
    %329 = vector.load %arg2[%c12_137, %c0_138] : memref<25x512xf32, #tpu.memory_space<vmem>>, vector<1x512xf32>
    %330 = vector.broadcast %329 : vector<1x512xf32> to vector<4x512xf32>
    %331 = arith.mulf %328, %330 : vector<4x512xf32>
    %332 = arith.addf %327, %331 : vector<4x512xf32>
    %333 = vector.extract_strided_slice %306 {offsets = [0, 35], sizes = [4, 512], strides = [1, 1]} : vector<4x580xf32> to vector<4x512xf32>
    %c13_139 = arith.constant 13 : index
    %c0_140 = arith.constant 0 : index
    %334 = vector.load %arg2[%c13_139, %c0_140] : memref<25x512xf32, #tpu.memory_space<vmem>>, vector<1x512xf32>
    %335 = vector.broadcast %334 : vector<1x512xf32> to vector<4x512xf32>
    %336 = arith.mulf %333, %335 : vector<4x512xf32>
    %337 = arith.addf %332, %336 : vector<4x512xf32>
    %338 = vector.extract_strided_slice %306 {offsets = [0, 49], sizes = [4, 512], strides = [1, 1]} : vector<4x580xf32> to vector<4x512xf32>
    %c16_141 = arith.constant 16 : index
    %c0_142 = arith.constant 0 : index
    %339 = vector.load %arg2[%c16_141, %c0_142] : memref<25x512xf32, #tpu.memory_space<vmem>>, vector<1x512xf32>
    %340 = vector.broadcast %339 : vector<1x512xf32> to vector<4x512xf32>
    %341 = arith.mulf %338, %340 : vector<4x512xf32>
    %342 = arith.addf %337, %341 : vector<4x512xf32>
    %343 = vector.extract_strided_slice %306 {offsets = [0, 50], sizes = [4, 512], strides = [1, 1]} : vector<4x580xf32> to vector<4x512xf32>
    %c17_143 = arith.constant 17 : index
    %c0_144 = arith.constant 0 : index
    %344 = vector.load %arg2[%c17_143, %c0_144] : memref<25x512xf32, #tpu.memory_space<vmem>>, vector<1x512xf32>
    %345 = vector.broadcast %344 : vector<1x512xf32> to vector<4x512xf32>
    %346 = arith.mulf %343, %345 : vector<4x512xf32>
    %347 = arith.addf %342, %346 : vector<4x512xf32>
    %348 = vector.extract_strided_slice %306 {offsets = [0, 51], sizes = [4, 512], strides = [1, 1]} : vector<4x580xf32> to vector<4x512xf32>
    %c18_145 = arith.constant 18 : index
    %c0_146 = arith.constant 0 : index
    %349 = vector.load %arg2[%c18_145, %c0_146] : memref<25x512xf32, #tpu.memory_space<vmem>>, vector<1x512xf32>
    %350 = vector.broadcast %349 : vector<1x512xf32> to vector<4x512xf32>
    %351 = arith.mulf %348, %350 : vector<4x512xf32>
    %352 = arith.addf %347, %351 : vector<4x512xf32>
    %c0_147 = arith.constant 0 : index
    %c0_148 = arith.constant 0 : index
    %353 = vector.load %arg11[%c0_147, %c0_148] : memref<8x4xf32, #tpu.memory_space<vmem>>, vector<8x4xf32>
    %cst_149 = arith.constant dense<0.000000e+00> : vector<8x512xf32>
    %354 = tpu.matmul %353, %352, %cst_149 {dimension_numbers = #tpu.dot_dimension_numbers<[1], [0], [0], [1], [0, 0, 1, 1], [], []>} : vector<8x4xf32>, vector<4x512xf32>, vector<8x512xf32> -> vector<8x512xf32>
    %c0_150 = arith.constant 0 : index
    %c0_151 = arith.constant 0 : index
    %355 = vector.load %arg12[%c0_150, %c0_151] : memref<8x1xf32, #tpu.memory_space<vmem>>, vector<8x1xf32>
    %356 = vector.broadcast %355 : vector<8x1xf32> to vector<8x512xf32>
    %357 = arith.addf %354, %356 : vector<8x512xf32>
    %cst_152 = arith.constant 0.000000e+00 : f32
    %358 = vector.broadcast %cst_152 : f32 to vector<8x512xf32>
    %359 = arith.maximumf %357, %358 : vector<8x512xf32>
    %360 = tpu.concatenate %8, %167, %304, %359 in 0 : vector<8x512xf32>, vector<8x512xf32>, vector<8x512xf32>, vector<8x512xf32> -> vector<32x512xf32>
    %c0_153 = arith.constant 0 : index
    %c0_154 = arith.constant 0 : index
    %361 = vector.load %arg13[%c0_153, %c0_154] : memref<8x32xf32, #tpu.memory_space<vmem>>, vector<8x32xf32>
    %cst_155 = arith.constant dense<0.000000e+00> : vector<8x512xf32>
    %362 = tpu.matmul %361, %360, %cst_155 {dimension_numbers = #tpu.dot_dimension_numbers<[1], [0], [0], [1], [0, 0, 1, 1], [], []>} : vector<8x32xf32>, vector<32x512xf32>, vector<8x512xf32> -> vector<8x512xf32>
    %c0_156 = arith.constant 0 : index
    %c0_157 = arith.constant 0 : index
    %363 = vector.load %arg14[%c0_156, %c0_157] : memref<8x1xf32, #tpu.memory_space<vmem>>, vector<8x1xf32>
    %364 = vector.broadcast %363 : vector<8x1xf32> to vector<8x512xf32>
    %365 = arith.addf %362, %364 : vector<8x512xf32>
    %cst_158 = arith.constant 0.000000e+00 : f32
    %366 = vector.broadcast %cst_158 : f32 to vector<8x512xf32>
    %367 = arith.maximumf %365, %366 : vector<8x512xf32>
    %368 = tpu.concatenate %0, %367 in 0 : vector<4x512xf32>, vector<8x512xf32> -> vector<12x512xf32>
    %c0_159 = arith.constant 0 : index
    %c0_160 = arith.constant 0 : index
    %369 = vector.load %arg15[%c0_159, %c0_160] : memref<12x512xf32, #tpu.memory_space<vmem>>, vector<12x512xf32>
    tpu.vector_store %arg15[%c0_159, %c0_160], %368 {strides = array<i32>} : memref<12x512xf32, #tpu.memory_space<vmem>>, vector<12x512xf32>,
    return
  }
  func.func @transform_0(%arg0: i32) -> (i32, i32) {
    %c0_i32 = arith.constant 0 : i32
    %c0_i32_0 = arith.constant 0 : i32
    %c0_i32_1 = arith.constant 0 : i32
    return %c0_i32, %c0_i32_0 : i32, i32
  }
  func.func @transform_1(%arg0: i32) -> (i32, i32) {
    %c0_i32 = arith.constant 0 : i32
    %c0_i32_0 = arith.constant 0 : i32
    %c0_i32_1 = arith.constant 0 : i32
    return %c0_i32, %c0_i32_0 : i32, i32
  }
  func.func @transform_2(%arg0: i32) -> (i32, i32) {
    %c0_i32 = arith.constant 0 : i32
    %c0_i32_0 = arith.constant 0 : i32
    %c0_i32_1 = arith.constant 0 : i32
    return %c0_i32, %c0_i32_0 : i32, i32
  }
  func.func @transform_3(%arg0: i32) -> (i32, i32) {
    %c0_i32 = arith.constant 0 : i32
    %c0_i32_0 = arith.constant 0 : i32
    %c0_i32_1 = arith.constant 0 : i32
    return %c0_i32, %c0_i32_0 : i32, i32
  }
  func.func @transform_4(%arg0: i32) -> (i32, i32, i32) {
    %c0_i32 = arith.constant 0 : i32
    %c0_i32_0 = arith.constant 0 : i32
    %c0_i32_1 = arith.constant 0 : i32
    %c0_i32_2 = arith.constant 0 : i32
    return %c0_i32, %c0_i32_0, %c0_i32_1 : i32, i32, i32
  }
  func.func @transform_5(%arg0: i32) -> (i32, i32) {
    %c0_i32 = arith.constant 0 : i32
    %c0_i32_0 = arith.constant 0 : i32
    %c0_i32_1 = arith.constant 0 : i32
    return %c0_i32, %c0_i32_0 : i32, i32
  }
  func.func @transform_6(%arg0: i32) -> (i32, i32, i32) {
    %c0_i32 = arith.constant 0 : i32
    %c0_i32_0 = arith.constant 0 : i32
    %c0_i32_1 = arith.constant 0 : i32
    %c0_i32_2 = arith.constant 0 : i32
    return %c0_i32, %c0_i32_0, %c0_i32_1 : i32, i32, i32
  }
  func.func @transform_7(%arg0: i32) -> (i32, i32) {
    %c0_i32 = arith.constant 0 : i32
    %c0_i32_0 = arith.constant 0 : i32
    %c0_i32_1 = arith.constant 0 : i32
    return %c0_i32, %c0_i32_0 : i32, i32
  }
  func.func @transform_8(%arg0: i32) -> (i32, i32, i32) {
    %c0_i32 = arith.constant 0 : i32
    %c0_i32_0 = arith.constant 0 : i32
    %c0_i32_1 = arith.constant 0 : i32
    %c0_i32_2 = arith.constant 0 : i32
    return %c0_i32, %c0_i32_0, %c0_i32_1 : i32, i32, i32
  }
  func.func @transform_9(%arg0: i32) -> (i32, i32) {
    %c0_i32 = arith.constant 0 : i32
    %c0_i32_0 = arith.constant 0 : i32
    %c0_i32_1 = arith.constant 0 : i32
    return %c0_i32, %c0_i32_0 : i32, i32
  }
  func.func @transform_10(%arg0: i32) -> (i32, i32) {
    %c0_i32 = arith.constant 0 : i32
    %c0_i32_0 = arith.constant 0 : i32
    %c0_i32_1 = arith.constant 0 : i32
    return %c0_i32, %c0_i32_0 : i32, i32
  }
  func.func @transform_11(%arg0: i32) -> (i32, i32) {
    %c0_i32 = arith.constant 0 : i32
    %c0_i32_0 = arith.constant 0 : i32
    %c0_i32_1 = arith.constant 0 : i32
    return %c0_i32, %c0_i32_0 : i32, i32
  }
  func.func @transform_12(%arg0: i32) -> (i32, i32) {
    %c0_i32 = arith.constant 0 : i32
    %c0_i32_0 = arith.constant 0 : i32
    %c0_i32_1 = arith.constant 0 : i32
    return %c0_i32, %c0_i32_0 : i32, i32
  }
  func.func @transform_13(%arg0: i32) -> (i32, i32) {
    %c0_i32 = arith.constant 0 : i32
    %c0_i32_0 = arith.constant 0 : i32
    %c0_i32_1 = arith.constant 0 : i32
    return %c0_i32, %c0_i32_0 : i32, i32
  }
  func.func @transform_14(%arg0: i32) -> (i32, i32) {
    %c0_i32 = arith.constant 0 : i32
    %c0_i32_0 = arith.constant 0 : i32
    %c0_i32_1 = arith.constant 0 : i32
    return %c0_i32, %c0_i32_0 : i32, i32
  }
}

</mosaic_0001>

<bundles_post_ra>
// kernel: tpu_custom_call.1
= control target key start
LH: loop header
LB: loop body
LE: loop exit
PB: predicated region body
PF: predicated region fallthrough
CT: control target
= control target key end

     0   :  { %19 = vsyncpa [#allocation3], 0  ;;  %s8198_s0 = inlined_call_operand.vmem [shape: f32[4,512], index: 0, kind: input, shape index: {}]   ;;  %s8199_s1 = inlined_call_operand.hbm [shape: f32[25,512], index: 1, kind: input, shape index: {}]   ;;  %s8200_s2 = inlined_call_operand.vmem [shape: f32[40,4], index: 2, kind: input, shape index: {}]   ;;  %s8201_s3 = inlined_call_operand.vmem [shape: f32[40,1], index: 3, kind: input, shape index: {}]   ;;  %s8202_s4 = inlined_call_operand.vmem [shape: bf16[5,8,80], index: 4, kind: input, shape index: {}]   ;;  %s8203_s5 = inlined_call_operand.vmem [shape: f32[8,1], index: 5, kind: input, shape index: {}]   ;;  %s8204_s6 = inlined_call_operand.vmem [shape: bf16[3,8,48], index: 6, kind: input, shape index: {}]   ;;  %s8205_s7 = inlined_call_operand.vmem [shape: f32[8,1], index: 7, kind: input, shape index: {}]   ;;  %s8206_s8 = inlined_call_operand.vmem [shape: bf16[3,8,24], index: 8, kind: input, shape index: {}]   ;;  %s8207_s9 = inlined_call_operand.vmem [shape: f32[8,1], index: 9, kind: input, shape index: {}]   ;;  %s8208_s10 = inlined_call_operand.vmem [shape: f32[8,4], index: 10, kind: input, shape index: {}]   ;;  %s8209_s11 = inlined_call_operand.vmem [shape: f32[8,1], index: 11, kind: input, shape index: {}]   ;;  %s8210_s12 = inlined_call_operand.vmem [shape: f32[8,32], index: 12, kind: input, shape index: {}]   ;;  %s8211_s13 = inlined_call_operand.vmem [shape: f32[8,1], index: 13, kind: input, shape index: {}]   ;;  %s8212_s14 = inlined_call_operand.hbm [shape: f32[12,512], index: 14, kind: output, shape index: {}]  }
   0x1   :  { %20 = vsyncpa [#allocation4], 0  ;;  %s27_s15 = sshll.u32 %s8199_s1, 4  ;;  %s5066_s16 = smov [#allocation2]   ;;  %s28_s15 = int_to_ptr.hbm [resolvable:$true] %s27_s15 }
   0x2   :  { %s29_s17 = sshll.u32 %s5066_s16, 4  ;;  %s5067_s18 = smov 512   ;;  %s30_s17 = int_to_ptr.vmem [resolvable:$true] %s29_s17 }
   0x3   :  { %s5068_s19 = smov 32  }
   0x4   :  { %35 = dma.hbm_to_vmem [thread:$0]  %s28_s15, 2048, %s30_s17, [#allocation3], %s5067_s18, %s5067_s18, %s5068_s19  }
   0x5   :  { %5062 = dma.done.wait [#allocation3], 2048  }
   0x6   :  { %5063 = vsyncadd [#allocation3], 4294965248  ;;  %v5069_v0 = vmov 0   ;;  %v74_v1 = vld [vmem:[%s8201_s3 + $0x10] sm:$0xff]  ;;  %v72_v2 = vld [vmem:[%s8201_s3] sm:$0xff]  ;;  %vm127_vm0 = vcmask 1043456  }
   0x7   :  { %5011 = vset.pattern.permute.xlu1 %v5069_v0  ;;  %5010 = vset.pattern.permute.xlu0 %v5069_v0  ;;  %v5196_v3 = vld [vmem:[%s8198_s0] sm:$0xff]  ;;  %v5201_v4 = vld [vmem:[%s8198_s0 + $0x8] sm:$0xff]  ;;  %v75_v6 = vld [vmem:[%s8201_s3 + $0x18] sm:$0xff]  ;;  %vm111_vm1 = vcmask 31744   ;;  %s5071_s1 = smov 2   ;;  %s5072_s26 = smov 3  }
   0x8   :  { %5012 = vset.pattern.permute.xlu2 %v5069_v0  ;;  %89 = vperm.xlu1 %5011, %v74_v1   ;;  %8340 = vst [vmem:[#allocation8_spill] sm:$0xff] %v5196_v3  ;;  %v76_v5 = vld [vmem:[%s8201_s3 + $0x20] sm:$0xff]  ;;  %v73_v7 = vld [vmem:[%s8201_s3 + $0x8] sm:$0xff]  ;;  %s5070_s3 = smov 1   ;;  %v69_v22 = vld [vmem:[%s8200_s2 + $0x10] sm:$0xff]  ;;  %s5073_s29 = smov 4  }
   0x9   :  { %79 = vperm.xlu0 %5010, %v72_v2   ;;  %8341 = vst [vmem:[#allocation9_spill] sm:$0xff] %v5201_v4  ;;  %99 = vperm.xlu2 %5012, %v76_v5   ;;  %v67_v8 = vld [vmem:[%s8200_s2] sm:$0xff]  ;;  %v68_v17 = vld [vmem:[%s8200_s2 + $0x8] sm:$0xff]  ;;  %v70_v27 = vld [vmem:[%s8200_s2 + $0x18] sm:$0xff]  ;;  %s5075_s30 = smov 17   ;;  %s5076_s15 = smov 18  }
   0xa   :  { %104 = vst [vmem:[#allocation1] ss:$2 sm:$0xff] %v5196_v3  ;;  %v352_v9 = vld [vmem:[#allocation2 + $0x1] ss:$8 sm:$0xf]  ;;  %s5077_s16 = smov 19  }
   0xb   :  { %106 = vst [vmem:[#allocation1 + $0x10] ss:$2 sm:$0xff] %v5201_v4  ;;  %v355_v13 = vperm.slane %v352_v9, 1  ;;  %v354_v15 = vperm.slane %v352_v9, 0  ;;  %v356_v16 = vperm.slane %v352_v9, 2  ;;  %v357_v20 = vperm.slane %v352_v9, 3 }
   0xc   :  { %v392_v18 = vld [vmem:[#allocation2 + $0x2] ss:$8 sm:$0xf]  ;;  %v432_v23 = vld [vmem:[#allocation2 + $0x3] ss:$8 sm:$0xf] }
   0xd   :  { %v394_v19 = vperm.slane %v392_v18, 0  ;;  %v395_v21 = vperm.slane %v392_v18, 1  ;;  %v397_v24 = vperm.slane %v392_v18, 3  ;;  %v396_v25 = vperm.slane %v392_v18, 2  ;;  %v71_v31 = vld [vmem:[%s8200_s2 + $0x20] sm:$0xff]  ;;  %s5074_s2 = smov 16  }
   0xe   :  { %v434_v26 = vperm.slane %v432_v23, 0  ;;  %v436_v28 = vperm.slane %v432_v23, 2  ;;  %v435_v29 = vperm.slane %v432_v23, 1  ;;  %v437_v30 = vperm.slane %v432_v23, 3  ;;  %s5078_s0 = smov 20   ;;  %s5079_s17 = smov 33  }
   0xf   :  { %v472_v32 = vld [vmem:[#allocation2 + $0x4] ss:$8 sm:$0xf]  ;;  %v692_v36 = vld [vmem:[#allocation2 + $0x5] ss:$8 sm:$0xf] }
  0x10   :  { %94 = vperm.xlu1 %5011, %v75_v6   ;;  %v475_v33 = vperm.slane %v472_v32, 1  ;;  %v474_v34 = vperm.slane %v472_v32, 0  ;;  %v476_v35 = vperm.slane %v472_v32, 2  ;;  %v695_v37 = vperm.slane %v692_v36, 1  ;;  %s5081_s20 = smov 35   ;;  %s5082_s21 = smov 126  }
  0x11   :  { %84 = vperm.xlu0 %5010, %v73_v7   ;;  %v107_v10 = vld.sshfl [vmem:[#allocation1] sm:$0xff pattern:$0x75316420]  ;;  %v108_v11 = vld.sshfl [vmem:[#allocation1 + $0x8] sm:$0xff pattern:$0x75316420]  ;;  %360 = vrot.lane.b32.xlu2 %v355_v13, %s5070_s3 }
  0x12   :  { %4882 = vmatpush.msk.msra.mxu0 %vm127_vm0, %v107_v10  ;;  %4888 = vmatpush.msk.msra.mxu1 %vm127_vm0, %v108_v11  ;;  %4298 = vst [vmem:[#allocation1] ss:$2 sm:$0xff] %v5196_v3  ;;  %v109_v12 = vld.sshfl [vmem:[#allocation1 + $0x10] sm:$0xff pattern:$0x75316420]  ;;  %v477_v38 = vperm.slane %v472_v32, 3 }
  0x13   :  { %4894 = vmatpush.msk.msra.mxu2 %vm127_vm0, %v109_v12  ;;  %v110_v14 = vld.sshfl [vmem:[#allocation1 + $0x18] sm:$0xff pattern:$0x75316420]  ;;  %4883 = vmatmul.msk.f32.vlgmr.msra.gmra.mxu0 %vm111_vm1, %v67_v8  ;;  %v696_v39 = vperm.slane %v692_v36, 2  ;;  %v694_v42 = vperm.slane %v692_v36, 0  ;;  %v697_v46 = vperm.slane %v692_v36, 3 }
  0x14   :  { %4900 = vmatpush.msk.msra.mxu3 %vm127_vm0, %v110_v14  ;;  %4300 = vst [vmem:[#allocation1 + $0x10] ss:$2 sm:$0xff] %v5201_v4  ;;  %4889 = vmatmul.msk.f32.vlgmr.msra.gmra.mxu1 %vm111_vm1, %v67_v8  ;;  %v732_v40 = vld [vmem:[#allocation2 + $0x6] ss:$8 sm:$0xf]  ;;  %vm366_vm2 = vcmask 7168  }
  0x15   :  { %4895 = vmatmul.msk.f32.vlgmr.msra.gmra.mxu2 %vm111_vm1, %v67_v8  ;;  %4901 = vmatmul.msk.f32.vlgmr.msra.gmra.mxu3 %vm111_vm1, %v67_v8  ;;  %v734_v41 = vperm.slane %v732_v40, 0  ;;  %v735_v43 = vperm.slane %v732_v40, 1  ;;  %v772_v44 = vld [vmem:[#allocation2 + $0x7] ss:$8 sm:$0xf]  ;;  %v737_v45 = vperm.slane %v732_v40, 3 }
  0x16   :  { %v774_v47 = vperm.slane %v772_v44, 0  ;;  %v776_v48 = vperm.slane %v772_v44, 2  ;;  %v736_v49 = vperm.slane %v732_v40, 2  ;;  %v777_v50 = vperm.slane %v772_v44, 3  ;;  %s5084_s22 = smov 125   ;;  %s5085_s23 = smov 124  }
  0x17   :  { %v812_v51 = vld [vmem:[#allocation2 + $0x20] ss:$8 sm:$0xf]  ;;  %v775_v53 = vperm.slane %v772_v44, 1  ;;  %vm406_vm3 = vcmask 15360   ;;  %vm308_vm4 = vcmask 277504  }
  0x18   :  { %358 = vrot.lane.b32.xlu1 %v354_v15, %s5070_s3  ;;  %v815_v52 = vperm.slane %v812_v51, 1  ;;  %v816_v54 = vperm.slane %v812_v51, 2  ;;  %v852_v55 = vld [vmem:[#allocation2 + $0x21] ss:$8 sm:$0xf]  ;;  %v814_v57 = vperm.slane %v812_v51, 0 }
  0x19   :  { %362 = vrot.lane.b32.xlu0 %v356_v16, %s5070_s3  ;;  %398 = vrot.lane.b32.xlu2 %v394_v19, %s5071_s1  ;;  %v854_v56 = vperm.slane %v852_v55, 0  ;;  %v855_v58 = vperm.slane %v852_v55, 1  ;;  %v1257_v59 = vld [vmem:[#allocation2 + $0x22] ss:$8 sm:$0xf]  ;;  %v857_v60 = vperm.slane %v852_v55, 3 }
  0x1a   :  { %v817_v62 = vperm.slane %v812_v51, 3  ;;  %v1259_v63 = vperm.slane %v1257_v59, 0  ;;  %v1261_v0 = vperm.slane %v1257_v59, 2  ;;  %v856_v1 = vperm.slane %v852_v55, 2  ;;  %s5086_s24 = smov 112   ;;  %s5087_s25 = smov 36  }
  0x1b   :  { %4884 = vmatmul.msk.f32.gmra.mxu0 %vm111_vm1, %v68_v17  ;;  %v1262_v2 = vperm.slane %v1257_v59, 3  ;;  %v1297_v6 = vld [vmem:[#allocation2 + $0x23] ss:$8 sm:$0xf]  ;;  %v1260_v10 = vperm.slane %v1257_v59, 1  ;;  %vm446_vm5 = vcmask 23552  }
  0x1c   :  { %4890 = vmatmul.msk.f32.gmra.mxu1 %vm111_vm1, %v68_v17  ;;  %v1300_v7 = vperm.slane %v1297_v6, 1  ;;  %v1301_v11 = vperm.slane %v1297_v6, 2  ;;  %v1337_v13 = vld [vmem:[#allocation2 + $0x24] ss:$8 sm:$0xf]  ;;  %vm746_vm6 = vcmask 138240  }
  0x1d   :  { %4896 = vmatmul.msk.f32.gmra.mxu2 %vm111_vm1, %v68_v17  ;;  %4902 = vmatmul.msk.f32.gmra.mxu3 %vm111_vm1, %v68_v17  ;;  %v1339_v14 = vperm.slane %v1337_v13, 0  ;;  %v1299_v17 = vperm.slane %v1297_v6, 0  ;;  %v1340_v18 = vperm.slane %v1337_v13, 1  ;;  %vm826_vm7 = vcmask 154624   ;;  %s5089_s27 = smov 48   ;;  %s5090_s28 = smov 49  }
  0x1e   :  { %vm786_vm8 = vcmask 146432   ;;  %vm866_vm9 = vcmask 162816   ;;  %vm706_vm10 = vcmask 130048   ;;  %vm1311_vm11 = vcmask 269312  }
  0x1f   :  { %vm1390_vm12 = vcmask 285696   ;;  %vm1430_vm13 = vcmask 293888   ;;  %vm1271_vm14 = vcmask 261120   ;;  %vm601_vm15 = vcmask 1031168  }
  0x20   :  { %364 = vrot.lane.b32.xlu1 %v357_v20, %s5070_s3  ;;  %s5080_s3 = smov 34   ;;  %v5275_v20 = vld [vmem:[#allocation2 + $0x25] ss:$8 sm:$0xf] }
  0x21   :  { %400 = vrot.lane.b32.xlu0 %v395_v21, %s5071_s1  ;;  %404 = vrot.lane.b32.xlu2 %v397_v24, %s5071_s1  ;;  %v1342_v21 = vperm.slane %v1337_v13, 3  ;;  %v1302_v24 = vperm.slane %v1297_v6, 3  ;;  %v1380_v59 = vperm.slane %v5275_v20, 2  ;;  %v1379_v6 = vperm.slane %v5275_v20, 1 }
  0x23   :  { %4885 = vmatmul.msk.f32.gmra.mxu0 %vm111_vm1, %v69_v22 }
  0x24   :  { %4891 = vmatmul.msk.f32.gmra.mxu1 %vm111_vm1, %v69_v22 }
  0x25   :  { %4897 = vmatmul.msk.f32.gmra.mxu2 %vm111_vm1, %v69_v22  ;;  %4903 = vmatmul.msk.f32.gmra.mxu3 %vm111_vm1, %v69_v22 }
  0x28   :  { %402 = vrot.lane.b32.xlu1 %v396_v25, %s5071_s1  ;;  %v1378_v25 = vperm.slane %v5275_v20, 0  ;;  %s5083_s1 = smov 127  }
  0x29   :  { %438 = vrot.lane.b32.xlu0 %v434_v26, %s5072_s26  ;;  %442 = vrot.lane.b32.xlu2 %v436_v28, %s5072_s26 }
  0x2b   :  { %4886 = vmatmul.msk.f32.gmra.mxu0 %vm111_vm1, %v70_v27 }
  0x2c   :  { %4892 = vmatmul.msk.f32.gmra.mxu1 %vm111_vm1, %v70_v27 }
  0x2d   :  { %4898 = vmatmul.msk.f32.gmra.mxu2 %vm111_vm1, %v70_v27  ;;  %4904 = vmatmul.msk.f32.gmra.mxu3 %vm111_vm1, %v70_v27 }
  0x30   :  { %440 = vrot.lane.b32.xlu1 %v435_v29, %s5072_s26 }
  0x31   :  { %444 = vrot.lane.b32.xlu0 %v437_v30, %s5072_s26  ;;  %480 = vrot.lane.b32.xlu2 %v475_v33, %s5073_s29  ;;  %s5088_s26 = smov 96  }
  0x33   :  { %4887 = vmatmul.msk.f32.gmra.mxu0 %vm111_vm1, %v71_v31 }
  0x34   :  { %4893 = vmatmul.msk.f32.gmra.mxu1 %vm111_vm1, %v71_v31 }
  0x35   :  { %4899 = vmatmul.msk.f32.gmra.mxu2 %vm111_vm1, %v71_v31  ;;  %4905 = vmatmul.msk.f32.gmra.mxu3 %vm111_vm1, %v71_v31  ;;  %v1341_v31 = vperm.slane %v1337_v13, 2 }
  0x38   :  { %478 = vrot.lane.b32.xlu1 %v474_v34, %s5073_s29 }
  0x39   :  { %482 = vrot.lane.b32.xlu0 %v476_v35, %s5073_s29  ;;  %700 = vrot.lane.b32.xlu2 %v695_v37, %s5074_s2 }
  0x40   :  { %484 = vrot.lane.b32.xlu1 %v477_v38, %s5073_s29  ;;  %s5091_s29 = smov 50  }
  0x41   :  { %702 = vrot.lane.b32.xlu0 %v696_v39, %s5074_s2  ;;  %738 = vrot.lane.b32.xlu2 %v734_v41, %s5075_s30 }
  0x48   :  { %698 = vrot.lane.b32.xlu1 %v694_v42, %s5074_s2 }
  0x49   :  { %740 = vrot.lane.b32.xlu0 %v735_v43, %s5075_s30  ;;  %744 = vrot.lane.b32.xlu2 %v737_v45, %s5075_s30 }
  0x50   :  { %704 = vrot.lane.b32.xlu1 %v697_v46, %s5074_s2  ;;  %s5092_s2 = smov 51  }
  0x51   :  { %778 = vrot.lane.b32.xlu0 %v774_v47, %s5076_s15  ;;  %782 = vrot.lane.b32.xlu2 %v776_v48, %s5076_s15 }
  0x58   :  { %742 = vrot.lane.b32.xlu1 %v736_v49, %s5075_s30  ;;  %s5093_s30 = smov 52  }
  0x59   :  { %784 = vrot.lane.b32.xlu0 %v777_v50, %s5076_s15  ;;  %820 = vrot.lane.b32.xlu2 %v815_v52, %s5077_s16 }
  0x60   :  { %780 = vrot.lane.b32.xlu1 %v775_v53, %s5076_s15  ;;  %s5101_s15 = smov 111  }
  0x61   :  { %822 = vrot.lane.b32.xlu0 %v816_v54, %s5077_s16  ;;  %858 = vrot.lane.b32.xlu2 %v854_v56, %s5078_s0 }
  0x63   :  { %v5255_v61 = vpop.permute.xlu2 %99 }
  0x64   :  { %8342 = vst [vmem:[#allocation10_spill] sm:$0xff] %v5255_v61 }
  0x68   :  { %818 = vrot.lane.b32.xlu1 %v814_v57, %s5077_s16 }
  0x69   :  { %860 = vrot.lane.b32.xlu0 %v855_v58, %s5078_s0  ;;  %864 = vrot.lane.b32.xlu2 %v857_v60, %s5078_s0 }
  0x6b   :  { %v5258_v5 = vpop.permute.xlu2 %360 }
  0x70   :  { %824 = vrot.lane.b32.xlu1 %v817_v62, %s5077_s16 }
  0x71   :  { %1263 = vrot.lane.b32.xlu0 %v1259_v63, %s5068_s19  ;;  %1267 = vrot.lane.b32.xlu2 %v1261_v0, %s5068_s19 }
  0x73   :  { %v5266_v12 = vpop.permute.xlu2 %398 }
  0x78   :  { %862 = vrot.lane.b32.xlu1 %v856_v1, %s5078_s0  ;;  %s5094_s0 = smov 80  }
  0x79   :  { %1269 = vrot.lane.b32.xlu0 %v1262_v2, %s5068_s19  ;;  %1305 = vrot.lane.b32.xlu2 %v1300_v7, %s5079_s17 }
  0x7a   :  { %v5262_v8 = vpop.permute.xlu1 %89 }
  0x7b   :  { %v5264_v9 = vpop.permute.xlu0 %79  ;;  %v5273_v19 = vpop.permute.xlu2 %404 }
  0x7c   :  { %8343 = vst [vmem:[#allocation11_spill] sm:$0xff] %v5264_v9 }
  0x80   :  { %1265 = vrot.lane.b32.xlu1 %v1260_v10, %s5068_s19 }
  0x81   :  { %1307 = vrot.lane.b32.xlu0 %v1301_v11, %s5079_s17  ;;  %1343 = vrot.lane.b32.xlu2 %v1339_v14, %s5080_s3 }
  0x82   :  { %v5269_v15 = vpop.permute.xlu1 %94 }
  0x83   :  { %8344 = vst [vmem:[#allocation12_spill] sm:$0xff] %v5269_v15  ;;  %v85_v16 = vpop.permute.xlu0 %84  ;;  %v5292_v30 = vpop.permute.xlu2 %442 }
  0x88   :  { %1303 = vrot.lane.b32.xlu1 %v1299_v17, %s5079_s17 }
  0x89   :  { %1345 = vrot.lane.b32.xlu0 %v1340_v18, %s5080_s3  ;;  %1349 = vrot.lane.b32.xlu2 %v1342_v21, %s5080_s3 }
  0x8a   :  { %v5277_v22 = vpop.permute.xlu1 %358 }
  0x8b   :  { %v5279_v23 = vpop.permute.xlu0 %362  ;;  %v5305_v42 = vpop.permute.xlu2 %480 }
  0x90   :  { %v5283_v26 = vpop.f32.mrf.mxu0  ;;  %1309 = vrot.lane.b32.xlu1 %v1302_v24, %s5079_s17  ;;  %s5095_s17 = smov 64  }
  0x91   :  { %8345 = vst [vmem:[#allocation13_spill] sm:$0xff] %v5283_v26  ;;  %v5285_v27 = vpop.f32.mrf.mxu1  ;;  %1382 = vrot.lane.b32.xlu0 %v1378_v25, %s5081_s20 }
  0x92   :  { %8346 = vst [vmem:[#allocation14_spill] sm:$0xff] %v5285_v27  ;;  %v5288_v28 = vpop.permute.xlu1 %364 }
  0x93   :  { %v5290_v29 = vpop.permute.xlu0 %400  ;;  %v5317_v58 = vpop.permute.xlu2 %700 }
  0x98   :  { %v5294_v32 = vpop.f32.mrf.mxu2  ;;  %v5296_v33 = vpop.f32.mrf.mxu3  ;;  %1347 = vrot.lane.b32.xlu1 %v1341_v31, %s5080_s3 }
  0x99   :  { %8347 = vst [vmem:[#allocation15_spill] sm:$0xff] %v5294_v32  ;;  %v156_v34 = vpop.f32.mrf.mxu0  ;;  %v188_v35 = vpop.f32.mrf.mxu1 }
  0x9a   :  { %8348 = vst [vmem:[#allocation16_spill] sm:$0xff] %v5296_v33  ;;  %v157_v36 = vadd.f32 %v156_v34, %v85_v16  ;;  %v189_v37 = vadd.f32 %v188_v35, %v85_v16  ;;  %v5299_v38 = vpop.permute.xlu1 %402 }
  0x9b   :  { %v5301_v39 = vpop.permute.xlu0 %438  ;;  %v5333_v13 = vpop.permute.xlu2 %738 }
  0x9c   :  { %v268_v40 = vmax.f32 %v157_v36, 0.0  ;;  %v269_v41 = vmax.f32 %v189_v37, 0.0  ;;  %8349 = vst [vmem:[#allocation17_spill] sm:$0xff] %v5333_v13 }
  0x9e   :  { %294 = vrot.lane.b32.xlu0 %v269_v41, %s5080_s3  ;;  %292 = vrot.lane.b32.xlu2 %v268_v40, %s5080_s3 }
  0xa0   :  { %v220_v43 = vpop.f32.mrf.mxu2  ;;  %v252_v44 = vpop.f32.mrf.mxu3 }
  0xa1   :  { %v221_v45 = vadd.f32 %v220_v43, %v85_v16  ;;  %v253_v46 = vadd.f32 %v252_v44, %v85_v16  ;;  %v159_v47 = vpop.f32.mrf.mxu0  ;;  %v191_v54 = vpop.f32.mrf.mxu1 }
  0xa2   :  { %v160_v48 = vadd.f32 %v159_v47, %v5262_v8  ;;  %v5308_v50 = vpop.permute.xlu1 %440  ;;  %v192_v55 = vadd.f32 %v191_v54, %v5262_v8 }
  0xa3   :  { %v270_v49 = vmax.f32 %v221_v45, 0.0  ;;  %v5310_v51 = vpop.permute.xlu0 %444  ;;  %v271_v52 = vmax.f32 %v253_v46, 0.0  ;;  %v5341_v17 = vpop.permute.xlu2 %744 }
  0xa4   :  { %v272_v53 = vmax.f32 %v160_v48, 0.0  ;;  %v273_v60 = vmax.f32 %v192_v55, 0.0  ;;  %8350 = vst [vmem:[#allocation18_spill] sm:$0xff] %v5341_v17 }
  0xa5   :  { %296 = vrot.lane.b32.xlu1 %v270_v49, %s5080_s3 }
  0xa6   :  { %300 = vrot.lane.b32.xlu0 %v272_v53, %s5080_s3  ;;  %298 = vrot.lane.b32.xlu2 %v271_v52, %s5080_s3 }
  0xa8   :  { %v255_v56 = vpop.f32.mrf.mxu3  ;;  %v223_v1 = vpop.f32.mrf.mxu2 }
  0xa9   :  { %v256_v57 = vadd.f32 %v255_v56, %v5262_v8  ;;  %v224_v2 = vadd.f32 %v223_v1, %v5262_v8 }
  0xaa   :  { %v5320_v62 = vpop.permute.xlu1 %478 }
  0xab   :  { %v5322_v63 = vpop.permute.xlu0 %482  ;;  %v275_v0 = vmax.f32 %v256_v57, 0.0  ;;  %v274_v11 = vmax.f32 %v224_v2, 0.0  ;;  %v5347_v20 = vpop.permute.xlu2 %782 }
  0xad   :  { %302 = vrot.lane.b32.xlu1 %v273_v60, %s5080_s3 }
  0xae   :  { %306 = vrot.lane.b32.xlu0 %v275_v0, %s5080_s3  ;;  %1386 = vrot.lane.b32.xlu2 %v1380_v59, %s5081_s20 }
  0xb2   :  { %v5329_v7 = vpop.permute.xlu1 %484 }
  0xb3   :  { %v5331_v10 = vpop.permute.xlu0 %702  ;;  %v5353_v25 = vpop.permute.xlu2 %820 }
  0xb5   :  { %1384 = vrot.lane.b32.xlu1 %v1379_v6, %s5081_s20  ;;  %v367_v6 = vsel %vm366_vm2, %v5277_v22, %v5258_v5 }
  0xb6   :  { %304 = vrot.lane.b32.xlu2 %v274_v11, %s5080_s3  ;;  %v407_v11 = vsel %vm406_vm3, %v5266_v12, %v5290_v29 }
  0xba   :  { %v5337_v14 = vpop.permute.xlu1 %698 }
  0xbb   :  { %v5339_v16 = vpop.permute.xlu0 %740  ;;  %v5363_v37 = vpop.permute.xlu2 %858 }
  0xc2   :  { %v5343_v8 = vpop.permute.xlu1 %704 }
  0xc3   :  { %v5345_v18 = vpop.permute.xlu0 %778  ;;  %v5369_v43 = vpop.permute.xlu2 %864 }
  0xc4   :  { %8351 = vst [vmem:[#allocation19_spill] sm:$0xff] %v5345_v18 }
  0xca   :  { %v5349_v21 = vpop.permute.xlu1 %742 }
  0xcb   :  { %v5351_v24 = vpop.permute.xlu0 %784  ;;  %v5375_v46 = vpop.permute.xlu2 %1267 }
  0xcc   :  { %8352 = vst [vmem:[#allocation20_spill] sm:$0xff] %v5351_v24 }
  0xcd   :  { %8357 = vst [vmem:[#allocation25_spill] sm:$0xff] %v5375_v46 }
  0xd2   :  { %v5355_v31 = vpop.permute.xlu1 %780 }
  0xd3   :  { %v5357_v34 = vpop.permute.xlu0 %822  ;;  %v5381_v49 = vpop.permute.xlu2 %1305 }
  0xd4   :  { %8360 = vst [vmem:[#allocation28_spill] sm:$0xff] %v5381_v49 }
  0xda   :  { %v5359_v35 = vpop.permute.xlu1 %818 }
  0xdb   :  { %8353 = vst [vmem:[#allocation21_spill] sm:$0xff] %v5359_v35  ;;  %v5361_v36 = vpop.permute.xlu0 %860  ;;  %v5389_v55 = vpop.permute.xlu2 %1343 }
  0xdc   :  { %8364 = vst [vmem:[#allocation32_spill] sm:$0xff] %v5389_v55 }
  0xe2   :  { %v5365_v40 = vpop.permute.xlu1 %824 }
  0xe3   :  { %8354 = vst [vmem:[#allocation22_spill] sm:$0xff] %v5365_v40  ;;  %v5367_v41 = vpop.permute.xlu0 %1263  ;;  %v5395_v59 = vpop.permute.xlu2 %1349 }
  0xe4   :  { %8355 = vst [vmem:[#allocation23_spill] sm:$0xff] %v5367_v41 }
  0xe5   :  { %8367 = vst [vmem:[#allocation35_spill] sm:$0xff] %v5395_v59 }
  0xea   :  { %v5371_v44 = vpop.permute.xlu1 %862 }
  0xeb   :  { %v5373_v45 = vpop.permute.xlu0 %1269 }
  0xec   :  { %8356 = vst [vmem:[#allocation24_spill] sm:$0xff] %v5373_v45 }
  0xf2   :  { %v5377_v47 = vpop.permute.xlu1 %1265 }
  0xf3   :  { %8358 = vst [vmem:[#allocation26_spill] sm:$0xff] %v5377_v47  ;;  %v5379_v48 = vpop.permute.xlu0 %1307 }
  0xf4   :  { %8359 = vst [vmem:[#allocation27_spill] sm:$0xff] %v5379_v48 }
  0xf8   :  { %v293_v1 = vpop.permute.xlu2 %292 }
  0xf9   :  { %v5412_v27 = vsel %vm308_vm4, 0.0, %v293_v1 }
  0xfa   :  { %v5383_v52 = vpop.permute.xlu1 %1303  ;;  %v415_v3 = vmul.f32 %v5266_v12, %v5412_v27  ;;  %v375_v4 = vmul.f32 %v5277_v22, %v5412_v27 }
  0xfb   :  { %8361 = vst [vmem:[#allocation29_spill] sm:$0xff] %v5383_v52  ;;  %v5385_v53 = vpop.permute.xlu0 %1345 }
  0xfc   :  { %8362 = vst [vmem:[#allocation30_spill] sm:$0xff] %v5385_v53 }
 0x102   :  { %v5387_v54 = vpop.permute.xlu1 %1309 }
 0x103   :  { %8363 = vst [vmem:[#allocation31_spill] sm:$0xff] %v5387_v54  ;;  %v5391_v56 = vpop.permute.xlu0 %1382 }
 0x104   :  { %8365 = vst [vmem:[#allocation33_spill] sm:$0xff] %v5391_v56 }
 0x10a   :  { %v5393_v57 = vpop.permute.xlu1 %1347 }
 0x10b   :  { %8366 = vst [vmem:[#allocation34_spill] sm:$0xff] %v5393_v57  ;;  %v447_v57 = vsel %vm446_vm5, %v5301_v39, %v5308_v50 }
 0x110   :  { %v5397_v60 = vpop.permute.xlu0 %294 }
 0x111   :  { %v5403_v2 = vsel %vm308_vm4, %v293_v1, %v5397_v60 }
 0x112   :  { %v416_v33 = vmul.f32 %v407_v11, %v5403_v2  ;;  %v376_v32 = vmul.f32 %v367_v6, %v5403_v2 }
 0x114   :  { %v425_v15 = vpack.c.bf16 %v416_v33, %v415_v3  ;;  %v385_v46 = vpack.c.bf16 %v376_v32, %v375_v4 }
 0x116   :  { %v576_v3 = vunpack.c.l.b16 %v425_v15  ;;  %v537_v4 = vunpack.c.h.b16 %v385_v46  ;;  %v536_v32 = vunpack.c.l.b16 %v385_v46 }
 0x117   :  { %v5399_v0 = vpop.permute.xlu1 %296 }
 0x118   :  { %v301_v26 = vpop.permute.xlu0 %300 }
 0x119   :  { %v5417_v9 = vsel %vm308_vm4, 0.0, %v301_v26 }
 0x11a   :  { %v420_v45 = vmul.f32 %v5266_v12, %v5417_v9  ;;  %v380_v47 = vmul.f32 %v5277_v22, %v5417_v9  ;;  %v456_v12 = vmul.f32 %v447_v57, %v5403_v2  ;;  %v460_v22 = vmul.f32 %v5301_v39, %v5417_v9 }
 0x11f   :  { %v5423_v61 = vpop.permute.xlu1 %302 }
 0x120   :  { %v5427_v1 = vsel %vm308_vm4, %v301_v26, %v5423_v61 }
 0x121   :  { %v421_v41 = vmul.f32 %v407_v11, %v5427_v1  ;;  %v381_v56 = vmul.f32 %v367_v6, %v5427_v1  ;;  %v461_v26 = vmul.f32 %v447_v57, %v5427_v1  ;;  %v455_v6 = vmul.f32 %v5301_v39, %v5412_v27  ;;  %v5455_v39 = vpop.permute.xlu2 %298 }
 0x123   :  { %v428_v59 = vpack.c.bf16 %v421_v41, %v420_v45  ;;  %v388_v55 = vpack.c.bf16 %v381_v56, %v380_v47  ;;  %v468_v47 = vpack.c.bf16 %v461_v26, %v460_v22  ;;  %v465_v46 = vpack.c.bf16 %v456_v12, %v455_v6 }
 0x124   :  { %v5452_v56 = vsel %vm746_vm6, %v5333_v13, %v5339_v16  ;;  %v499_v22 = vmul.f32 %v5320_v62, %v5417_v9  ;;  %v577_v6 = vunpack.c.h.b16 %v425_v15  ;;  %v5477_v15 = vsel %vm826_vm7, %v5359_v35, %v5353_v25 }
 0x125   :  { %v581_v33 = vunpack.c.l.b16 %v428_v59  ;;  %v542_v11 = vunpack.c.h.b16 %v388_v55  ;;  %v541_v53 = vunpack.c.l.b16 %v388_v55  ;;  %v486_v55 = vsel %vm111_vm1, %v5320_v62, %v5305_v42  ;;  %8368 = vst [vmem:[#allocation36_spill] sm:$0xff] %v5452_v56 }
 0x126   :  { %v621_v57 = vunpack.c.l.b16 %v468_v47  ;;  %v500_v26 = vmul.f32 %v486_v55, %v5427_v1  ;;  %v617_v12 = vunpack.c.h.b16 %v465_v46  ;;  %8369 = vst [vmem:[#allocation37_spill] sm:$0xff] %v5477_v15 }
 0x127   :  { %v586_v52 = vpack.c.b16 %v581_v33, %v576_v3  ;;  %v547_v41 = vpack.c.b16 %v542_v11, %v537_v4  ;;  %v546_v45 = vpack.c.b16 %v541_v53, %v536_v32  ;;  %v622_v53 = vunpack.c.h.b16 %v468_v47 }
 0x128   :  { %v582_v3 = vunpack.c.h.b16 %v428_v59  ;;  %v756_v4 = vmul.f32 %v5452_v56, %v5403_v2  ;;  %v495_v32 = vmul.f32 %v486_v55, %v5403_v2  ;;  %v616_v33 = vunpack.c.l.b16 %v465_v46 }
 0x129   :  { %591 = vrot.lane.b32.xlu1 %v586_v52, %s5082_s21  ;;  %553 = vrot.lane.b32.xlu0 %v547_v41, %s5083_s1  ;;  %v761_v52 = vmul.f32 %v5452_v56, %v5427_v1  ;;  %v760_v11 = vmul.f32 %v5333_v13, %v5417_v9  ;;  %v755_v41 = vmul.f32 %v5333_v13, %v5412_v27 }
 0x12a   :  { %551 = vrot.lane.b32.xlu2 %v546_v45, %s5083_s1  ;;  %v494_v59 = vmul.f32 %v5320_v62, %v5412_v27  ;;  %v627_v45 = vpack.c.b16 %v622_v53, %v617_v12  ;;  %v626_v47 = vpack.c.b16 %v621_v57, %v616_v33  ;;  %v507_v55 = vpack.c.bf16 %v500_v26, %v499_v22 }
 0x12b   :  { %v768_v56 = vpack.c.bf16 %v761_v52, %v760_v11  ;;  %v587_v46 = vpack.c.b16 %v582_v3, %v577_v6  ;;  %v765_v49 = vpack.c.bf16 %v756_v4, %v755_v41  ;;  %v5482_v62 = vsel %vm786_vm8, %v5345_v18, %v5355_v31  ;;  %v5488_v4 = vpop.permute.xlu2 %1386 }
 0x12c   :  { %v504_v48 = vpack.c.bf16 %v495_v32, %v494_v59  ;;  %8370 = vst [vmem:[#allocation38_spill] sm:$0xff] %v5482_v62  ;;  %v662_v57 = vunpack.c.h.b16 %v507_v55  ;;  %v841_v52 = vmul.f32 %v5477_v15, %v5427_v1  ;;  %v661_v26 = vunpack.c.l.b16 %v507_v55 }
 0x12d   :  { %v924_v53 = vunpack.c.h.b16 %v768_v56  ;;  %v801_v3 = vmul.f32 %v5482_v62, %v5427_v1  ;;  %v919_v32 = vunpack.c.h.b16 %v765_v49  ;;  %v836_v33 = vmul.f32 %v5477_v15, %v5403_v2 }
 0x12e   :  { %v657_v12 = vunpack.c.h.b16 %v504_v48  ;;  %v840_v11 = vmul.f32 %v5359_v35, %v5417_v9  ;;  %v656_v22 = vunpack.c.l.b16 %v504_v48  ;;  %v796_v6 = vmul.f32 %v5482_v62, %v5403_v2 }
 0x12f   :  { %v800_v41 = vmul.f32 %v5345_v18, %v5417_v9  ;;  %v929_v59 = vpack.c.b16 %v924_v53, %v919_v32  ;;  %v795_v13 = vmul.f32 %v5345_v18, %v5412_v27  ;;  %v867_v53 = vsel %vm866_vm9, %v5363_v37, %v5361_v36 }
 0x130   :  { %v848_v55 = vpack.c.bf16 %v841_v52, %v840_v11  ;;  %v923_v52 = vunpack.c.l.b16 %v768_v56  ;;  %v307_v11 = vpop.permute.xlu0 %306 }
 0x131   :  { %633 = vrot.lane.b32.xlu1 %v627_v45, %s5084_s22  ;;  %631 = vrot.lane.b32.xlu0 %v626_v47, %s5084_s22  ;;  %v667_v45 = vpack.c.b16 %v662_v57, %v657_v12  ;;  %v835_v47 = vmul.f32 %v5359_v35, %v5412_v27  ;;  %v808_v15 = vpack.c.bf16 %v801_v3, %v800_v41  ;;  %v918_v41 = vunpack.c.l.b16 %v765_v49 }
 0x132   :  { %593 = vrot.lane.b32.xlu2 %v587_v46, %s5082_s21  ;;  %v666_v46 = vpack.c.b16 %v661_v26, %v656_v22  ;;  %v805_v57 = vpack.c.bf16 %v796_v6, %v795_v13  ;;  %v993_v32 = vunpack.c.l.b16 %v848_v55  ;;  %v881_v26 = vmul.f32 %v867_v53, %v5427_v1 }
 0x133   :  { %v845_v48 = vpack.c.bf16 %v836_v33, %v835_v47  ;;  %v958_v12 = vunpack.c.l.b16 %v808_v15  ;;  %v876_v3 = vmul.f32 %v867_v53, %v5403_v2  ;;  %v880_v33 = vmul.f32 %v5363_v37, %v5417_v9  ;;  %v305_v47 = vpop.permute.xlu2 %304 }
 0x134   :  { %v928_v13 = vpack.c.b16 %v923_v52, %v918_v41  ;;  %v5515_v56 = vsel %vm308_vm4, %v305_v47, %v307_v11  ;;  %v369_v49 = vsel %vm366_vm2, %v5279_v23, %v5288_v28  ;;  %v5534_v52 = vsel %vm308_vm4, %v5423_v61, %v305_v47 }
 0x135   :  { %v988_v22 = vunpack.c.l.b16 %v845_v48  ;;  %v888_v6 = vpack.c.bf16 %v881_v26, %v880_v33  ;;  %v707_v26 = vsel %vm706_vm10, %v5337_v14, %v5317_v58  ;;  %v994_v41 = vunpack.c.h.b16 %v848_v55 }
 0x136   :  { %v721_v33 = vmul.f32 %v707_v26, %v5427_v1  ;;  %v954_v61 = vunpack.c.h.b16 %v805_v57  ;;  %v989_v47 = vunpack.c.h.b16 %v845_v48  ;;  %v715_v55 = vmul.f32 %v5337_v14, %v5412_v27 }
 0x137   :  { %v409_v48 = vsel %vm406_vm3, %v5299_v38, %v5273_v19 }
 0x139   :  { %935 = vrot.lane.b32.xlu1 %v929_v59, %s5083_s1  ;;  %673 = vrot.lane.b32.xlu0 %v667_v45, %s5085_s23  ;;  %v953_v59 = vunpack.c.l.b16 %v805_v57  ;;  %v875_v45 = vmul.f32 %v5363_v37, %v5412_v27  ;;  %v5525_v37 = vsel %vm308_vm4, %v5397_v60, %v5399_v0  ;;  %v383_v60 = vmul.f32 %v369_v49, %v5515_v56 }
 0x13a   :  { %671 = vrot.lane.b32.xlu2 %v666_v46, %s5085_s23  ;;  %v998_v46 = vpack.c.b16 %v993_v32, %v988_v22  ;;  %v5530_v32 = vsel %vm308_vm4, %v5399_v0, %v5455_v39  ;;  %v368_v22 = vsel %vm366_vm2, %v5258_v5, %v5279_v23  ;;  %v999_v23 = vpack.c.b16 %v994_v41, %v989_v47 }
 0x13b   :  { %v963_v62 = vpack.c.b16 %v958_v12, %v953_v59  ;;  %v885_v53 = vpack.c.bf16 %v876_v3, %v875_v45  ;;  %v1029_v12 = vunpack.c.h.b16 %v888_v6  ;;  %v959_v3 = vunpack.c.h.b16 %v808_v15 }
 0x13c   :  { %v377_v59 = vmul.f32 %v368_v22, %v5525_v37  ;;  %v382_v45 = vmul.f32 %v368_v22, %v5534_v52  ;;  %v716_v15 = vmul.f32 %v707_v26, %v5403_v2  ;;  %v5569_v47 = vsel %vm308_vm4, %v307_v11, 0.0 }
 0x13d   :  { %v1024_v0 = vunpack.c.h.b16 %v885_v53  ;;  %v964_v18 = vpack.c.b16 %v959_v3, %v954_v61  ;;  %v1023_v22 = vunpack.c.l.b16 %v885_v53  ;;  %v384_v11 = vmul.f32 %v5288_v28, %v5569_v47 }
 0x13e   :  { %v389_v5 = vpack.c.bf16 %v383_v60, %v382_v45  ;;  %v725_v26 = vpack.c.bf16 %v716_v15, %v715_v55  ;;  %v423_v60 = vmul.f32 %v409_v48, %v5515_v56  ;;  %v424_v55 = vmul.f32 %v5273_v19, %v5569_v47 }
 0x13f   :  { %vm561_vm2 = vcmask 1039360  }
 0x140   :  { %v543_v3 = vunpack.c.l.b16 %v389_v5 }
 0x141   :  { %1003 = vrot.lane.b32.xlu1 %v998_v46, %s5084_s22  ;;  %933 = vrot.lane.b32.xlu0 %v928_v13, %s5083_s1  ;;  %v720_v46 = vmul.f32 %v5337_v14, %v5417_v9  ;;  %v1034_v13 = vpack.c.b16 %v1029_v12, %v1024_v0  ;;  %v1028_v12 = vunpack.c.l.b16 %v888_v6  ;;  %v408_v14 = vsel %vm406_vm3, %v5290_v29, %v5299_v38 }
 0x142   :  { %968 = vrot.lane.b32.xlu2 %v963_v62, %s5082_s21  ;;  %v378_v62 = vmul.f32 %v369_v49, %v5530_v32  ;;  %v422_v61 = vmul.f32 %v408_v14, %v5534_v52  ;;  %v5573_v29 = vsel %vm308_vm4, %v5455_v39, 0.0  ;;  %v544_v39 = vunpack.c.h.b16 %v389_v5 }
 0x143   :  { %v728_v57 = vpack.c.bf16 %v721_v33, %v720_v46  ;;  %v418_v33 = vmul.f32 %v409_v48, %v5530_v32  ;;  %v898_v48 = vunpack.c.h.b16 %v725_v26  ;;  %vm681_vm3 = vcmask 1014784  }
 0x144   :  { %v386_v49 = vpack.c.bf16 %v378_v62, %v377_v59  ;;  %v897_v59 = vunpack.c.l.b16 %v725_v26  ;;  %v1033_v62 = vpack.c.b16 %v1028_v12, %v1023_v22  ;;  %v5566_v6 = vpack.c.bf16 %v423_v60, %v422_v61 }
 0x145   :  { %v902_v0 = vunpack.c.l.b16 %v728_v57  ;;  %v903_v53 = vunpack.c.h.b16 %v728_v57  ;;  %v459_v57 = vmul.f32 %v5310_v51, %v5573_v29  ;;  %v419_v60 = vmul.f32 %v5273_v19, %v5573_v29 }
 0x146   :  { %v538_v41 = vunpack.c.l.b16 %v386_v49  ;;  %v584_v46 = vunpack.c.h.b16 %v5566_v6  ;;  %v488_v19 = vsel %vm111_vm1, %v5322_v63, %v5329_v7  ;;  %v449_v61 = vsel %vm446_vm5, %v5292_v30, %v5310_v51 }
 0x147   :  { %v907_v15 = vpack.c.b16 %v902_v0, %v897_v59  ;;  %v390_v0 = vpack.c.bf16 %v384_v11, %v384_v11  ;;  %v467_v26 = vpack.c.bf16 %v459_v57, %v459_v57 }
 0x148   :  { %v548_v45 = vpack.c.b16 %v543_v3, %v538_v41  ;;  %v539_v3 = vunpack.c.h.b16 %v386_v49  ;;  %v427_v49 = vpack.c.bf16 %v419_v60, %v419_v60 }
 0x149   :  { %1040 = vrot.lane.b32.xlu1 %v1034_v13, %s5085_s23  ;;  %970 = vrot.lane.b32.xlu0 %v964_v18, %s5082_s21  ;;  %v417_v18 = vmul.f32 %v408_v14, %v5525_v37  ;;  %v464_v13 = vmul.f32 %v5310_v51, %v5569_v47  ;;  %v908_v14 = vpack.c.b16 %v903_v53, %v898_v48  ;;  %v545_v59 = vunpack.c.l.b16 %v390_v0 }
 0x14a   :  { %1005 = vrot.lane.b32.xlu2 %v999_v23, %s5084_s22  ;;  %v379_v23 = vmul.f32 %v5288_v28, %v5573_v29  ;;  %v549_v41 = vpack.c.b16 %v544_v39, %v539_v3  ;;  %v430_v28 = vpack.c.bf16 %v424_v55, %v424_v55  ;;  %v620_v11 = vunpack.c.l.b16 %v467_v26 }
 0x14b   :  { %v5577_v38 = vpack.c.bf16 %v418_v33, %v417_v18  ;;  %v470_v5 = vpack.c.bf16 %v464_v13, %v464_v13  ;;  %v448_v33 = vsel %vm446_vm5, %v5308_v50, %v5292_v30  ;;  %v497_v39 = vmul.f32 %v488_v19, %v5530_v32 }
 0x14c   :  { %v387_v18 = vpack.c.bf16 %v379_v23, %v379_v23  ;;  %v585_v53 = vunpack.c.l.b16 %v430_v28  ;;  %v580_v30 = vunpack.c.l.b16 %v427_v49  ;;  %v457_v51 = vmul.f32 %v448_v33, %v5525_v37 }
 0x14d   :  { %v579_v12 = vunpack.c.h.b16 %v5577_v38  ;;  %v458_v55 = vmul.f32 %v449_v61, %v5530_v32  ;;  %v462_v48 = vmul.f32 %v448_v33, %v5534_v52  ;;  %v578_v28 = vunpack.c.l.b16 %v5577_v38 }
 0x14e   :  { %v540_v50 = vunpack.c.l.b16 %v387_v18  ;;  %v590_v57 = vpack.c.b16 %v585_v53, %v580_v30  ;;  %v759_v18 = vmul.f32 %v5341_v17, %v5573_v29  ;;  %v5636_v38 = vsel %vm746_vm6, %v5349_v21, %v5341_v17 }
 0x14f   :  { %v589_v22 = vpack.c.b16 %v584_v46, %v579_v12  ;;  %v463_v46 = vmul.f32 %v449_v61, %v5515_v56  ;;  %8372 = vst [vmem:[#allocation40_spill] sm:$0xff] %v5636_v38  ;;  %v503_v53 = vmul.f32 %v5329_v7, %v5569_v47  ;;  %vm641_vm5 = vcmask 1022976  }
 0x150   :  { %v550_v12 = vpack.c.b16 %v545_v59, %v540_v50 }
 0x151   :  { %1038 = vrot.lane.b32.xlu0 %v1033_v62, %s5085_s23  ;;  %555 = vrot.lane.b32.xlu1 %v548_v45, %s5083_s1  ;;  %v625_v62 = vunpack.c.l.b16 %v470_v5  ;;  %v502_v45 = vmul.f32 %v488_v19, %v5515_v56  ;;  %v469_v3 = vpack.c.bf16 %v463_v46, %v462_v48  ;;  %v764_v5 = vmul.f32 %v5341_v17, %v5569_v47 }
 0x152   :  { %1054 = vrot.lane.b32.xlu2 %v907_v15, %s5086_s24  ;;  %v487_v15 = vsel %vm111_vm1, %v5305_v42, %v5322_v63 }
 0x153   :  { %v496_v13 = vmul.f32 %v487_v15, %v5525_v37  ;;  %v501_v23 = vmul.f32 %v487_v15, %v5534_v52  ;;  %v630_v42 = vpack.c.b16 %v625_v62, %v620_v11  ;;  %v770_v61 = vpack.c.bf16 %v764_v5, %v764_v5 }
 0x154   :  { %v767_v62 = vpack.c.bf16 %v759_v18, %v759_v18  ;;  %v5646_v15 = vsel %vm786_vm8, %v5347_v20, %v5351_v24  ;;  %v624_v50 = vunpack.c.h.b16 %v469_v3  ;;  %v5675_v5 = vsel %vm826_vm7, %v5357_v34, %v5365_v40 }
 0x155   :  { %v508_v63 = vpack.c.bf16 %v502_v45, %v501_v23  ;;  %v505_v60 = vpack.c.bf16 %v497_v39, %v496_v13  ;;  %v5641_v45 = vsel %vm786_vm8, %v5355_v31, %v5347_v20  ;;  %8374 = vst [vmem:[#allocation42_spill] sm:$0xff] %v5646_v15  ;;  %v498_v31 = vmul.f32 %v5329_v7, %v5573_v29 }
 0x156   :  { %8373 = vst [vmem:[#allocation41_spill] sm:$0xff] %v5641_v45  ;;  %v922_v11 = vunpack.c.l.b16 %v767_v62  ;;  %v763_v13 = vmul.f32 %v5636_v38, %v5515_v56  ;;  %v797_v39 = vmul.f32 %v5641_v45, %v5525_v37  ;;  %v798_v23 = vmul.f32 %v5646_v15, %v5530_v32 }
 0x157   :  { %v663_v0 = vunpack.c.l.b16 %v508_v63  ;;  %v658_v26 = vunpack.c.l.b16 %v505_v60  ;;  %v664_v46 = vunpack.c.h.b16 %v508_v63  ;;  %v802_v30 = vmul.f32 %v5641_v45, %v5534_v52  ;;  %8375 = vst [vmem:[#allocation43_spill] sm:$0xff] %v5675_v5 }
 0x158   :  { %v758_v7 = vmul.f32 %v5636_v38, %v5530_v32  ;;  %v509_v63 = vpack.c.bf16 %v503_v53, %v503_v53  ;;  %vm1668_vm8 = vcmask 785408  }
 0x159   :  { %1056 = vrot.lane.b32.xlu0 %v908_v14, %s5086_s24  ;;  %597 = vrot.lane.b32.xlu1 %v589_v22, %s5082_s21  ;;  %v466_v14 = vpack.c.bf16 %v458_v55, %v457_v51  ;;  %v583_v22 = vunpack.c.l.b16 %v5566_v6  ;;  %v668_v49 = vpack.c.b16 %v663_v0, %v658_v26  ;;  %v5631_v6 = vsel %vm746_vm6, %v5339_v16, %v5349_v21 }
 0x15a   :  { %557 = vrot.lane.b32.xlu2 %v549_v41, %s5083_s1  ;;  %v623_v41 = vunpack.c.l.b16 %v469_v3  ;;  %8371 = vst [vmem:[#allocation39_spill] sm:$0xff] %v5631_v6  ;;  %v927_v16 = vunpack.c.l.b16 %v770_v61  ;;  %v803_v21 = vmul.f32 %v5646_v15, %v5515_v56  ;;  %v659_v51 = vunpack.c.h.b16 %v505_v60 }
 0x15b   :  { %v618_v33 = vunpack.c.l.b16 %v466_v14  ;;  %v588_v19 = vpack.c.b16 %v583_v22, %v578_v28  ;;  %v619_v20 = vunpack.c.h.b16 %v466_v14  ;;  %v757_v55 = vmul.f32 %v5631_v6, %v5525_v37 }
 0x15c   :  { %v762_v48 = vmul.f32 %v5631_v6, %v5534_v52  ;;  %v669_v3 = vpack.c.b16 %v664_v46, %v659_v51  ;;  %v506_v14 = vpack.c.bf16 %v498_v31, %v498_v31  ;;  %v806_v60 = vpack.c.bf16 %v798_v23, %v797_v39 }
 0x15d   :  { %v628_v59 = vpack.c.b16 %v623_v41, %v618_v33  ;;  %v766_v0 = vpack.c.bf16 %v758_v7, %v757_v55  ;;  %v665_v41 = vunpack.c.l.b16 %v509_v63  ;;  %v843_v28 = vmul.f32 %v5675_v5, %v5515_v56 }
 0x15e   :  { %v769_v22 = vpack.c.bf16 %v763_v13, %v762_v48  ;;  %v5682_v26 = vsel %vm826_vm7, %v5353_v25, %v5357_v34  ;;  %v660_v33 = vunpack.c.l.b16 %v506_v14  ;;  %v804_v31 = vmul.f32 %v5351_v24, %v5569_v47 }
 0x15f   :  { %8376 = vst [vmem:[#allocation44_spill] sm:$0xff] %v5682_v26  ;;  %v837_v61 = vmul.f32 %v5682_v26, %v5525_v37  ;;  %v842_v62 = vmul.f32 %v5682_v26, %v5534_v52  ;;  %v884_v13 = vmul.f32 %v5369_v43, %v5569_v47  ;;  %v799_v39 = vmul.f32 %v5351_v24, %v5573_v29 }
 0x160   :  { %v926_v34 = vunpack.c.h.b16 %v769_v22  ;;  %v844_v23 = vmul.f32 %v5365_v40, %v5569_v47  ;;  %v879_v55 = vmul.f32 %v5369_v43, %v5573_v29  ;;  %v956_v7 = vunpack.c.h.b16 %v806_v60 }
 0x161   :  { %559 = vrot.lane.b32.xlu0 %v550_v12, %s5083_s1  ;;  %639 = vrot.lane.b32.xlu1 %v630_v42, %s5084_s22  ;;  %v629_v12 = vpack.c.b16 %v624_v50, %v619_v20  ;;  %v932_v42 = vpack.c.b16 %v927_v16, %v922_v11  ;;  %v920_v50 = vunpack.c.l.b16 %v766_v0  ;;  %v670_v16 = vpack.c.b16 %v665_v41, %v660_v33 }
 0x162   :  { %599 = vrot.lane.b32.xlu2 %v590_v57, %s5082_s21  ;;  %v809_v57 = vpack.c.bf16 %v803_v21, %v802_v30  ;;  %v5690_v21 = vpack.c.bf16 %v843_v28, %v842_v62  ;;  %v921_v30 = vunpack.c.h.b16 %v766_v0  ;;  %v839_v48 = vmul.f32 %v5365_v40, %v5573_v29 }
 0x163   :  { %v810_v63 = vpack.c.bf16 %v804_v31, %v804_v31  ;;  %v807_v14 = vpack.c.bf16 %v799_v39, %v799_v39  ;;  %v887_v0 = vpack.c.bf16 %v879_v55, %v879_v55  ;;  %v708_v41 = vsel %vm706_vm10, %v5317_v58, %v5331_v10 }
 0x164   :  { %v960_v18 = vunpack.c.l.b16 %v809_v57  ;;  %v996_v11 = vunpack.c.h.b16 %v5690_v21  ;;  %v961_v20 = vunpack.c.h.b16 %v809_v57  ;;  %v890_v57 = vpack.c.bf16 %v884_v13, %v884_v13 }
 0x165   :  { %v869_v28 = vsel %vm866_vm9, %v5371_v44, %v5369_v43  ;;  %v962_v33 = vunpack.c.l.b16 %v810_v63  ;;  %v722_v43 = vmul.f32 %v708_v41, %v5534_v52  ;;  %vm1104_vm6 = vcmask 916480  }
 0x166   :  { %vm1145_vm7 = vcmask 654336  }
 0x169   :  { %595 = vrot.lane.b32.xlu0 %v588_v19, %s5082_s21  ;;  %675 = vrot.lane.b32.xlu1 %v668_v49, %s5085_s23  ;;  %v925_v19 = vunpack.c.l.b16 %v769_v22  ;;  %v955_v49 = vunpack.c.l.b16 %v806_v60  ;;  %v850_v22 = vpack.c.bf16 %v844_v23, %v844_v23  ;;  %v709_v60 = vsel %vm706_vm10, %v5331_v10, %v5343_v8 }
 0x16a   :  { %635 = vrot.lane.b32.xlu2 %v628_v59, %s5084_s22  ;;  %v838_v59 = vmul.f32 %v5675_v5, %v5530_v32  ;;  %v883_v10 = vmul.f32 %v869_v28, %v5515_v56  ;;  %vm1863_vm10 = vcmask 408576  }
 0x16b   :  { %v965_v53 = vpack.c.b16 %v960_v18, %v955_v49  ;;  %v930_v46 = vpack.c.b16 %v925_v19, %v920_v50  ;;  %v847_v18 = vpack.c.bf16 %v839_v48, %v839_v48  ;;  %v1032_v19 = vunpack.c.l.b16 %v890_v57 }
 0x16c   :  { %v5694_v25 = vpack.c.bf16 %v838_v59, %v837_v61  ;;  %v723_v49 = vmul.f32 %v709_v60, %v5515_v56  ;;  %v868_v61 = vsel %vm866_vm9, %v5361_v36, %v5371_v44  ;;  %v957_v59 = vunpack.c.l.b16 %v807_v14 }
 0x16d   :  { %v997_v62 = vunpack.c.l.b16 %v850_v22  ;;  %v1027_v50 = vunpack.c.l.b16 %v887_v0  ;;  %v882_v36 = vmul.f32 %v868_v61, %v5534_v52  ;;  %v5746_v22 = vld [vmem:[#allocation2 + $0x26] ss:$8 sm:$0xf]  ;;  %vm1823_vm9 = vcmask 400384  }
 0x16e   :  { %v991_v51 = vunpack.c.h.b16 %v5694_v25  ;;  %v967_v44 = vpack.c.b16 %v962_v33, %v957_v59  ;;  %v729_v13 = vpack.c.bf16 %v723_v49, %v722_v43  ;;  %v990_v48 = vunpack.c.l.b16 %v5694_v25  ;;  %v8383_v43 = vld [vmem:[#allocation28_spill] sm:$0xff] }
 0x16f   :  { %v1037_v31 = vpack.c.b16 %v1032_v19, %v1027_v50  ;;  %v889_v39 = vpack.c.bf16 %v883_v10, %v882_v36  ;;  %v724_v25 = vmul.f32 %v5343_v8, %v5569_v47 }
 0x170   :  { %v904_v55 = vunpack.c.l.b16 %v729_v13 }
 0x171   :  { %637 = vrot.lane.b32.xlu0 %v629_v12, %s5084_s22  ;;  %941 = vrot.lane.b32.xlu1 %v932_v42, %s5083_s1  ;;  %v931_v12 = vpack.c.b16 %v926_v34, %v921_v30  ;;  %v1001_v42 = vpack.c.b16 %v996_v11, %v991_v51  ;;  %v877_v34 = vmul.f32 %v868_v61, %v5525_v37  ;;  %v995_v51 = vunpack.c.l.b16 %v5690_v21  ;;  %v5748_v21 = vpop.permute.xlu1 %1384 }
 0x172   :  { %677 = vrot.lane.b32.xlu2 %v669_v3, %s5085_s23  ;;  %v966_v3 = vpack.c.b16 %v961_v20, %v956_v7  ;;  %v878_v11 = vmul.f32 %v869_v28, %v5530_v32  ;;  %v1030_v7 = vunpack.c.l.b16 %v889_v39  ;;  %v1031_v0 = vunpack.c.h.b16 %v889_v39 }
 0x173   :  { %v1000_v57 = vpack.c.b16 %v995_v51, %v990_v48  ;;  %v1418_v28 = vperm.slane %v5746_v22, 0  ;;  %v730_v49 = vpack.c.bf16 %v724_v25, %v724_v25 }
 0x174   :  { %v886_v30 = vpack.c.bf16 %v878_v11, %v877_v34 }
 0x176   :  { %v1025_v63 = vunpack.c.l.b16 %v886_v30 }
 0x178   :  { %v1035_v14 = vpack.c.b16 %v1030_v7, %v1025_v63 }
 0x179   :  { %679 = vrot.lane.b32.xlu0 %v670_v16, %s5085_s23  ;;  %972 = vrot.lane.b32.xlu1 %v965_v53, %s5082_s21  ;;  %v717_v16 = vmul.f32 %v708_v41, %v5525_v37  ;;  %v718_v53 = vmul.f32 %v709_v60, %v5530_v32  ;;  %v905_v41 = vunpack.c.h.b16 %v729_v13  ;;  %v719_v60 = vmul.f32 %v5343_v8, %v5573_v29  ;;  %v8379_v8 = vld [vmem:[#allocation27_spill] sm:$0xff] }
 0x17a   :  { %937 = vrot.lane.b32.xlu2 %v930_v46, %s5083_s1  ;;  %v992_v46 = vunpack.c.l.b16 %v847_v18  ;;  %v1026_v18 = vunpack.c.h.b16 %v886_v30  ;;  %v5762_v10 = vsel %vm1311_vm11, %v8379_v8, %v5387_v54  ;;  %v5776_v36 = vsel %vm1311_vm11, %v8383_v43, %v8379_v8 }
 0x17b   :  { %v726_v23 = vpack.c.bf16 %v718_v53, %v717_v16  ;;  %8380 = vst [vmem:[#allocation27_spill] sm:$0xff] %v5762_v10  ;;  %v906_v53 = vunpack.c.l.b16 %v730_v49  ;;  %v1328_v11 = vmul.f32 %v5762_v10, %v5515_v56  ;;  %v1421_v13 = vperm.slane %v5746_v22, 3  ;;  %v5013_v49 = vld [vmem:[#allocation2 + $0x25] ss:$8 sm:$0xf] }
 0x17c   :  { %v1002_v20 = vpack.c.b16 %v997_v62, %v992_v46  ;;  %v1036_v19 = vpack.c.b16 %v1031_v0, %v1026_v18  ;;  %v727_v62 = vpack.c.bf16 %v719_v60, %v719_v60  ;;  %v8384_v46 = vld [vmem:[#allocation29_spill] sm:$0xff]  ;;  %8386 = vst [vmem:[#allocation49_spill] sm:$0xff] %v5776_v36  ;;  %v1323_v39 = vmul.f32 %v5762_v10, %v5530_v32 }
 0x17d   :  { %v900_v33 = vunpack.c.h.b16 %v726_v23  ;;  %v5770_v34 = vsel %vm1311_vm11, %v8384_v46, %v8383_v43  ;;  %v1419_v30 = vperm.slane %v5746_v22, 1  ;;  %vm1903_vm11 = vcmask 416768  }
 0x17e   :  { %8385 = vst [vmem:[#allocation28_spill] sm:$0xff] %v5770_v34  ;;  %v1321_v51 = vmul.f32 %v5770_v34, %v5403_v2 }
 0x17f   :  { %v910_v59 = vpack.c.b16 %v905_v41, %v900_v33 }
 0x181   :  { %939 = vrot.lane.b32.xlu0 %v931_v12, %s5083_s1  ;;  %1009 = vrot.lane.b32.xlu1 %v1001_v42, %s5084_s22  ;;  %v899_v12 = vunpack.c.l.b16 %v726_v23  ;;  %v1327_v23 = vmul.f32 %v5776_v36, %v5534_v52 }
 0x182   :  { %974 = vrot.lane.b32.xlu2 %v966_v3, %s5082_s21 }
 0x183   :  { %v909_v3 = vpack.c.b16 %v904_v55, %v899_v12  ;;  %v1325_v55 = vmul.f32 %v8384_v46, %v5417_v9  ;;  %v1334_v48 = vpack.c.bf16 %v1328_v11, %v1327_v23  ;;  %v1320_v12 = vmul.f32 %v8384_v46, %v5412_v27  ;;  %v8393_v23 = vld [vmem:[#allocation34_spill] sm:$0xff] }
 0x184   :  { %v5727_v58 = vpop.permute.xlu2 %551 }
 0x185   :  { %8377 = vst [vmem:[#allocation45_spill] sm:$0xff] %v5727_v58  ;;  %v1330_v41 = vpack.c.bf16 %v1321_v51, %v1320_v12 }
 0x187   :  { %v1482_v43 = vunpack.c.l.b16 %v1330_v41 }
 0x189   :  { %976 = vrot.lane.b32.xlu0 %v967_v44, %s5082_s21  ;;  %1046 = vrot.lane.b32.xlu1 %v1037_v31, %s5085_s23  ;;  %v901_v44 = vunpack.c.l.b16 %v727_v62  ;;  %v1326_v31 = vmul.f32 %v5770_v34, %v5427_v1 }
 0x18a   :  { %1011 = vrot.lane.b32.xlu2 %v1002_v20, %s5084_s22  ;;  %v1322_v20 = vmul.f32 %v5776_v36, %v5525_v37 }
 0x18b   :  { %v911_v7 = vpack.c.b16 %v906_v53, %v901_v44  ;;  %v5794_v63 = vpack.c.bf16 %v1326_v31, %v1325_v55 }
 0x18c   :  { %v5741_v42 = vpop.permute.xlu2 %593 }
 0x18d   :  { %8378 = vst [vmem:[#allocation46_spill] sm:$0xff] %v5741_v42 }
 0x191   :  { %1007 = vrot.lane.b32.xlu0 %v1000_v57, %s5084_s22  ;;  %1058 = vrot.lane.b32.xlu1 %v909_v3, %s5086_s24  ;;  %v1331_v57 = vpack.c.bf16 %v1323_v39, %v1322_v20  ;;  %v8387_v3 = vld [vmem:[#allocation30_spill] sm:$0xff]  ;;  %v8392_v39 = vld [vmem:[#allocation35_spill] sm:$0xff] }
 0x192   :  { %1042 = vrot.lane.b32.xlu2 %v1035_v14, %s5085_s23  ;;  %v8388_v14 = vld [vmem:[#allocation32_spill] sm:$0xff]  ;;  %v5830_v51 = vsel %vm308_vm4, %v8387_v3, %v8393_v23 }
 0x193   :  { %v5801_v0 = vsel %vm308_vm4, %v8388_v14, %v8387_v3  ;;  %v1484_v62 = vunpack.c.l.b16 %v1331_v57  ;;  %v1364_v53 = vmul.f32 %v8388_v14, %v5417_v9  ;;  %v1359_v44 = vmul.f32 %v8388_v14, %v5412_v27  ;;  %8395 = vst [vmem:[#allocation52_spill] sm:$0xff] %v5830_v51 }
 0x194   :  { %v5755_v61 = vpop.permute.xlu2 %671  ;;  %8389 = vst [vmem:[#allocation30_spill] sm:$0xff] %v5801_v0  ;;  %v1365_v33 = vmul.f32 %v5801_v0, %v5427_v1  ;;  %v1360_v8 = vmul.f32 %v5801_v0, %v5403_v2  ;;  %v5951_v0 = vsel %vm1390_vm12, %v5748_v21, %v5488_v4 }
 0x195   :  { %8413 = vst [vmem:[#allocation69_spill] sm:$0xff] %v5951_v0 }
 0x196   :  { %v1372_v31 = vpack.c.bf16 %v1365_v33, %v1364_v53  ;;  %v1369_v20 = vpack.c.bf16 %v1360_v8, %v1359_v44  ;;  %v1366_v8 = vmul.f32 %v5830_v51, %v5534_v52  ;;  %v1485_v53 = vunpack.c.h.b16 %v1331_v57  ;;  %v8396_v44 = vld [vmem:[#allocation33_spill] sm:$0xff] }
 0x198   :  { %v1522_v12 = vunpack.c.l.b16 %v1372_v31  ;;  %v1518_v38 = vunpack.c.h.b16 %v1369_v20 }
 0x199   :  { %1044 = vrot.lane.b32.xlu0 %v1036_v19, %s5085_s23  ;;  %1422 = vrot.lane.b32.xlu1 %v1418_v28, %s5087_s25  ;;  %v1489_v28 = vunpack.c.l.b16 %v1334_v48  ;;  %v1487_v19 = vunpack.c.l.b16 %v5794_v63 }
 0x19a   :  { %1060 = vrot.lane.b32.xlu2 %v910_v59, %s5086_s24  ;;  %v1381_v59 = vperm.slane %v5013_v49, 3  ;;  %v1361_v49 = vmul.f32 %v5830_v51, %v5525_v37 }
 0x19b   :  { %v5764_v50 = vpop.permute.xlu1 %591  ;;  %v5766_v16 = vpop.permute.xlu0 %553  ;;  %v1494_v11 = vpack.c.b16 %v1489_v28, %v1484_v62  ;;  %v1517_v62 = vunpack.c.l.b16 %v1369_v20 }
 0x19c   :  { %8381 = vst [vmem:[#allocation47_spill] sm:$0xff] %v5764_v50  ;;  %v5803_v25 = vpop.permute.xlu2 %968 }
 0x19d   :  { %8382 = vst [vmem:[#allocation48_spill] sm:$0xff] %v5766_v16 }
 0x1a1   :  { %1062 = vrot.lane.b32.xlu0 %v911_v7, %s5086_s24  ;;  %1428 = vrot.lane.b32.xlu1 %v1421_v13, %s5087_s25  ;;  %v1492_v13 = vpack.c.b16 %v1487_v19, %v1482_v43  ;;  %v1490_v19 = vunpack.c.h.b16 %v1334_v48  ;;  %v1527_v43 = vpack.c.b16 %v1522_v12, %v1517_v62  ;;  %v1488_v12 = vunpack.c.h.b16 %v5794_v63 }
 0x1a2   :  { %1424 = vrot.lane.b32.xlu2 %v1419_v30, %s5087_s25  ;;  %v5824_v30 = vsel %vm308_vm4, %v8393_v23, %v8392_v39  ;;  %v1329_v23 = vmul.f32 %v5387_v54, %v5569_v47  ;;  %v1483_v62 = vunpack.c.h.b16 %v1330_v41  ;;  %v1404_v63 = vmul.f32 %v8396_v44, %v5417_v9 }
 0x1a3   :  { %v5806_v60 = vpop.permute.xlu1 %633  ;;  %v5808_v18 = vpop.permute.xlu0 %631  ;;  %8394 = vst [vmem:[#allocation34_spill] sm:$0xff] %v5824_v30  ;;  %v1367_v28 = vmul.f32 %v5824_v30, %v5515_v56  ;;  %v1362_v3 = vmul.f32 %v5824_v30, %v5530_v32  ;;  %v1495_v48 = vpack.c.b16 %v1490_v19, %v1485_v53  ;;  %v1324_v53 = vmul.f32 %v5387_v54, %v5573_v29 }
 0x1a4   :  { %8390 = vst [vmem:[#allocation50_spill] sm:$0xff] %v5806_v60  ;;  %v5838_v33 = vpop.permute.xlu2 %1005  ;;  %v1335_v6 = vpack.c.bf16 %v1329_v23, %v1329_v23  ;;  %v1363_v41 = vmul.f32 %v8392_v39, %v5573_v29  ;;  %v1401_v30 = vmul.f32 %v5951_v0, %v5525_v37  ;;  %v8416_v60 = vld [vmem:[#allocation26_spill] sm:$0xff] }
 0x1a5   :  { %8391 = vst [vmem:[#allocation51_spill] sm:$0xff] %v5808_v18  ;;  %v1332_v54 = vpack.c.bf16 %v1324_v53, %v1324_v53 }
 0x1a6   :  { %v1371_v35 = vpack.c.bf16 %v1363_v41, %v1363_v41  ;;  %v1491_v23 = vunpack.c.l.b16 %v1335_v6 }
 0x1a9   :  { %1388 = vrot.lane.b32.xlu0 %v1381_v59, %s5081_s20  ;;  %1501 = vrot.lane.b32.xlu1 %v1494_v11, %s5083_s1  ;;  %v1420_v59 = vperm.slane %v5746_v22, 2  ;;  %v1373_v11 = vpack.c.bf16 %v1367_v28, %v1366_v8  ;;  %v1370_v22 = vpack.c.bf16 %v1362_v3, %v1361_v49  ;;  %v1523_v49 = vunpack.c.h.b16 %v1372_v31  ;;  %s5096_s20 = smov 65  }
 0x1aa   :  { %1497 = vrot.lane.b32.xlu2 %v1492_v13, %s5083_s1  ;;  %v5850_v13 = vsel %vm1390_vm12, %v8396_v44, %v5748_v21  ;;  %v1368_v3 = vmul.f32 %v8392_v39, %v5569_v47  ;;  %v1493_v31 = vpack.c.b16 %v1488_v12, %v1483_v62 }
 0x1ab   :  { %v5832_v55 = vpop.permute.xlu1 %935  ;;  %v5834_v7 = vpop.permute.xlu0 %673  ;;  %8397 = vst [vmem:[#allocation53_spill] sm:$0xff] %v5850_v13  ;;  %v1525_v28 = vunpack.c.h.b16 %v1373_v11  ;;  %v1400_v19 = vmul.f32 %v5850_v13, %v5403_v2  ;;  %v1520_v8 = vunpack.c.h.b16 %v1370_v22  ;;  %v1528_v36 = vpack.c.b16 %v1523_v49, %v1518_v38 }
 0x1ac   :  { %v1374_v24 = vpack.c.bf16 %v1368_v3, %v1368_v3  ;;  %v1524_v6 = vunpack.c.l.b16 %v1373_v11 }
 0x1ad   :  { %v1530_v34 = vpack.c.b16 %v1525_v28, %v1520_v8  ;;  %v1519_v8 = vunpack.c.l.b16 %v1370_v22 }
 0x1ae   :  { %v1526_v28 = vunpack.c.l.b16 %v1374_v24 }
 0x1af   :  { %v1529_v24 = vpack.c.b16 %v1524_v6, %v1519_v8 }
 0x1b1   :  { %1426 = vrot.lane.b32.xlu0 %v1420_v59, %s5087_s25  ;;  %1532 = vrot.lane.b32.xlu1 %v1527_v43, %s5082_s21  ;;  %v1405_v59 = vmul.f32 %v5850_v13, %v5427_v1  ;;  %v1399_v43 = vmul.f32 %v8396_v44, %v5412_v27  ;;  %s5097_s25 = smov 68  }
 0x1b2   :  { %1503 = vrot.lane.b32.xlu2 %v1495_v48, %s5083_s1  ;;  %v5874_v48 = vpop.permute.xlu2 %1054 }
 0x1b3   :  { %v5857_v17 = vpop.permute.xlu1 %1003  ;;  %v5859_v57 = vpop.permute.xlu0 %933  ;;  %v1409_v46 = vpack.c.bf16 %v1400_v19, %v1399_v43  ;;  %v1412_v10 = vpack.c.bf16 %v1405_v59, %v1404_v63  ;;  %v1486_v19 = vunpack.c.l.b16 %v1332_v54  ;;  %v1521_v59 = vunpack.c.l.b16 %v1371_v35 }
 0x1b5   :  { %v1553_v45 = vunpack.c.h.b16 %v1409_v46  ;;  %v1558_v12 = vunpack.c.h.b16 %v1412_v10  ;;  %v1496_v38 = vpack.c.b16 %v1491_v23, %v1486_v19  ;;  %v1531_v3 = vpack.c.b16 %v1526_v28, %v1521_v59 }
 0x1b6   :  { %v1552_v53 = vunpack.c.l.b16 %v1409_v46  ;;  %v1557_v43 = vunpack.c.l.b16 %v1412_v10 }
 0x1b7   :  { %v1563_v62 = vpack.c.b16 %v1558_v12, %v1553_v45 }
 0x1b8   :  { %v1562_v63 = vpack.c.b16 %v1557_v43, %v1552_v53 }
 0x1b9   :  { %1499 = vrot.lane.b32.xlu0 %v1493_v31, %s5083_s1  ;;  %1538 = vrot.lane.b32.xlu1 %v1530_v34, %s5082_s21 }
 0x1ba   :  { %1534 = vrot.lane.b32.xlu2 %v1528_v36, %s5082_s21  ;;  %v5885_v49 = vpop.permute.xlu2 %557 }
 0x1bb   :  { %v5881_v15 = vpop.permute.xlu1 %1040  ;;  %v5883_v20 = vpop.permute.xlu0 %970  ;;  %8398 = vst [vmem:[#allocation54_spill] sm:$0xff] %v5885_v49  ;;  %v1406_v49 = vmul.f32 %v5951_v0, %v5534_v52 }
 0x1c1   :  { %1505 = vrot.lane.b32.xlu0 %v1496_v38, %s5083_s1  ;;  %1569 = vrot.lane.b32.xlu1 %v1563_v62, %s5084_s22 }
 0x1c2   :  { %1540 = vrot.lane.b32.xlu2 %v1531_v3, %s5082_s21  ;;  %v5895_v35 = vpop.permute.xlu2 %599 }
 0x1c3   :  { %v5890_v34 = vpop.permute.xlu0 %1038  ;;  %v5892_v36 = vpop.permute.xlu1 %555  ;;  %8400 = vst [vmem:[#allocation56_spill] sm:$0xff] %v5895_v35 }
 0x1c4   :  { %8399 = vst [vmem:[#allocation55_spill] sm:$0xff] %v5892_v36 }
 0x1c9   :  { %1536 = vrot.lane.b32.xlu0 %v1529_v24, %s5082_s21 }
 0x1ca   :  { %v5906_v11 = vpop.permute.xlu2 %635 }
 0x1cb   :  { %v5897_v54 = vpop.permute.xlu0 %1056  ;;  %v5899_v45 = vpop.permute.xlu1 %597  ;;  %8404 = vst [vmem:[#allocation60_spill] sm:$0xff] %v5906_v11 }
 0x1cc   :  { %8401 = vst [vmem:[#allocation57_spill] sm:$0xff] %v5899_v45 }
 0x1d1   :  { %1567 = vrot.lane.b32.xlu0 %v1562_v63, %s5084_s22 }
 0x1d2   :  { %v5912_v12 = vpop.permute.xlu2 %677 }
 0x1d3   :  { %v5902_v41 = vpop.permute.xlu0 %559  ;;  %v5904_v31 = vpop.permute.xlu1 %639  ;;  %8407 = vst [vmem:[#allocation63_spill] sm:$0xff] %v5912_v12 }
 0x1d4   :  { %8402 = vst [vmem:[#allocation58_spill] sm:$0xff] %v5902_v41 }
 0x1d5   :  { %8403 = vst [vmem:[#allocation59_spill] sm:$0xff] %v5904_v31 }
 0x1da   :  { %v5918_v10 = vpop.permute.xlu2 %937 }
 0x1db   :  { %v5908_v22 = vpop.permute.xlu0 %595  ;;  %v5910_v23 = vpop.permute.xlu1 %675 }
 0x1dc   :  { %8405 = vst [vmem:[#allocation61_spill] sm:$0xff] %v5908_v22 }
 0x1dd   :  { %8406 = vst [vmem:[#allocation62_spill] sm:$0xff] %v5910_v23 }
 0x1e2   :  { %v5924_v38 = vpop.permute.xlu2 %974 }
 0x1e3   :  { %v5914_v28 = vpop.permute.xlu0 %637  ;;  %v5916_v19 = vpop.permute.xlu1 %941 }
 0x1e4   :  { %8408 = vst [vmem:[#allocation64_spill] sm:$0xff] %v5914_v28 }
 0x1ea   :  { %v5932_v8 = vpop.permute.xlu2 %1011 }
 0x1eb   :  { %v5920_v46 = vpop.permute.xlu0 %679  ;;  %v5922_v59 = vpop.permute.xlu1 %972 }
 0x1ec   :  { %8409 = vst [vmem:[#allocation65_spill] sm:$0xff] %v5920_v46 }
 0x1f2   :  { %v5938_v43 = vpop.permute.xlu2 %1042 }
 0x1f3   :  { %v5926_v62 = vpop.permute.xlu0 %939  ;;  %v5928_v3 = vpop.permute.xlu1 %1009 }
 0x1fa   :  { %v5944_v26 = vpop.permute.xlu2 %1060 }
 0x1fb   :  { %v5930_v6 = vpop.permute.xlu0 %976  ;;  %v5936_v53 = vpop.permute.xlu1 %1046  ;;  %8411 = vst [vmem:[#allocation67_spill] sm:$0xff] %v5944_v26 }
 0x202   :  { %v1425_v13 = vpop.permute.xlu2 %1424 }
 0x203   :  { %v5934_v24 = vpop.permute.xlu0 %1007  ;;  %v5942_v5 = vpop.permute.xlu1 %1058 }
 0x204   :  { %8410 = vst [vmem:[#allocation66_spill] sm:$0xff] %v5942_v5 }
 0x20b   :  { %v5940_v63 = vpop.permute.xlu0 %1044  ;;  %v1423_v14 = vpop.permute.xlu1 %1422 }
 0x20c   :  { %v1431_v44 = vsel %vm1430_vm13, %v1423_v14, %v1425_v13  ;;  %v1439_v35 = vmul.f32 %v1423_v14, %v5412_v27  ;;  %v1444_v45 = vmul.f32 %v1423_v14, %v5417_v9 }
 0x20d   :  { %v1440_v28 = vmul.f32 %v1431_v44, %v5403_v2  ;;  %v1445_v22 = vmul.f32 %v1431_v44, %v5427_v1  ;;  %v8417_v44 = vld [vmem:[#allocation23_spill] sm:$0xff] }
 0x20f   :  { %v1449_v16 = vpack.c.bf16 %v1440_v28, %v1439_v35  ;;  %v1452_v23 = vpack.c.bf16 %v1445_v22, %v1444_v45  ;;  %v1285_v22 = vmul.f32 %v8417_v44, %v5417_v9 }
 0x213   :  { %v5946_v40 = vpop.permute.xlu0 %1062  ;;  %v1429_v42 = vpop.permute.xlu1 %1428 }
 0x214   :  { %8412 = vst [vmem:[#allocation68_spill] sm:$0xff] %v5946_v40  ;;  %v1443_v35 = vmul.f32 %v1429_v42, %v5573_v29 }
 0x21b   :  { %v5954_v39 = vpop.permute.xlu0 %1388 }
 0x21c   :  { %8414 = vst [vmem:[#allocation70_spill] sm:$0xff] %v5954_v39  ;;  %v1403_v51 = vmul.f32 %v5954_v39, %v5573_v29  ;;  %v1408_v41 = vmul.f32 %v5954_v39, %v5569_v47  ;;  %v5965_v21 = vsel %vm1390_vm12, %v5488_v4, %v5954_v39  ;;  %vm1943_vm12 = vcmask 424960  }
 0x21d   :  { %8415 = vst [vmem:[#allocation71_spill] sm:$0xff] %v5965_v21  ;;  %v1402_v31 = vmul.f32 %v5965_v21, %v5530_v32  ;;  %v1407_v36 = vmul.f32 %v5965_v21, %v5515_v56 }
 0x21e   :  { %v1411_v46 = vpack.c.bf16 %v1403_v51, %v1403_v51  ;;  %v1414_v4 = vpack.c.bf16 %v1408_v41, %v1408_v41  ;;  %v1272_v51 = vsel %vm1271_vm14, %v8417_v44, %v8416_v60 }
 0x21f   :  { %v1410_v39 = vpack.c.bf16 %v1402_v31, %v1401_v30  ;;  %v1413_v40 = vpack.c.bf16 %v1407_v36, %v1406_v49  ;;  %v1587_v31 = vunpack.c.l.b16 %v1449_v16 }
 0x220   :  { %v1556_v0 = vunpack.c.l.b16 %v1411_v46  ;;  %v1561_v12 = vunpack.c.l.b16 %v1414_v4 }
 0x221   :  { %v1555_v26 = vunpack.c.h.b16 %v1410_v39  ;;  %v1560_v11 = vunpack.c.h.b16 %v1413_v40  ;;  %v1554_v14 = vunpack.c.l.b16 %v1410_v39  ;;  %v1559_v58 = vunpack.c.l.b16 %v1413_v40 }
 0x222   :  { %v1566_v50 = vpack.c.b16 %v1561_v12, %v1556_v0 }
 0x223   :  { %v1427_v21 = vpop.permute.xlu0 %1426  ;;  %v1565_v5 = vpack.c.b16 %v1560_v11, %v1555_v26  ;;  %v1564_v18 = vpack.c.b16 %v1559_v58, %v1554_v14  ;;  %v1588_v26 = vunpack.c.h.b16 %v1449_v16  ;;  %v1593_v58 = vunpack.c.h.b16 %v1452_v23 }
 0x224   :  { %v1432_v30 = vsel %vm1430_vm13, %v1425_v13, %v1427_v21  ;;  %v1433_v49 = vsel %vm1430_vm13, %v1427_v21, %v1429_v42  ;;  %1575 = vrot.lane.b32.xlu1 %v1566_v50, %s5084_s22  ;;  %v1286_v13 = vmul.f32 %v1272_v51, %v5427_v1  ;;  %v1448_v50 = vmul.f32 %v1429_v42, %v5569_v47 }
 0x225   :  { %v1441_v39 = vmul.f32 %v1432_v30, %v5525_v37  ;;  %v1442_v40 = vmul.f32 %v1433_v49, %v5530_v32  ;;  %v1446_v0 = vmul.f32 %v1432_v30, %v5534_v52  ;;  %v1447_v36 = vmul.f32 %v1433_v49, %v5515_v56  ;;  %1573 = vrot.lane.b32.xlu0 %v1565_v5, %s5084_s22 }
 0x226   :  { %1571 = vrot.lane.b32.xlu2 %v1564_v18, %s5084_s22  ;;  %v1592_v11 = vunpack.c.l.b16 %v1452_v23  ;;  %v1281_v5 = vmul.f32 %v1272_v51, %v5403_v2  ;;  %v1280_v18 = vmul.f32 %v8417_v44, %v5412_v27  ;;  %v1293_v46 = vpack.c.bf16 %v1286_v13, %v1285_v22  ;;  %v8419_v22 = vld [vmem:[#allocation25_spill] sm:$0xff] }
 0x227   :  { %v1450_v45 = vpack.c.bf16 %v1442_v40, %v1441_v39  ;;  %v1453_v41 = vpack.c.bf16 %v1447_v36, %v1446_v0  ;;  %v1451_v21 = vpack.c.bf16 %v1443_v35, %v1443_v35  ;;  %v1454_v4 = vpack.c.bf16 %v1448_v50, %v1448_v50 }
 0x228   :  { %v1598_v30 = vpack.c.b16 %v1593_v58, %v1588_v26  ;;  %v1597_v42 = vpack.c.b16 %v1592_v11, %v1587_v31  ;;  %v1290_v16 = vpack.c.bf16 %v1281_v5, %v1280_v18  ;;  %v1466_v23 = vunpack.c.l.b16 %v1293_v46  ;;  %v1498_v31 = vpop.permute.xlu2 %1497 }
 0x229   :  { %v1589_v12 = vunpack.c.l.b16 %v1450_v45  ;;  %v1594_v28 = vunpack.c.l.b16 %v1453_v41  ;;  %v1591_v49 = vunpack.c.l.b16 %v1451_v21  ;;  %v1596_v39 = vunpack.c.l.b16 %v1454_v4 }
 0x22a   :  { %v1590_v51 = vunpack.c.h.b16 %v1450_v45  ;;  %v1595_v40 = vunpack.c.h.b16 %v1453_v41  ;;  %v1461_v0 = vunpack.c.l.b16 %v1290_v16  ;;  %v1467_v26 = vunpack.c.h.b16 %v1293_v46 }
 0x22b   :  { %v1599_v14 = vpack.c.b16 %v1594_v28, %v1589_v12  ;;  %v1601_v36 = vpack.c.b16 %v1596_v39, %v1591_v49  ;;  %v1462_v58 = vunpack.c.h.b16 %v1290_v16  ;;  %v943_v35 = vsel %vm561_vm2, %v5859_v57, %v5832_v55  ;;  %v1500_v16 = vpop.permute.xlu0 %1499  ;;  %v1502_v49 = vpop.permute.xlu1 %1501 }
 0x22c   :  { %v1471_v44 = vpack.c.b16 %v1466_v23, %v1461_v0  ;;  %v1600_v13 = vpack.c.b16 %v1595_v40, %v1590_v51  ;;  %v978_v50 = vsel %vm601_vm15, %v5803_v25, %v5883_v20  ;;  %v1048_v41 = vsel %vm681_vm3, %v5890_v34, %v5881_v15 }
 0x22d   :  { %1606 = vrot.lane.b32.xlu1 %v1599_v14, %s5085_s23  ;;  %1604 = vrot.lane.b32.xlu0 %v1598_v30, %s5085_s23  ;;  %v1472_v45 = vpack.c.b16 %v1467_v26, %v1462_v58  ;;  %v1013_v25 = vsel %vm641_vm5, %v5857_v17, %v5838_v33  ;;  %v945_v57 = vsel %vm561_vm2, %v5918_v10, %v5926_v62  ;;  %vm1783_vm13 = vcmask 392192  }
 0x22e   :  { %1602 = vrot.lane.b32.xlu2 %v1597_v42, %s5085_s23  ;;  %v946_v34 = vsel %vm561_vm2, %v5926_v62, %v5916_v19  ;;  %v981_v17 = vsel %vm601_vm15, %v5924_v38, %v5930_v6  ;;  %v979_v11 = vsel %vm601_vm15, %v5883_v20, %v5922_v59  ;;  %v944_v62 = vsel %vm561_vm2, %v5832_v55, %v5918_v10 }
 0x22f   :  { %v1015_v10 = vsel %vm641_vm5, %v5934_v24, %v5928_v3  ;;  %v1050_v21 = vsel %vm681_vm3, %v5938_v43, %v5940_v63  ;;  %v1016_v23 = vsel %vm641_vm5, %v5928_v3, %v5932_v8  ;;  %v1507_v40 = vsel %vm561_vm2, %v1498_v31, %v1500_v16 }
 0x230   :  { %v1504_v55 = vpop.permute.xlu2 %1503  ;;  %v1049_v3 = vsel %vm681_vm3, %v5881_v15, %v5938_v43 }
 0x233   :  { %v1533_v26 = vpop.permute.xlu1 %1532 }
 0x235   :  { %1618 = vrot.lane.b32.xlu1 %v1471_v44, %s5088_s26  ;;  %1610 = vrot.lane.b32.xlu0 %v1601_v36, %s5085_s23  ;;  %v1506_v44 = vpop.permute.xlu0 %1505 }
 0x236   :  { %1608 = vrot.lane.b32.xlu2 %v1600_v13, %s5085_s23 }
 0x23d   :  { %1064 = vrot.lane.b32.xlu1 %v943_v35, %s5086_s24  ;;  %1074 = vrot.lane.b32.xlu0 %v978_v50, %s5086_s24  ;;  %v1508_v35 = vsel %vm561_vm2, %v1500_v16, %v1502_v49  ;;  %v1537_v43 = vpop.permute.xlu0 %1536 }
 0x23e   :  { %1620 = vrot.lane.b32.xlu2 %v1472_v45, %s5088_s26  ;;  %v1510_v45 = vsel %vm561_vm2, %v1504_v55, %v1506_v44 }
 0x245   :  { %1094 = vrot.lane.b32.xlu1 %v1048_v41, %s5086_s24  ;;  %1092 = vrot.lane.b32.xlu0 %v5932_v8, %s5086_s24  ;;  %v1539_v41 = vpop.permute.xlu1 %1538 }
 0x246   :  { %1084 = vrot.lane.b32.xlu2 %v1013_v25, %s5086_s24 }
 0x24d   :  { %1082 = vrot.lane.b32.xlu1 %v5930_v6, %s5086_s24  ;;  %1068 = vrot.lane.b32.xlu0 %v945_v57, %s5086_s24  ;;  %v8418_v6 = vld [vmem:[#allocation24_spill] sm:$0xff]  ;;  %v1509_v57 = vsel %vm561_vm2, %v1502_v49, %v1504_v55 }
 0x24e   :  { %1072 = vrot.lane.b32.xlu2 %v5916_v19, %s5086_s24  ;;  %v1014_v19 = vsel %vm641_vm5, %v5838_v33, %v5934_v24  ;;  %v1274_v12 = vsel %vm1271_vm14, %v8419_v22, %v8418_v6  ;;  %v1273_v33 = vsel %vm1271_vm14, %v8416_v60, %v8419_v22  ;;  %v980_v60 = vsel %vm601_vm15, %v5922_v59, %v5924_v38  ;;  %v1535_v59 = vpop.permute.xlu2 %1534 }
 0x24f   :  { %v1288_v20 = vmul.f32 %v1274_v12, %v5515_v56  ;;  %v1282_v28 = vmul.f32 %v1273_v33, %v5525_v37  ;;  %v1283_v5 = vmul.f32 %v1274_v12, %v5530_v32  ;;  %v1287_v18 = vmul.f32 %v1273_v33, %v5534_v52 }
 0x250   :  { %v1051_v24 = vsel %vm681_vm3, %v5940_v63, %v5936_v53  ;;  %v1289_v39 = vmul.f32 %v8418_v6, %v5569_v47  ;;  %v1543_v25 = vsel %vm601_vm15, %v1535_v59, %v1537_v43  ;;  %v1542_v31 = vsel %vm601_vm15, %v1533_v26, %v1535_v59 }
 0x251   :  { %v1294_v46 = vpack.c.bf16 %v1288_v20, %v1287_v18  ;;  %v1291_v4 = vpack.c.bf16 %v1283_v5, %v1282_v28 }
 0x252   :  { %v1295_v0 = vpack.c.bf16 %v1289_v39, %v1289_v39 }
 0x253   :  { %v1468_v14 = vunpack.c.l.b16 %v1294_v46  ;;  %v1463_v30 = vunpack.c.l.b16 %v1291_v4  ;;  %v1469_v38 = vunpack.c.h.b16 %v1294_v46  ;;  %v1464_v51 = vunpack.c.h.b16 %v1291_v4 }
 0x254   :  { %v1470_v13 = vunpack.c.l.b16 %v1295_v0 }
 0x255   :  { %1070 = vrot.lane.b32.xlu1 %v946_v34, %s5086_s24  ;;  %1080 = vrot.lane.b32.xlu0 %v981_v17, %s5086_s24  ;;  %v1473_v42 = vpack.c.b16 %v1468_v14, %v1463_v30  ;;  %v1474_v63 = vpack.c.b16 %v1469_v38, %v1464_v51  ;;  %v1544_v17 = vsel %vm601_vm15, %v1537_v43, %v1539_v41 }
 0x256   :  { %1102 = vrot.lane.b32.xlu2 %v5936_v53, %s5086_s24  ;;  %v1284_v53 = vmul.f32 %v8418_v6, %v5573_v29  ;;  %v1541_v36 = vpop.permute.xlu2 %1540 }
 0x257   :  { %v1545_v22 = vsel %vm601_vm15, %v1539_v41, %v1541_v36 }
 0x258   :  { %v1292_v8 = vpack.c.bf16 %v1284_v53, %v1284_v53  ;;  %v1809_v53 = vld [vmem:[#allocation2 + $0x40] ss:$8 sm:$0xf] }
 0x25a   :  { %v1465_v58 = vunpack.c.l.b16 %v1292_v8  ;;  %v1812_v8 = vperm.slane %v1809_v53, 1 }
 0x25c   :  { %v1475_v50 = vpack.c.b16 %v1470_v13, %v1465_v58  ;;  %v1849_v13 = vld [vmem:[#allocation2 + $0x41] ss:$8 sm:$0xf] }
 0x25d   :  { %1076 = vrot.lane.b32.xlu1 %v979_v11, %s5086_s24  ;;  %1086 = vrot.lane.b32.xlu0 %v1014_v19, %s5086_s24  ;;  %v1570_v11 = vpop.permute.xlu1 %1569  ;;  %v1568_v19 = vpop.permute.xlu0 %1567 }
 0x25e   :  { %1066 = vrot.lane.b32.xlu2 %v944_v62, %s5086_s24  ;;  %v1577_v6 = vsel %vm641_vm5, %v1568_v19, %v1570_v11 }
 0x265   :  { %1088 = vrot.lane.b32.xlu1 %v1015_v10, %s5086_s24  ;;  %1098 = vrot.lane.b32.xlu0 %v1050_v21, %s5086_s24 }
 0x266   :  { %1078 = vrot.lane.b32.xlu2 %v980_v60, %s5086_s24 }
 0x26d   :  { %1100 = vrot.lane.b32.xlu1 %v1051_v24, %s5086_s24  ;;  %1622 = vrot.lane.b32.xlu0 %v1473_v42, %s5088_s26  ;;  %v1769_v24 = vld [vmem:[#allocation2 + $0x27] ss:$8 sm:$0xf] }
 0x26e   :  { %1090 = vrot.lane.b32.xlu2 %v1016_v23, %s5086_s24  ;;  %v1772_v23 = vperm.slane %v1769_v24, 1  ;;  %v1773_v39 = vperm.slane %v1769_v24, 2  ;;  %v1771_v51 = vperm.slane %v1769_v24, 0 }
 0x275   :  { %1624 = vrot.lane.b32.xlu1 %v1474_v63, %s5088_s26  ;;  %1628 = vrot.lane.b32.xlu0 %v1507_v40, %s5088_s26  ;;  %v1811_v63 = vperm.slane %v1809_v53, 0 }
 0x276   :  { %1096 = vrot.lane.b32.xlu2 %v1049_v3, %s5086_s24 }
 0x27d   :  { %1630 = vrot.lane.b32.xlu1 %v1508_v35, %s5088_s26  ;;  %1634 = vrot.lane.b32.xlu0 %v1510_v45, %s5088_s26  ;;  %v1813_v45 = vperm.slane %v1809_v53, 2 }
 0x27e   :  { %1626 = vrot.lane.b32.xlu2 %v1475_v50, %s5088_s26  ;;  %v1851_v50 = vperm.slane %v1849_v13, 0 }
 0x280   :  { %v1572_v15 = vpop.permute.xlu2 %1571 }
 0x281   :  { %v1578_v18 = vsel %vm641_vm5, %v1570_v11, %v1572_v15 }
 0x285   :  { %1636 = vrot.lane.b32.xlu1 %v1506_v44, %s5088_s26  ;;  %1640 = vrot.lane.b32.xlu0 %v1543_v25, %s5088_s26  ;;  %v1774_v44 = vperm.slane %v1769_v24, 3 }
 0x286   :  { %1632 = vrot.lane.b32.xlu2 %v1509_v57, %s5088_s26  ;;  %v1854_v57 = vperm.slane %v1849_v13, 3 }
 0x288   :  { %v1603_v34 = vpop.permute.xlu2 %1602 }
 0x28d   :  { %1642 = vrot.lane.b32.xlu1 %v1544_v17, %s5088_s26  ;;  %1646 = vrot.lane.b32.xlu0 %v1541_v36, %s5088_s26  ;;  %v1814_v36 = vperm.slane %v1809_v53, 3  ;;  %v1889_v17 = vld [vmem:[#allocation2 + $0x42] ss:$8 sm:$0xf] }
 0x28e   :  { %1638 = vrot.lane.b32.xlu2 %v1542_v31, %s5088_s26  ;;  %v1892_v31 = vperm.slane %v1889_v17, 1 }
 0x290   :  { %v1609_v62 = vpop.permute.xlu2 %1608 }
 0x295   :  { %1648 = vrot.lane.b32.xlu1 %v1577_v6, %s5088_s26 }
 0x296   :  { %1644 = vrot.lane.b32.xlu2 %v1545_v22, %s5088_s26  ;;  %v1576_v12 = vpop.permute.xlu1 %1575  ;;  %v1893_v22 = vperm.slane %v1889_v17, 2 }
 0x297   :  { %v1574_v20 = vpop.permute.xlu0 %1573 }
 0x298   :  { %v6113_v33 = vpop.permute.xlu2 %1620  ;;  %v1579_v28 = vsel %vm641_vm5, %v1572_v15, %v1574_v20  ;;  %v1580_v5 = vsel %vm641_vm5, %v1574_v20, %v1576_v12  ;;  %v1853_v15 = vperm.slane %v1849_v13, 2  ;;  %v1929_v20 = vld [vmem:[#allocation2 + $0x43] ss:$8 sm:$0xf] }
 0x299   :  { %1652 = vrot.lane.b32.xlu0 %v1579_v28, %s5088_s26 }
 0x29d   :  { %1654 = vrot.lane.b32.xlu1 %v1580_v5, %s5088_s26  ;;  %v1931_v5 = vperm.slane %v1929_v20, 0 }
 0x29e   :  { %1650 = vrot.lane.b32.xlu2 %v1578_v18, %s5088_s26 }
 0x29f   :  { %v1607_v46 = vpop.permute.xlu1 %1606  ;;  %v1605_v55 = vpop.permute.xlu0 %1604 }
 0x2a0   :  { %v6121_v10 = vpop.permute.xlu2 %1084  ;;  %v1612_v21 = vsel %vm681_vm3, %v1603_v34, %v1605_v55  ;;  %v1613_v60 = vsel %vm681_vm3, %v1605_v55, %v1607_v46  ;;  %v1614_v16 = vsel %vm681_vm3, %v1607_v46, %v1609_v62  ;;  %v1852_v34 = vperm.slane %v1849_v13, 1 }
 0x2a1   :  { %1658 = vrot.lane.b32.xlu0 %v1612_v21, %s5088_s26 }
 0x2a5   :  { %1660 = vrot.lane.b32.xlu1 %v1613_v60, %s5088_s26 }
 0x2a6   :  { %1656 = vrot.lane.b32.xlu2 %v1576_v12, %s5088_s26  ;;  %v1891_v12 = vperm.slane %v1889_v17, 0 }
 0x2a7   :  { %v6128_v4 = vpop.permute.xlu1 %1618  ;;  %v1611_v14 = vpop.permute.xlu0 %1610 }
 0x2a8   :  { %v6130_v30 = vpop.permute.xlu2 %1072  ;;  %v1615_v42 = vsel %vm681_vm3, %v1609_v62, %v1611_v14 }
 0x2a9   :  { %1664 = vrot.lane.b32.xlu0 %v1615_v42, %s5088_s26  ;;  %v1894_v42 = vperm.slane %v1889_v17, 3 }
 0x2ad   :  { %1666 = vrot.lane.b32.xlu1 %v1611_v14, %s5088_s26  ;;  %v1932_v14 = vperm.slane %v1929_v20, 1 }
 0x2ae   :  { %1662 = vrot.lane.b32.xlu2 %v1614_v16, %s5088_s26  ;;  %v1934_v16 = vperm.slane %v1929_v20, 3 }
 0x2af   :  { %v6137_v59 = vpop.permute.xlu1 %1064  ;;  %v6139_v38 = vpop.permute.xlu0 %1074 }
 0x2b0   :  { %v6141_v49 = vpop.permute.xlu2 %1102 }
 0x2b1   :  { %1777 = vrot.lane.b32.xlu0 %v1772_v23, %s5089_s27 }
 0x2b5   :  { %1779 = vrot.lane.b32.xlu1 %v1773_v39, %s5089_s27 }
 0x2b6   :  { %1775 = vrot.lane.b32.xlu2 %v1771_v51, %s5089_s27 }
 0x2b7   :  { %v1095_v40 = vpop.permute.xlu1 %1094  ;;  %v6143_v0 = vpop.permute.xlu0 %1092 }
 0x2b8   :  { %v6145_v3 = vpop.permute.xlu2 %1066 }
 0x2b9   :  { %1815 = vrot.lane.b32.xlu0 %v1811_v63, %s5090_s28  ;;  %v1109_v24 = vsel %vm1104_vm6, %v6137_v59, %v6145_v3  ;;  %v1105_v59 = vsel %vm1104_vm6, %v5874_v48, %v5897_v54 }
 0x2bd   :  { %1817 = vrot.lane.b32.xlu1 %v1812_v8, %s5090_s28  ;;  %v6189_v8 = vld [vmem:[#allocation2] ss:$8 sm:$0xf] }
 0x2be   :  { %1781 = vrot.lane.b32.xlu2 %v1774_v44, %s5089_s27  ;;  %v1933_v44 = vperm.slane %v1929_v20, 2  ;;  %v331_v13 = vperm.slane %v6189_v8, 0  ;;  %v8424_v20 = vld [vmem:[#allocation47_spill] sm:$0xff]  ;;  %s5098_s27 = smov 67  }
 0x2bf   :  { %v6147_v26 = vpop.permute.xlu1 %1082  ;;  %v6149_v58 = vpop.permute.xlu0 %1068 }
 0x2c0   :  { %v6151_v35 = vpop.permute.xlu2 %1078  ;;  %v1110_v48 = vsel %vm1104_vm6, %v6145_v3, %v6149_v58 }
 0x2c1   :  { %1821 = vrot.lane.b32.xlu0 %v1814_v36, %s5090_s28 }
 0x2c5   :  { %1855 = vrot.lane.b32.xlu1 %v1851_v50, %s5091_s29 }
 0x2c6   :  { %1819 = vrot.lane.b32.xlu2 %v1813_v45, %s5090_s28  ;;  %v8420_v45 = vld [vmem:[#allocation50_spill] sm:$0xff]  ;;  %s5099_s28 = smov 66  }
 0x2c7   :  { %v6153_v43 = vpop.permute.xlu1 %1070  ;;  %v6155_v41 = vpop.permute.xlu0 %1080 }
 0x2c8   :  { %v6157_v25 = vpop.permute.xlu2 %1090 }
 0x2c9   :  { %1859 = vrot.lane.b32.xlu0 %v1853_v15, %s5091_s29  ;;  %v8421_v15 = vld [vmem:[#allocation51_spill] sm:$0xff] }
 0x2cd   :  { %1861 = vrot.lane.b32.xlu1 %v1854_v57, %s5091_s29  ;;  %v642_v57 = vsel %vm641_vm5, %v8421_v15, %v8420_v45 }
 0x2ce   :  { %1857 = vrot.lane.b32.xlu2 %v1852_v34, %s5091_s29  ;;  %s4869_s29 = sshll.u32 %s8212_s14, 4  ;;  %s4870_s29 = int_to_ptr.hbm [resolvable:$true] %s4869_s29 }
 0x2cf   :  { %v1077_v11 = vpop.permute.xlu1 %1076  ;;  %v1087_v19 = vpop.permute.xlu0 %1086 }
 0x2d0   :  { %v1097_v62 = vpop.permute.xlu2 %1096  ;;  %v1117_v28 = vsel %vm1104_vm6, %v6121_v10, %v1087_v19  ;;  %v1113_v60 = vsel %vm1104_vm6, %v6139_v38, %v1077_v11  ;;  %v1114_v63 = vsel %vm1104_vm6, %v1077_v11, %v6151_v35 }
 0x2d1   :  { %1897 = vrot.lane.b32.xlu0 %v1892_v31, %s5092_s2  ;;  %v1121_v6 = vsel %vm1104_vm6, %v1095_v40, %v1097_v62  ;;  %v682_v40 = vsel %vm681_vm3, %v5755_v61, %v5834_v7  ;;  %v1120_v61 = vsel %vm1104_vm6, %v6157_v25, %v6143_v0  ;;  %v343_v31 = vmul.f32 %v331_v13, %v5417_v9 }
 0x2d2   :  { %1152 = vmatpush.bf16.msrb.mxu0 %v1121_v6  ;;  %v1115_v0 = vsel %vm1104_vm6, %v6151_v35, %v6155_v41  ;;  %v8425_v35 = vld [vmem:[#allocation62_spill] sm:$0xff] }
 0x2d5   :  { %1899 = vrot.lane.b32.xlu1 %v1893_v22, %s5092_s2  ;;  %v1116_v22 = vsel %vm1104_vm6, %v6155_v41, %v6147_v26  ;;  %v1112_v26 = vsel %vm1104_vm6, %v6153_v43, %v6130_v30  ;;  %v8426_v41 = vld [vmem:[#allocation48_spill] sm:$0xff] }
 0x2d6   :  { %1895 = vrot.lane.b32.xlu2 %v1891_v12, %s5092_s2  ;;  %1153 = vmatpush.bf16.msrb.mxu0 %v1117_v28  ;;  %v8423_v12 = vld [vmem:[#allocation46_spill] sm:$0xff] }
 0x2d7   :  { %v1089_v18 = vpop.permute.xlu1 %1088  ;;  %v1099_v46 = vpop.permute.xlu0 %1098  ;;  %v602_v28 = vsel %vm601_vm15, %v8424_v20, %v8423_v12  ;;  %v8437_v20 = vld [vmem:[#allocation57_spill] sm:$0xff] }
 0x2d8   :  { %v6162_v55 = vpop.permute.xlu2 %1626  ;;  %v1122_v21 = vsel %vm1104_vm6, %v1097_v62, %v1099_v46  ;;  %v1118_v10 = vsel %vm1104_vm6, %v1087_v19, %v1089_v18  ;;  %v1119_v36 = vsel %vm1104_vm6, %v1089_v18, %v6157_v25  ;;  %v8422_v25 = vld [vmem:[#allocation66_spill] sm:$0xff]  ;;  %v339_v62 = vmul.f32 %v331_v13, %v5412_v27 }
 0x2d9   :  { %1935 = vrot.lane.b32.xlu0 %v1931_v5, %s5093_s30  ;;  %1165 = vmatpush.bf16.msrb.mxu1 %v1122_v21  ;;  %v1106_v19 = vsel %vm1104_vm6, %v5897_v54, %v8422_v25  ;;  %v683_v5 = vsel %vm681_vm3, %v5834_v7, %v8425_v35  ;;  %v1111_v18 = vsel %vm1104_vm6, %v6149_v58, %v6153_v43  ;;  %v8427_v21 = vld [vmem:[#allocation45_spill] sm:$0xff] }
 0x2da   :  { %1154 = vmatpush.bf16.msrb.mxu0 %v1113_v60  ;;  %v562_v60 = vsel %vm561_vm2, %v8427_v21, %v8426_v41  ;;  %v4906_v21 = vld [vmem:[%s8202_s4 + $0x4] sm:$0xf] }
 0x2dd   :  { %1937 = vrot.lane.b32.xlu1 %v1932_v14, %s5093_s30  ;;  %1166 = vmatpush.bf16.msrb.mxu1 %v1118_v10  ;;  %v8428_v14 = vld [vmem:[#allocation60_spill] sm:$0xff] }
 0x2de   :  { %1901 = vrot.lane.b32.xlu2 %v1894_v42, %s5092_s2  ;;  %1155 = vmatpush.bf16.msrb.mxu0 %v1109_v24  ;;  %v643_v7 = vsel %vm641_vm5, %v8420_v45, %v8428_v14 }
 0x2df   :  { %v1101_v23 = vpop.permute.xlu1 %1100  ;;  %v6173_v39 = vpop.permute.xlu0 %1622 }
 0x2e0   :  { %v6175_v38 = vpop.permute.xlu2 %1632  ;;  %v1123_v51 = vsel %vm1104_vm6, %v1099_v46, %v1101_v23  ;;  %v1124_v53 = vsel %vm1104_vm6, %v1101_v23, %v6141_v49  ;;  %v332_v49 = vperm.slane %v6189_v8, 1  ;;  %v8430_v23 = vld [vmem:[#allocation63_spill] sm:$0xff] }
 0x2e1   :  { %1178 = vmatpush.bf16.msrb.mxu2 %v1123_v51  ;;  %1941 = vrot.lane.b32.xlu0 %v1934_v16, %s5093_s30  ;;  %v8429_v16 = vld [vmem:[#allocation67_spill] sm:$0xff]  ;;  %v684_v51 = vsel %vm681_vm3, %v8425_v35, %v8430_v23 }
 0x2e2   :  { %1156 = vmatpush.bf16.msrb.mxu0 %v1105_v59  ;;  %1167 = vmatpush.bf16.msrb.mxu1 %v1114_v63  ;;  %v344_v50 = vmul.f32 %v332_v49, %v5427_v1  ;;  %v340_v17 = vmul.f32 %v332_v49, %v5403_v2  ;;  %v1107_v30 = vsel %vm1104_vm6, %v8422_v25, %v8429_v16  ;;  %v333_v63 = vperm.slane %v6189_v8, 2 }
 0x2e3   :  { %1191 = vmatpush.bf16.msrb.mxu3 %v1124_v53  ;;  %v8431_v53 = vld [vmem:[#allocation68_spill] sm:$0xff] }
 0x2e4   :  { %v349_v6 = vpack.c.bf16 %v344_v50, %v343_v31  ;;  %v347_v54 = vpack.c.bf16 %v340_v17, %v339_v62  ;;  %v1108_v59 = vsel %vm1104_vm6, %v8429_v16, %v8431_v53  ;;  %v8434_v50 = vld [vmem:[#allocation64_spill] sm:$0xff]  ;;  %v341_v45 = vmul.f32 %v333_v63, %v5525_v37  ;;  %v8435_v17 = vld [vmem:[#allocation55_spill] sm:$0xff] }
 0x2e5   :  { %1179 = vmatpush.bf16.msrb.mxu2 %v1119_v36  ;;  %v8433_v36 = vld [vmem:[#allocation61_spill] sm:$0xff]  ;;  %v563_v31 = vsel %vm561_vm2, %v8426_v41, %v8435_v17  ;;  %v8439_v41 = vld [vmem:[#allocation54_spill] sm:$0xff]  ;;  %4907 = vmatmul.msk.bf16.vlgmr.msrb.gmra.mxu0 %vm1145_vm7, %v4906_v21 }
 0x2e6   :  { %1207 = vmatpush.bf16.msra.mxu0 %v682_v40  ;;  %1168 = vmatpush.bf16.msrb.mxu1 %v1110_v48  ;;  %v518_v46 = vunpack.c.l.b16 %v349_v6  ;;  %v514_v58 = vunpack.c.l.b16 %v347_v54  ;;  %v334_v40 = vperm.slane %v6189_v8, 3  ;;  %v603_v48 = vsel %vm601_vm15, %v8423_v12, %v8433_v36 }
 0x2e7   :  { %1939 = vrot.lane.b32.xlu2 %v1933_v44, %s5093_s30  ;;  %1192 = vmatpush.bf16.msrb.mxu3 %v1120_v61  ;;  %v6206_v34 = vpop.permute.xlu1 %1624  ;;  %v6208_v3 = vpop.permute.xlu0 %1628  ;;  %v8432_v44 = vld [vmem:[#allocation65_spill] sm:$0xff]  ;;  %v644_v61 = vsel %vm641_vm5, %v8428_v14, %v8434_v50  ;;  %v519_v8 = vunpack.c.h.b16 %v349_v6  ;;  %v515_v6 = vunpack.c.h.b16 %v347_v54  ;;  %v564_v54 = vsel %vm561_vm2, %v8435_v17, %v8439_v41  ;;  %s5100_s30 = smov 95  }
 0x2e8   :  { %v6212_v11 = vpop.permute.xlu2 %1638  ;;  %v522_v43 = vpack.c.b16 %v518_v46, %v514_v58  ;;  %v685_v49 = vsel %vm681_vm3, %v8430_v23, %v8432_v44  ;;  %v346_v13 = vmul.f32 %v334_v40, %v5515_v56  ;;  %v342_v15 = vmul.f32 %v334_v40, %v5530_v32 }
 0x2e9   :  { %1180 = vmatpush.bf16.msrb.mxu2 %v1115_v0  ;;  %v8436_v0 = vld [vmem:[#allocation59_spill] sm:$0xff]  ;;  %v523_v35 = vpack.c.b16 %v519_v8, %v515_v6 }
 0x2ea   :  { %1208 = vmatpush.bf16.msra.mxu0 %v642_v57  ;;  %1169 = vmatpush.bf16.msrb.mxu1 %v1106_v19  ;;  %v345_v57 = vmul.f32 %v333_v63, %v5534_v52  ;;  %v645_v25 = vsel %vm641_vm5, %v8434_v50, %v8436_v0 }
 0x2eb   :  { %1193 = vmatpush.bf16.msrb.mxu3 %v1116_v22 }
 0x2ec   :  { %v350_v22 = vpack.c.bf16 %v346_v13, %v345_v57 }
 0x2ed   :  { %1181 = vmatpush.bf16.msrb.mxu2 %v1111_v18  ;;  %v8438_v18 = vld [vmem:[#allocation56_spill] sm:$0xff]  ;;  %4908 = vmatmul.msk.bf16.vlgmr.msrb.gmra.mxu1 %vm1145_vm7, %v4906_v21 }
 0x2ee   :  { %1209 = vmatpush.bf16.msra.mxu0 %v602_v28  ;;  %1220 = vmatpush.bf16.msra.mxu1 %v683_v5  ;;  %v604_v28 = vsel %vm601_vm15, %v8433_v36, %v8437_v20  ;;  %v348_v5 = vpack.c.bf16 %v342_v15, %v341_v45  ;;  %v605_v46 = vsel %vm601_vm15, %v8437_v20, %v8438_v18  ;;  %v521_v14 = vunpack.c.h.b16 %v350_v22 }
 0x2ef   :  { %1194 = vmatpush.bf16.msrb.mxu3 %v1112_v26  ;;  %v6242_v42 = vpop.permute.xlu1 %1630  ;;  %v6244_v10 = vpop.permute.xlu0 %1634  ;;  %v520_v26 = vunpack.c.l.b16 %v350_v22 }
 0x2f0   :  { %v6246_v24 = vpop.permute.xlu2 %1644  ;;  %v1673_v22 = vsel %vm1668_vm8, %v6208_v3, %v6242_v42  ;;  %v1674_v20 = vsel %vm1668_vm8, %v6242_v42, %v6175_v38  ;;  %v1670_v3 = vsel %vm1668_vm8, %v6113_v33, %v6173_v39 }
 0x2f1   :  { %1182 = vmatpush.bf16.msrb.mxu2 %v1107_v30 }
 0x2f2   :  { %1210 = vmatpush.bf16.msra.mxu0 %v562_v60  ;;  %1221 = vmatpush.bf16.msra.mxu1 %v643_v7  ;;  %v516_v60 = vunpack.c.l.b16 %v348_v5  ;;  %v8440_v7 = vld [vmem:[#allocation58_spill] sm:$0xff] }
 0x2f3   :  { %1195 = vmatpush.bf16.msrb.mxu3 %v1108_v59  ;;  %v565_v58 = vsel %vm561_vm2, %v8439_v41, %v8440_v7 }
 0x2f4   :  { %4909 = vmatmul.msk.bf16.vlgmr.msrb.gmra.mxu2 %vm1145_vm7, %v4906_v21  ;;  %v524_v30 = vpack.c.b16 %v520_v26, %v516_v60 }
 0x2f5   :  { %1233 = vmatpush.bf16.msra.mxu2 %v684_v51 }
 0x2f6   :  { %1211 = vmatpush.bf16.msra.mxu0 %v522_v43  ;;  %1222 = vmatpush.bf16.msra.mxu1 %v603_v48  ;;  %v517_v43 = vunpack.c.h.b16 %v348_v5  ;;  %v1675_v5 = vsel %vm1668_vm8, %v6175_v38, %v6244_v10 }
 0x2f7   :  { %1246 = vmatpush.bf16.msra.mxu3 %v685_v49  ;;  %v6278_v19 = vpop.permute.xlu1 %1636  ;;  %v1641_v12 = vpop.permute.xlu0 %1640 }
 0x2f8   :  { %v1651_v62 = vpop.permute.xlu2 %1650  ;;  %4910 = vmatmul.msk.bf16.vlgmr.msrb.gmra.mxu3 %vm1145_vm7, %v4906_v21  ;;  %v525_v51 = vpack.c.b16 %v521_v14, %v517_v43  ;;  %v1677_v0 = vsel %vm1668_vm8, %v6212_v11, %v1641_v12 }
 0x2f9   :  { %1234 = vmatpush.bf16.msra.mxu2 %v644_v61 }
 0x2fa   :  { %1223 = vmatpush.bf16.msra.mxu1 %v563_v31 }
 0x2fb   :  { %1247 = vmatpush.bf16.msra.mxu3 %v645_v25 }
 0x2fd   :  { %1235 = vmatpush.bf16.msra.mxu2 %v604_v28 }
 0x2fe   :  { %1224 = vmatpush.bf16.msra.mxu1 %v523_v35  ;;  %v1669_v35 = vsel %vm1668_vm8, %v6128_v4, %v6113_v33  ;;  %v1671_v4 = vsel %vm1668_vm8, %v6173_v39, %v6206_v34  ;;  %v1676_v33 = vsel %vm1668_vm8, %v6244_v10, %v6278_v19  ;;  %v1672_v19 = vsel %vm1668_vm8, %v6206_v34, %v6162_v55 }
 0x2ff   :  { %1248 = vmatpush.bf16.msra.mxu3 %v605_v46  ;;  %v1643_v16 = vpop.permute.xlu1 %1642  ;;  %v1647_v53 = vpop.permute.xlu0 %1646 }
 0x300   :  { %v1657_v23 = vpop.permute.xlu2 %1656  ;;  %v1678_v25 = vsel %vm1668_vm8, %v1641_v12, %v1643_v16  ;;  %v1679_v11 = vsel %vm1668_vm8, %v1643_v16, %v6246_v24  ;;  %v1680_v18 = vsel %vm1668_vm8, %v6246_v24, %v1647_v53 }
 0x301   :  { %1236 = vmatpush.bf16.msra.mxu2 %v564_v54 }
 0x303   :  { %1249 = vmatpush.bf16.msra.mxu3 %v565_v58 }
 0x305   :  { %1237 = vmatpush.bf16.msra.mxu2 %v524_v30 }
 0x307   :  { %1250 = vmatpush.bf16.msra.mxu3 %v525_v51  ;;  %v1649_v59 = vpop.permute.xlu1 %1648 }
 0x308   :  { %v1663_v63 = vpop.permute.xlu2 %1662  ;;  %v1681_v8 = vsel %vm1668_vm8, %v1649_v59, %v1651_v62 }
 0x30b   :  { %v1653_v40 = vpop.permute.xlu0 %1652 }
 0x30c   :  { %v1682_v45 = vsel %vm1668_vm8, %v1651_v62, %v1653_v40 }
 0x30f   :  { %v1655_v44 = vpop.permute.xlu1 %1654 }
 0x310   :  { %v6299_v36 = vpop.permute.xlu2 %1775  ;;  %v1683_v6 = vsel %vm1668_vm8, %v1653_v40, %v1655_v44  ;;  %v1684_v12 = vsel %vm1668_vm8, %v1655_v44, %v1657_v23 }
 0x313   :  { %v1659_v49 = vpop.permute.xlu0 %1658 }
 0x317   :  { %v1661_v48 = vpop.permute.xlu1 %1660 }
 0x318   :  { %v1685_v13 = vsel %vm1668_vm8, %v1659_v49, %v1661_v48  ;;  %v1686_v50 = vsel %vm1668_vm8, %v1661_v48, %v1663_v63  ;;  %v6306_v57 = vpop.permute.xlu2 %1781 }
 0x319   :  { %1715 = vmatpush.bf16.msrb.mxu0 %v1685_v13  ;;  %1728 = vmatpush.bf16.msrb.mxu1 %v1686_v50 }
 0x31b   :  { %v1665_v61 = vpop.permute.xlu0 %1664 }
 0x31c   :  { %v1687_v15 = vsel %vm1668_vm8, %v1663_v63, %v1665_v61 }
 0x31d   :  { %1716 = vmatpush.bf16.msrb.mxu0 %v1681_v8  ;;  %1729 = vmatpush.bf16.msrb.mxu1 %v1682_v45 }
 0x31e   :  { %1741 = vmatpush.bf16.msrb.mxu2 %v1687_v15 }
 0x31f   :  { %v1667_v17 = vpop.permute.xlu1 %1666 }
 0x320   :  { %v1688_v31 = vsel %vm1668_vm8, %v1665_v61, %v1667_v17  ;;  %v1820_v42 = vpop.permute.xlu2 %1819 }
 0x321   :  { %1717 = vmatpush.bf16.msrb.mxu0 %v1677_v0  ;;  %1730 = vmatpush.bf16.msrb.mxu1 %v1678_v25 }
 0x322   :  { %1742 = vmatpush.bf16.msrb.mxu2 %v1683_v6  ;;  %1754 = vmatpush.bf16.msrb.mxu3 %v1688_v31 }
 0x323   :  { %v6313_v62 = vpop.permute.xlu0 %1777 }
 0x325   :  { %1718 = vmatpush.bf16.msrb.mxu0 %v1673_v22  ;;  %1731 = vmatpush.bf16.msrb.mxu1 %v1674_v20 }
 0x326   :  { %1743 = vmatpush.bf16.msrb.mxu2 %v1679_v11  ;;  %1755 = vmatpush.bf16.msrb.mxu3 %v1684_v12 }
 0x327   :  { %v6324_v28 = vpop.permute.xlu1 %1779 }
 0x328   :  { %v1858_v21 = vpop.permute.xlu2 %1857 }
 0x329   :  { %1719 = vmatpush.bf16.msrb.mxu0 %v1669_v35  ;;  %1732 = vmatpush.bf16.msrb.mxu1 %v1670_v3 }
 0x32a   :  { %1744 = vmatpush.bf16.msrb.mxu2 %v1675_v5  ;;  %1756 = vmatpush.bf16.msrb.mxu3 %v1680_v18 }
 0x32b   :  { %v6337_v46 = vpop.permute.xlu0 %1815 }
 0x32c   :  { %8441 = vst [vmem:[#allocation26_spill] sm:$0xff] %v6337_v46  ;;  %v1832_v24 = vmul.f32 %v6337_v46, %v5412_v27  ;;  %v1837_v10 = vmul.f32 %v6337_v46, %v5417_v9 }
 0x32e   :  { %1745 = vmatpush.bf16.msrb.mxu2 %v1671_v4  ;;  %1757 = vmatpush.bf16.msrb.mxu3 %v1676_v33 }
 0x32f   :  { %v1818_v26 = vpop.permute.xlu1 %1817 }
 0x330   :  { %v6347_v38 = vsel %vm1823_vm9, %v6337_v46, %v1818_v26  ;;  %v6352_v41 = vsel %vm1823_vm9, %v1818_v26, %v1820_v42 }
 0x331   :  { %8442 = vst [vmem:[#allocation23_spill] sm:$0xff] %v6347_v38  ;;  %v1833_v39 = vmul.f32 %v6347_v38, %v5403_v2  ;;  %v1838_v54 = vmul.f32 %v6347_v38, %v5427_v1  ;;  %v1834_v58 = vmul.f32 %v6352_v41, %v5525_v37  ;;  %v1839_v53 = vmul.f32 %v6352_v41, %v5534_v52 }
 0x332   :  { %8443 = vst [vmem:[#allocation24_spill] sm:$0xff] %v6352_v41  ;;  %1758 = vmatpush.bf16.msrb.mxu3 %v1672_v19 }
 0x333   :  { %v6363_v60 = vpop.permute.xlu0 %1821  ;;  %v1842_v14 = vpack.c.bf16 %v1833_v39, %v1832_v24  ;;  %v1845_v7 = vpack.c.bf16 %v1838_v54, %v1837_v10 }
 0x334   :  { %8444 = vst [vmem:[#allocation25_spill] sm:$0xff] %v6363_v60  ;;  %v6369_v16 = vsel %vm1823_vm9, %v1820_v42, %v6363_v60  ;;  %v1836_v30 = vmul.f32 %v6363_v60, %v5573_v29  ;;  %v1841_v55 = vmul.f32 %v6363_v60, %v5569_v47  ;;  %v6397_v42 = vpop.permute.xlu2 %1895  ;;  %vm2456_vm9 = vcmask 556032   ;;  %v8468_v60 = vld [vmem:[#allocation37_spill] sm:$0xff] }
 0x335   :  { %8445 = vst [vmem:[#allocation50_spill] sm:$0xff] %v6369_v16  ;;  %v1995_v34 = vunpack.c.l.b16 %v1842_v14  ;;  %v2000_v43 = vunpack.c.l.b16 %v1845_v7  ;;  %v1996_v23 = vunpack.c.h.b16 %v1842_v14  ;;  %v2001_v51 = vunpack.c.h.b16 %v1845_v7 }
 0x336   :  { %v1835_v59 = vmul.f32 %v6369_v16, %v5530_v32  ;;  %v1840_v63 = vmul.f32 %v6369_v16, %v5515_v56  ;;  %v1844_v40 = vpack.c.bf16 %v1836_v30, %v1836_v30  ;;  %v1847_v13 = vpack.c.bf16 %v1841_v55, %v1841_v55 }
 0x337   :  { %v6381_v44 = vpop.permute.xlu1 %1855  ;;  %v2005_v49 = vpack.c.b16 %v2000_v43, %v1995_v34  ;;  %v2006_v48 = vpack.c.b16 %v2001_v51, %v1996_v23 }
 0x338   :  { %8446 = vst [vmem:[#allocation51_spill] sm:$0xff] %v6381_v44  ;;  %v6385_v50 = vsel %vm1863_vm10, %v6381_v44, %v1858_v21  ;;  %v1843_v61 = vpack.c.bf16 %v1835_v59, %v1834_v58  ;;  %v1846_v8 = vpack.c.bf16 %v1840_v63, %v1839_v53  ;;  %v1872_v45 = vmul.f32 %v6381_v44, %v5412_v27 }
 0x339   :  { %8447 = vst [vmem:[#allocation66_spill] sm:$0xff] %v6385_v50  ;;  %2010 = vrot.lane.b32.xlu1 %v2005_v49, %s5083_s1  ;;  %2012 = vrot.lane.b32.xlu2 %v2006_v48, %s5083_s1  ;;  %v1873_v15 = vmul.f32 %v6385_v50, %v5403_v2  ;;  %v1877_v17 = vmul.f32 %v6381_v44, %v5417_v9  ;;  %v1999_v25 = vunpack.c.l.b16 %v1844_v40  ;;  %v2004_v22 = vunpack.c.l.b16 %v1847_v13 }
 0x33a   :  { %v1997_v31 = vunpack.c.l.b16 %v1843_v61  ;;  %v2002_v0 = vunpack.c.l.b16 %v1846_v8  ;;  %v1998_v20 = vunpack.c.h.b16 %v1843_v61  ;;  %v2003_v11 = vunpack.c.h.b16 %v1846_v8 }
 0x33b   :  { %v1860_v6 = vpop.permute.xlu0 %1859  ;;  %v1878_v12 = vmul.f32 %v6385_v50, %v5427_v1  ;;  %v1882_v3 = vpack.c.bf16 %v1873_v15, %v1872_v45  ;;  %v2009_v33 = vpack.c.b16 %v2004_v22, %v1999_v25  ;;  %v1912_v59 = vmul.f32 %v6397_v42, %v5412_v27 }
 0x33c   :  { %v2007_v35 = vpack.c.b16 %v2002_v0, %v1997_v31  ;;  %v6400_v5 = vsel %vm1863_vm10, %v1858_v21, %v1860_v6  ;;  %v2008_v26 = vpack.c.b16 %v2003_v11, %v1998_v20  ;;  %v1917_v63 = vmul.f32 %v6397_v42, %v5417_v9  ;;  %v6436_v45 = vpop.permute.xlu2 %1901 }
 0x33d   :  { %v1885_v18 = vpack.c.bf16 %v1878_v12, %v1877_v17  ;;  %v1874_v24 = vmul.f32 %v6400_v5, %v5525_v37  ;;  %v2030_v54 = vunpack.c.l.b16 %v1882_v3  ;;  %v1879_v19 = vmul.f32 %v6400_v5, %v5534_v52 }
 0x33e   :  { %2014 = vrot.lane.b32.xlu0 %v2007_v35, %s5083_s1  ;;  %v2031_v7 = vunpack.c.h.b16 %v1882_v3 }
 0x33f   :  { %v6403_v4 = vpop.permute.xlu1 %1861  ;;  %v2035_v10 = vunpack.c.l.b16 %v1885_v18  ;;  %v2036_v58 = vunpack.c.h.b16 %v1885_v18 }
 0x340   :  { %v6409_v39 = vsel %vm1863_vm10, %v1860_v6, %v6403_v4  ;;  %v1876_v30 = vmul.f32 %v6403_v4, %v5573_v29  ;;  %v1881_v23 = vmul.f32 %v6403_v4, %v5569_v47  ;;  %vm2416_vm10 = vcmask 547840  }
 0x341   :  { %2018 = vrot.lane.b32.xlu2 %v2009_v33, %s5083_s1  ;;  %2016 = vrot.lane.b32.xlu1 %v2008_v26, %s5083_s1  ;;  %v1875_v21 = vmul.f32 %v6409_v39, %v5530_v32  ;;  %v1880_v14 = vmul.f32 %v6409_v39, %v5515_v56  ;;  %v2040_v53 = vpack.c.b16 %v2035_v10, %v2030_v54 }
 0x342   :  { %v2041_v61 = vpack.c.b16 %v2036_v58, %v2031_v7  ;;  %v1884_v8 = vpack.c.bf16 %v1876_v30, %v1876_v30  ;;  %v1887_v31 = vpack.c.bf16 %v1881_v23, %v1881_v23 }
 0x343   :  { %v1898_v55 = vpop.permute.xlu0 %1897  ;;  %v1883_v34 = vpack.c.bf16 %v1875_v21, %v1874_v24  ;;  %v1886_v43 = vpack.c.bf16 %v1880_v14, %v1879_v19  ;;  %v1916_v21 = vmul.f32 %v6436_v45, %v5573_v29  ;;  %v1921_v14 = vmul.f32 %v6436_v45, %v5569_v47 }
 0x344   :  { %v6425_v51 = vsel %vm1903_vm11, %v6397_v42, %v1898_v55  ;;  %v2034_v10 = vunpack.c.l.b16 %v1884_v8  ;;  %v2039_v19 = vunpack.c.l.b16 %v1887_v31  ;;  %v1940_v8 = vpop.permute.xlu2 %1939 }
 0x345   :  { %v1913_v40 = vmul.f32 %v6425_v51, %v5403_v2  ;;  %v1918_v49 = vmul.f32 %v6425_v51, %v5427_v1  ;;  %v2032_v48 = vunpack.c.l.b16 %v1883_v34  ;;  %v2037_v13 = vunpack.c.l.b16 %v1886_v43 }
 0x346   :  { %2045 = vrot.lane.b32.xlu0 %v2040_v53, %s5082_s21  ;;  %v2033_v20 = vunpack.c.h.b16 %v1883_v34  ;;  %v2038_v11 = vunpack.c.h.b16 %v1886_v43  ;;  %v2044_v43 = vpack.c.b16 %v2039_v19, %v2034_v10 }
 0x347   :  { %v1900_v15 = vpop.permute.xlu1 %1899  ;;  %v2042_v17 = vpack.c.b16 %v2037_v13, %v2032_v48  ;;  %v1922_v0 = vpack.c.bf16 %v1913_v40, %v1912_v59  ;;  %v1925_v25 = vpack.c.bf16 %v1918_v49, %v1917_v63  ;;  %v1924_v59 = vpack.c.bf16 %v1916_v21, %v1916_v21 }
 0x348   :  { %v6439_v6 = vsel %vm1903_vm11, %v1898_v55, %v1900_v15  ;;  %v6443_v22 = vsel %vm1903_vm11, %v1900_v15, %v6436_v45  ;;  %v2043_v54 = vpack.c.b16 %v2038_v11, %v2033_v20  ;;  %v1927_v63 = vpack.c.bf16 %v1921_v14, %v1921_v14 }
 0x349   :  { %2049 = vrot.lane.b32.xlu2 %v2042_v17, %s5082_s21  ;;  %v1914_v12 = vmul.f32 %v6439_v6, %v5525_v37  ;;  %v1915_v35 = vmul.f32 %v6443_v22, %v5530_v32  ;;  %2047 = vrot.lane.b32.xlu1 %v2041_v61, %s5082_s21  ;;  %v1919_v3 = vmul.f32 %v6439_v6, %v5534_v52  ;;  %v2065_v26 = vunpack.c.l.b16 %v1922_v0 }
 0x34a   :  { %v1920_v18 = vmul.f32 %v6443_v22, %v5515_v56  ;;  %v2070_v24 = vunpack.c.l.b16 %v1925_v25  ;;  %v2066_v23 = vunpack.c.h.b16 %v1922_v0  ;;  %v2071_v53 = vunpack.c.h.b16 %v1925_v25 }
 0x34b   :  { %v1936_v33 = vpop.permute.xlu0 %1935  ;;  %v1923_v30 = vpack.c.bf16 %v1915_v35, %v1914_v12  ;;  %v2069_v11 = vunpack.c.l.b16 %v1924_v59  ;;  %v2074_v12 = vunpack.c.l.b16 %v1927_v63  ;;  %v1792_v59 = vmul.f32 %v6299_v36, %v5412_v27 }
 0x34c   :  { %v2075_v58 = vpack.c.b16 %v2070_v24, %v2065_v26  ;;  %v1926_v55 = vpack.c.bf16 %v1920_v18, %v1919_v3  ;;  %v2076_v15 = vpack.c.b16 %v2071_v53, %v2066_v23  ;;  %v1952_v0 = vmul.f32 %v1936_v33, %v5412_v27 }
 0x34d   :  { %v2068_v13 = vunpack.c.h.b16 %v1923_v30  ;;  %v2067_v17 = vunpack.c.l.b16 %v1923_v30  ;;  %v1957_v25 = vmul.f32 %v1936_v33, %v5417_v9  ;;  %v2079_v14 = vpack.c.b16 %v2074_v12, %v2069_v11 }
 0x34e   :  { %2051 = vrot.lane.b32.xlu0 %v2043_v54, %s5082_s21  ;;  %v2073_v61 = vunpack.c.h.b16 %v1926_v55  ;;  %v2072_v31 = vunpack.c.l.b16 %v1926_v55  ;;  %vm2376_vm11 = vcmask 539648  }
 0x34f   :  { %v1938_v7 = vpop.permute.xlu1 %1937 }
 0x350   :  { %v1944_v34 = vsel %vm1943_vm12, %v1936_v33, %v1938_v7  ;;  %v1945_v18 = vsel %vm1943_vm12, %v1938_v7, %v1940_v8  ;;  %v2078_v26 = vpack.c.b16 %v2073_v61, %v2068_v13  ;;  %v2077_v10 = vpack.c.b16 %v2072_v31, %v2067_v17 }
 0x351   :  { %2080 = vrot.lane.b32.xlu2 %v2075_v58, %s5084_s22  ;;  %2053 = vrot.lane.b32.xlu1 %v2044_v43, %s5082_s21  ;;  %v1953_v40 = vmul.f32 %v1944_v34, %v5403_v2  ;;  %v1958_v49 = vmul.f32 %v1944_v34, %v5427_v1  ;;  %v1784_v33 = vsel %vm1783_vm13, %v6299_v36, %v6313_v62 }
 0x352   :  { %v1954_v19 = vmul.f32 %v1945_v18, %v5525_v37  ;;  %v1959_v21 = vmul.f32 %v1945_v18, %v5534_v52  ;;  %v1793_v63 = vmul.f32 %v1784_v33, %v5403_v2 }
 0x353   :  { %v1942_v48 = vpop.permute.xlu0 %1941  ;;  %v1962_v35 = vpack.c.bf16 %v1953_v40, %v1952_v0  ;;  %v1965_v3 = vpack.c.bf16 %v1958_v49, %v1957_v25  ;;  %v1785_v40 = vsel %vm1783_vm13, %v6313_v62, %v6324_v28  ;;  %v1786_v49 = vsel %vm1783_vm13, %v6324_v28, %v6306_v57 }
 0x354   :  { %v1946_v20 = vsel %vm1943_vm12, %v1940_v8, %v1942_v48  ;;  %v1956_v30 = vmul.f32 %v1942_v48, %v5573_v29  ;;  %v1961_v55 = vmul.f32 %v1942_v48, %v5569_v47  ;;  %v1798_v8 = vmul.f32 %v1784_v33, %v5427_v1 }
 0x355   :  { %v1955_v24 = vmul.f32 %v1946_v20, %v5530_v32  ;;  %v1960_v54 = vmul.f32 %v1946_v20, %v5515_v56  ;;  %v2101_v7 = vunpack.c.h.b16 %v1962_v35  ;;  %v2106_v58 = vunpack.c.h.b16 %v1965_v3 }
 0x356   :  { %2082 = vrot.lane.b32.xlu0 %v2076_v15, %s5084_s22  ;;  %v2100_v34 = vunpack.c.l.b16 %v1962_v35  ;;  %v2105_v43 = vunpack.c.l.b16 %v1965_v3  ;;  %v1964_v48 = vpack.c.bf16 %v1956_v30, %v1956_v30  ;;  %v1967_v13 = vpack.c.bf16 %v1961_v55, %v1961_v55 }
 0x357   :  { %v1963_v23 = vpack.c.bf16 %v1955_v24, %v1954_v19  ;;  %v1966_v53 = vpack.c.bf16 %v1960_v54, %v1959_v21  ;;  %v2111_v61 = vpack.c.b16 %v2106_v58, %v2101_v7  ;;  %v1797_v0 = vmul.f32 %v6299_v36, %v5417_v9 }
 0x358   :  { %v2110_v15 = vpack.c.b16 %v2105_v43, %v2100_v34  ;;  %v1802_v62 = vpack.c.bf16 %v1793_v63, %v1792_v59  ;;  %v1794_v25 = vmul.f32 %v1785_v40, %v5525_v37  ;;  %v1795_v20 = vmul.f32 %v1786_v49, %v5530_v32 }
 0x359   :  { %2086 = vrot.lane.b32.xlu2 %v2078_v26, %s5084_s22  ;;  %2084 = vrot.lane.b32.xlu1 %v2077_v10, %s5084_s22  ;;  %v2102_v17 = vunpack.c.l.b16 %v1963_v23  ;;  %v2107_v31 = vunpack.c.l.b16 %v1966_v53  ;;  %v1799_v28 = vmul.f32 %v1785_v40, %v5534_v52  ;;  %v1800_v11 = vmul.f32 %v1786_v49, %v5515_v56 }
 0x35a   :  { %v2104_v12 = vunpack.c.l.b16 %v1964_v48  ;;  %v2109_v35 = vunpack.c.l.b16 %v1967_v13  ;;  %v1805_v3 = vpack.c.bf16 %v1798_v8, %v1797_v0  ;;  %v2103_v26 = vunpack.c.h.b16 %v1963_v23 }
 0x35b   :  { %v2112_v18 = vpack.c.b16 %v2107_v31, %v2102_v17  ;;  %v2108_v24 = vunpack.c.h.b16 %v1966_v53  ;;  %v1803_v36 = vpack.c.bf16 %v1795_v20, %v1794_v25  ;;  %v1806_v54 = vpack.c.bf16 %v1800_v11, %v1799_v28 }
 0x35c   :  { %v2114_v10 = vpack.c.b16 %v2109_v35, %v2104_v12  ;;  %v1974_v33 = vunpack.c.l.b16 %v1802_v62  ;;  %v1979_v19 = vunpack.c.l.b16 %v1805_v3  ;;  %v1801_v30 = vmul.f32 %v6306_v57, %v5569_v47 }
 0x35d   :  { %v2113_v21 = vpack.c.b16 %v2108_v24, %v2103_v26  ;;  %v1976_v7 = vunpack.c.l.b16 %v1803_v36  ;;  %v1981_v58 = vunpack.c.l.b16 %v1806_v54  ;;  %v1975_v55 = vunpack.c.h.b16 %v1802_v62 }
 0x35e   :  { %2088 = vrot.lane.b32.xlu0 %v2079_v14, %s5084_s22  ;;  %v1796_v14 = vmul.f32 %v6306_v57, %v5573_v29  ;;  %v1980_v34 = vunpack.c.h.b16 %v1805_v3  ;;  %v1984_v43 = vpack.c.b16 %v1979_v19, %v1974_v33  ;;  %v1807_v59 = vpack.c.bf16 %v1801_v30, %v1801_v30 }
 0x35f   :  { %v1986_v53 = vpack.c.b16 %v1981_v58, %v1976_v7  ;;  %v1977_v63 = vunpack.c.h.b16 %v1803_v36  ;;  %v1982_v40 = vunpack.c.h.b16 %v1806_v54  ;;  %vm2336_vm12 = vcmask 531456  }
 0x360   :  { %v1804_v23 = vpack.c.bf16 %v1796_v14, %v1796_v14  ;;  %v1985_v49 = vpack.c.b16 %v1980_v34, %v1975_v55  ;;  %v1983_v13 = vunpack.c.l.b16 %v1807_v59 }
 0x361   :  { %2117 = vrot.lane.b32.xlu2 %v2111_v61, %s5085_s23  ;;  %2115 = vrot.lane.b32.xlu1 %v2110_v15, %s5085_s23  ;;  %v1987_v61 = vpack.c.b16 %v1982_v40, %v1977_v63 }
 0x362   :  { %v1978_v48 = vunpack.c.l.b16 %v1804_v23 }
 0x364   :  { %v1988_v57 = vpack.c.b16 %v1983_v13, %v1978_v48  ;;  %v2282_v13 = vld [vmem:[#allocation2 + $0x44] ss:$8 sm:$0xf] }
 0x366   :  { %2119 = vrot.lane.b32.xlu0 %v2112_v18, %s5085_s23 }
 0x369   :  { %2123 = vrot.lane.b32.xlu2 %v2114_v10, %s5085_s23  ;;  %2121 = vrot.lane.b32.xlu1 %v2113_v21, %s5085_s23 }
 0x36e   :  { %2131 = vrot.lane.b32.xlu0 %v1984_v43, %s5094_s0 }
 0x371   :  { %2135 = vrot.lane.b32.xlu2 %v1986_v53, %s5094_s0  ;;  %2133 = vrot.lane.b32.xlu1 %v1985_v49, %s5094_s0 }
 0x376   :  { %2137 = vrot.lane.b32.xlu0 %v1987_v61, %s5094_s0  ;;  %v2284_v61 = vperm.slane %v2282_v13, 0 }
 0x379   :  { %2139 = vrot.lane.b32.xlu1 %v1988_v57, %s5094_s0  ;;  %v2285_v57 = vperm.slane %v2282_v13, 1 }
 0x393   :  { %v2013_v8 = vpop.permute.xlu2 %2012 }
 0x39b   :  { %v2019_v15 = vpop.permute.xlu2 %2018 }
 0x3a3   :  { %v2050_v20 = vpop.permute.xlu2 %2049 }
 0x3ab   :  { %v2011_v17 = vpop.permute.xlu1 %2010  ;;  %v2081_v26 = vpop.permute.xlu2 %2080 }
 0x3ac   :  { %v2020_v31 = vsel %vm561_vm2, %v2011_v17, %v2013_v8  ;;  %v2287_v17 = vperm.slane %v2282_v13, 3 }
 0x3ad   :  { %2141 = vrot.lane.b32.xlu2 %v2020_v31, %s5094_s0 }
 0x3b0   :  { %v2015_v0 = vpop.permute.xlu0 %2014 }
 0x3b1   :  { %v2021_v62 = vsel %vm561_vm2, %v2013_v8, %v2015_v0  ;;  %v2286_v8 = vperm.slane %v2282_v13, 2 }
 0x3b2   :  { %2143 = vrot.lane.b32.xlu0 %v2021_v62, %s5094_s0 }
 0x3b3   :  { %v2017_v25 = vpop.permute.xlu1 %2016  ;;  %v2087_v33 = vpop.permute.xlu2 %2086 }
 0x3b4   :  { %v2022_v28 = vsel %vm561_vm2, %v2015_v0, %v2017_v25  ;;  %v2023_v11 = vsel %vm561_vm2, %v2017_v25, %v2019_v15  ;;  %v2442_v0 = vld [vmem:[#allocation2 + $0x60] ss:$8 sm:$0xf] }
 0x3b5   :  { %2145 = vrot.lane.b32.xlu1 %v2022_v28, %s5094_s0  ;;  %2147 = vrot.lane.b32.xlu2 %v2023_v11, %s5094_s0  ;;  %v2445_v62 = vperm.slane %v2442_v0, 1  ;;  %v2446_v25 = vperm.slane %v2442_v0, 2  ;;  %v2402_v28 = vld [vmem:[#allocation2 + $0x47] ss:$8 sm:$0xf] }
 0x3b6   :  { %v2405_v11 = vperm.slane %v2402_v28, 1 }
 0x3b8   :  { %v2046_v12 = vpop.permute.xlu0 %2045 }
 0x3ba   :  { %2149 = vrot.lane.b32.xlu0 %v2019_v15, %s5094_s0  ;;  %v2322_v15 = vld [vmem:[#allocation2 + $0x45] ss:$8 sm:$0xf] }
 0x3bb   :  { %v2048_v35 = vpop.permute.xlu1 %2047  ;;  %v2118_v34 = vpop.permute.xlu2 %2117  ;;  %v2324_v31 = vperm.slane %v2322_v15, 0 }
 0x3bc   :  { %v2055_v3 = vsel %vm601_vm15, %v2046_v12, %v2048_v35  ;;  %v2056_v18 = vsel %vm601_vm15, %v2048_v35, %v2050_v20  ;;  %v2406_v12 = vperm.slane %v2402_v28, 2  ;;  %v2407_v35 = vperm.slane %v2402_v28, 3 }
 0x3bd   :  { %2151 = vrot.lane.b32.xlu1 %v2055_v3, %s5094_s0  ;;  %2153 = vrot.lane.b32.xlu2 %v2056_v18, %s5094_s0  ;;  %v2444_v3 = vperm.slane %v2442_v0, 0 }
 0x3c0   :  { %v2052_v24 = vpop.permute.xlu0 %2051 }
 0x3c1   :  { %v2057_v36 = vsel %vm601_vm15, %v2050_v20, %v2052_v24  ;;  %v2447_v20 = vperm.slane %v2442_v0, 3 }
 0x3c2   :  { %2155 = vrot.lane.b32.xlu0 %v2057_v36, %s5094_s0 }
 0x3c3   :  { %v2054_v54 = vpop.permute.xlu1 %2053  ;;  %v2124_v63 = vpop.permute.xlu2 %2123 }
 0x3c4   :  { %v2058_v10 = vsel %vm601_vm15, %v2052_v24, %v2054_v54 }
 0x3c5   :  { %2157 = vrot.lane.b32.xlu1 %v2058_v10, %s5094_s0  ;;  %2159 = vrot.lane.b32.xlu2 %v2054_v54, %s5094_s0 }
 0x3c8   :  { %v2083_v19 = vpop.permute.xlu0 %2082 }
 0x3c9   :  { %v2090_v21 = vsel %vm641_vm5, %v2081_v26, %v2083_v19  ;;  %v2362_v26 = vld [vmem:[#allocation2 + $0x46] ss:$8 sm:$0xf] }
 0x3ca   :  { %2161 = vrot.lane.b32.xlu0 %v2090_v21, %s5094_s0  ;;  %v2365_v24 = vperm.slane %v2362_v26, 1  ;;  %v2366_v36 = vperm.slane %v2362_v26, 2  ;;  %v2367_v54 = vperm.slane %v2362_v26, 3  ;;  %v2326_v21 = vperm.slane %v2322_v15, 2 }
 0x3cb   :  { %v2085_v14 = vpop.permute.xlu1 %2084  ;;  %v6553_v18 = vpop.permute.xlu2 %2135 }
 0x3cc   :  { %v2091_v7 = vsel %vm641_vm5, %v2083_v19, %v2085_v14  ;;  %v2092_v58 = vsel %vm641_vm5, %v2085_v14, %v2087_v33  ;;  %v2325_v19 = vperm.slane %v2322_v15, 1  ;;  %v194_v14 = vpop.f32.mrf.mxu1 }
 0x3cd   :  { %2163 = vrot.lane.b32.xlu1 %v2091_v7, %s5094_s0  ;;  %2165 = vrot.lane.b32.xlu2 %v2092_v58, %s5094_s0 }
 0x3d0   :  { %v2089_v30 = vpop.permute.xlu0 %2088 }
 0x3d1   :  { %v2093_v55 = vsel %vm641_vm5, %v2087_v33, %v2089_v30  ;;  %v2404_v33 = vperm.slane %v2402_v28, 0 }
 0x3d2   :  { %2167 = vrot.lane.b32.xlu0 %v2093_v55, %s5094_s0  ;;  %v2364_v55 = vperm.slane %v2362_v26, 0 }
 0x3d3   :  { %v2116_v43 = vpop.permute.xlu1 %2115 }
 0x3d4   :  { %v2125_v23 = vsel %vm681_vm3, %v2116_v43, %v2118_v34  ;;  %v258_v43 = vpop.f32.mrf.mxu3  ;;  %v197_v13 = vpop.f32.mrf.mxu1 }
 0x3d5   :  { %2169 = vrot.lane.b32.xlu1 %v2089_v30, %s5094_s0  ;;  %2171 = vrot.lane.b32.xlu2 %v2125_v23, %s5094_s0  ;;  %v2327_v30 = vperm.slane %v2322_v15, 3  ;;  %v8448_v23 = vld [vmem:[#allocation12_spill] sm:$0xff]  ;;  %v8449_v15 = vld [vmem:[#allocation10_spill] sm:$0xff] }
 0x3d8   :  { %v2120_v53 = vpop.permute.xlu0 %2119 }
 0x3d9   :  { %v2126_v59 = vsel %vm681_vm3, %v2118_v34, %v2120_v53  ;;  %v226_v34 = vpop.f32.mrf.mxu2 }
 0x3da   :  { %2173 = vrot.lane.b32.xlu0 %v2126_v59, %s5094_s0 }
 0x3db   :  { %v2122_v40 = vpop.permute.xlu1 %2121 }
 0x3dc   :  { %v2127_v49 = vsel %vm681_vm3, %v2120_v53, %v2122_v40  ;;  %v2128_v48 = vsel %vm681_vm3, %v2122_v40, %v2124_v63  ;;  %v195_v53 = vadd.f32 %v194_v14, %v8448_v23  ;;  %v227_v40 = vadd.f32 %v226_v34, %v8448_v23 }
 0x3dd   :  { %2175 = vrot.lane.b32.xlu1 %v2127_v49, %s5094_s0  ;;  %2177 = vrot.lane.b32.xlu2 %v2128_v48, %s5094_s0  ;;  %v259_v49 = vadd.f32 %v258_v43, %v8448_v23 }
 0x3e0   :  { %v6560_v58 = vpop.permute.xlu0 %2131 }
 0x3e1   :  { %v229_v0 = vpop.f32.mrf.mxu2 }
 0x3e2   :  { %2179 = vrot.lane.b32.xlu0 %v2124_v63, %s5094_s0  ;;  %v277_v63 = vmax.f32 %v195_v53, 0.0  ;;  %v230_v28 = vadd.f32 %v229_v0, %v8449_v15 }
 0x3e3   :  { %v6564_v59 = vpop.permute.xlu1 %2133 }
 0x3e5   :  { %2288 = vrot.lane.b32.xlu1 %v2284_v61, %s5095_s17  ;;  %2290 = vrot.lane.b32.xlu2 %v2285_v57, %s5095_s17  ;;  %v162_v61 = vpop.f32.mrf.mxu0  ;;  %v278_v57 = vmax.f32 %v227_v40, 0.0 }
 0x3ea   :  { %2292 = vrot.lane.b32.xlu0 %v2286_v8, %s5095_s17  ;;  %v279_v8 = vmax.f32 %v259_v49, 0.0 }
 0x3ed   :  { %2294 = vrot.lane.b32.xlu1 %v2287_v17, %s5095_s17  ;;  %2328 = vrot.lane.b32.xlu2 %v2324_v31, %s5096_s20  ;;  %v198_v17 = vadd.f32 %v197_v13, %v8449_v15  ;;  %v6573_v31 = vpop.permute.xlu0 %2137 }
 0x3f2   :  { %2450 = vrot.lane.b32.xlu0 %v2445_v62, %s5097_s25  ;;  %v261_v62 = vpop.f32.mrf.mxu3 }
 0x3f5   :  { %2452 = vrot.lane.b32.xlu1 %v2446_v25, %s5097_s25  ;;  %2454 = vrot.lane.b32.xlu2 %v2447_v20, %s5097_s25  ;;  %v6577_v25 = vpop.permute.xlu1 %2139  ;;  %v281_v20 = vmax.f32 %v198_v17, 0.0 }
 0x3fa   :  { %2410 = vrot.lane.b32.xlu0 %v2405_v11, %s5098_s27  ;;  %v262_v11 = vadd.f32 %v261_v62, %v8449_v15 }
 0x3fc   :  { %v283_v26 = vmax.f32 %v262_v11, 0.0 }
 0x3fd   :  { %2412 = vrot.lane.b32.xlu1 %v2406_v12, %s5098_s27  ;;  %2414 = vrot.lane.b32.xlu2 %v2407_v35, %s5098_s27  ;;  %v163_v35 = vadd.f32 %v162_v61, %v8448_v23 }
 0x402   :  { %2448 = vrot.lane.b32.xlu0 %v2444_v3, %s5097_s25  ;;  %v282_v3 = vmax.f32 %v230_v28, 0.0 }
 0x405   :  { %2370 = vrot.lane.b32.xlu1 %v2365_v24, %s5099_s28  ;;  %2372 = vrot.lane.b32.xlu2 %v2366_v36, %s5099_s28  ;;  %v165_v36 = vpop.f32.mrf.mxu0 }
 0x407   :  { %v6555_v10 = vpop.permute.xlu2 %2141 }
 0x40a   :  { %2374 = vrot.lane.b32.xlu0 %v2367_v54, %s5099_s28 }
 0x40d   :  { %2408 = vrot.lane.b32.xlu1 %v2404_v33, %s5098_s27  ;;  %2330 = vrot.lane.b32.xlu2 %v2325_v19, %s5096_s20  ;;  %v276_v33 = vmax.f32 %v163_v35, 0.0  ;;  %v166_v19 = vadd.f32 %v165_v36, %v8449_v15 }
 0x40f   :  { %v6558_v7 = vpop.permute.xlu2 %2147  ;;  %v280_v14 = vmax.f32 %v166_v19, 0.0 }
 0x412   :  { %2332 = vrot.lane.b32.xlu0 %v2326_v21, %s5096_s20 }
 0x415   :  { %2334 = vrot.lane.b32.xlu1 %v2327_v30, %s5096_s20  ;;  %2368 = vrot.lane.b32.xlu2 %v2364_v55, %s5099_s28  ;;  %v690_v55 = vld [vmem:[%s8202_s4] sm:$0xf] }
 0x416   :  { %4911 = vmatmul.msk.bf16.vlgmr.msra.gmra.mxu0 %vm1145_vm7, %v690_v55  ;;  %4912 = vmatmul.msk.bf16.vlgmr.msra.gmra.mxu1 %vm1145_vm7, %v690_v55 }
 0x417   :  { %v6569_v48 = vpop.permute.xlu2 %2153  ;;  %4913 = vmatmul.msk.bf16.vlgmr.msra.gmra.mxu2 %vm1145_vm7, %v690_v55  ;;  %4914 = vmatmul.msk.bf16.vlgmr.msra.gmra.mxu3 %vm1145_vm7, %v690_v55 }
 0x41a   :  { %2818 = vrot.lane.b32.xlu0 %v277_v63, %s5080_s3 }
 0x41d   :  { %2820 = vrot.lane.b32.xlu1 %v278_v57, %s5080_s3  ;;  %2822 = vrot.lane.b32.xlu2 %v279_v8, %s5080_s3 }
 0x41f   :  { %v6581_v12 = vpop.permute.xlu2 %2159 }
 0x422   :  { %2826 = vrot.lane.b32.xlu0 %v281_v20, %s5080_s3 }
 0x424   :  { %v6585_v24 = vpop.permute.xlu0 %2143 }
 0x425   :  { %2828 = vrot.lane.b32.xlu1 %v282_v3, %s5080_s3  ;;  %2830 = vrot.lane.b32.xlu2 %v283_v26, %s5080_s3 }
 0x427   :  { %v6589_v54 = vpop.permute.xlu1 %2145  ;;  %v2166_v21 = vpop.permute.xlu2 %2165 }
 0x42a   :  { %2816 = vrot.lane.b32.xlu0 %v276_v33, %s5080_s3 }
 0x42c   :  { %v6593_v30 = vpop.permute.xlu0 %2149 }
 0x42d   :  { %2824 = vrot.lane.b32.xlu1 %v280_v14, %s5080_s3 }
 0x42f   :  { %v2152_v34 = vpop.permute.xlu1 %2151  ;;  %v2172_v43 = vpop.permute.xlu2 %2171 }
 0x430   :  { %v2190_v19 = vsel %vm1145_vm7, %v2152_v34, %v6569_v48  ;;  %v2186_v34 = vsel %vm1145_vm7, %v6555_v10, %v6585_v24  ;;  %v2182_v10 = vsel %vm1145_vm7, %v6560_v58, %v6564_v59  ;;  %v2183_v58 = vsel %vm1145_vm7, %v6564_v59, %v6553_v18 }
 0x434   :  { %v2156_v23 = vpop.permute.xlu0 %2155 }
 0x437   :  { %v2158_v53 = vpop.permute.xlu1 %2157  ;;  %v2178_v63 = vpop.permute.xlu2 %2177 }
 0x43c   :  { %v2162_v40 = vpop.permute.xlu0 %2161 }
 0x43f   :  { %v2164_v49 = vpop.permute.xlu1 %2163  ;;  %v6603_v13 = vpop.permute.xlu2 %2290 }
 0x440   :  { %v2194_v20 = vsel %vm1145_vm7, %v2162_v40, %v2164_v49  ;;  %v2195_v40 = vsel %vm1145_vm7, %v2164_v49, %v2166_v21 }
 0x444   :  { %v2168_v61 = vpop.permute.xlu0 %2167 }
 0x447   :  { %v2170_v57 = vpop.permute.xlu1 %2169  ;;  %v6605_v8 = vpop.permute.xlu2 %2328 }
 0x44c   :  { %v2174_v15 = vpop.permute.xlu0 %2173 }
 0x44d   :  { %v2198_v17 = vsel %vm1145_vm7, %v2172_v43, %v2174_v15 }
 0x44e   :  { %2228 = vmatpush.bf16.msra.mxu0 %v2198_v17 }
 0x44f   :  { %v2176_v0 = vpop.permute.xlu1 %2175  ;;  %v6608_v62 = vpop.permute.xlu2 %2454 }
 0x450   :  { %v2469_v28 = vmul.f32 %v6608_v62, %v5573_v29  ;;  %v2474_v11 = vmul.f32 %v6608_v62, %v5569_v47  ;;  %v2199_v35 = vsel %vm1145_vm7, %v2174_v15, %v2176_v0  ;;  %v2200_v3 = vsel %vm1145_vm7, %v2176_v0, %v2178_v63 }
 0x451   :  { %2241 = vmatpush.bf16.msra.mxu1 %v2199_v35  ;;  %2254 = vmatpush.bf16.msra.mxu2 %v2200_v3  ;;  %v2196_v15 = vsel %vm1145_vm7, %v2166_v21, %v2168_v61  ;;  %v2192_v21 = vsel %vm1145_vm7, %v2156_v23, %v2158_v53 }
 0x452   :  { %2229 = vmatpush.bf16.msra.mxu0 %v2194_v20  ;;  %v2477_v26 = vpack.c.bf16 %v2469_v28, %v2469_v28  ;;  %v2480_v36 = vpack.c.bf16 %v2474_v11, %v2474_v11  ;;  %v2197_v11 = vsel %vm1145_vm7, %v2168_v61, %v2170_v57  ;;  %v2193_v61 = vsel %vm1145_vm7, %v2158_v53, %v6581_v12 }
 0x453   :  { %v2189_v12 = vsel %vm1145_vm7, %v6558_v7, %v6593_v30  ;;  %v2185_v53 = vsel %vm1145_vm7, %v6573_v31, %v6577_v25 }
 0x454   :  { %v2180_v33 = vpop.permute.xlu0 %2179  ;;  %v2617_v14 = vunpack.c.l.b16 %v2477_v26  ;;  %v2622_v55 = vunpack.c.l.b16 %v2480_v36 }
 0x455   :  { %v2201_v43 = vsel %vm1145_vm7, %v2178_v63, %v2180_v33  ;;  %2242 = vmatpush.bf16.msra.mxu1 %v2195_v40  ;;  %2255 = vmatpush.bf16.msra.mxu2 %v2196_v15  ;;  %v2191_v63 = vsel %vm1145_vm7, %v6569_v48, %v2156_v23  ;;  %v2187_v48 = vsel %vm1145_vm7, %v6585_v24, %v6589_v54 }
 0x456   :  { %2230 = vmatpush.bf16.msra.mxu0 %v2190_v19  ;;  %2267 = vmatpush.bf16.msra.mxu3 %v2201_v43  ;;  %v2627_v17 = vpack.c.b16 %v2622_v55, %v2617_v14  ;;  %v2188_v23 = vsel %vm1145_vm7, %v6589_v54, %v6558_v7  ;;  %v2184_v24 = vsel %vm1145_vm7, %v6553_v18, %v6573_v31 }
 0x457   :  { %v6622_v0 = vpop.permute.xlu1 %2288  ;;  %v2415_v20 = vpop.permute.xlu2 %2414 }
 0x458   :  { %v2429_v28 = vmul.f32 %v2415_v20, %v5573_v29  ;;  %2636 = vrot.lane.b32.xlu1 %v2627_v17, %s5085_s23  ;;  %v2434_v49 = vmul.f32 %v2415_v20, %v5569_v47 }
 0x459   :  { %2243 = vmatpush.bf16.msra.mxu1 %v2191_v63  ;;  %2256 = vmatpush.bf16.msra.mxu2 %v2192_v21 }
 0x45a   :  { %2231 = vmatpush.bf16.msra.mxu0 %v2186_v34  ;;  %v2437_v35 = vpack.c.bf16 %v2429_v28, %v2429_v28  ;;  %2268 = vmatpush.bf16.msra.mxu3 %v2197_v11  ;;  %v2440_v3 = vpack.c.bf16 %v2434_v49, %v2434_v49 }
 0x45c   :  { %v6634_v26 = vpop.permute.xlu0 %2292  ;;  %v2582_v36 = vunpack.c.l.b16 %v2437_v35  ;;  %v2587_v33 = vunpack.c.l.b16 %v2440_v3 }
 0x45d   :  { %2244 = vmatpush.bf16.msra.mxu1 %v2187_v48  ;;  %2257 = vmatpush.bf16.msra.mxu2 %v2188_v23 }
 0x45e   :  { %2232 = vmatpush.bf16.msra.mxu0 %v2182_v10  ;;  %2269 = vmatpush.bf16.msra.mxu3 %v2193_v61  ;;  %v2592_v19 = vpack.c.b16 %v2587_v33, %v2582_v36 }
 0x45f   :  { %v6647_v57 = vpop.permute.xlu1 %2294  ;;  %v2373_v31 = vpop.permute.xlu2 %2372 }
 0x460   :  { %2601 = vrot.lane.b32.xlu1 %v2592_v19, %s5084_s22 }
 0x461   :  { %2245 = vmatpush.bf16.msra.mxu1 %v2183_v58  ;;  %2258 = vmatpush.bf16.msra.mxu2 %v2184_v24 }
 0x462   :  { %2270 = vmatpush.bf16.msra.mxu3 %v2189_v12 }
 0x464   :  { %v2451_v54 = vpop.permute.xlu0 %2450 }
 0x466   :  { %2271 = vmatpush.bf16.msra.mxu3 %v2185_v53 }
 0x467   :  { %v2453_v59 = vpop.permute.xlu1 %2452 }
 0x468   :  { %v2458_v14 = vsel %vm2456_vm9, %v2451_v54, %v2453_v59  ;;  %v2459_v55 = vsel %vm2456_vm9, %v2453_v59, %v6608_v62 }
 0x469   :  { %v2467_v18 = vmul.f32 %v2458_v14, %v5525_v37  ;;  %v2468_v43 = vmul.f32 %v2459_v55, %v5530_v32  ;;  %v2472_v7 = vmul.f32 %v2458_v14, %v5534_v52  ;;  %v2473_v30 = vmul.f32 %v2459_v55, %v5515_v56 }
 0x46b   :  { %v2476_v40 = vpack.c.bf16 %v2468_v43, %v2467_v18  ;;  %v2479_v15 = vpack.c.bf16 %v2473_v30, %v2472_v7  ;;  %v2331_v18 = vpop.permute.xlu2 %2330 }
 0x46c   :  { %v2411_v17 = vpop.permute.xlu0 %2410 }
 0x46d   :  { %v2615_v25 = vunpack.c.l.b16 %v2476_v40  ;;  %v2616_v28 = vunpack.c.h.b16 %v2476_v40  ;;  %v2620_v34 = vunpack.c.l.b16 %v2479_v15  ;;  %v2621_v63 = vunpack.c.h.b16 %v2479_v15 }
 0x46f   :  { %v2413_v49 = vpop.permute.xlu1 %2412  ;;  %v2626_v21 = vpack.c.b16 %v2621_v63, %v2616_v28  ;;  %v2625_v62 = vpack.c.b16 %v2620_v34, %v2615_v25 }
 0x470   :  { %v2418_v11 = vsel %vm2416_vm10, %v2411_v17, %v2413_v49  ;;  %v2419_v35 = vsel %vm2416_vm10, %v2413_v49, %v2415_v20 }
 0x471   :  { %v2427_v3 = vmul.f32 %v2418_v11, %v5525_v37  ;;  %v2428_v36 = vmul.f32 %v2419_v35, %v5530_v32  ;;  %v2432_v10 = vmul.f32 %v2418_v11, %v5534_v52  ;;  %v2433_v48 = vmul.f32 %v2419_v35, %v5515_v56  ;;  %2634 = vrot.lane.b32.xlu0 %v2626_v21, %s5085_s23 }
 0x472   :  { %2632 = vrot.lane.b32.xlu2 %v2625_v62, %s5085_s23 }
 0x473   :  { %v2436_v33 = vpack.c.bf16 %v2428_v36, %v2427_v3  ;;  %v2439_v23 = vpack.c.bf16 %v2433_v48, %v2432_v10 }
 0x474   :  { %v2449_v61 = vpop.permute.xlu0 %2448 }
 0x475   :  { %v2457_v19 = vsel %vm2456_vm9, %v2449_v61, %v2451_v54  ;;  %v2465_v58 = vmul.f32 %v2449_v61, %v5412_v27  ;;  %v2470_v20 = vmul.f32 %v2449_v61, %v5417_v9  ;;  %v2580_v24 = vunpack.c.l.b16 %v2436_v33  ;;  %v2369_v61 = vpop.permute.xlu2 %2368 }
 0x476   :  { %v2581_v12 = vunpack.c.h.b16 %v2436_v33  ;;  %v2585_v53 = vunpack.c.l.b16 %v2439_v23  ;;  %v2586_v59 = vunpack.c.h.b16 %v2439_v23  ;;  %v2466_v14 = vmul.f32 %v2457_v19, %v5403_v2 }
 0x477   :  { %v2471_v55 = vmul.f32 %v2457_v19, %v5427_v1  ;;  %v2371_v43 = vpop.permute.xlu1 %2370  ;;  %vm2296_vm9 = vcmask 523264  }
 0x478   :  { %v2591_v7 = vpack.c.b16 %v2586_v59, %v2581_v12  ;;  %v2590_v30 = vpack.c.b16 %v2585_v53, %v2580_v24  ;;  %v6682_v40 = vpack.c.bf16 %v2466_v14, %v2465_v58  ;;  %v2378_v54 = vsel %vm2376_vm11, %v2371_v43, %v2373_v31 }
 0x479   :  { %v6684_v15 = vpack.c.bf16 %v2471_v55, %v2470_v20  ;;  %v2387_v62 = vmul.f32 %v2378_v54, %v5525_v37  ;;  %v2392_v11 = vmul.f32 %v2378_v54, %v5534_v52 }
 0x47a   :  { %2599 = vrot.lane.b32.xlu0 %v2591_v7, %s5084_s22  ;;  %2597 = vrot.lane.b32.xlu2 %v2590_v30, %s5084_s22  ;;  %v2614_v28 = vunpack.c.h.b16 %v6682_v40 }
 0x47b   :  { %v2619_v21 = vunpack.c.h.b16 %v6684_v15 }
 0x47c   :  { %v2375_v25 = vpop.permute.xlu0 %2374 }
 0x47d   :  { %v2379_v34 = vsel %vm2376_vm11, %v2373_v31, %v2375_v25  ;;  %v2389_v63 = vmul.f32 %v2375_v25, %v5573_v29  ;;  %v2394_v49 = vmul.f32 %v2375_v25, %v5569_v47  ;;  %v2624_v31 = vpack.c.b16 %v2619_v21, %v2614_v28 }
 0x47e   :  { %v2388_v35 = vmul.f32 %v2379_v34, %v5530_v32  ;;  %v2393_v3 = vmul.f32 %v2379_v34, %v5515_v56  ;;  %v2337_v21 = vsel %vm2336_vm12, %v6605_v8, %v2331_v18 }
 0x47f   :  { %v2397_v36 = vpack.c.bf16 %v2389_v63, %v2389_v63  ;;  %v2400_v10 = vpack.c.bf16 %v2394_v49, %v2394_v49  ;;  %v2409_v48 = vpop.permute.xlu1 %2408  ;;  %v2345_v63 = vmul.f32 %v6605_v8, %v5412_v27 }
 0x480   :  { %v2396_v33 = vpack.c.bf16 %v2388_v35, %v2387_v62  ;;  %v2399_v23 = vpack.c.bf16 %v2393_v3, %v2392_v11  ;;  %v2417_v19 = vsel %vm2416_vm10, %v2409_v48, %v2411_v17  ;;  %v2425_v58 = vmul.f32 %v2409_v48, %v5412_v27 }
 0x481   :  { %v2430_v20 = vmul.f32 %v2409_v48, %v5417_v9  ;;  %v2426_v24 = vmul.f32 %v2417_v19, %v5403_v2  ;;  %v2431_v12 = vmul.f32 %v2417_v19, %v5427_v1  ;;  %v2547_v14 = vunpack.c.l.b16 %v2397_v36 }
 0x482   :  { %2630 = vrot.lane.b32.xlu2 %v2624_v31, %s5085_s23  ;;  %v2546_v53 = vunpack.c.h.b16 %v2396_v33  ;;  %v2551_v59 = vunpack.c.h.b16 %v2399_v23  ;;  %v2552_v55 = vunpack.c.l.b16 %v2400_v10  ;;  %v2545_v30 = vunpack.c.l.b16 %v2396_v33 }
 0x483   :  { %v2550_v54 = vunpack.c.l.b16 %v2399_v23  ;;  %v6704_v25 = vpack.c.bf16 %v2426_v24, %v2425_v58  ;;  %v6706_v17 = vpack.c.bf16 %v2431_v12, %v2430_v20  ;;  %v2377_v62 = vsel %vm2376_vm11, %v2369_v61, %v2371_v43 }
 0x484   :  { %v2333_v7 = vpop.permute.xlu0 %2332  ;;  %v2556_v28 = vpack.c.b16 %v2551_v59, %v2546_v53  ;;  %v2557_v35 = vpack.c.b16 %v2552_v55, %v2547_v14  ;;  %v2350_v19 = vmul.f32 %v6605_v8, %v5417_v9  ;;  %v2346_v58 = vmul.f32 %v2337_v21, %v5403_v2  ;;  %v2823_v59 = vpop.permute.xlu2 %2822 }
 0x485   :  { %v2555_v34 = vpack.c.b16 %v2550_v54, %v2545_v30  ;;  %v2338_v49 = vsel %vm2336_vm12, %v2331_v18, %v2333_v7  ;;  %v2579_v3 = vunpack.c.h.b16 %v6704_v25  ;;  %v2584_v33 = vunpack.c.h.b16 %v6706_v17 }
 0x486   :  { %2564 = vrot.lane.b32.xlu1 %v2556_v28, %s5082_s21  ;;  %v2347_v23 = vmul.f32 %v2338_v49, %v5525_v37  ;;  %v2352_v31 = vmul.f32 %v2338_v49, %v5534_v52  ;;  %v2351_v20 = vmul.f32 %v2337_v21, %v5427_v1  ;;  %v2385_v24 = vmul.f32 %v2369_v61, %v5412_v27 }
 0x487   :  { %2562 = vrot.lane.b32.xlu0 %v2555_v34, %s5082_s21  ;;  %v2335_v11 = vpop.permute.xlu1 %2334  ;;  %v2386_v12 = vmul.f32 %v2377_v62, %v5403_v2  ;;  %v2391_v53 = vmul.f32 %v2377_v62, %v5427_v1  ;;  %v2589_v8 = vpack.c.b16 %v2584_v33, %v2579_v3  ;;  %vm3896_vm10 = vcmask 195584  }
 0x488   :  { %v2339_v36 = vsel %vm2336_vm12, %v2333_v7, %v2335_v11  ;;  %v2349_v10 = vmul.f32 %v2335_v11, %v5573_v29  ;;  %v2354_v48 = vmul.f32 %v2335_v11, %v5569_v47  ;;  %v2390_v7 = vmul.f32 %v2369_v61, %v5417_v9 }
 0x489   :  { %v2348_v18 = vmul.f32 %v2339_v36, %v5530_v32  ;;  %v2353_v43 = vmul.f32 %v2339_v36, %v5515_v56  ;;  %v6733_v36 = vpack.c.bf16 %v2346_v58, %v2345_v63  ;;  %v6737_v38 = vpack.c.bf16 %v2386_v12, %v2385_v24  ;;  %v8450_v24 = vld [vmem:[#allocation69_spill] sm:$0xff] }
 0x48a   :  { %2566 = vrot.lane.b32.xlu2 %v2557_v35, %s5082_s21  ;;  %v2357_v30 = vpack.c.bf16 %v2349_v10, %v2349_v10  ;;  %v2360_v54 = vpack.c.bf16 %v2354_v48, %v2354_v48  ;;  %v6735_v35 = vpack.c.bf16 %v2351_v20, %v2350_v19  ;;  %v6739_v62 = vpack.c.bf16 %v2391_v53, %v2390_v7  ;;  %v8451_v53 = vld [vmem:[#allocation71_spill] sm:$0xff] }
 0x48b   :  { %v2356_v14 = vpack.c.bf16 %v2348_v18, %v2347_v23  ;;  %v2359_v55 = vpack.c.bf16 %v2353_v43, %v2352_v31  ;;  %v2509_v31 = vunpack.c.h.b16 %v6733_v36  ;;  %v2544_v43 = vunpack.c.h.b16 %v6737_v38 }
 0x48c   :  { %v6731_v28 = vpop.permute.xlu0 %2818  ;;  %v2512_v3 = vunpack.c.l.b16 %v2357_v30  ;;  %v2517_v33 = vunpack.c.l.b16 %v2360_v54  ;;  %v2514_v18 = vunpack.c.h.b16 %v6735_v35  ;;  %v2549_v19 = vunpack.c.h.b16 %v6739_v62  ;;  %v2831_v58 = vpop.permute.xlu2 %2830 }
 0x48d   :  { %v2511_v34 = vunpack.c.h.b16 %v2356_v14  ;;  %v2516_v49 = vunpack.c.h.b16 %v2359_v55  ;;  %v2510_v21 = vunpack.c.l.b16 %v2356_v14  ;;  %v2515_v11 = vunpack.c.l.b16 %v2359_v55 }
 0x48e   :  { %v2522_v20 = vpack.c.b16 %v2517_v33, %v2512_v3  ;;  %v2519_v30 = vpack.c.b16 %v2514_v18, %v2509_v31  ;;  %v2554_v54 = vpack.c.b16 %v2549_v19, %v2544_v43  ;;  %v6777_v3 = vsel %vm308_vm4, %v2823_v59, 0.0  ;;  %v8452_v18 = vld [vmem:[#allocation70_spill] sm:$0xff] }
 0x48f   :  { %2595 = vrot.lane.b32.xlu0 %v2589_v8, %s5084_s22  ;;  %v2821_v61 = vpop.permute.xlu1 %2820  ;;  %v2521_v10 = vpack.c.b16 %v2516_v49, %v2511_v34  ;;  %v2520_v48 = vpack.c.b16 %v2515_v11, %v2510_v21  ;;  %v6761_v8 = vsel %vm308_vm4, %v2831_v58, 0.0  ;;  %v2613_v21 = vunpack.c.l.b16 %v6682_v40 }
 0x490   :  { %v6745_v23 = vsel %vm308_vm4, %v6731_v28, %v2821_v61  ;;  %v6748_v63 = vsel %vm308_vm4, %v2821_v61, %v2823_v59  ;;  %v2618_v11 = vunpack.c.l.b16 %v6684_v15  ;;  %v2578_v33 = vunpack.c.l.b16 %v6704_v25 }
 0x491   :  { %2527 = vrot.lane.b32.xlu1 %v2520_v48, %s5083_s1  ;;  %v3026_v12 = vmul.f32 %v6745_v23, %v8450_v24  ;;  %v3027_v14 = vmul.f32 %v6748_v63, %v8451_v53  ;;  %v2583_v40 = vunpack.c.l.b16 %v6706_v17  ;;  %v3033_v15 = vmul.f32 %v6761_v8, %v8452_v18  ;;  %v8453_v17 = vld [vmem:[#allocation52_spill] sm:$0xff] }
 0x492   :  { %2529 = vrot.lane.b32.xlu2 %v2521_v10, %s5083_s1  ;;  %v2623_v43 = vpack.c.b16 %v2618_v11, %v2613_v21 }
 0x493   :  { %v3035_v48 = vpack.c.bf16 %v3027_v14, %v3026_v12  ;;  %v2588_v59 = vpack.c.b16 %v2583_v40, %v2578_v33  ;;  %v3039_v14 = vpack.c.bf16 %v3033_v15, %v3033_v15  ;;  %v2543_v40 = vunpack.c.l.b16 %v6737_v38  ;;  %v8455_v15 = vld [vmem:[#allocation35_spill] sm:$0xff] }
 0x494   :  { %v2827_v55 = vpop.permute.xlu0 %2826 }
 0x495   :  { %v3104_v19 = vunpack.c.l.b16 %v3035_v48  ;;  %v3105_v11 = vunpack.c.h.b16 %v3035_v48  ;;  %v3012_v48 = vmul.f32 %v6777_v3, %v8455_v15 }
 0x497   :  { %2531 = vrot.lane.b32.xlu0 %v2522_v20, %s5083_s1  ;;  %v2829_v7 = vpop.permute.xlu1 %2828  ;;  %v3028_v20 = vmul.f32 %v6777_v3, %v8452_v18  ;;  %v8467_v18 = vld [vmem:[#allocation21_spill] sm:$0xff] }
 0x498   :  { %v6764_v34 = vsel %vm308_vm4, %v2827_v55, %v2829_v7  ;;  %v6767_v49 = vsel %vm308_vm4, %v2829_v7, %v2831_v58 }
 0x499   :  { %2560 = vrot.lane.b32.xlu1 %v2554_v54, %s5082_s21  ;;  %v3031_v61 = vmul.f32 %v6764_v34, %v8450_v24  ;;  %v3032_v10 = vmul.f32 %v6767_v49, %v8451_v53  ;;  %v3036_v7 = vpack.c.bf16 %v3028_v20, %v3028_v20  ;;  %v8454_v54 = vld [vmem:[#allocation34_spill] sm:$0xff] }
 0x49a   :  { %2525 = vrot.lane.b32.xlu2 %v2519_v30, %s5083_s1  ;;  %v3015_v30 = vmul.f32 %v6764_v34, %v8453_v17  ;;  %v3016_v21 = vmul.f32 %v6767_v49, %v8454_v54  ;;  %v3011_v33 = vmul.f32 %v6748_v63, %v8454_v54 }
 0x49b   :  { %v3038_v31 = vpack.c.bf16 %v3032_v10, %v3031_v61  ;;  %v3111_v61 = vunpack.c.l.b16 %v3039_v14  ;;  %v3010_v10 = vmul.f32 %v6745_v23, %v8453_v17  ;;  %v3106_v20 = vunpack.c.l.b16 %v3036_v7 }
 0x49d   :  { %v3109_v58 = vunpack.c.l.b16 %v3038_v31  ;;  %v3110_v25 = vunpack.c.h.b16 %v3038_v31  ;;  %v2548_v31 = vunpack.c.l.b16 %v6739_v62  ;;  %v3116_v14 = vpack.c.b16 %v3111_v61, %v3106_v20  ;;  %v8458_v61 = vld [vmem:[#allocation33_spill] sm:$0xff] }
 0x49e   :  { %v3019_v17 = vpack.c.bf16 %v3011_v33, %v3010_v10  ;;  %v8459_v33 = vld [vmem:[#allocation53_spill] sm:$0xff] }
 0x49f   :  { %2628 = vrot.lane.b32.xlu0 %v2623_v43, %s5085_s23  ;;  %v3114_v12 = vpack.c.b16 %v3109_v58, %v3104_v19  ;;  %v3017_v43 = vmul.f32 %v6761_v8, %v8455_v15  ;;  %v2825_v19 = vpop.permute.xlu1 %2824  ;;  %v3115_v58 = vpack.c.b16 %v3110_v25, %v3105_v11  ;;  %v2553_v62 = vpack.c.b16 %v2548_v31, %v2543_v40 }
 0x4a0   :  { %v6805_v54 = vsel %vm308_vm4, %v2825_v19, %v2827_v55  ;;  %v6808_v38 = vsel %vm308_vm4, 0.0, %v2825_v19  ;;  %v3069_v55 = vunpack.c.l.b16 %v3019_v17 }
 0x4a1   :  { %2593 = vrot.lane.b32.xlu1 %v2588_v59, %s5084_s22  ;;  %v3022_v59 = vpack.c.bf16 %v3016_v21, %v3015_v30  ;;  %v3023_v53 = vpack.c.bf16 %v3017_v43, %v3017_v43  ;;  %v3020_v21 = vpack.c.bf16 %v3012_v48, %v3012_v48  ;;  %v3029_v10 = vmul.f32 %v6808_v38, %v8458_v61  ;;  %v8460_v43 = vld [vmem:[#allocation32_spill] sm:$0xff] }
 0x4a2   :  { %3121 = vrot.lane.b32.xlu2 %v3114_v12, %s5082_s21  ;;  %v2817_v12 = vpop.permute.xlu0 %2816  ;;  %v3030_v40 = vmul.f32 %v6805_v54, %v8459_v33  ;;  %v3013_v19 = vmul.f32 %v6808_v38, %v8460_v43 }
 0x4a3   :  { %v3074_v25 = vunpack.c.l.b16 %v3022_v59  ;;  %v6813_v7 = vsel %vm308_vm4, %v2817_v12, %v6731_v28  ;;  %v6816_v30 = vsel %vm308_vm4, 0.0, %v2817_v12  ;;  %v3075_v11 = vunpack.c.h.b16 %v3022_v59  ;;  %v8461_v28 = vld [vmem:[#allocation30_spill] sm:$0xff] }
 0x4a4   :  { %8456 = vst [vmem:[#allocation46_spill] sm:$0xff] %v6813_v7  ;;  %v3076_v31 = vunpack.c.l.b16 %v3023_v53  ;;  %v3070_v12 = vunpack.c.h.b16 %v3019_v17  ;;  %v3024_v48 = vmul.f32 %v6816_v30, %v8458_v61  ;;  %v3025_v59 = vmul.f32 %v6813_v7, %v8459_v33 }
 0x4a5   :  { %8457 = vst [vmem:[#allocation47_spill] sm:$0xff] %v6816_v30  ;;  %v3079_v20 = vpack.c.b16 %v3074_v25, %v3069_v55  ;;  %v3009_v53 = vmul.f32 %v6813_v7, %v8461_v28  ;;  %v6836_v15 = vpack.c.bf16 %v3030_v40, %v3029_v10  ;;  %v2508_v55 = vunpack.c.l.b16 %v6733_v36 }
 0x4a6   :  { %v3080_v24 = vpack.c.b16 %v3075_v11, %v3070_v12  ;;  %v2513_v61 = vunpack.c.l.b16 %v6735_v35  ;;  %v2884_v46 = vmul.f32 %v6816_v30, %v8467_v18  ;;  %v2885_v16 = vmul.f32 %v6813_v7, %v8468_v60 }
 0x4a7   :  { %3123 = vrot.lane.b32.xlu0 %v3115_v58, %s5082_s21  ;;  %v3014_v58 = vmul.f32 %v6805_v54, %v8461_v28  ;;  %v8466_v28 = vld [vmem:[#allocation42_spill] sm:$0xff] }
 0x4a8   :  { %v2518_v10 = vpack.c.b16 %v2513_v61, %v2508_v55  ;;  %v8463_v55 = vld [vmem:[#allocation44_spill] sm:$0xff] }
 0x4a9   :  { %3125 = vrot.lane.b32.xlu1 %v3116_v14, %s5082_s21  ;;  %v3071_v14 = vunpack.c.l.b16 %v3020_v21  ;;  %v6838_v17 = vpack.c.bf16 %v3014_v58, %v3013_v19  ;;  %v6843_v21 = vpack.c.bf16 %v3025_v59, %v3024_v48 }
 0x4aa   :  { %2558 = vrot.lane.b32.xlu2 %v2553_v62, %s5082_s21  ;;  %v3008_v62 = vmul.f32 %v6816_v30, %v8460_v43 }
 0x4ab   :  { %v3081_v25 = vpack.c.b16 %v3076_v31, %v3071_v14  ;;  %v3073_v11 = vunpack.c.h.b16 %v6838_v17  ;;  %v3103_v40 = vunpack.c.h.b16 %v6843_v21  ;;  %v3102_v50 = vunpack.c.l.b16 %v6843_v21 }
 0x4ac   :  { %v6846_v43 = vpack.c.bf16 %v3009_v53, %v3008_v62 }
 0x4ae   :  { %v3068_v31 = vunpack.c.h.b16 %v6846_v43 }
 0x4af   :  { %3086 = vrot.lane.b32.xlu0 %v3079_v20, %s5083_s1  ;;  %v3108_v20 = vunpack.c.h.b16 %v6836_v15 }
 0x4b0   :  { %v3078_v35 = vpack.c.b16 %v3073_v11, %v3068_v31  ;;  %v8464_v11 = vld [vmem:[#allocation43_spill] sm:$0xff] }
 0x4b1   :  { %3088 = vrot.lane.b32.xlu1 %v3080_v24, %s5083_s1  ;;  %v3113_v36 = vpack.c.b16 %v3108_v20, %v3103_v40  ;;  %v8462_v24 = vld [vmem:[#allocation22_spill] sm:$0xff]  ;;  %v2891_v20 = vmul.f32 %v6764_v34, %v8463_v55  ;;  %v2886_v40 = vmul.f32 %v6745_v23, %v8463_v55  ;;  %v2887_v31 = vmul.f32 %v6748_v63, %v8464_v11 }
 0x4b2   :  { %3090 = vrot.lane.b32.xlu2 %v3081_v25, %s5083_s1  ;;  %v2893_v19 = vmul.f32 %v6761_v8, %v8462_v24  ;;  %v2888_v58 = vmul.f32 %v6777_v3, %v8462_v24 }
 0x4b4   :  { %v2899_v12 = vpack.c.bf16 %v2893_v19, %v2893_v19  ;;  %v2896_v48 = vpack.c.bf16 %v2888_v58, %v2888_v58 }
 0x4b6   :  { %v2971_v59 = vunpack.c.l.b16 %v2899_v12  ;;  %v2966_v14 = vunpack.c.l.b16 %v2896_v48  ;;  %v2895_v12 = vpack.c.bf16 %v2887_v31, %v2886_v40 }
 0x4b7   :  { %2523 = vrot.lane.b32.xlu0 %v2518_v10, %s5083_s1  ;;  %v2892_v10 = vmul.f32 %v6767_v49, %v8464_v11 }
 0x4b8   :  { %v2976_v62 = vpack.c.b16 %v2971_v59, %v2966_v14 }
 0x4b9   :  { %3119 = vrot.lane.b32.xlu1 %v3113_v36, %s5082_s21  ;;  %v2898_v36 = vpack.c.bf16 %v2892_v10, %v2891_v20  ;;  %v2871_v20 = vmul.f32 %v6748_v63, %v8466_v28  ;;  %v2876_v10 = vmul.f32 %v6767_v49, %v8466_v28 }
 0x4ba   :  { %3084 = vrot.lane.b32.xlu2 %v3078_v35, %s5083_s1 }
 0x4bb   :  { %v2970_v48 = vunpack.c.h.b16 %v2898_v36  ;;  %v2969_v59 = vunpack.c.l.b16 %v2898_v36 }
 0x4ca   :  { %v2637_v61 = vpop.permute.xlu1 %2636 }
 0x4cb   :  { %2692 = vrot.lane.b32.xlu2 %v2637_v61, %s5095_s17 }
 0x4cc   :  { %v6860_v53 = vpop.permute.xlu2 %2632 }
 0x4d3   :  { %2985 = vrot.lane.b32.xlu2 %v2976_v62, %s5082_s21  ;;  %v8465_v62 = vld [vmem:[#allocation41_spill] sm:$0xff] }
 0x4d4   :  { %v6863_v25 = vpop.permute.xlu2 %2597  ;;  %v2870_v24 = vmul.f32 %v6745_v23, %v8465_v62 }
 0x4d6   :  { %v2879_v33 = vpack.c.bf16 %v2871_v20, %v2870_v24  ;;  %v8469_v24 = vld [vmem:[#allocation19_spill] sm:$0xff] }
 0x4dc   :  { %v6878_v14 = vpop.permute.xlu2 %2630 }
 0x4e3   :  { %v2635_v35 = vpop.permute.xlu0 %2634 }
 0x4e4   :  { %v2641_v19 = vsel %vm681_vm3, %v2635_v35, %v2637_v61  ;;  %v2640_v58 = vsel %vm681_vm3, %v6860_v53, %v2635_v35  ;;  %v2875_v61 = vmul.f32 %v6764_v34, %v8465_v62  ;;  %v2965_v35 = vunpack.c.h.b16 %v2895_v12 }
 0x4e5   :  { %2690 = vrot.lane.b32.xlu1 %v2641_v19, %s5095_s17  ;;  %2688 = vrot.lane.b32.xlu0 %v2640_v58, %s5095_s17  ;;  %v2964_v19 = vunpack.c.l.b16 %v2895_v12  ;;  %v2602_v58 = vpop.permute.xlu1 %2601  ;;  %v2889_v62 = vmul.f32 %v6808_v38, %v8467_v18  ;;  %v2890_v12 = vmul.f32 %v6805_v54, %v8468_v60  ;;  %v2894_v60 = vpack.c.bf16 %v2885_v16, %v2884_v46 }
 0x4e6   :  { %v2975_v31 = vpack.c.b16 %v2970_v48, %v2965_v35  ;;  %v2882_v11 = vpack.c.bf16 %v2876_v10, %v2875_v61  ;;  %v2868_v48 = vmul.f32 %v6816_v30, %v8469_v24  ;;  %v2873_v61 = vmul.f32 %v6808_v38, %v8469_v24 }
 0x4e7   :  { %v2974_v36 = vpack.c.b16 %v2969_v59, %v2964_v19  ;;  %v8470_v59 = vld [vmem:[#allocation38_spill] sm:$0xff]  ;;  %v2930_v35 = vunpack.c.h.b16 %v2879_v33  ;;  %v3107_v19 = vunpack.c.l.b16 %v6836_v15  ;;  %v2897_v18 = vpack.c.bf16 %v2890_v12, %v2889_v62 }
 0x4e8   :  { %v2869_v20 = vmul.f32 %v6813_v7, %v8470_v59  ;;  %v2874_v10 = vmul.f32 %v6805_v54, %v8470_v59  ;;  %v2962_v59 = vunpack.c.l.b16 %v2894_v60  ;;  %v2934_v16 = vunpack.c.l.b16 %v2882_v11 }
 0x4e9   :  { %v2967_v7 = vunpack.c.l.b16 %v2897_v18  ;;  %v2968_v46 = vunpack.c.h.b16 %v2897_v18 }
 0x4ea   :  { %v2878_v28 = vpack.c.bf16 %v2869_v20, %v2868_v48  ;;  %v2881_v41 = vpack.c.bf16 %v2874_v10, %v2873_v61  ;;  %v2929_v48 = vunpack.c.l.b16 %v2879_v33 }
 0x4eb   :  { %v6917_v62 = vpack.c.b16 %v2967_v7, %v2962_v59  ;;  %v2639_v59 = vsel %vm681_vm3, %v6878_v14, %v6860_v53 }
 0x4ec   :  { %v2600_v40 = vpop.permute.xlu0 %2599  ;;  %v2927_v15 = vunpack.c.l.b16 %v2878_v28  ;;  %v2932_v30 = vunpack.c.l.b16 %v2881_v41  ;;  %v2939_v61 = vpack.c.b16 %v2934_v16, %v2929_v48  ;;  %v2299_v16 = vsel %vm2296_vm9, %v6634_v26, %v6647_v57 }
 0x4ed   :  { %v2606_v55 = vsel %vm641_vm5, %v2600_v40, %v2602_v58  ;;  %2983 = vrot.lane.b32.xlu1 %v2975_v31, %s5082_s21  ;;  %2981 = vrot.lane.b32.xlu0 %v2974_v36, %s5082_s21  ;;  %v6909_v31 = vpop.permute.xlu2 %2566  ;;  %v3112_v36 = vpack.c.b16 %v3107_v19, %v3102_v50  ;;  %v2605_v24 = vsel %vm641_vm5, %v6863_v25, %v2600_v40  ;;  %v8471_v50 = vld [vmem:[#allocation20_spill] sm:$0xff]  ;;  %v2963_v40 = vunpack.c.h.b16 %v2894_v60 }
 0x4ee   :  { %2680 = vrot.lane.b32.xlu2 %v2606_v55, %s5095_s17  ;;  %v2935_v55 = vunpack.c.h.b16 %v2882_v11  ;;  %v6919_v21 = vpack.c.b16 %v2932_v30, %v2927_v15  ;;  %v2877_v12 = vmul.f32 %v6761_v8, %v8471_v50  ;;  %v3072_v19 = vunpack.c.l.b16 %v6838_v17 }
 0x4ef   :  { %v2973_v20 = vpack.c.b16 %v2968_v46, %v2963_v40  ;;  %v3067_v46 = vunpack.c.l.b16 %v6846_v43  ;;  %v2308_v43 = vmul.f32 %v2299_v16, %v5530_v32 }
 0x4f0   :  { %v2940_v44 = vpack.c.b16 %v2935_v55, %v2930_v35  ;;  %v2883_v10 = vpack.c.bf16 %v2877_v12, %v2877_v12 }
 0x4f1   :  { %v3077_v12 = vpack.c.b16 %v3072_v19, %v3067_v46  ;;  %v2309_v46 = vmul.f32 %v6647_v57, %v5573_v29 }
 0x4f2   :  { %v2936_v30 = vunpack.c.l.b16 %v2883_v10 }
 0x4f5   :  { %2678 = vrot.lane.b32.xlu1 %v2605_v24, %s5095_s17  ;;  %3117 = vrot.lane.b32.xlu0 %v3112_v36, %s5082_s21  ;;  %v2530_v24 = vpop.permute.xlu2 %2529  ;;  %v2928_v36 = vunpack.c.h.b16 %v2878_v28  ;;  %v2313_v28 = vmul.f32 %v2299_v16, %v5515_v56 }
 0x4f6   :  { %2948 = vrot.lane.b32.xlu2 %v2940_v44, %s5083_s1  ;;  %v2872_v44 = vmul.f32 %v6777_v3, %v8471_v50 }
 0x4f8   :  { %v2880_v18 = vpack.c.bf16 %v2872_v44, %v2872_v44  ;;  %v2565_v11 = vpop.permute.xlu1 %2564 }
 0x4f9   :  { %v6928_v7 = vpop.permute.xlu0 %2562  ;;  %v2571_v55 = vsel %vm601_vm15, %v2565_v11, %v6909_v31 }
 0x4fa   :  { %v2931_v60 = vunpack.c.l.b16 %v2880_v18  ;;  %v2570_v40 = vsel %vm601_vm15, %v6928_v7, %v2565_v11  ;;  %v3388_v11 = vmul.f32 %v6748_v63, %v6443_v22 }
 0x4fc   :  { %v2941_v33 = vpack.c.b16 %v2936_v30, %v2931_v60 }
 0x4fd   :  { %2946 = vrot.lane.b32.xlu1 %v2939_v61, %s5083_s1  ;;  %2682 = vrot.lane.b32.xlu0 %v2602_v58, %s5095_s17  ;;  %v6935_v35 = vpop.permute.xlu2 %2525  ;;  %v2933_v58 = vunpack.c.h.b16 %v2881_v41  ;;  %v2298_v41 = vsel %vm2296_vm9, %v6603_v13, %v6634_v26 }
 0x4fe   :  { %2979 = vrot.lane.b32.xlu2 %v2973_v20, %s5082_s21  ;;  %v2307_v48 = vmul.f32 %v2298_v41, %v5525_v37  ;;  %v2312_v44 = vmul.f32 %v2298_v41, %v5534_v52  ;;  %v3392_v37 = vmul.f32 %v6764_v34, %v6439_v6  ;;  %v3393_v52 = vmul.f32 %v6767_v49, %v6443_v22 }
 0x4ff   :  { %v2938_v53 = vpack.c.b16 %v2933_v58, %v2928_v36 }
 0x500   :  { %v2316_v20 = vpack.c.bf16 %v2308_v43, %v2307_v48  ;;  %v2319_v61 = vpack.c.bf16 %v2313_v28, %v2312_v44  ;;  %v3377_v48 = vmul.f32 %v6767_v49, %v6409_v39 }
 0x501   :  { %v6941_v15 = vpop.permute.xlu0 %2595 }
 0x502   :  { %v2604_v18 = vsel %vm641_vm5, %v6941_v15, %v6863_v25  ;;  %v2490_v56 = vunpack.c.h.b16 %v2316_v20  ;;  %v2495_v32 = vunpack.c.h.b16 %v2319_v61  ;;  %v3387_v25 = vmul.f32 %v6745_v23, %v6439_v6 }
 0x503   :  { %v2528_v26 = vpop.permute.xlu1 %2527  ;;  %v2489_v19 = vunpack.c.l.b16 %v2316_v20  ;;  %v2494_v36 = vunpack.c.l.b16 %v2319_v61  ;;  %v3394_v61 = vmul.f32 %v6761_v8, %v6436_v45 }
 0x504   :  { %v2500_v60 = vpack.c.b16 %v2495_v32, %v2490_v56  ;;  %v3371_v56 = vmul.f32 %v6745_v23, %v6400_v5  ;;  %v3389_v32 = vmul.f32 %v6777_v3, %v6436_v45 }
 0x505   :  { %2686 = vrot.lane.b32.xlu1 %v2639_v59, %s5095_s17  ;;  %2950 = vrot.lane.b32.xlu0 %v2941_v33, %s5083_s1  ;;  %v6957_v17 = vpop.permute.xlu2 %3121  ;;  %v3399_v33 = vpack.c.bf16 %v3393_v52, %v3392_v37  ;;  %v2535_v59 = vsel %vm561_vm2, %v2528_v26, %v2530_v24  ;;  %v2499_v43 = vpack.c.b16 %v2494_v36, %v2489_v19 }
 0x506   :  { %2670 = vrot.lane.b32.xlu2 %v2571_v55, %s5095_s17  ;;  %v3396_v55 = vpack.c.bf16 %v3388_v11, %v3387_v25 }
 0x507   :  { %v3471_v58 = vunpack.c.h.b16 %v3399_v33 }
 0x508   :  { %v3466_v16 = vunpack.c.h.b16 %v3396_v55 }
 0x509   :  { %v2532_v10 = vpop.permute.xlu0 %2531 }
 0x50a   :  { %v3476_v41 = vpack.c.b16 %v3471_v58, %v3466_v16 }
 0x50d   :  { %2668 = vrot.lane.b32.xlu1 %v2570_v40, %s5095_s17  ;;  %3082 = vrot.lane.b32.xlu0 %v3077_v12, %s5083_s1  ;;  %v6972_v30 = vpop.permute.xlu2 %2558  ;;  %v6987_v12 = vpop.permute.xlu1 %2560 }
 0x50e   :  { %2944 = vrot.lane.b32.xlu2 %v2938_v53, %s5083_s1  ;;  %v2314_v53 = vmul.f32 %v6647_v57, %v5569_v47  ;;  %v2569_v29 = vsel %vm601_vm15, %v6987_v12, %v6928_v7  ;;  %v3470_v47 = vunpack.c.l.b16 %v3399_v33  ;;  %v3376_v57 = vmul.f32 %v6764_v34, %v6400_v5 }
 0x50f   :  { %v3372_v7 = vmul.f32 %v6748_v63, %v6409_v39 }
 0x510   :  { %v2320_v28 = vpack.c.bf16 %v2314_v53, %v2314_v53  ;;  %v3383_v52 = vpack.c.bf16 %v3377_v48, %v3376_v57  ;;  %v4915_v57 = vld [vmem:[%s8202_s4 + $0x8] sm:$0xf] }
 0x511   :  { %4918 = vmatmul.msk.bf16.vlgmr.msrb.gmra.mxu2 %vm1145_vm7, %v4915_v57  ;;  %4919 = vmatmul.msk.bf16.vlgmr.msrb.gmra.mxu3 %vm1145_vm7, %v4915_v57 }
 0x512   :  { %v2496_v20 = vunpack.c.l.b16 %v2320_v28  ;;  %4917 = vmatmul.msk.bf16.vlgmr.msrb.gmra.mxu1 %vm1145_vm7, %v4915_v57  ;;  %4916 = vmatmul.msk.bf16.vlgmr.msrb.gmra.mxu0 %vm1145_vm7, %v4915_v57  ;;  %v8475_v57 = vld [vmem:[#allocation66_spill] sm:$0xff] }
 0x515   :  { %2676 = vrot.lane.b32.xlu1 %v2604_v18, %s5095_s17  ;;  %2672 = vrot.lane.b32.xlu0 %v6909_v31, %s5095_s17  ;;  %v2536_v31 = vsel %vm561_vm2, %v2530_v24, %v2532_v10  ;;  %v6989_v40 = vpop.permute.xlu2 %3090  ;;  %v2317_v24 = vpack.c.bf16 %v2309_v46, %v2309_v46  ;;  %v3465_v18 = vunpack.c.l.b16 %v3396_v55  ;;  %v3436_v55 = vunpack.c.h.b16 %v3383_v52  ;;  %v2594_v19 = vpop.permute.xlu1 %2593 }
 0x516   :  { %2662 = vrot.lane.b32.xlu2 %v2532_v10, %s5095_s17  ;;  %v2629_v10 = vpop.permute.xlu0 %2628 }
 0x517   :  { %v2491_v44 = vunpack.c.l.b16 %v2317_v24  ;;  %v3475_v37 = vpack.c.b16 %v3470_v47, %v3465_v18  ;;  %v2638_v25 = vsel %vm681_vm3, %v2629_v10, %v6878_v14  ;;  %v2297_v14 = vsel %vm2296_vm9, %v6622_v0, %v6603_v13 }
 0x518   :  { %v2305_v24 = vmul.f32 %v6622_v0, %v5412_v27  ;;  %v2306_v28 = vmul.f32 %v2297_v14, %v5403_v2  ;;  %v2310_v13 = vmul.f32 %v6622_v0, %v5417_v9  ;;  %v3435_v47 = vunpack.c.l.b16 %v3383_v52  ;;  %v8472_v52 = vld [vmem:[#allocation47_spill] sm:$0xff] }
 0x519   :  { %v2501_v11 = vpack.c.b16 %v2496_v20, %v2491_v44  ;;  %v3373_v2 = vmul.f32 %v6777_v3, %v6403_v4  ;;  %v2603_v20 = vsel %vm641_vm5, %v2594_v19, %v6941_v15  ;;  %v3391_v15 = vmul.f32 %v6805_v54, %v6425_v51 }
 0x51a   :  { %v7043_v9 = vpack.c.bf16 %v2306_v28, %v2305_v24  ;;  %v2568_v24 = vsel %vm601_vm15, %v6972_v30, %v6987_v12  ;;  %vm3163_vm3 = vcmask 777216   ;;  %vm3273_vm5 = vcmask 908288  }
 0x51b   :  { %v3381_v10 = vpack.c.bf16 %v3373_v2, %v3373_v2 }
 0x51d   :  { %2660 = vrot.lane.b32.xlu1 %v2536_v31, %s5095_s17  ;;  %2658 = vrot.lane.b32.xlu0 %v2535_v59, %s5095_s17  ;;  %v7011_v33 = vpop.permute.xlu2 %3084  ;;  %v3380_v31 = vpack.c.bf16 %v3372_v7, %v3371_v56  ;;  %v3397_v59 = vpack.c.bf16 %v3389_v32, %v3389_v32  ;;  %v3126_v0 = vpop.permute.xlu1 %3125  ;;  %v2488_v56 = vunpack.c.h.b16 %v7043_v9  ;;  %v3390_v32 = vmul.f32 %v6808_v38, %v6397_v42 }
 0x51e   :  { %2650 = vrot.lane.b32.xlu2 %v2500_v60, %s5095_s17  ;;  %v3400_v60 = vpack.c.bf16 %v3394_v61, %v3394_v61  ;;  %v3124_v27 = vpop.permute.xlu0 %3123 }
 0x51f   :  { %v3431_v36 = vunpack.c.h.b16 %v3380_v31  ;;  %v3467_v46 = vunpack.c.l.b16 %v3397_v59  ;;  %v3430_v48 = vunpack.c.l.b16 %v3380_v31  ;;  %v7065_v59 = vpack.c.bf16 %v3391_v15, %v3390_v32 }
 0x520   :  { %v3472_v58 = vunpack.c.l.b16 %v3400_v60  ;;  %v3432_v60 = vunpack.c.l.b16 %v3381_v10  ;;  %v3129_v19 = vsel %vm601_vm15, %v6957_v17, %v3124_v27 }
 0x521   :  { %v3441_v53 = vpack.c.b16 %v3436_v55, %v3431_v36  ;;  %v3440_v44 = vpack.c.b16 %v3435_v47, %v3430_v48  ;;  %v8474_v47 = vld [vmem:[#allocation51_spill] sm:$0xff]  ;;  %v3375_v48 = vmul.f32 %v6805_v54, %v8475_v57 }
 0x522   :  { %v3477_v16 = vpack.c.b16 %v3472_v58, %v3467_v46  ;;  %v3369_v30 = vmul.f32 %v8472_v52, %v8474_v47 }
 0x525   :  { %2648 = vrot.lane.b32.xlu1 %v2499_v43, %s5095_s17  ;;  %2666 = vrot.lane.b32.xlu0 %v2569_v29, %s5095_s17  ;;  %v7021_v43 = vpop.permute.xlu2 %2692  ;;  %v2311_v29 = vmul.f32 %v2297_v14, %v5427_v1  ;;  %v3089_v36 = vpop.permute.xlu1 %3088  ;;  %v3469_v14 = vunpack.c.h.b16 %v7065_v59 }
 0x526   :  { %3484 = vrot.lane.b32.xlu2 %v3476_v41, %s5082_s21  ;;  %v2534_v41 = vsel %vm561_vm2, %v6935_v35, %v2528_v26  ;;  %v3378_v26 = vmul.f32 %v6761_v8, %v6403_v4  ;;  %v7067_v55 = vpop.permute.xlu0 %3086  ;;  %v3095_v2 = vsel %vm561_vm2, %v3089_v36, %v6989_v40 }
 0x527   :  { %v7045_v1 = vpack.c.bf16 %v2311_v29, %v2310_v13 }
 0x528   :  { %v3384_v61 = vpack.c.bf16 %v3378_v26, %v3378_v26  ;;  %v3374_v26 = vmul.f32 %v6808_v38, %v8474_v47 }
 0x529   :  { %v2493_v7 = vunpack.c.h.b16 %v7045_v1 }
 0x52b   :  { %v2498_v31 = vpack.c.b16 %v2493_v7, %v2488_v56  ;;  %v8476_v56 = vld [vmem:[#allocation31_spill] sm:$0xff] }
 0x52c   :  { %v3001_v7 = vmul.f32 %v6761_v8, %v8476_v56 }
 0x52d   :  { %3482 = vrot.lane.b32.xlu1 %v3475_v37, %s5082_s21  ;;  %2652 = vrot.lane.b32.xlu0 %v2501_v11, %s5095_s17  ;;  %v7053_v18 = vpop.permute.xlu2 %2985  ;;  %v3437_v37 = vunpack.c.l.b16 %v3384_v61  ;;  %v8473_v11 = vld [vmem:[#allocation46_spill] sm:$0xff]  ;;  %v7087_v13 = vpop.permute.xlu1 %3119 }
 0x52e   :  { %2684 = vrot.lane.b32.xlu2 %v2638_v25, %s5095_s17  ;;  %v3385_v25 = vmul.f32 %v8472_v52, %v6397_v42  ;;  %v2524_v28 = vpop.permute.xlu0 %2523  ;;  %v3370_v12 = vmul.f32 %v8473_v11, %v8475_v57 }
 0x52f   :  { %v3442_v58 = vpack.c.b16 %v3437_v37, %v3432_v60  ;;  %v2996_v37 = vmul.f32 %v6777_v3, %v8476_v56 }
 0x535   :  { %2656 = vrot.lane.b32.xlu1 %v2534_v41, %s5095_s17  ;;  %3486 = vrot.lane.b32.xlu0 %v3477_v16, %s5082_s21 }
 0x536   :  { %3449 = vrot.lane.b32.xlu2 %v3441_v53, %s5083_s1 }
 0x53d   :  { %3447 = vrot.lane.b32.xlu1 %v3440_v44, %s5083_s1  ;;  %2977 = vrot.lane.b32.xlu0 %v6917_v62, %s5082_s21  ;;  %v3386_v62 = vmul.f32 %v8473_v11, %v6425_v51  ;;  %v3130_v44 = vsel %vm601_vm15, %v3124_v27, %v3126_v0 }
 0x53e   :  { %2674 = vrot.lane.b32.xlu2 %v2603_v20, %s5095_s17  ;;  %v7107_v20 = vpack.c.bf16 %v3370_v12, %v3369_v30 }
 0x53f   :  { %v7073_v46 = vpack.c.bf16 %v3386_v62, %v3385_v25  ;;  %v3007_v62 = vpack.c.bf16 %v3001_v7, %v3001_v7 }
 0x540   :  { %v3429_v25 = vunpack.c.h.b16 %v7107_v20 }
 0x541   :  { %v3464_v16 = vunpack.c.h.b16 %v7073_v46 }
 0x543   :  { %v3474_v41 = vpack.c.b16 %v3469_v14, %v3464_v16  ;;  %v3055_v14 = vunpack.c.l.b16 %v3007_v62  ;;  %v8477_v16 = vld [vmem:[#allocation49_spill] sm:$0xff] }
 0x544   :  { %v2994_v30 = vmul.f32 %v6745_v23, %v8477_v16 }
 0x545   :  { %2646 = vrot.lane.b32.xlu1 %v2498_v31, %s5095_s17  ;;  %3451 = vrot.lane.b32.xlu0 %v3442_v58, %s5083_s1  ;;  %v3094_v31 = vsel %vm561_vm2, %v7067_v55, %v3089_v36  ;;  %v3128_v58 = vsel %vm601_vm15, %v7087_v13, %v6957_v17 }
 0x546   :  { %3157 = vrot.lane.b32.xlu2 %v3129_v19, %s5100_s30 }
 0x548   :  { %v7076_v53 = vpop.permute.xlu2 %2680 }
 0x54d   :  { %3480 = vrot.lane.b32.xlu1 %v3474_v41, %s5082_s21  ;;  %2942 = vrot.lane.b32.xlu0 %v6919_v21, %s5083_s1  ;;  %v7101_v21 = vpack.c.bf16 %v3375_v48, %v3374_v26  ;;  %v2999_v41 = vmul.f32 %v6764_v34, %v8477_v16 }
 0x54e   :  { %2664 = vrot.lane.b32.xlu2 %v2568_v24, %s5095_s17  ;;  %v8478_v24 = vld [vmem:[#allocation27_spill] sm:$0xff] }
 0x54f   :  { %v3000_v36 = vmul.f32 %v6767_v49, %v8478_v24  ;;  %v2995_v12 = vmul.f32 %v6748_v63, %v8478_v24 }
 0x550   :  { %v7089_v29 = vpop.permute.xlu2 %2948 }
 0x551   :  { %v3003_v7 = vpack.c.bf16 %v2995_v12, %v2994_v30  ;;  %v8480_v12 = vld [vmem:[#allocation28_spill] sm:$0xff] }
 0x553   :  { %v3049_v62 = vunpack.c.h.b16 %v3003_v7 }
 0x555   :  { %3161 = vrot.lane.b32.xlu1 %v3126_v0, %s5100_s30  ;;  %3159 = vrot.lane.b32.xlu0 %v3130_v44, %s5100_s30  ;;  %v3434_v0 = vunpack.c.h.b16 %v7101_v21  ;;  %v3006_v44 = vpack.c.bf16 %v3000_v36, %v2999_v41  ;;  %v2487_v36 = vunpack.c.l.b16 %v7043_v9 }
 0x556   :  { %3149 = vrot.lane.b32.xlu2 %v3095_v2, %s5100_s30 }
 0x557   :  { %v2691_v61 = vpop.permute.xlu1 %2690  ;;  %v7109_v10 = vpop.permute.xlu0 %2688  ;;  %v3439_v60 = vpack.c.b16 %v3434_v0, %v3429_v25  ;;  %v3468_v0 = vunpack.c.l.b16 %v7065_v59 }
 0x558   :  { %v7113_v32 = vpop.permute.xlu2 %2979  ;;  %v2713_v15 = vsel %vm2296_vm9, %v7109_v10, %v2691_v61  ;;  %v2714_v27 = vsel %vm2296_vm9, %v2691_v61, %v7021_v43  ;;  %v3004_v43 = vpack.c.bf16 %v2996_v37, %v2996_v37  ;;  %v2533_v61 = vsel %vm561_vm2, %v2524_v28, %v6935_v35 }
 0x559   :  { %2767 = vmatpush.bf16.msrb.mxu2 %v2713_v15  ;;  %2780 = vmatpush.bf16.msrb.mxu3 %v2714_v27  ;;  %v3054_v27 = vunpack.c.h.b16 %v3006_v44  ;;  %v3053_v28 = vunpack.c.l.b16 %v3006_v44 }
 0x55a   :  { %v3050_v17 = vunpack.c.l.b16 %v3004_v43 }
 0x55c   :  { %v3060_v2 = vpack.c.b16 %v3055_v14, %v3050_v17  ;;  %v2492_v17 = vunpack.c.l.b16 %v7045_v1 }
 0x55d   :  { %3147 = vrot.lane.b32.xlu1 %v3094_v31, %s5100_s30  ;;  %3445 = vrot.lane.b32.xlu0 %v3439_v60, %s5083_s1  ;;  %v3463_v60 = vunpack.c.l.b16 %v7073_v46  ;;  %v3048_v31 = vunpack.c.l.b16 %v3003_v7  ;;  %v8479_v46 = vld [vmem:[#allocation29_spill] sm:$0xff]  ;;  %v2993_v7 = vmul.f32 %v8473_v11, %v8480_v12 }
 0x55e   :  { %3155 = vrot.lane.b32.xlu2 %v3128_v58, %s5100_s30  ;;  %v3059_v58 = vpack.c.b16 %v3054_v27, %v3049_v62  ;;  %v2997_v30 = vmul.f32 %v6808_v38, %v8479_v46  ;;  %v2497_v1 = vpack.c.b16 %v2492_v17, %v2487_v36  ;;  %v3093_v27 = vsel %vm561_vm2, %v7011_v33, %v7067_v55  ;;  %v8481_v17 = vld [vmem:[#allocation39_spill] sm:$0xff] }
 0x55f   :  { %v7131_v19 = vpop.permute.xlu1 %2983  ;;  %v7137_v26 = vpop.permute.xlu0 %2981  ;;  %v3058_v43 = vpack.c.b16 %v3053_v28, %v3048_v31  ;;  %v3433_v28 = vunpack.c.l.b16 %v7101_v21 }
 0x560   :  { %v7139_v48 = vpop.permute.xlu2 %2670  ;;  %v2989_v9 = vsel %vm601_vm15, %v7137_v26, %v7131_v19 }
 0x565   :  { %2654 = vrot.lane.b32.xlu1 %v2533_v61, %s5095_s17  ;;  %3151 = vrot.lane.b32.xlu0 %v6989_v40, %s5100_s30  ;;  %v3473_v40 = vpack.c.b16 %v3468_v0, %v3463_v60  ;;  %v2992_v61 = vmul.f32 %v8472_v52, %v8479_v46 }
 0x566   :  { %3141 = vrot.lane.b32.xlu2 %v3060_v2, %s5100_s30  ;;  %v2998_v2 = vmul.f32 %v6805_v54, %v8480_v12 }
 0x567   :  { %v7151_v15 = vpop.permute.xlu1 %2678  ;;  %v3118_v37 = vpop.permute.xlu0 %3117 }
 0x568   :  { %v7154_v25 = vpop.permute.xlu2 %2944  ;;  %v2709_v35 = vsel %vm2296_vm9, %v7151_v15, %v7076_v53  ;;  %v7185_v0 = vpack.c.bf16 %v2998_v2, %v2997_v30  ;;  %v8482_v30 = vld [vmem:[#allocation40_spill] sm:$0xff] }
 0x569   :  { %2768 = vmatpush.bf16.msrb.mxu2 %v2709_v35  ;;  %v2860_v2 = vmul.f32 %v6767_v49, %v8482_v30 }
 0x56a   :  { %v3052_v55 = vunpack.c.h.b16 %v7185_v0 }
 0x56d   :  { %3139 = vrot.lane.b32.xlu1 %v3059_v58, %s5100_s30  ;;  %3137 = vrot.lane.b32.xlu0 %v3058_v43, %s5100_s30  ;;  %v3428_v58 = vunpack.c.l.b16 %v7107_v20 }
 0x56e   :  { %3478 = vrot.lane.b32.xlu2 %v3473_v40, %s5082_s21 }
 0x56f   :  { %v7163_v59 = vpop.permute.xlu1 %2946  ;;  %v2683_v14 = vpop.permute.xlu0 %2682  ;;  %v3438_v43 = vpack.c.b16 %v3433_v28, %v3428_v58 }
 0x570   :  { %v7165_v41 = vpop.permute.xlu2 %2662  ;;  %v2710_v44 = vsel %vm2296_vm9, %v7076_v53, %v2683_v14  ;;  %v3002_v53 = vpack.c.bf16 %v2993_v7, %v2992_v61  ;;  %v3127_v14 = vsel %vm601_vm15, %v3118_v37, %v7087_v13  ;;  %v2854_v37 = vmul.f32 %v6745_v23, %v8481_v17 }
 0x571   :  { %2781 = vmatpush.bf16.msrb.mxu3 %v2710_v44  ;;  %v2855_v61 = vmul.f32 %v6748_v63, %v8482_v30 }
 0x572   :  { %v3047_v40 = vunpack.c.h.b16 %v3002_v53 }
 0x574   :  { %v3057_v36 = vpack.c.b16 %v3052_v55, %v3047_v40 }
 0x575   :  { %3145 = vrot.lane.b32.xlu1 %v3093_v27, %s5100_s30  ;;  %2644 = vrot.lane.b32.xlu0 %v2497_v1, %s5095_s17  ;;  %v2863_v1 = vpack.c.bf16 %v2855_v61, %v2854_v37  ;;  %s5102_s17 = smov 79  }
 0x576   :  { %3267 = vrot.lane.b32.xlu2 %v2989_v9, %s5101_s15  ;;  %v2990_v9 = vsel %vm601_vm15, %v7131_v19, %v7053_v18 }
 0x577   :  { %v2687_v35 = vpop.permute.xlu1 %2686  ;;  %v2951_v62 = vpop.permute.xlu0 %2950 }
 0x578   :  { %v7191_v60 = vpop.permute.xlu2 %2650  ;;  %v2712_v31 = vsel %vm2296_vm9, %v2687_v35, %v7109_v10  ;;  %v2859_v10 = vmul.f32 %v6764_v34, %v8481_v17 }
 0x579   :  { %2754 = vmatpush.bf16.msrb.mxu1 %v2712_v31 }
 0x57a   :  { %v7214_v7 = vpack.c.bf16 %v2860_v2, %v2859_v10 }
 0x57c   :  { %v2913_v28 = vunpack.c.l.b16 %v7214_v7 }
 0x57d   :  { %3443 = vrot.lane.b32.xlu1 %v3438_v43, %s5083_s1  ;;  %3135 = vrot.lane.b32.xlu0 %v3057_v36, %s5100_s30  ;;  %v2908_v43 = vunpack.c.l.b16 %v2863_v1  ;;  %v8483_v36 = vld [vmem:[#allocation18_spill] sm:$0xff] }
 0x57e   :  { %3153 = vrot.lane.b32.xlu2 %v3127_v14, %s5100_s30  ;;  %v2955_v14 = vsel %vm561_vm2, %v7089_v29, %v2951_v62  ;;  %v2861_v10 = vmul.f32 %v6761_v8, %v8483_v36  ;;  %v2856_v37 = vmul.f32 %v6777_v3, %v8483_v36 }
 0x57f   :  { %v2669_v21 = vpop.permute.xlu1 %2668  ;;  %v3083_v20 = vpop.permute.xlu0 %3082 }
 0x580   :  { %v7206_v44 = vpop.permute.xlu2 %3484  ;;  %v2705_v13 = vsel %vm2296_vm9, %v2669_v21, %v7139_v48 }
 0x581   :  { %2769 = vmatpush.bf16.msrb.mxu2 %v2705_v13 }
 0x585   :  { %3271 = vrot.lane.b32.xlu1 %v7053_v18, %s5101_s15  ;;  %3269 = vrot.lane.b32.xlu0 %v2990_v9, %s5101_s15  ;;  %v2918_v18 = vpack.c.b16 %v2913_v28, %v2908_v43  ;;  %v2867_v28 = vpack.c.bf16 %v2861_v10, %v2861_v10 }
 0x586   :  { %3261 = vrot.lane.b32.xlu2 %v2951_v62, %s5101_s15 }
 0x587   :  { %v2677_v27 = vpop.permute.xlu1 %2676  ;;  %v2673_v31 = vpop.permute.xlu0 %2672 }
 0x588   :  { %v2685_v55 = vpop.permute.xlu2 %2684  ;;  %v2708_v58 = vsel %vm2296_vm9, %v2677_v27, %v7151_v15  ;;  %v2706_v19 = vsel %vm2296_vm9, %v7139_v48, %v2673_v31  ;;  %v2954_v15 = vsel %vm561_vm2, %v7163_v59, %v7089_v29  ;;  %v3051_v48 = vunpack.c.l.b16 %v7185_v0 }
 0x589   :  { %v2711_v40 = vsel %vm2296_vm9, %v2685_v55, %v2687_v35  ;;  %2755 = vmatpush.bf16.msrb.mxu1 %v2708_v58  ;;  %2782 = vmatpush.bf16.msrb.mxu3 %v2706_v19  ;;  %v3046_v29 = vunpack.c.l.b16 %v3002_v53  ;;  %v2988_v0 = vsel %vm601_vm15, %v7113_v32, %v7137_v26  ;;  %v2864_v31 = vpack.c.bf16 %v2856_v37, %v2856_v37  ;;  %v8484_v58 = vld [vmem:[#allocation17_spill] sm:$0xff]  ;;  %v8485_v19 = vld [vmem:[#allocation36_spill] sm:$0xff] }
 0x58a   :  { %2741 = vmatpush.bf16.msrb.mxu0 %v2711_v40  ;;  %v3092_v55 = vsel %vm561_vm2, %v3083_v20, %v7011_v33  ;;  %v2915_v53 = vunpack.c.l.b16 %v2867_v28  ;;  %v2857_v40 = vmul.f32 %v6808_v38, %v8484_v58  ;;  %v2858_v43 = vmul.f32 %v6805_v54, %v8485_v19  ;;  %v4920_v37 = vld [vmem:[%s8202_s4 + $0xc] sm:$0xf] }
 0x58b   :  { %v3056_v9 = vpack.c.b16 %v3051_v48, %v3046_v29  ;;  %v2914_v20 = vunpack.c.h.b16 %v7214_v7  ;;  %v2852_v48 = vmul.f32 %v8472_v52, %v8484_v58  ;;  %v2853_v10 = vmul.f32 %v8473_v11, %v8485_v19  ;;  %4922 = vmatmul.msk.bf16.vlgmr.msra.gmra.mxu1 %vm1145_vm7, %v4920_v37  ;;  %4923 = vmatmul.msk.bf16.vlgmr.msra.gmra.mxu2 %vm1145_vm7, %v4920_v37 }
 0x58c   :  { %4924 = vmatmul.msk.bf16.vlgmr.msra.gmra.mxu3 %vm1145_vm7, %v4920_v37  ;;  %4921 = vmatmul.msk.bf16.vlgmr.msra.gmra.mxu0 %vm1145_vm7, %v4920_v37 }
 0x58d   :  { %3259 = vrot.lane.b32.xlu1 %v2955_v14, %s5101_s15  ;;  %3257 = vrot.lane.b32.xlu0 %v2954_v15, %s5101_s15  ;;  %v2910_v14 = vunpack.c.l.b16 %v2864_v31 }
 0x58e   :  { %3247 = vrot.lane.b32.xlu2 %v2918_v18, %s5101_s15 }
 0x58f   :  { %v2661_v35 = vpop.permute.xlu1 %2660  ;;  %v2659_v2 = vpop.permute.xlu0 %2658  ;;  %v2920_v7 = vpack.c.b16 %v2915_v53, %v2910_v14 }
 0x590   :  { %v7240_v13 = vpop.permute.xlu2 %3449  ;;  %v2702_v62 = vsel %vm2296_vm9, %v2661_v35, %v7165_v41  ;;  %v2701_v61 = vsel %vm2296_vm9, %v2659_v2, %v2661_v35 }
 0x591   :  { %2783 = vmatpush.bf16.msrb.mxu3 %v2702_v62  ;;  %2770 = vmatpush.bf16.msrb.mxu2 %v2701_v61  ;;  %v2909_v62 = vunpack.c.h.b16 %v2863_v1  ;;  %v7274_v61 = vpack.c.bf16 %v2858_v43, %v2857_v40  ;;  %v2953_v40 = vsel %vm561_vm2, %v7154_v25, %v7163_v59 }
 0x593   :  { %v2912_v29 = vunpack.c.h.b16 %v7274_v61 }
 0x595   :  { %3265 = vrot.lane.b32.xlu1 %v2988_v0, %s5101_s15  ;;  %3143 = vrot.lane.b32.xlu0 %v3092_v55, %s5100_s30 }
 0x596   :  { %3133 = vrot.lane.b32.xlu2 %v3056_v9, %s5100_s30 }
 0x597   :  { %v7255_v41 = vpop.permute.xlu1 %2648  ;;  %v2667_v26 = vpop.permute.xlu0 %2666 }
 0x598   :  { %v2675_v18 = vpop.permute.xlu2 %2674  ;;  %v2697_v33 = vsel %vm2296_vm9, %v7255_v41, %v7191_v60  ;;  %v2704_v35 = vsel %vm2296_vm9, %v2667_v26, %v2669_v21  ;;  %v2919_v21 = vpack.c.b16 %v2914_v20, %v2909_v62 }
 0x599   :  { %v2707_v15 = vsel %vm2296_vm9, %v2675_v18, %v2677_v27  ;;  %2771 = vmatpush.bf16.msrb.mxu2 %v2697_v33  ;;  %2756 = vmatpush.bf16.msrb.mxu1 %v2704_v35  ;;  %v7281_v27 = vpack.c.bf16 %v2853_v10, %v2852_v48  ;;  %v8487_v10 = vld [vmem:[#allocation50_spill] sm:$0xff] }
 0x59a   :  { %2742 = vmatpush.bf16.msrb.mxu0 %v2707_v15  ;;  %v3361_v62 = vmul.f32 %v6767_v49, %v8487_v10 }
 0x59b   :  { %v2907_v55 = vunpack.c.h.b16 %v7281_v27 }
 0x59d   :  { %3251 = vrot.lane.b32.xlu1 %v2920_v7, %s5101_s15  ;;  %3249 = vrot.lane.b32.xlu0 %v2919_v21, %s5101_s15  ;;  %v2917_v53 = vpack.c.b16 %v2912_v29, %v2907_v55 }
 0x59f   :  { %v3483_v1 = vpop.permute.xlu1 %3482  ;;  %v2653_v9 = vpop.permute.xlu0 %2652 }
 0x5a0   :  { %v7285_v28 = vpop.permute.xlu2 %3157  ;;  %v3490_v0 = vsel %vm601_vm15, %v3483_v1, %v7206_v44  ;;  %v2698_v31 = vsel %vm2296_vm9, %v7191_v60, %v2653_v9 }
 0x5a1   :  { %3518 = vrot.lane.b32.xlu2 %v3490_v0, %s5102_s17  ;;  %2784 = vmatpush.bf16.msrb.mxu3 %v2698_v31  ;;  %v7343_v0 = vld [vmem:[%s8202_s4 + $0x10] sm:$0xf] }
 0x5a2   :  { %v8488_v31 = vld [vmem:[#allocation25_spill] sm:$0xff]  ;;  %4928 = vmatmul.msk.bf16.vlgmr.msrb.gmra.mxu2 %vm1145_vm7, %v7343_v0 }
 0x5a3   :  { %v3362_v55 = vmul.f32 %v6761_v8, %v8488_v31 }
 0x5a4   :  { %4929 = vmatmul.msk.bf16.vlgmr.msrb.gmra.mxu3 %vm1145_vm7, %v7343_v0 }
 0x5a5   :  { %3245 = vrot.lane.b32.xlu1 %v2917_v53, %s5101_s15  ;;  %3255 = vrot.lane.b32.xlu0 %v2953_v40, %s5101_s15  ;;  %v3357_v53 = vmul.f32 %v6777_v3, %v8488_v31  ;;  %v2911_v3 = vunpack.c.l.b16 %v7274_v61 }
 0x5a7   :  { %v7298_v43 = vpop.permute.xlu1 %2656  ;;  %v3487_v18 = vpop.permute.xlu0 %3486 }
 0x5a8   :  { %v2665_v33 = vpop.permute.xlu2 %2664  ;;  %v2700_v60 = vsel %vm2296_vm9, %v7298_v43, %v2659_v2  ;;  %v3491_v14 = vsel %vm601_vm15, %v7206_v44, %v3487_v18  ;;  %v8486_v2 = vld [vmem:[#allocation24_spill] sm:$0xff] }
 0x5a9   :  { %v2703_v20 = vsel %vm2296_vm9, %v2665_v33, %v2667_v26  ;;  %2757 = vmatpush.bf16.msrb.mxu1 %v2700_v60  ;;  %v3360_v26 = vmul.f32 %v6764_v34, %v8486_v2  ;;  %v3355_v37 = vmul.f32 %v6745_v23, %v8486_v2 }
 0x5aa   :  { %2743 = vmatpush.bf16.msrb.mxu0 %v2703_v20  ;;  %v3368_v20 = vpack.c.bf16 %v3362_v55, %v3362_v55 }
 0x5ab   :  { %v3367_v29 = vpack.c.bf16 %v3361_v62, %v3360_v26  ;;  %v8489_v62 = vld [vmem:[#allocation26_spill] sm:$0xff] }
 0x5ad   :  { %3522 = vrot.lane.b32.xlu1 %v3487_v18, %s5102_s17  ;;  %3520 = vrot.lane.b32.xlu0 %v3491_v14, %s5102_s17  ;;  %v3415_v26 = vunpack.c.h.b16 %v3367_v29 }
 0x5af   :  { %v7307_v59 = vpop.permute.xlu1 %3447  ;;  %v2978_v15 = vpop.permute.xlu0 %2977 }
 0x5b0   :  { %v7309_v35 = vpop.permute.xlu2 %3149  ;;  %v2987_v48 = vsel %vm601_vm15, %v2978_v15, %v7113_v32  ;;  %v3455_v44 = vsel %vm561_vm2, %v7307_v59, %v7240_v13  ;;  %v3356_v32 = vmul.f32 %v6748_v63, %v8487_v10  ;;  %v3365_v15 = vpack.c.bf16 %v3357_v53, %v3357_v53 }
 0x5b1   :  { %3263 = vrot.lane.b32.xlu2 %v2987_v48, %s5101_s15  ;;  %v3416_v48 = vunpack.c.l.b16 %v3368_v20 }
 0x5b2   :  { %v3364_v63 = vpack.c.bf16 %v3356_v32, %v3355_v37  ;;  %v8490_v37 = vld [vmem:[#allocation23_spill] sm:$0xff]  ;;  %v2906_v32 = vunpack.c.l.b16 %v7281_v27 }
 0x5b5   :  { %3508 = vrot.lane.b32.xlu0 %v3455_v44, %s5102_s17  ;;  %v3358_v44 = vmul.f32 %v6808_v38, %v8489_v62 }
 0x5b7   :  { %v7326_v7 = vpop.permute.xlu1 %2646  ;;  %v3452_v21 = vpop.permute.xlu0 %3451 }
 0x5b8   :  { %v7328_v34 = vpop.permute.xlu2 %3155  ;;  %v2696_v49 = vsel %vm2296_vm9, %v7326_v7, %v7255_v41  ;;  %v3456_v9 = vsel %vm561_vm2, %v7240_v13, %v3452_v21  ;;  %v3414_v41 = vunpack.c.l.b16 %v3367_v29  ;;  %v3409_v13 = vunpack.c.l.b16 %v3364_v63 }
 0x5b9   :  { %2758 = vmatpush.bf16.msrb.mxu1 %v2696_v49  ;;  %v3173_v23 = vsel %vm3163_vm3, %v7328_v34, %v7285_v28  ;;  %3512 = vrot.lane.b32.xlu2 %v3452_v21, %s5102_s17  ;;  %v3410_v49 = vunpack.c.h.b16 %v3364_v63 }
 0x5ba   :  { %3510 = vrot.lane.b32.xlu1 %v3456_v9, %s5102_s17  ;;  %v3419_v60 = vpack.c.b16 %v3414_v41, %v3409_v13  ;;  %v3353_v9 = vmul.f32 %v8472_v52, %v8489_v62  ;;  %v2916_v41 = vpack.c.b16 %v2911_v3, %v2906_v32 }
 0x5bb   :  { %v3420_v38 = vpack.c.b16 %v3415_v26, %v3410_v49 }
 0x5bc   :  { %4927 = vmatmul.msk.bf16.vlgmr.msrb.gmra.mxu1 %vm1145_vm7, %v7343_v0 }
 0x5bd   :  { %3209 = vmatpush.bf16.msra.mxu1 %v3173_v23  ;;  %v3354_v23 = vmul.f32 %v8473_v11, %v8490_v37 }
 0x5bf   :  { %v3481_v40 = vpop.permute.xlu1 %3480  ;;  %v2943_v18 = vpop.permute.xlu0 %2942  ;;  %v3363_v52 = vpack.c.bf16 %v3354_v23, %v3353_v9 }
 0x5c0   :  { %v7355_v33 = vpop.permute.xlu2 %3141  ;;  %v3489_v8 = vsel %vm601_vm15, %v3481_v40, %v3483_v1  ;;  %v2952_v14 = vsel %vm561_vm2, %v2943_v18, %v7154_v25  ;;  %v3359_v1 = vmul.f32 %v6805_v54, %v8490_v37  ;;  %v3411_v25 = vunpack.c.l.b16 %v3365_v15 }
 0x5c1   :  { %3498 = vrot.lane.b32.xlu2 %v3419_v60, %s5102_s17  ;;  %3253 = vrot.lane.b32.xlu0 %v2952_v14, %s5101_s15  ;;  %v3408_v53 = vunpack.c.h.b16 %v3363_v52 }
 0x5c2   :  { %3516 = vrot.lane.b32.xlu1 %v3489_v8, %s5102_s17  ;;  %v3421_v29 = vpack.c.b16 %v3416_v48, %v3411_v25  ;;  %v3366_v13 = vpack.c.bf16 %v3359_v1, %v3358_v44  ;;  %v3407_v48 = vunpack.c.l.b16 %v3363_v52 }
 0x5c4   :  { %v3413_v11 = vunpack.c.h.b16 %v3366_v13  ;;  %v3412_v15 = vunpack.c.l.b16 %v3366_v13 }
 0x5c6   :  { %v3418_v8 = vpack.c.b16 %v3413_v11, %v3408_v53  ;;  %v3417_v44 = vpack.c.b16 %v3412_v15, %v3407_v48  ;;  %v1184_v53 = vpop.f32.mrf.mxu2 }
 0x5c7   :  { %v3162_v21 = vpop.permute.xlu1 %3161  ;;  %v3160_v61 = vpop.permute.xlu0 %3159 }
 0x5c8   :  { %v3175_v55 = vsel %vm3163_vm3, %v3160_v61, %v3162_v21  ;;  %v3174_v54 = vsel %vm3163_vm3, %v7285_v28, %v3160_v61  ;;  %v3479_v27 = vpop.permute.xlu2 %3478 }
 0x5c9   :  { %3235 = vmatpush.bf16.msra.mxu3 %v3175_v55  ;;  %3243 = vrot.lane.b32.xlu2 %v2916_v41, %s5101_s15  ;;  %v3488_v28 = vsel %vm601_vm15, %v3479_v27, %v3481_v40  ;;  %v3608_v40 = vld [vmem:[%s8205_s7] sm:$0xff] }
 0x5ca   :  { %3502 = vrot.lane.b32.xlu1 %v3421_v29, %s5102_s17  ;;  %3500 = vrot.lane.b32.xlu0 %v3420_v38, %s5102_s17 }
 0x5cb   :  { %3222 = vmatpush.bf16.msra.mxu2 %v3174_v54 }
 0x5cf   :  { %v3148_v63 = vpop.permute.xlu1 %3147  ;;  %v3446_v18 = vpop.permute.xlu0 %3445 }
 0x5d0   :  { %v3170_v60 = vsel %vm3163_vm3, %v3148_v63, %v7309_v35  ;;  %v3454_v20 = vsel %vm561_vm2, %v3446_v18, %v7307_v59  ;;  %v7387_v14 = vpop.permute.xlu2 %3267 }
 0x5d1   :  { %3223 = vmatpush.bf16.msra.mxu2 %v3170_v60  ;;  %3514 = vrot.lane.b32.xlu2 %v3488_v28, %s5102_s17 }
 0x5d2   :  { %3496 = vrot.lane.b32.xlu1 %v3418_v8, %s5102_s17  ;;  %3506 = vrot.lane.b32.xlu0 %v3454_v20, %s5102_s17 }
 0x5d7   :  { %v2655_v3 = vpop.permute.xlu1 %2654  ;;  %v3152_v26 = vpop.permute.xlu0 %3151 }
 0x5d8   :  { %v2699_v59 = vsel %vm2296_vm9, %v2655_v3, %v7298_v43  ;;  %v3171_v1 = vsel %vm3163_vm3, %v7309_v35, %v3152_v26  ;;  %v3154_v32 = vpop.permute.xlu2 %3153  ;;  %v1186_v3 = vpop.f32.mrf.mxu2 }
 0x5d9   :  { %2744 = vmatpush.bf16.msrb.mxu0 %v2699_v59  ;;  %3236 = vmatpush.bf16.msra.mxu3 %v3171_v1  ;;  %v3172_v29 = vsel %vm3163_vm3, %v3154_v32, %v7328_v34 }
 0x5da   :  { %3611 = vperm.xlu2 %5012, %v3608_v40   ;;  %3494 = vrot.lane.b32.xlu1 %v3417_v44, %s5102_s17 }
 0x5df   :  { %v3140_v25 = vpop.permute.xlu1 %3139  ;;  %v3138_v21 = vpop.permute.xlu0 %3137 }
 0x5e0   :  { %v3167_v49 = vsel %vm3163_vm3, %v3140_v25, %v7355_v33  ;;  %v3166_v9 = vsel %vm3163_vm3, %v3138_v21, %v3140_v25  ;;  %v3262_v23 = vpop.permute.xlu2 %3261 }
 0x5e1   :  { %3237 = vmatpush.bf16.msra.mxu3 %v3167_v49  ;;  %3224 = vmatpush.bf16.msra.mxu2 %v3166_v9 }
 0x5e7   :  { %v3146_v43 = vpop.permute.xlu1 %3145  ;;  %v2645_v61 = vpop.permute.xlu0 %2644 }
 0x5e8   :  { %v3169_v41 = vsel %vm3163_vm3, %v3146_v43, %v3148_v63  ;;  %v2695_v35 = vsel %vm2296_vm9, %v2645_v61, %v7326_v7  ;;  %v3248_v13 = vpop.permute.xlu2 %3247  ;;  %v4930_v7 = vld [vmem:[%s8204_s6 + $0x4] sm:$0xf]  ;;  %v1171_v63 = vpop.f32.mrf.mxu1 }
 0x5e9   :  { %3210 = vmatpush.bf16.msra.mxu1 %v3169_v41  ;;  %2745 = vmatpush.bf16.msrb.mxu0 %v2695_v35 }
 0x5ea   :  { %4933 = vmatmul.msk.bf16.vlgmr.msra.gmra.mxu2 %vm1783_vm13, %v4930_v7  ;;  %4934 = vmatmul.msk.bf16.vlgmr.msra.gmra.mxu3 %vm1783_vm13, %v4930_v7 }
 0x5ec   :  { %4926 = vmatmul.msk.bf16.vlgmr.msrb.gmra.mxu0 %vm1145_vm7, %v7343_v0  ;;  %vm3524_vm7 = vcmask 646144  }
 0x5ed   :  { %3196 = vmatpush.bf16.msra.mxu0 %v3172_v29 }
 0x5ef   :  { %v3444_v33 = vpop.permute.xlu1 %3443  ;;  %v3136_v55 = vpop.permute.xlu0 %3135 }
 0x5f0   :  { %v3453_v38 = vsel %vm561_vm2, %v3444_v33, %v3446_v18  ;;  %v3165_v54 = vsel %vm3163_vm3, %v3136_v55, %v3138_v21  ;;  %v3134_v11 = vpop.permute.xlu2 %3133  ;;  %v1173_v15 = vpop.f32.mrf.mxu1 }
 0x5f1   :  { %3504 = vrot.lane.b32.xlu0 %v3453_v38, %s5102_s17  ;;  %3211 = vmatpush.bf16.msra.mxu1 %v3165_v54  ;;  %v3164_v32 = vsel %vm3163_vm3, %v3134_v11, %v3136_v55  ;;  %v1239_v21 = vpop.f32.mrf.mxu2  ;;  %v1197_v55 = vpop.f32.mrf.mxu3 }
 0x5f4   :  { %4932 = vmatmul.msk.bf16.vlgmr.msra.gmra.mxu1 %vm1783_vm13, %v4930_v7 }
 0x5f7   :  { %v3272_v34 = vpop.permute.xlu1 %3271  ;;  %v3270_v0 = vpop.permute.xlu0 %3269 }
 0x5f8   :  { %v3285_v27 = vsel %vm3273_vm5, %v3270_v0, %v3272_v34  ;;  %v3284_v52 = vsel %vm3273_vm5, %v7387_v14, %v3270_v0  ;;  %v1226_v25 = vpop.f32.mrf.mxu1 }
 0x5f9   :  { %3332 = vmatpush.bf16.msrb.mxu2 %v3284_v52  ;;  %3345 = vmatpush.bf16.msrb.mxu3 %v3285_v27  ;;  %v1227_v9 = vadd.f32 %v1226_v25, %v1171_v63  ;;  %v1241_v29 = vpop.f32.mrf.mxu2  ;;  %v1199_v27 = vpop.f32.mrf.mxu3 }
 0x5fb   :  { %v7421_v20 = vpop.permute.xlu2 %3518 }
 0x5ff   :  { %v3260_v18 = vpop.permute.xlu1 %3259  ;;  %v3258_v60 = vpop.permute.xlu0 %3257 }
 0x600   :  { %v3281_v28 = vsel %vm3273_vm5, %v3260_v18, %v3262_v23  ;;  %v3280_v8 = vsel %vm3273_vm5, %v3258_v60, %v3260_v18  ;;  %v1240_v23 = vadd.f32 %v1239_v21, %v1184_v53  ;;  %v1228_v35 = vpop.f32.mrf.mxu1 }
 0x601   :  { %3346 = vmatpush.bf16.msrb.mxu3 %v3281_v28  ;;  %3333 = vmatpush.bf16.msrb.mxu2 %v3280_v8  ;;  %v1252_v8 = vpop.f32.mrf.mxu3 }
 0x602   :  { %v1253_v15 = vadd.f32 %v1252_v8, %v1197_v55 }
 0x607   :  { %v3266_v48 = vpop.permute.xlu1 %3265  ;;  %v3144_v40 = vpop.permute.xlu0 %3143 }
 0x608   :  { %v3283_v26 = vsel %vm3273_vm5, %v3266_v48, %v7387_v14  ;;  %v3168_v59 = vsel %vm3163_vm3, %v3144_v40, %v3146_v43  ;;  %v7434_v43 = vld [vmem:[%s8204_s6] sm:$0xf]  ;;  %v1734_v11 = vpop.f32.mrf.mxu1 }
 0x609   :  { %3319 = vmatpush.bf16.msrb.mxu1 %v3283_v26  ;;  %3197 = vmatpush.bf16.msra.mxu0 %v3168_v59  ;;  %v1765_v18 = vadd.f32 %v1734_v11, %v1227_v9 }
 0x60b   :  { %v3264_v44 = vpop.permute.xlu2 %3263 }
 0x60c   :  { %v3282_v1 = vsel %vm3273_vm5, %v3264_v44, %v3266_v48 }
 0x60d   :  { %3198 = vmatpush.bf16.msra.mxu0 %v3164_v32  ;;  %v1254_v32 = vpop.f32.mrf.mxu3 }
 0x60f   :  { %v3252_v49 = vpop.permute.xlu1 %3251  ;;  %v3250_v61 = vpop.permute.xlu0 %3249 }
 0x610   :  { %v3276_v41 = vsel %vm3273_vm5, %v3248_v13, %v3250_v61  ;;  %v3277_v14 = vsel %vm3273_vm5, %v3250_v61, %v3252_v49  ;;  %4931 = vmatmul.msk.bf16.vlgmr.msra.gmra.mxu0 %vm1783_vm13, %v4930_v7  ;;  %v1736_v3 = vpop.f32.mrf.mxu1 }
 0x611   :  { %3306 = vmatpush.bf16.msrb.mxu0 %v3282_v1  ;;  %3334 = vmatpush.bf16.msrb.mxu2 %v3276_v41  ;;  %v1158_v1 = vpop.f32.mrf.mxu0 }
 0x612   :  { %3347 = vmatpush.bf16.msrb.mxu3 %v3277_v14 }
 0x613   :  { %v3513_v7 = vpop.permute.xlu2 %3512 }
 0x614   :  { %4937 = vmatmul.msk.bf16.vlgmr.msrb.gmra.mxu2 %vm1783_vm13, %v7434_v43 }
 0x615   :  { %4938 = vmatmul.msk.bf16.vlgmr.msrb.gmra.mxu3 %vm1783_vm13, %v7434_v43  ;;  %v1760_v55 = vpop.f32.mrf.mxu3 }
 0x617   :  { %v3246_v33 = vpop.permute.xlu1 %3245  ;;  %v3256_v38 = vpop.permute.xlu0 %3255 }
 0x618   :  { %v3279_v54 = vsel %vm3273_vm5, %v3256_v38, %v3258_v60  ;;  %v3275_v34 = vsel %vm3273_vm5, %v3246_v33, %v3248_v13  ;;  %v1747_v60 = vpop.f32.mrf.mxu2  ;;  %v2247_v21 = vpop.f32.mrf.mxu1 }
 0x619   :  { %3320 = vmatpush.bf16.msrb.mxu1 %v3279_v54  ;;  %v1766_v28 = vadd.f32 %v1747_v60, %v1240_v23  ;;  %v2278_v49 = vadd.f32 %v2247_v21, %v1765_v18  ;;  %v1160_v29 = vpop.f32.mrf.mxu0  ;;  %v1767_v54 = vadd.f32 %v1760_v55, %v1253_v15 }
 0x61b   :  { %v3499_v13 = vpop.permute.xlu2 %3498 }
 0x61d   :  { %3321 = vmatpush.bf16.msrb.mxu1 %v3275_v34 }
 0x61f   :  { %v3523_v0 = vpop.permute.xlu1 %3522  ;;  %v3521_v52 = vpop.permute.xlu0 %3520 }
 0x620   :  { %v3535_v63 = vsel %vm3524_vm7, %v7421_v20, %v3521_v52  ;;  %v3536_v53 = vsel %vm3524_vm7, %v3521_v52, %v3523_v0  ;;  %4936 = vmatmul.msk.bf16.vlgmr.msrb.gmra.mxu1 %vm1783_vm13, %v7434_v43  ;;  %v1749_v48 = vpop.f32.mrf.mxu2 }
 0x621   :  { %3583 = vmatpush.bf16.msra.mxu2 %v3535_v63  ;;  %3596 = vmatpush.bf16.msra.mxu3 %v3536_v53  ;;  %v4939_v53 = vld [vmem:[%s8204_s6 + $0x8] sm:$0xf]  ;;  %v1213_v15 = vpop.f32.mrf.mxu0  ;;  %s5103_s6 = smov 110  }
 0x622   :  { %v1214_v3 = vadd.f32 %v1213_v15, %v1158_v1 }
 0x623   :  { %v3244_v25 = vpop.permute.xlu2 %3243 }
 0x624   :  { %v3274_v27 = vsel %vm3273_vm5, %v3244_v25, %v3246_v33  ;;  %v1762_v33 = vpop.f32.mrf.mxu3 }
 0x627   :  { %v3509_v40 = vpop.permute.xlu0 %3508 }
 0x628   :  { %v2260_v9 = vpop.f32.mrf.mxu2 }
 0x629   :  { %v2279_v23 = vadd.f32 %v2260_v9, %v1766_v28 }
 0x62b   :  { %v3515_v0 = vpop.permute.xlu2 %3514 }
 0x62c   :  { %v3511_v26 = vpop.permute.xlu1 %3510 }
 0x62d   :  { %v3531_v59 = vsel %vm3524_vm7, %v3509_v40, %v3511_v26  ;;  %v3532_v44 = vsel %vm3524_vm7, %v3511_v26, %v3513_v7  ;;  %v2249_v7 = vpop.f32.mrf.mxu1 }
 0x62e   :  { %3584 = vmatpush.bf16.msra.mxu2 %v3531_v59  ;;  %3597 = vmatpush.bf16.msra.mxu3 %v3532_v44  ;;  %v2273_v59 = vpop.f32.mrf.mxu3 }
 0x62f   :  { %v2280_v44 = vadd.f32 %v2273_v59, %v1767_v54 }
 0x630   :  { %v2262_v34 = vpop.f32.mrf.mxu2 }
 0x633   :  { %v3254_v14 = vpop.permute.xlu0 %3253 }
 0x634   :  { %v3517_v61 = vpop.permute.xlu1 %3516  ;;  %v3278_v35 = vsel %vm3273_vm5, %v3254_v14, %v3256_v38 }
 0x635   :  { %v3534_v41 = vsel %vm3524_vm7, %v3517_v61, %v7421_v20  ;;  %3307 = vmatpush.bf16.msrb.mxu0 %v3278_v35  ;;  %v3533_v52 = vsel %vm3524_vm7, %v3515_v0, %v3517_v61 }
 0x636   :  { %3570 = vmatpush.bf16.msra.mxu1 %v3534_v41  ;;  %v2275_v9 = vpop.f32.mrf.mxu3 }
 0x638   :  { %v2773_v28 = vpop.f32.mrf.mxu2 }
 0x639   :  { %3308 = vmatpush.bf16.msrb.mxu0 %v3274_v27  ;;  %v2760_v18 = vpop.f32.mrf.mxu1  ;;  %v7465_v8 = vadd.f32 %v2773_v28, %v2279_v23 }
 0x63a   :  { %v7461_v60 = vadd.f32 %v2760_v18, %v2278_v49  ;;  %v1215_v49 = vpop.f32.mrf.mxu0 }
 0x63b   :  { %8492 = vst [vmem:[#allocation48_spill] sm:$0xff] %v7465_v8 }
 0x63c   :  { %v3503_v11 = vpop.permute.xlu1 %3502  ;;  %v3501_v63 = vpop.permute.xlu0 %3500  ;;  %4935 = vmatmul.msk.bf16.vlgmr.msrb.gmra.mxu0 %vm1783_vm13, %v7434_v43  ;;  %8491 = vst [vmem:[#allocation62_spill] sm:$0xff] %v7461_v60 }
 0x63d   :  { %3557 = vmatpush.bf16.msra.mxu0 %v3533_v52  ;;  %v3527_v20 = vsel %vm3524_vm7, %v3499_v13, %v3501_v63  ;;  %v3528_v38 = vsel %vm3524_vm7, %v3501_v63, %v3503_v11 }
 0x63e   :  { %3585 = vmatpush.bf16.msra.mxu2 %v3527_v20  ;;  %3598 = vmatpush.bf16.msra.mxu3 %v3528_v38  ;;  %v2786_v41 = vpop.f32.mrf.mxu3 }
 0x63f   :  { %v7470_v1 = vadd.f32 %v2786_v41, %v2280_v44  ;;  %v3612_v41 = vpop.permute.xlu2 %3611 }
 0x640   :  { %v2775_v25 = vpop.f32.mrf.mxu2 }
 0x641   :  { %4942 = vmatmul.msk.bf16.vlgmr.msra.gmra.mxu2 %vm1783_vm13, %v4939_v53  ;;  %4943 = vmatmul.msk.bf16.vlgmr.msra.gmra.mxu3 %vm1783_vm13, %v4939_v53  ;;  %v2762_v32 = vpop.f32.mrf.mxu1  ;;  %8493 = vst [vmem:[#allocation45_spill] sm:$0xff] %v7470_v1  ;;  %v8511_v1 = vld [vmem:[#allocation42_spill] sm:$0xff] }
 0x642   :  { %v1721_v23 = vpop.f32.mrf.mxu0 }
 0x643   :  { %v1764_v61 = vadd.f32 %v1721_v23, %v1214_v3 }
 0x644   :  { %v3507_v43 = vpop.permute.xlu0 %3506  ;;  %v3497_v26 = vpop.permute.xlu1 %3496 }
 0x645   :  { %v3530_v48 = vsel %vm3524_vm7, %v3507_v43, %v3509_v40  ;;  %v3526_v21 = vsel %vm3524_vm7, %v3497_v26, %v3499_v13 }
 0x646   :  { %3571 = vmatpush.bf16.msra.mxu1 %v3530_v48  ;;  %v2788_v40 = vpop.f32.mrf.mxu3 }
 0x64a   :  { %3572 = vmatpush.bf16.msra.mxu1 %v3526_v21  ;;  %v1723_v14 = vpop.f32.mrf.mxu0 }
 0x64c   :  { %v3495_v7 = vpop.permute.xlu1 %3494 }
 0x64d   :  { %4941 = vmatmul.msk.bf16.vlgmr.msra.gmra.mxu1 %vm1783_vm13, %v4939_v53  ;;  %v3525_v13 = vsel %vm3524_vm7, %v3495_v7, %v3497_v26 }
 0x652   :  { %v2234_v29 = vpop.f32.mrf.mxu0 }
 0x653   :  { %v2277_v54 = vadd.f32 %v2234_v29, %v1764_v61 }
 0x65a   :  { %v2236_v34 = vpop.f32.mrf.mxu0 }
 0x663   :  { %v3505_v35 = vpop.permute.xlu0 %3504 }
 0x664   :  { %v3529_v55 = vsel %vm3524_vm7, %v3505_v35, %v3507_v43 }
 0x665   :  { %3558 = vmatpush.bf16.msra.mxu0 %v3529_v55 }
 0x669   :  { %3559 = vmatpush.bf16.msra.mxu0 %v3525_v13  ;;  %v2747_v27 = vpop.f32.mrf.mxu0 }
 0x66a   :  { %v7475_v52 = vadd.f32 %v2747_v27, %v2277_v54 }
 0x66c   :  { %4940 = vmatmul.msk.bf16.vlgmr.msra.gmra.mxu0 %vm1783_vm13, %v4939_v53  ;;  %8494 = vst [vmem:[#allocation60_spill] sm:$0xff] %v7475_v52  ;;  %vm4598_vm13 = vcmask 769024  }
 0x66d   :  { %v3226_v11 = vpop.f32.mrf.mxu2  ;;  %v3239_v63 = vpop.f32.mrf.mxu3 }
 0x671   :  { %v3213_v0 = vpop.f32.mrf.mxu1  ;;  %v2749_v38 = vpop.f32.mrf.mxu0 }
 0x672   :  { %v4302_v38 = vld.sshfl [vmem:[#allocation1 + $0x8] sm:$0xff pattern:$0x75316420] }
 0x675   :  { %v3228_v33 = vpop.f32.mrf.mxu2  ;;  %v3241_v18 = vpop.f32.mrf.mxu3 }
 0x676   :  { %v8495_v33 = vld [vmem:[#allocation9_spill] sm:$0xff] }
 0x679   :  { %v3215_v20 = vpop.f32.mrf.mxu1 }
 0x67a   :  { %v4304_v20 = vld.sshfl [vmem:[#allocation1 + $0x18] sm:$0xff pattern:$0x75316420] }
 0x68d   :  { %v3200_v59 = vpop.f32.mrf.mxu0 }
 0x695   :  { %v3202_v44 = vpop.f32.mrf.mxu0 }
 0x697   :  { %v3336_v28 = vpop.f32.mrf.mxu2 }
 0x698   :  { %v3349_v15 = vpop.f32.mrf.mxu3  ;;  %v3337_v21 = vadd.f32 %v3336_v28, %v3226_v11  ;;  %v4303_v11 = vld.sshfl [vmem:[#allocation1 + $0x10] sm:$0xff pattern:$0x75316420] }
 0x699   :  { %v3350_v53 = vadd.f32 %v3349_v15, %v3239_v63  ;;  %4830 = vst [vmem:[#allocation1 + $0x10] ss:$2 sm:$0xff] %v8495_v33 }
 0x69d   :  { %v3323_v3 = vpop.f32.mrf.mxu1 }
 0x69e   :  { %v3324_v35 = vadd.f32 %v3323_v3, %v3213_v0 }
 0x69f   :  { %v3338_v43 = vpop.f32.mrf.mxu2 }
 0x6a0   :  { %v3351_v48 = vpop.f32.mrf.mxu3 }
 0x6a5   :  { %v3325_v26 = vpop.f32.mrf.mxu1 }
 0x6b9   :  { %v3310_v32 = vpop.f32.mrf.mxu0 }
 0x6ba   :  { %v3311_v18 = vadd.f32 %v3310_v32, %v3200_v59 }
 0x6c1   :  { %v3312_v25 = vpop.f32.mrf.mxu0 }
 0x6c4   :  { %v3587_v49 = vpop.f32.mrf.mxu2  ;;  %v3600_v9 = vpop.f32.mrf.mxu3 }
 0x6c5   :  { %v3606_v23 = vadd.f32 %v3587_v49, %v3337_v21  ;;  %v3607_v61 = vadd.f32 %v3600_v9, %v3350_v53  ;;  %v8496_v53 = vld [vmem:[#allocation70_spill] sm:$0xff]  ;;  %v8497_v49 = vld [vmem:[#allocation35_spill] sm:$0xff] }
 0x6c7   :  { %v3616_v14 = vadd.f32 %v3612_v41, %v3606_v23  ;;  %v3617_v40 = vadd.f32 %v3612_v41, %v3607_v61 }
 0x6c9   :  { %v3620_v29 = vmax.f32 %v3616_v14, 0.0  ;;  %v3621_v55 = vmax.f32 %v3617_v40, 0.0  ;;  %v4301_v14 = vld.sshfl [vmem:[#allocation1] sm:$0xff pattern:$0x75316420]  ;;  %v8498_v40 = vld [vmem:[#allocation8_spill] sm:$0xff] }
 0x6ca   :  { %v3574_v54 = vpop.f32.mrf.mxu1  ;;  %4828 = vst [vmem:[#allocation1] ss:$2 sm:$0xff] %v8498_v40 }
 0x6cb   :  { %v3605_v7 = vadd.f32 %v3574_v54, %v3324_v35  ;;  %3632 = vrot.lane.b32.xlu2 %v3621_v55, %s5080_s3  ;;  %3630 = vrot.lane.b32.xlu1 %v3620_v29, %s5080_s3 }
 0x6cc   :  { %v3589_v13 = vpop.f32.mrf.mxu2  ;;  %v3602_v34 = vpop.f32.mrf.mxu3 }
 0x6cd   :  { %v3615_v27 = vadd.f32 %v3612_v41, %v3605_v7  ;;  %v8499_v7 = vld [vmem:[#allocation69_spill] sm:$0xff]  ;;  %v8500_v34 = vld [vmem:[#allocation71_spill] sm:$0xff] }
 0x6cf   :  { %v3619_v63 = vmax.f32 %v3615_v27, 0.0 }
 0x6d1   :  { %3628 = vrot.lane.b32.xlu0 %v3619_v63, %s5080_s3  ;;  %v8501_v63 = vld [vmem:[#allocation52_spill] sm:$0xff] }
 0x6d2   :  { %v3576_v0 = vpop.f32.mrf.mxu1 }
 0x6d3   :  { %4307 = vrot.lane.b32.xlu1 %v4302_v38, %s5080_s3  ;;  %4309 = vrot.lane.b32.xlu2 %v4303_v11, %s5080_s3  ;;  %v8502_v0 = vld [vmem:[#allocation34_spill] sm:$0xff] }
 0x6e9   :  { %v3561_v28 = vpop.f32.mrf.mxu0 }
 0x6ea   :  { %v3604_v15 = vadd.f32 %v3561_v28, %v3311_v18 }
 0x6ec   :  { %v3614_v3 = vadd.f32 %v3612_v41, %v3604_v15 }
 0x6ee   :  { %v3618_v43 = vmax.f32 %v3614_v3, 0.0 }
 0x6f0   :  { %3626 = vrot.lane.b32.xlu0 %v3618_v43, %s5080_s3 }
 0x6f1   :  { %v3563_v48 = vpop.f32.mrf.mxu0 }
 0x6f8   :  { %4311 = vrot.lane.b32.xlu0 %v4304_v20, %s5080_s3 }
 0x725   :  { %v3633_v26 = vpop.permute.xlu2 %3632 }
 0x726   :  { %v7486_v44 = vsel %vm308_vm4, %v3633_v26, 0.0 }
 0x727   :  { %v3771_v25 = vmul.f32 %v7486_v44, %v8496_v53  ;;  %v3763_v59 = vmul.f32 %v7486_v44, %v8497_v49 }
 0x729   :  { %v3774_v21 = vpack.c.bf16 %v3771_v25, %v3771_v25  ;;  %v3766_v23 = vpack.c.bf16 %v3763_v59, %v3763_v59 }
 0x72b   :  { %v3822_v32 = vunpack.c.l.b16 %v3774_v21  ;;  %v3795_v61 = vunpack.c.l.b16 %v3766_v23  ;;  %v8503_v21 = vld [vmem:[#allocation44_spill] sm:$0xff] }
 0x72d   :  { %v3827_v9 = vpack.c.b16 %v3822_v32, %v3822_v32  ;;  %v3800_v41 = vpack.c.b16 %v3795_v61, %v3795_v61  ;;  %v8504_v32 = vld [vmem:[#allocation43_spill] sm:$0xff] }
 0x72f   :  { %3836 = vrot.lane.b32.xlu0 %v3827_v9, %s5082_s21 }
 0x737   :  { %3809 = vrot.lane.b32.xlu0 %v3800_v41, %s5083_s1 }
 0x73d   :  { %v3631_v35 = vpop.permute.xlu1 %3630 }
 0x73e   :  { %v7496_v29 = vsel %vm308_vm4, %v3631_v35, %v3633_v26 }
 0x73f   :  { %v3770_v27 = vmul.f32 %v7496_v29, %v8500_v34  ;;  %v3762_v18 = vmul.f32 %v7496_v29, %v8502_v0  ;;  %v3663_v9 = vmul.f32 %v7496_v29, %v8504_v32  ;;  %v3655_v8 = vmul.f32 %v7496_v29, %v8511_v1 }
 0x743   :  { %v3629_v55 = vpop.permute.xlu0 %3628 }
 0x744   :  { %v7499_v54 = vsel %vm308_vm4, %v3629_v55, %v3631_v35 }
 0x745   :  { %v3769_v13 = vmul.f32 %v7499_v54, %v8499_v7  ;;  %v3761_v20 = vmul.f32 %v7499_v54, %v8501_v63  ;;  %v3662_v59 = vmul.f32 %v7499_v54, %v8503_v21 }
 0x747   :  { %v3773_v11 = vpack.c.bf16 %v3770_v27, %v3769_v13  ;;  %v3765_v3 = vpack.c.bf16 %v3762_v18, %v3761_v20  ;;  %v3666_v23 = vpack.c.bf16 %v3663_v9, %v3662_v59  ;;  %v8505_v27 = vld [vmem:[#allocation33_spill] sm:$0xff] }
 0x748   :  { %v8506_v20 = vld [vmem:[#allocation53_spill] sm:$0xff] }
 0x749   :  { %v3821_v38 = vunpack.c.h.b16 %v3773_v11  ;;  %v3820_v33 = vunpack.c.l.b16 %v3773_v11  ;;  %v3794_v43 = vunpack.c.h.b16 %v3765_v3  ;;  %v3793_v48 = vunpack.c.l.b16 %v3765_v3  ;;  %v8510_v59 = vld [vmem:[#allocation41_spill] sm:$0xff] }
 0x74a   :  { %v3713_v61 = vunpack.c.l.b16 %v3666_v23  ;;  %v3654_v9 = vmul.f32 %v7499_v54, %v8510_v59 }
 0x74b   :  { %v3826_v28 = vpack.c.b16 %v3821_v38, %v3821_v38  ;;  %v3825_v15 = vpack.c.b16 %v3820_v33, %v3820_v33  ;;  %v3799_v26 = vpack.c.b16 %v3794_v43, %v3794_v43  ;;  %v3798_v25 = vpack.c.b16 %v3793_v48, %v3793_v48  ;;  %v8507_v33 = vld [vmem:[#allocation32_spill] sm:$0xff] }
 0x74c   :  { %v3718_v13 = vpack.c.b16 %v3713_v61, %v3713_v61 }
 0x74d   :  { %3834 = vrot.lane.b32.xlu2 %v3826_v28, %s5082_s21  ;;  %3832 = vrot.lane.b32.xlu1 %v3825_v15, %s5082_s21  ;;  %v8508_v28 = vld [vmem:[#allocation30_spill] sm:$0xff] }
 0x74e   :  { %v8509_v15 = vld [vmem:[#allocation22_spill] sm:$0xff] }
 0x755   :  { %3807 = vrot.lane.b32.xlu2 %v3799_v26, %s5083_s1  ;;  %3805 = vrot.lane.b32.xlu1 %v3798_v25, %s5083_s1 }
 0x75d   :  { %4305 = vrot.lane.b32.xlu1 %v4301_v14, %s5080_s3  ;;  %s5104_s3 = smov 94  }
 0x762   :  { %v3627_v41 = vpop.permute.xlu0 %3626 }
 0x763   :  { %v7519_v40 = vsel %vm308_vm4, %v3627_v41, %v3629_v55  ;;  %v7522_v35 = vsel %vm308_vm4, 0.0, %v3627_v41  ;;  %v3664_v55 = vmul.f32 %v7486_v44, %v8509_v15 }
 0x764   :  { %v3767_v11 = vmul.f32 %v7522_v35, %v8505_v27  ;;  %v3768_v38 = vmul.f32 %v7519_v40, %v8506_v20  ;;  %v3759_v18 = vmul.f32 %v7522_v35, %v8507_v33  ;;  %v3760_v14 = vmul.f32 %v7519_v40, %v8508_v28 }
 0x765   :  { %3725 = vrot.lane.b32.xlu1 %v3718_v13, %s5082_s21  ;;  %v3667_v61 = vpack.c.bf16 %v3664_v55, %v3664_v55  ;;  %v3658_v13 = vpack.c.bf16 %v3655_v8, %v3654_v9  ;;  %v8513_v55 = vld [vmem:[#allocation37_spill] sm:$0xff] }
 0x766   :  { %v3772_v3 = vpack.c.bf16 %v3768_v38, %v3767_v11  ;;  %v3764_v43 = vpack.c.bf16 %v3760_v14, %v3759_v18  ;;  %v3714_v38 = vunpack.c.h.b16 %v3666_v23  ;;  %v8512_v14 = vld [vmem:[#allocation21_spill] sm:$0xff]  ;;  %v3656_v23 = vmul.f32 %v7486_v44, %v8471_v50 }
 0x767   :  { %v3715_v11 = vunpack.c.l.b16 %v3667_v61  ;;  %v3687_v18 = vunpack.c.h.b16 %v3658_v13  ;;  %v3686_v8 = vunpack.c.l.b16 %v3658_v13  ;;  %v4086_v61 = vmul.f32 %v7499_v54, %v6439_v6 }
 0x768   :  { %v3819_v48 = vunpack.c.h.b16 %v3772_v3  ;;  %v3818_v26 = vunpack.c.l.b16 %v3772_v3  ;;  %v3791_v25 = vunpack.c.l.b16 %v3764_v43  ;;  %v3660_v3 = vmul.f32 %v7522_v35, %v8512_v14 }
 0x769   :  { %v3691_v62 = vpack.c.b16 %v3686_v8, %v3686_v8 }
 0x76a   :  { %v3824_v41 = vpack.c.b16 %v3819_v48, %v3819_v48  ;;  %v3823_v60 = vpack.c.b16 %v3818_v26, %v3818_v26  ;;  %v3796_v52 = vpack.c.b16 %v3791_v25, %v3791_v25  ;;  %v3661_v48 = vmul.f32 %v7519_v40, %v8513_v55 }
 0x76b   :  { %v3720_v26 = vpack.c.b16 %v3715_v11, %v3715_v11  ;;  %v3719_v25 = vpack.c.b16 %v3714_v38, %v3714_v38  ;;  %v3659_v38 = vpack.c.bf16 %v3656_v23, %v3656_v23  ;;  %v4078_v23 = vmul.f32 %v7499_v54, %v6400_v5 }
 0x76c   :  { %3830 = vrot.lane.b32.xlu0 %v3824_v41, %s5082_s21  ;;  %3828 = vrot.lane.b32.xlu2 %v3823_v60, %s5082_s21  ;;  %v3692_v41 = vpack.c.b16 %v3687_v18, %v3687_v18  ;;  %v3665_v60 = vpack.c.bf16 %v3661_v48, %v3660_v3  ;;  %v8514_v48 = vld [vmem:[#allocation19_spill] sm:$0xff] }
 0x76d   :  { %3801 = vrot.lane.b32.xlu1 %v3796_v52, %s5083_s1  ;;  %v3792_v52 = vunpack.c.h.b16 %v3764_v43  ;;  %v3688_v43 = vunpack.c.l.b16 %v3659_v38 }
 0x76e   :  { %v3712_v9 = vunpack.c.h.b16 %v3665_v60  ;;  %v3711_v3 = vunpack.c.l.b16 %v3665_v60 }
 0x76f   :  { %v3797_v11 = vpack.c.b16 %v3792_v52, %v3792_v52  ;;  %v3693_v19 = vpack.c.b16 %v3688_v43, %v3688_v43 }
 0x770   :  { %v3717_v18 = vpack.c.b16 %v3712_v9, %v3712_v9  ;;  %v4079_v9 = vmul.f32 %v7496_v29, %v6409_v39 }
 0x772   :  { %v4082_v60 = vpack.c.bf16 %v4079_v9, %v4078_v23  ;;  %v4080_v23 = vmul.f32 %v7486_v44, %v6403_v4 }
 0x774   :  { %3729 = vrot.lane.b32.xlu0 %v3720_v26, %s5082_s21  ;;  %3727 = vrot.lane.b32.xlu2 %v3719_v25, %s5082_s21  ;;  %v4087_v26 = vmul.f32 %v7496_v29, %v6443_v22  ;;  %v3652_v25 = vmul.f32 %v7522_v35, %v8514_v48  ;;  %v4110_v58 = vunpack.c.l.b16 %v4082_v60 }
 0x775   :  { %3700 = vrot.lane.b32.xlu1 %v3692_v41, %s5083_s1  ;;  %v8515_v41 = vld [vmem:[#allocation38_spill] sm:$0xff] }
 0x776   :  { %v4090_v13 = vpack.c.bf16 %v4087_v26, %v4086_v61  ;;  %v3653_v8 = vmul.f32 %v7519_v40, %v8515_v41  ;;  %v4115_v37 = vpack.c.b16 %v4110_v58, %v4110_v58 }
 0x778   :  { %v4137_v52 = vunpack.c.l.b16 %v4090_v13  ;;  %v3657_v61 = vpack.c.bf16 %v3653_v8, %v3652_v25  ;;  %v7573_v25 = vpop.permute.xlu1 %4307 }
 0x77a   :  { %v3685_v38 = vunpack.c.h.b16 %v3657_v61  ;;  %v3684_v26 = vunpack.c.l.b16 %v3657_v61  ;;  %v4083_v61 = vpack.c.bf16 %v4080_v23, %v4080_v23  ;;  %v4085_v23 = vmul.f32 %v7519_v40, %v6425_v51 }
 0x77c   :  { %3698 = vrot.lane.b32.xlu0 %v3691_v62, %s5083_s1  ;;  %3803 = vrot.lane.b32.xlu2 %v3797_v11, %s5083_s1  ;;  %v3716_v62 = vpack.c.b16 %v3711_v3, %v3711_v3  ;;  %v4142_v11 = vpack.c.b16 %v4137_v52, %v4137_v52  ;;  %v3690_v43 = vpack.c.b16 %v3685_v38, %v3685_v38  ;;  %v4138_v52 = vunpack.c.h.b16 %v4090_v13 }
 0x77d   :  { %3723 = vrot.lane.b32.xlu1 %v3717_v18, %s5082_s21  ;;  %v4088_v18 = vmul.f32 %v7486_v44, %v6436_v45  ;;  %v3689_v3 = vpack.c.b16 %v3684_v26, %v3684_v26  ;;  %v4312_v26 = vpop.permute.xlu0 %4311 }
 0x77e   :  { %v4143_v58 = vpack.c.b16 %v4138_v52, %v4138_v52 }
 0x77f   :  { %v4091_v28 = vpack.c.bf16 %v4088_v18, %v4088_v18 }
 0x781   :  { %v4139_v8 = vunpack.c.l.b16 %v4091_v28  ;;  %v4111_v28 = vunpack.c.h.b16 %v4082_v60 }
 0x783   :  { %v4144_v9 = vpack.c.b16 %v4139_v8, %v4139_v8  ;;  %v4116_v38 = vpack.c.b16 %v4111_v28, %v4111_v28  ;;  %v3754_v28 = vmul.f32 %v7496_v29, %v8478_v24 }
 0x784   :  { %3702 = vrot.lane.b32.xlu2 %v3693_v19, %s5083_s1  ;;  %3721 = vrot.lane.b32.xlu0 %v3716_v62, %s5082_s21  ;;  %v4310_v19 = vpop.permute.xlu2 %4309 }
 0x785   :  { %4149 = vrot.lane.b32.xlu1 %v4142_v11, %s5082_s21  ;;  %v7580_v62 = vsel %vm308_vm4, %v7573_v25, %v4310_v19  ;;  %v7590_v18 = vsel %vm308_vm4, %v4310_v19, %v4312_v26 }
 0x786   :  { %v4335_v11 = vmul.f32 %v7580_v62, %v8510_v59  ;;  %v7593_v59 = vsel %vm308_vm4, %v4312_v26, 0.0  ;;  %v4371_v19 = vmul.f32 %v7590_v18, %v8504_v32 }
 0x78c   :  { %3696 = vrot.lane.b32.xlu0 %v3690_v43, %s5083_s1  ;;  %3694 = vrot.lane.b32.xlu2 %v3689_v3, %s5083_s1  ;;  %v4337_v43 = vmul.f32 %v7593_v59, %v8471_v50  ;;  %v4336_v3 = vmul.f32 %v7590_v18, %v8511_v1  ;;  %v4372_v50 = vmul.f32 %v7593_v59, %v8509_v15 }
 0x78d   :  { %4122 = vrot.lane.b32.xlu1 %v4115_v37, %s5083_s1  ;;  %v4112_v37 = vunpack.c.l.b16 %v4083_v61  ;;  %v4084_v1 = vmul.f32 %v7522_v35, %v6397_v42  ;;  %v3753_v15 = vmul.f32 %v7499_v54, %v8477_v16  ;;  %v3755_v61 = vmul.f32 %v7486_v44, %v8476_v56 }
 0x78f   :  { %v4117_v13 = vpack.c.b16 %v4112_v37, %v4112_v37  ;;  %v4089_v32 = vpack.c.bf16 %v4085_v23, %v4084_v1  ;;  %v3758_v26 = vpack.c.bf16 %v3755_v61, %v3755_v61 }
 0x791   :  { %v4136_v37 = vunpack.c.h.b16 %v4089_v32 }
 0x794   :  { %4153 = vrot.lane.b32.xlu0 %v4144_v9, %s5082_s21  ;;  %4151 = vrot.lane.b32.xlu2 %v4143_v58, %s5082_s21  ;;  %v4406_v9 = vmul.f32 %v7590_v18, %v8478_v24  ;;  %v4407_v58 = vmul.f32 %v7593_v59, %v8476_v56  ;;  %v4370_v24 = vmul.f32 %v7580_v62, %v8503_v21 }
 0x795   :  { %4347 = vrot.lane.b32.xlu1 %v4335_v11, %s5083_s1  ;;  %v4405_v21 = vmul.f32 %v7580_v62, %v8477_v16 }
 0x79c   :  { %4126 = vrot.lane.b32.xlu0 %v4117_v13, %s5083_s1  ;;  %4124 = vrot.lane.b32.xlu2 %v4116_v38, %s5083_s1  ;;  %v3757_v38 = vpack.c.bf16 %v3754_v28, %v3753_v15  ;;  %v4442_v28 = vmul.f32 %v7593_v59, %v8497_v49 }
 0x7a1   :  { %v3837_v8 = vpop.permute.xlu0 %3836 }
 0x7a4   :  { %4351 = vrot.lane.b32.xlu0 %v4337_v43, %s5083_s1  ;;  %4349 = vrot.lane.b32.xlu2 %v4336_v3, %s5083_s1  ;;  %v4141_v3 = vpack.c.b16 %v4136_v37, %v4136_v37  ;;  %v4440_v37 = vmul.f32 %v7580_v62, %v8501_v63 }
 0x7a7   :  { %v3835_v60 = vpop.permute.xlu2 %3834 }
 0x7a8   :  { %v3841_v52 = vsel %vm601_vm15, %v3835_v60, %v3837_v8 }
 0x7ac   :  { %3880 = vrot.lane.b32.xlu2 %v3841_v52, %s5100_s30  ;;  %3882 = vrot.lane.b32.xlu0 %v3837_v8, %s5100_s30  ;;  %v3780_v8 = vunpack.c.l.b16 %v3757_v38  ;;  %v3782_v52 = vunpack.c.l.b16 %v3758_v26  ;;  %v4135_v26 = vunpack.c.l.b16 %v4089_v32  ;;  %v4477_v32 = vmul.f32 %v7593_v59, %v8496_v53 }
 0x7ad   :  { %v4510_v53 = vmul.f32 %v7580_v62, %v8486_v2 }
 0x7ae   :  { %v3785_v1 = vpack.c.b16 %v3780_v8, %v3780_v8  ;;  %v3787_v23 = vpack.c.b16 %v3782_v52, %v3782_v52  ;;  %v4140_v49 = vpack.c.b16 %v4135_v26, %v4135_v26  ;;  %v4475_v52 = vmul.f32 %v7580_v62, %v8499_v7 }
 0x7af   :  { %v3808_v11 = vpop.permute.xlu2 %3807  ;;  %v4441_v26 = vmul.f32 %v7590_v18, %v8502_v0 }
 0x7b4   :  { %4384 = vrot.lane.b32.xlu2 %v4371_v19, %s5082_s21  ;;  %4386 = vrot.lane.b32.xlu0 %v4372_v50, %s5082_s21  ;;  %v3810_v19 = vpop.permute.xlu0 %3809 }
 0x7bc   :  { %4419 = vrot.lane.b32.xlu2 %v4406_v9, %s5086_s24  ;;  %4421 = vrot.lane.b32.xlu0 %v4407_v58, %s5086_s24  ;;  %v3856_v58 = vsel %vm127_vm0, %v3787_v23, %v3810_v19  ;;  %v3814_v23 = vsel %vm561_vm2, %v3808_v11, %v3810_v19 }
 0x7bf   :  { %v7626_v13 = vpop.permute.xlu1 %3832 }
 0x7c0   :  { %v3840_v43 = vsel %vm601_vm15, %v7626_v13, %v3835_v60 }
 0x7c1   :  { %3878 = vrot.lane.b32.xlu1 %v3840_v43, %s5100_s30  ;;  %v4076_v43 = vmul.f32 %v7522_v35, %v8474_v47 }
 0x7c4   :  { %4147 = vrot.lane.b32.xlu2 %v4141_v3, %s5082_s21  ;;  %v4077_v3 = vmul.f32 %v7519_v40, %v8475_v57 }
 0x7c6   :  { %v7632_v56 = vpop.permute.xlu2 %3828 }
 0x7c7   :  { %v3806_v50 = vpop.permute.xlu1 %3805 }
 0x7c8   :  { %v3813_v9 = vsel %vm561_vm2, %v3806_v50, %v3808_v11 }
 0x7c9   :  { %4382 = vrot.lane.b32.xlu1 %v4370_v24, %s5082_s21  ;;  %v3850_v60 = vsel %vm127_vm0, %v3785_v1, %v3813_v9  ;;  %v4081_v24 = vpack.c.bf16 %v4077_v3, %v4076_v43  ;;  %v3781_v1 = vunpack.c.h.b16 %v3757_v38  ;;  %v4511_v43 = vmul.f32 %v7590_v18, %v8487_v10 }
 0x7ca   :  { %3868 = vrot.lane.b32.xlu0 %v3850_v60, %s5100_s30 }
 0x7cb   :  { %v3786_v7 = vpack.c.b16 %v3781_v1, %v3781_v1  ;;  %v4476_v1 = vmul.f32 %v7590_v18, %v8500_v34 }
 0x7cc   :  { %3872 = vrot.lane.b32.xlu2 %v3856_v58, %s5100_s30 }
 0x7ce   :  { %v7642_v15 = vpop.permute.xlu2 %3727 }
 0x7cf   :  { %v4306_v61 = vpop.permute.xlu1 %4305 }
 0x7d0   :  { %v7688_v19 = vsel %vm308_vm4, 0.0, %v4306_v61 }
 0x7d1   :  { %4417 = vrot.lane.b32.xlu1 %v4405_v21, %s5086_s24  ;;  %v3853_v21 = vsel %vm127_vm0, %v3786_v7, %v3814_v23  ;;  %v4333_v3 = vmul.f32 %v7688_v19, %v8514_v48 }
 0x7d2   :  { %4452 = vrot.lane.b32.xlu0 %v4440_v37, %s5101_s15 }
 0x7d4   :  { %4456 = vrot.lane.b32.xlu2 %v4442_v28, %s5101_s15 }
 0x7d6   :  { %v7657_v16 = vpop.permute.xlu2 %3803 }
 0x7d7   :  { %v7661_v63 = vsel %vm561_vm2, %v7657_v16, %v3806_v50  ;;  %v7663_v8 = vpop.permute.xlu1 %3725  ;;  %v4108_v50 = vunpack.c.l.b16 %v4081_v24 }
 0x7d9   :  { %4145 = vrot.lane.b32.xlu1 %v4140_v49, %s5082_s21  ;;  %v4113_v37 = vpack.c.b16 %v4108_v50, %v4108_v50  ;;  %v7703_v49 = vsel %vm308_vm4, %v4306_v61, %v7573_v25  ;;  %v4546_v50 = vmul.f32 %v7590_v18, %v6409_v39  ;;  %v4109_v25 = vunpack.c.h.b16 %v4081_v24 }
 0x7da   :  { %4487 = vrot.lane.b32.xlu0 %v4475_v52, %s5103_s6  ;;  %v4334_v48 = vmul.f32 %v7703_v49, %v8515_v41  ;;  %vm4493_vm4 = vcmask 900096  }
 0x7db   :  { %v4114_v41 = vpack.c.b16 %v4109_v25, %v4109_v25  ;;  %v4581_v25 = vmul.f32 %v7590_v18, %v6443_v22 }
 0x7dc   :  { %4491 = vrot.lane.b32.xlu2 %v4477_v32, %s5103_s6 }
 0x7de   :  { %v7673_v9 = vpop.permute.xlu2 %3702  ;;  %v7675_v60 = vpop.permute.xlu0 %3830 }
 0x7df   :  { %v7677_v58 = vpop.permute.xlu1 %3801  ;;  %v3839_v39 = vsel %vm601_vm15, %v7675_v60, %v7626_v13  ;;  %v4368_v13 = vmul.f32 %v7688_v19, %v8512_v14  ;;  %v4545_v14 = vmul.f32 %v7580_v62, %v6400_v5  ;;  %v3751_v5 = vmul.f32 %v7522_v35, %v8479_v46 }
 0x7e1   :  { %3870 = vrot.lane.b32.xlu1 %v3853_v21, %s5100_s30  ;;  %v4547_v21 = vmul.f32 %v7593_v59, %v6403_v4 }
 0x7e2   :  { %4118 = vrot.lane.b32.xlu0 %v4113_v37, %s5083_s1 }
 0x7e4   :  { %4522 = vrot.lane.b32.xlu2 %v4510_v53, %s5088_s26 }
 0x7e6   :  { %v3695_v11 = vpop.permute.xlu2 %3694  ;;  %v7685_v38 = vpop.permute.xlu0 %3729 }
 0x7e7   :  { %v7690_v28 = vpop.permute.xlu1 %3700 }
 0x7e9   :  { %4454 = vrot.lane.b32.xlu1 %v4441_v26, %s5101_s15 }
 0x7ea   :  { %4524 = vrot.lane.b32.xlu0 %v4511_v43, %s5088_s26  ;;  %v4512_v43 = vmul.f32 %v7593_v59, %v8488_v31 }
 0x7ec   :  { %4343 = vrot.lane.b32.xlu2 %v4333_v3, %s5083_s1  ;;  %v4580_v3 = vmul.f32 %v7580_v62, %v6439_v6 }
 0x7ee   :  { %v7705_v52 = vpop.permute.xlu2 %4151  ;;  %v7707_v32 = vpop.permute.xlu0 %3698 }
 0x7ef   :  { %v7709_v0 = vpop.permute.xlu1 %3723 }
 0x7f1   :  { %4489 = vrot.lane.b32.xlu1 %v4476_v1, %s5103_s6 }
 0x7f2   :  { %4345 = vrot.lane.b32.xlu0 %v4334_v48, %s5083_s1  ;;  %v4325_v48 = vmul.f32 %v7580_v62, %v8481_v17  ;;  %v3752_v62 = vmul.f32 %v7519_v40, %v8480_v12 }
 0x7f4   :  { %4559 = vrot.lane.b32.xlu2 %v4546_v50, %s5100_s30 }
 0x7f6   :  { %v7720_v61 = vpop.permute.xlu2 %4124  ;;  %v3722_v23 = vpop.permute.xlu0 %3721 }
 0x7f7   :  { %v7724_v7 = vsel %vm601_vm15, %v3722_v23, %v7709_v0  ;;  %v7726_v34 = vpop.permute.xlu1 %4149 }
 0x7f9   :  { %4120 = vrot.lane.b32.xlu1 %v4114_v41, %s5083_s1  ;;  %v4403_v41 = vmul.f32 %v7688_v19, %v8479_v46  ;;  %v3756_v46 = vpack.c.bf16 %v3752_v62, %v3751_v5 }
 0x7fa   :  { %4561 = vrot.lane.b32.xlu0 %v4547_v21, %s5100_s30 }
 0x7fc   :  { %3876 = vrot.lane.b32.xlu2 %v3839_v39, %s5100_s30 }
 0x7fe   :  { %v4350_v24 = vpop.permute.xlu2 %4349  ;;  %v3697_v37 = vpop.permute.xlu0 %3696 }
 0x7ff   :  { %v7737_v53 = vsel %vm561_vm2, %v3695_v11, %v3697_v37  ;;  %v7741_v26 = vsel %vm561_vm2, %v3697_v37, %v7707_v32  ;;  %v7743_v4 = vpop.permute.xlu1 %4122  ;;  %v3838_v37 = vsel %vm601_vm15, %v7632_v56, %v7675_v60 }
 0x801   :  { %4526 = vrot.lane.b32.xlu1 %v4512_v43, %s5088_s26  ;;  %v4404_v43 = vmul.f32 %v7703_v49, %v8480_v12  ;;  %v4326_v12 = vmul.f32 %v7590_v18, %v8482_v30  ;;  %v3646_v18 = vmul.f32 %v7499_v54, %v8481_v17  ;;  %v4438_v17 = vmul.f32 %v7688_v19, %v8507_v33 }
 0x802   :  { %4378 = vrot.lane.b32.xlu0 %v4368_v13, %s5082_s21  ;;  %v3734_v13 = vsel %vm601_vm15, %v7642_v15, %v7685_v38 }
 0x804   :  { %4592 = vrot.lane.b32.xlu2 %v4580_v3, %s5104_s3  ;;  %v4327_v3 = vmul.f32 %v7593_v59, %v8483_v36 }
 0x806   :  { %v7754_v11 = vpop.permute.xlu2 %3880  ;;  %v7756_v1 = vpop.permute.xlu0 %4153 }
 0x807   :  { %v7760_v50 = vpop.permute.xlu1 %4347 }
 0x808   :  { %v4356_v6 = vsel %vm561_vm2, %v7760_v50, %v4350_v24 }
 0x809   :  { %v7768_v23 = vadd.f32 %v4356_v6, %v4325_v48  ;;  %4557 = vrot.lane.b32.xlu1 %v4545_v14, %s5100_s30  ;;  %v3779_v48 = vunpack.c.h.b16 %v3756_v46 }
 0x80a   :  { %4594 = vrot.lane.b32.xlu0 %v4581_v25, %s5104_s3 }
 0x80b   :  { %v3784_v5 = vpack.c.b16 %v3779_v48, %v3779_v48  ;;  %v4473_v48 = vmul.f32 %v7688_v19, %v8505_v27  ;;  %v3707_v27 = vsel %vm561_vm2, %v7690_v28, %v7673_v9 }
 0x80c   :  { %4413 = vrot.lane.b32.xlu2 %v4403_v41, %s5086_s24  ;;  %v4369_v41 = vmul.f32 %v7703_v49, %v8513_v55 }
 0x80d   :  { %v3847_v62 = vsel %vm127_vm0, %v3784_v5, %v7661_v63  ;;  %v4474_v5 = vmul.f32 %v7703_v49, %v8506_v20 }
 0x80e   :  { %v7779_v21 = vpop.permute.xlu2 %4384  ;;  %v7781_v22 = vpop.permute.xlu0 %4126 }
 0x80f   :  { %v7786_v39 = vsel %vm561_vm2, %v7720_v61, %v7781_v22 }
 0x811   :  { %3874 = vrot.lane.b32.xlu1 %v3838_v37, %s5100_s30 }
 0x812   :  { %4415 = vrot.lane.b32.xlu0 %v4404_v43, %s5086_s24 }
 0x814   :  { %3985 = vrot.lane.b32.xlu2 %v3734_v13, %s5101_s15  ;;  %v4582_v13 = vmul.f32 %v7593_v59, %v6436_v45 }
 0x816   :  { %v7801_v14 = vpop.permute.xlu2 %4419  ;;  %v4352_v56 = vpop.permute.xlu0 %4351 }
 0x817   :  { %v4357_v60 = vsel %vm561_vm2, %v4350_v24, %v4352_v56  ;;  %v4367_v6 = vadd.f32 %v4352_v56, %v4327_v3 }
 0x818   :  { %v4366_v25 = vadd.f32 %v4357_v60, %v4326_v12 }
 0x819   :  { %4380 = vrot.lane.b32.xlu1 %v4369_v41, %s5082_s21 }
 0x81a   :  { %3987 = vrot.lane.b32.xlu0 %v7685_v38, %s5101_s15  ;;  %v3647_v38 = vmul.f32 %v7496_v29, %v8482_v30  ;;  %v3648_v30 = vmul.f32 %v7486_v44, %v8483_v36  ;;  %v3733_v36 = vsel %vm601_vm15, %v7663_v8, %v7642_v15 }
 0x81c   :  { %3866 = vrot.lane.b32.xlu2 %v3847_v62, %s5100_s30  ;;  %v3650_v3 = vpack.c.bf16 %v3647_v38, %v3646_v18  ;;  %v3651_v60 = vpack.c.bf16 %v3648_v30, %v3648_v30  ;;  %v3778_v18 = vunpack.c.l.b16 %v3756_v46 }
 0x81e   :  { %v7816_v24 = vpop.permute.xlu2 %4147  ;;  %v3883_v37 = vpop.permute.xlu0 %3882  ;;  %v3674_v12 = vunpack.c.h.b16 %v3650_v3 }
 0x81f   :  { %v7821_v55 = vsel %vm601_vm15, %v7816_v24, %v7726_v34  ;;  %v3891_v43 = vsel %vm3163_vm3, %v7754_v11, %v3883_v37  ;;  %v3675_v37 = vunpack.c.l.b16 %v3651_v60  ;;  %v8517_v60 = vld [vmem:[#allocation30_spill] sm:$0xff] }
 0x820   :  { %v3910_v63 = vsel %vm127_vm0, %v3891_v43, 0  ;;  %v3679_v62 = vpack.c.b16 %v3674_v12, %v3674_v12 }
 0x821   :  { %3957 = vmatpush.bf16.msrb.mxu3 %v3910_v63  ;;  %4596 = vrot.lane.b32.xlu1 %v4582_v13, %s5104_s3  ;;  %v3783_v63 = vpack.c.b16 %v3778_v18, %v3778_v18  ;;  %v3680_v13 = vpack.c.b16 %v3675_v37, %v3675_v37 }
 0x822   :  { %4448 = vrot.lane.b32.xlu0 %v4438_v17, %s5101_s15 }
 0x823   :  { %v3749_v30 = vsel %vm127_vm0, %v3680_v13, %v7673_v9  ;;  %v4071_v13 = vmul.f32 %v7496_v29, %v8487_v10 }
 0x824   :  { %4483 = vrot.lane.b32.xlu2 %v4473_v48, %s5103_s6 }
 0x826   :  { %v7839_v56 = vpop.permute.xlu2 %3872  ;;  %v4387_v45 = vpop.permute.xlu0 %4386 }
 0x827   :  { %v4392_v33 = vsel %vm601_vm15, %v7779_v21, %v4387_v45  ;;  %v4402_v59 = vadd.f32 %v4387_v45, %v4367_v6  ;;  %v3746_v6 = vsel %vm127_vm0, %v3679_v62, %v3707_v27  ;;  %v4439_v27 = vmul.f32 %v7703_v49, %v8517_v60 }
 0x828   :  { %v4401_v41 = vadd.f32 %v4392_v33, %v4366_v25  ;;  %v3811_v25 = vsel %vm561_vm2, %v7677_v58, %v7657_v16  ;;  %v8516_v16 = vld [vmem:[#allocation23_spill] sm:$0xff] }
 0x829   :  { %3983 = vrot.lane.b32.xlu1 %v3733_v36, %s5101_s15  ;;  %v3844_v46 = vsel %vm127_vm0, %v3783_v63, %v3811_v25  ;;  %v4509_v58 = vmul.f32 %v7703_v49, %v8516_v16  ;;  %v4578_v36 = vmul.f32 %v7688_v19, %v6397_v42  ;;  %v4579_v25 = vmul.f32 %v7703_v49, %v6425_v51 }
 0x82a   :  { %4485 = vrot.lane.b32.xlu0 %v4474_v5, %s5103_s6 }
 0x82c   :  { %3975 = vrot.lane.b32.xlu2 %v3746_v6, %s5101_s15 }
 0x82e   :  { %v7858_v43 = vpop.permute.xlu2 %4456  ;;  %v4422_v15 = vpop.permute.xlu0 %4421 }
 0x82f   :  { %v4427_v20 = vsel %vm1104_vm6, %v7801_v14, %v4422_v15  ;;  %v4437_v38 = vadd.f32 %v4422_v15, %v4402_v59 }
 0x830   :  { %v7862_v17 = vadd.f32 %v4427_v20, %v4401_v41  ;;  %v4543_v41 = vmul.f32 %v7688_v19, %v8474_v47  ;;  %v3706_v47 = vsel %vm561_vm2, %v7707_v32, %v7690_v28  ;;  %v8518_v28 = vld [vmem:[#allocation17_spill] sm:$0xff] }
 0x831   :  { %v4472_v48 = vadd.f32 %v7858_v43, %v4437_v38  ;;  %3864 = vrot.lane.b32.xlu1 %v3844_v46, %s5100_s30  ;;  %v3644_v32 = vmul.f32 %v7522_v35, %v8518_v28  ;;  %v8520_v46 = vld [vmem:[#allocation26_spill] sm:$0xff] }
 0x832   :  { %3977 = vrot.lane.b32.xlu0 %v3749_v30, %s5101_s15 }
 0x833   :  { %v7872_v12 = vpop.permute.xlu1 %3878 }
 0x834   :  { %4520 = vrot.lane.b32.xlu2 %v4509_v58, %s5088_s26  ;;  %v3890_v45 = vsel %vm3163_vm3, %v7872_v12, %v7754_v11  ;;  %v3673_v11 = vunpack.c.l.b16 %v3650_v3 }
 0x835   :  { %v3907_v33 = vsel %vm127_vm0, %v3890_v45, 0 }
 0x836   :  { %v7879_v59 = vpop.permute.xlu2 %4491  ;;  %3944 = vmatpush.bf16.msrb.mxu2 %v3907_v33  ;;  %v3678_v37 = vpack.c.b16 %v3673_v11, %v3673_v11  ;;  %v4130_v33 = vsel %vm561_vm2, %v7743_v4, %v7720_v61 }
 0x837   :  { %v7882_v9 = vadd.f32 %v7879_v59, %v4472_v48  ;;  %v4508_v48 = vmul.f32 %v7688_v19, %v8520_v46 }
 0x838   :  { %v3743_v3 = vsel %vm127_vm0, %v3678_v37, %v3706_v47 }
 0x839   :  { %4450 = vrot.lane.b32.xlu1 %v4439_v27, %s5101_s15 }
 0x83a   :  { %4553 = vrot.lane.b32.xlu0 %v4543_v41, %s5100_s30 }
 0x83b   :  { %v7892_v5 = vpop.permute.xlu1 %4382 }
 0x83c   :  { %4588 = vrot.lane.b32.xlu2 %v4578_v36, %s5104_s3  ;;  %v4391_v62 = vsel %vm601_vm15, %v7892_v5, %v7779_v21  ;;  %v7898_v6 = vpop.permute.xlu0 %3868  ;;  %v3732_v21 = vsel %vm601_vm15, %v7709_v0, %v7663_v8  ;;  %v4070_v8 = vmul.f32 %v7499_v54, %v8486_v2 }
 0x83d   :  { %v4400_v18 = vadd.f32 %v4391_v62, %v7768_v23  ;;  %v8519_v23 = vld [vmem:[#allocation36_spill] sm:$0xff] }
 0x83e   :  { %v7904_v42 = vpop.permute.xlu2 %4522  ;;  %v3645_v20 = vmul.f32 %v7519_v40, %v8519_v23  ;;  %v4074_v58 = vpack.c.bf16 %v4071_v13, %v4070_v8 }
 0x840   :  { %v3649_v30 = vpack.c.bf16 %v3645_v20, %v3644_v32  ;;  %v4097_v10 = vunpack.c.l.b16 %v4074_v58  ;;  %v4098_v62 = vunpack.c.h.b16 %v4074_v58 }
 0x841   :  { %3973 = vrot.lane.b32.xlu1 %v3743_v3, %s5101_s15 }
 0x842   :  { %4590 = vrot.lane.b32.xlu0 %v4579_v25, %s5104_s3  ;;  %v3671_v54 = vunpack.c.l.b16 %v3649_v30  ;;  %v4102_v27 = vpack.c.b16 %v4097_v10, %v4097_v10  ;;  %v4103_v3 = vpack.c.b16 %v4098_v62, %v4098_v62 }
 0x843   :  { %v7914_v15 = vpop.permute.xlu1 %4417 }
 0x844   :  { %3981 = vrot.lane.b32.xlu2 %v3732_v21, %s5101_s15  ;;  %v4426_v51 = vsel %vm1104_vm6, %v7914_v15, %v7801_v14  ;;  %v7924_v38 = vpop.permute.xlu0 %4452  ;;  %v4157_v14 = vsel %vm601_vm15, %v7726_v34, %v7705_v52  ;;  %v4544_v34 = vmul.f32 %v7703_v49, %v8475_v57  ;;  %v3676_v60 = vpack.c.b16 %v3671_v54, %v3671_v54 }
 0x845   :  { %v7928_v0 = vadd.f32 %v4426_v51, %v4400_v18  ;;  %v4167_v36 = vsel %vm127_vm0, %v4102_v27, %v4130_v33  ;;  %v4170_v25 = vsel %vm127_vm0, %v4103_v3, %v7786_v39  ;;  %v4069_v39 = vmul.f32 %v7519_v40, %v8516_v16 }
 0x846   :  { %v4344_v63 = vpop.permute.xlu2 %4343  ;;  %v3737_v41 = vsel %vm127_vm0, %v3676_v60, %v7737_v53 }
 0x849   :  { %4518 = vrot.lane.b32.xlu1 %v4508_v48, %s5088_s26 }
 0x84a   :  { %4195 = vrot.lane.b32.xlu0 %v4157_v14, %s5102_s17 }
 0x84b   :  { %v4146_v2 = vpop.permute.xlu1 %4145 }
 0x84c   :  { %4199 = vrot.lane.b32.xlu2 %v7756_v1, %s5102_s17  ;;  %v7941_v45 = vpop.permute.xlu0 %4487 }
 0x84e   :  { %v7943_v29 = vpop.permute.xlu2 %4559 }
 0x851   :  { %4555 = vrot.lane.b32.xlu1 %v4544_v34, %s5100_s30 }
 0x852   :  { %3969 = vrot.lane.b32.xlu0 %v3737_v41, %s5101_s15 }
 0x853   :  { %v3871_v11 = vpop.permute.xlu1 %3870 }
 0x854   :  { %4185 = vrot.lane.b32.xlu2 %v4167_v36, %s5102_s17  ;;  %v4119_v47 = vpop.permute.xlu0 %4118  ;;  %v3886_v61 = vsel %vm3163_vm3, %v7898_v6, %v3871_v11  ;;  %v3887_v57 = vsel %vm3163_vm3, %v3871_v11, %v7839_v56  ;;  %v4155_v56 = vsel %vm601_vm15, %v4146_v2, %v7816_v24  ;;  %v4158_v24 = vsel %vm601_vm15, %v7705_v52, %v7756_v1 }
 0x855   :  { %3945 = vmatpush.bf16.msrb.mxu2 %v3886_v61  ;;  %3958 = vmatpush.bf16.msrb.mxu3 %v3887_v57 }
 0x856   :  { %v7960_v18 = vpop.permute.xlu2 %3876 }
 0x857   :  { %v3889_v53 = vsel %vm3163_vm3, %v7960_v18, %v7872_v12 }
 0x858   :  { %v3904_v37 = vsel %vm127_vm0, %v3889_v53, 0 }
 0x859   :  { %3931 = vmatpush.bf16.msrb.mxu1 %v3904_v37  ;;  %3979 = vrot.lane.b32.xlu1 %v7724_v7, %s5101_s15  ;;  %v4068_v7 = vmul.f32 %v7522_v35, %v8520_v46 }
 0x85a   :  { %4187 = vrot.lane.b32.xlu0 %v4170_v25, %s5102_s17 }
 0x85b   :  { %v4455_v21 = vpop.permute.xlu1 %4454  ;;  %v4073_v13 = vpack.c.bf16 %v4069_v39, %v4068_v7 }
 0x85c   :  { %4191 = vrot.lane.b32.xlu2 %v4155_v56, %s5102_s17  ;;  %v4462_v12 = vsel %vm3273_vm5, %v4455_v21, %v7858_v43  ;;  %v4525_v32 = vpop.permute.xlu0 %4524  ;;  %v4072_v43 = vmul.f32 %v7486_v44, %v8488_v31 }
 0x85d   :  { %v4471_v20 = vadd.f32 %v4462_v12, %v7862_v17  ;;  %v3672_v17 = vunpack.c.h.b16 %v3649_v30  ;;  %v4096_v58 = vunpack.c.h.b16 %v4073_v13  ;;  %v4095_v33 = vunpack.c.l.b16 %v4073_v13 }
 0x85e   :  { %v7977_v51 = vpop.permute.xlu2 %4592  ;;  %v4075_v46 = vpack.c.bf16 %v4072_v43, %v4072_v43 }
 0x85f   :  { %v3677_v48 = vpack.c.b16 %v3672_v17, %v3672_v17  ;;  %v4101_v30 = vpack.c.b16 %v4096_v58, %v4096_v58  ;;  %v4100_v57 = vpack.c.b16 %v4095_v33, %v4095_v33 }
 0x860   :  { %v4099_v44 = vunpack.c.l.b16 %v4075_v46 }
 0x861   :  { %4197 = vrot.lane.b32.xlu1 %v4158_v24, %s5102_s17  ;;  %v3740_v31 = vsel %vm127_vm0, %v3677_v48, %v7741_v26  ;;  %v4461_v26 = vsel %vm3273_vm5, %v7924_v38, %v4455_v21 }
 0x862   :  { %4193 = vrot.lane.b32.xlu0 %v7821_v55, %s5102_s17  ;;  %v4470_v41 = vadd.f32 %v4461_v26, %v7928_v0  ;;  %v4531_v0 = vsel %vm1668_vm8, %v7904_v42, %v4525_v32 }
 0x863   :  { %v4490_v8 = vpop.permute.xlu1 %4489 }
 0x864   :  { %v4497_v35 = vsel %vm4493_vm4, %v4490_v8, %v7879_v59  ;;  %v7993_v40 = vpop.permute.xlu0 %4345 }
 0x865   :  { %v4506_v16 = vadd.f32 %v4497_v35, %v4471_v20  ;;  %v4354_v52 = vsel %vm561_vm2, %v4344_v63, %v7993_v40  ;;  %v4104_v63 = vpack.c.b16 %v4099_v44, %v4099_v44 }
 0x866   :  { %v4414_v1 = vpop.permute.xlu2 %4413 }
 0x867   :  { %v4173_v10 = vsel %vm127_vm0, %v4104_v63, %v7781_v22 }
 0x869   :  { %3971 = vrot.lane.b32.xlu1 %v3740_v31, %s5101_s15 }
 0x86b   :  { %v4121_v55 = vpop.permute.xlu1 %4120 }
 0x86c   :  { %v4129_v59 = vsel %vm561_vm2, %v4121_v55, %v7743_v4  ;;  %v4562_v14 = vpop.permute.xlu0 %4561  ;;  %v4496_v4 = vsel %vm4493_vm4, %v7941_v45, %v4490_v8  ;;  %v4128_v36 = vsel %vm561_vm2, %v4119_v47, %v4121_v55 }
 0x86d   :  { %v4164_v2 = vsel %vm127_vm0, %v4101_v30, %v4129_v59  ;;  %v4567_v22 = vsel %vm3163_vm3, %v7943_v29, %v4562_v14  ;;  %v4505_v53 = vadd.f32 %v4496_v4, %v4470_v41  ;;  %v4161_v3 = vsel %vm127_vm0, %v4100_v57, %v4128_v36  ;;  %v4944_v4 = vld [vmem:[%s8206_s8 + $0x4] sm:$0xf] }
 0x86e   :  { %v8003_v54 = vpop.permute.xlu2 %3985  ;;  %4183 = vrot.lane.b32.xlu2 %v4164_v2, %s5102_s17  ;;  %4947 = vmatmul.msk.bf16.vlgmr.msrb.gmra.mxu2 %vm3896_vm10, %v4944_v4  ;;  %v4324_v41 = vmul.f32 %v7703_v49, %v8519_v23 }
 0x86f   :  { %v4540_v25 = vadd.f32 %v4531_v0, %v4505_v53  ;;  %4948 = vmatmul.msk.bf16.vlgmr.msrb.gmra.mxu3 %vm3896_vm10, %v4944_v4 }
 0x871   :  { %4189 = vrot.lane.b32.xlu1 %v4173_v10, %s5102_s17 }
 0x873   :  { %v4527_v34 = vpop.permute.xlu1 %4526 }
 0x874   :  { %v4532_v60 = vsel %vm1668_vm8, %v4525_v32, %v4527_v34  ;;  %v4379_v27 = vpop.permute.xlu0 %4378 }
 0x875   :  { %v4541_v11 = vadd.f32 %v4532_v60, %v4506_v16 }
 0x876   :  { %v8016_v62 = vpop.permute.xlu2 %3866 }
 0x877   :  { %v3885_v61 = vsel %vm3163_vm3, %v8016_v62, %v7898_v6  ;;  %v4576_v37 = vadd.f32 %v4567_v22, %v4541_v11  ;;  %v4735_v11 = vld [vmem:[%s8211_s13] sm:$0xff] }
 0x878   :  { %3932 = vmatpush.bf16.msrb.mxu1 %v3885_v61 }
 0x879   :  { %4181 = vrot.lane.b32.xlu1 %v4161_v3, %s5102_s17 }
 0x87b   :  { %v8027_v47 = vpop.permute.xlu1 %4557  ;;  %4946 = vmatmul.msk.bf16.vlgmr.msrb.gmra.mxu1 %vm3896_vm10, %v4944_v4 }
 0x87c   :  { %v4566_v56 = vsel %vm3163_vm3, %v8027_v47, %v7943_v29  ;;  %v4595_v6 = vpop.permute.xlu0 %4594  ;;  %v4323_v29 = vmul.f32 %v7688_v19, %v8518_v28 }
 0x87d   :  { %v4575_v21 = vadd.f32 %v4566_v56, %v4540_v25  ;;  %v4601_v12 = vsel %vm4598_vm13, %v7977_v51, %v4595_v6 }
 0x87e   :  { %v4484_v20 = vpop.permute.xlu2 %4483  ;;  %v4363_v8 = vadd.f32 %v4354_v52, %v4323_v29 }
 0x87f   :  { %v4610_v7 = vadd.f32 %v4601_v12, %v4575_v21 }
 0x881   :  { %4629 = vrot.lane.b32.xlu0 %v4610_v7, %s5101_s15 }
 0x883   :  { %v3875_v39 = vpop.permute.xlu1 %3874 }
 0x884   :  { %v3888_v32 = vsel %vm3163_vm3, %v3875_v39, %v7960_v18  ;;  %v4416_v24 = vpop.permute.xlu0 %4415  ;;  %v4542_v18 = vadd.f32 %v4527_v34, %v7882_v9 }
 0x885   :  { %v3901_v43 = vsel %vm127_vm0, %v3888_v32, 0  ;;  %v4424_v31 = vsel %vm1104_vm6, %v4414_v1, %v4416_v24  ;;  %v4614_v1 = vld [vmem:[%s8209_s11] sm:$0xff]  ;;  %v4425_v23 = vsel %vm1104_vm6, %v4416_v24, %v7914_v15 }
 0x886   :  { %v8038_v17 = vpop.permute.xlu2 %3975  ;;  %3918 = vmatpush.bf16.msrb.mxu0 %v3901_v43  ;;  %v4577_v19 = vadd.f32 %v4562_v14, %v4542_v18 }
 0x88b   :  { %v4381_v13 = vpop.permute.xlu1 %4380 }
 0x88c   :  { %v4389_v35 = vsel %vm601_vm15, %v4379_v27, %v4381_v13  ;;  %v3988_v16 = vpop.permute.xlu0 %3987  ;;  %v4390_v22 = vsel %vm601_vm15, %v4381_v13, %v7892_v5 }
 0x88d   :  { %v4398_v46 = vadd.f32 %v4389_v35, %v4363_v8  ;;  %v3996_v48 = vsel %vm3273_vm5, %v8003_v54, %v3988_v16 }
 0x88e   :  { %v8045_v58 = vpop.permute.xlu2 %4520  ;;  %v4014_v44 = vsel %vm127_vm0, %v3996_v48, 0 }
 0x88f   :  { %4061 = vmatpush.bf16.msra.mxu3 %v4014_v44  ;;  %v4433_v55 = vadd.f32 %v4424_v31, %v4398_v46  ;;  %v4530_v32 = vsel %vm1668_vm8, %v8045_v58, %v7904_v42 }
 0x893   :  { %v4597_v28 = vpop.permute.xlu1 %4596 }
 0x894   :  { %v4602_v52 = vsel %vm4598_vm13, %v4595_v6, %v4597_v28  ;;  %v4612_v30 = vadd.f32 %v4597_v28, %v4577_v19  ;;  %v4449_v59 = vpop.permute.xlu0 %4448  ;;  %v8098_v6 = vld [vmem:[%s8206_s8] sm:$0xf] }
 0x895   :  { %v4611_v2 = vadd.f32 %v4602_v52, %v4576_v37  ;;  %v2794_v28 = vld [vmem:[%s8203_s5] sm:$0xff] }
 0x896   :  { %v8051_v63 = vpop.permute.xlu2 %4588  ;;  %4633 = vrot.lane.b32.xlu2 %v4612_v30, %s5101_s15 }
 0x897   :  { %4631 = vrot.lane.b32.xlu1 %v4611_v2, %s5101_s15 }
 0x89b   :  { %v3984_v9 = vpop.permute.xlu1 %3983 }
 0x89c   :  { %v3995_v14 = vsel %vm3273_vm5, %v3984_v9, %v8003_v54  ;;  %v4486_v10 = vpop.permute.xlu0 %4485  ;;  %v4355_v54 = vsel %vm561_vm2, %v7993_v40, %v7760_v50 }
 0x89d   :  { %v4011_v26 = vsel %vm127_vm0, %v3995_v14, 0  ;;  %v4494_v33 = vsel %vm4493_vm4, %v4484_v20, %v4486_v10  ;;  %v4364_v53 = vadd.f32 %v4355_v54, %v4324_v41  ;;  %v4495_v56 = vsel %vm4493_vm4, %v4486_v10, %v7941_v45 }
 0x89e   :  { %v8062_v34 = vpop.permute.xlu2 %3981  ;;  %4048 = vmatpush.bf16.msra.mxu2 %v4011_v26  ;;  %4617 = vperm.xlu2 %5012, %v4614_v1  }
 0x89f   :  { %v3994_v60 = vsel %vm3273_vm5, %v8062_v34, %v3984_v9  ;;  %v4399_v49 = vadd.f32 %v4390_v22, %v4364_v53 }
 0x8a0   :  { %v4008_v27 = vsel %vm127_vm0, %v3994_v60, 0 }
 0x8a1   :  { %4035 = vmatpush.bf16.msra.mxu1 %v4008_v27  ;;  %v4434_v37 = vadd.f32 %v4425_v23, %v4399_v49  ;;  %v4613_v23 = vld [vmem:[%s8208_s10] sm:$0xff] }
 0x8a3   :  { %v3865_v36 = vpop.permute.xlu1 %3864 }
 0x8a4   :  { %v3978_v61 = vpop.permute.xlu0 %3977  ;;  %v3884_v57 = vsel %vm3163_vm3, %v3865_v36, %v8016_v62 }
 0x8a5   :  { %3919 = vmatpush.bf16.msrb.mxu0 %v3884_v57  ;;  %v3992_v50 = vsel %vm3273_vm5, %v8038_v17, %v3978_v61 }
 0x8a6   :  { %4738 = vperm.xlu2 %5012, %v4735_v11   ;;  %4062 = vmatpush.bf16.msra.mxu3 %v3992_v50  ;;  %v4200_v24 = vpop.permute.xlu2 %4199 }
 0x8a8   :  { %4945 = vmatmul.msk.bf16.vlgmr.msrb.gmra.mxu0 %vm3896_vm10, %v4944_v4 }
 0x8a9   :  { %4952 = vmatmul.msk.bf16.vlgmr.msra.gmra.mxu3 %vm3896_vm10, %v8098_v6 }
 0x8ab   :  { %v4451_v40 = vpop.permute.xlu1 %4450 }
 0x8ac   :  { %v4459_v5 = vsel %vm3273_vm5, %v4449_v59, %v4451_v40  ;;  %v4460_v62 = vsel %vm3273_vm5, %v4451_v40, %v7924_v38  ;;  %v4554_v3 = vpop.permute.xlu0 %4553 }
 0x8ad   :  { %v4468_v0 = vadd.f32 %v4459_v5, %v4433_v55  ;;  %v4469_v25 = vadd.f32 %v4460_v62, %v4434_v37 }
 0x8af   :  { %v4504_v21 = vadd.f32 %v4495_v56, %v4469_v25  ;;  %v4503_v15 = vadd.f32 %v4494_v33, %v4468_v0 }
 0x8b1   :  { %v4539_v8 = vadd.f32 %v4530_v32, %v4504_v21 }
 0x8b3   :  { %v3974_v12 = vpop.permute.xlu1 %3973 }
 0x8b4   :  { %v4591_v20 = vpop.permute.xlu0 %4590  ;;  %v3991_v38 = vsel %vm3273_vm5, %v3974_v12, %v8038_v17 }
 0x8b5   :  { %4049 = vmatpush.bf16.msra.mxu2 %v3991_v38  ;;  %v4599_v48 = vsel %vm4598_vm13, %v8051_v63, %v4591_v20  ;;  %v4600_v18 = vsel %vm4598_vm13, %v4591_v20, %v7977_v51  ;;  %v4284_v51 = vld [vmem:[%s8207_s9] sm:$0xff] }
 0x8b8   :  { %4951 = vmatmul.msk.bf16.vlgmr.msra.gmra.mxu2 %vm3896_vm10, %v8098_v6 }
 0x8bb   :  { %v4519_v45 = vpop.permute.xlu1 %4518 }
 0x8bc   :  { %v4196_v7 = vpop.permute.xlu0 %4195  ;;  %v4529_v39 = vsel %vm1668_vm8, %v4519_v45, %v8045_v58 }
 0x8bd   :  { %v4538_v43 = vadd.f32 %v4529_v39, %v4503_v15 }
 0x8c3   :  { %v4556_v29 = vpop.permute.xlu1 %4555 }
 0x8c4   :  { %v4564_v13 = vsel %vm3163_vm3, %v4554_v3, %v4556_v29  ;;  %v4565_v17 = vsel %vm3163_vm3, %v4556_v29, %v8027_v47  ;;  %v3970_v35 = vpop.permute.xlu0 %3969  ;;  %v4186_v47 = vpop.permute.xlu2 %4185 }
 0x8c5   :  { %v4573_v16 = vadd.f32 %v4564_v13, %v4538_v43  ;;  %v4574_v46 = vadd.f32 %v4565_v17, %v4539_v8 }
 0x8c7   :  { %v4608_v31 = vadd.f32 %v4599_v48, %v4573_v16  ;;  %v4609_v42 = vadd.f32 %v4600_v18, %v4574_v46 }
 0x8c9   :  { %4627 = vrot.lane.b32.xlu1 %v4609_v42, %s5101_s15  ;;  %4625 = vrot.lane.b32.xlu0 %v4608_v31, %s5101_s15 }
 0x8cb   :  { %v3980_v58 = vpop.permute.xlu1 %3979 }
 0x8cc   :  { %v3993_v44 = vsel %vm3273_vm5, %v3980_v58, %v8062_v34  ;;  %v4188_v19 = vpop.permute.xlu0 %4187  ;;  %v4192_v9 = vpop.permute.xlu2 %4191  ;;  %v4953_v34 = vld [vmem:[%s8206_s8 + $0x8] sm:$0xf] }
 0x8cd   :  { %v4005_v55 = vsel %vm127_vm0, %v3993_v44, 0  ;;  %v4203_v14 = vsel %vm3524_vm7, %v4186_v47, %v4188_v19 }
 0x8ce   :  { %4022 = vmatpush.bf16.msra.mxu0 %v4005_v55 }
 0x8d1   :  { %2797 = vperm.xlu1 %5011, %v2794_v28   ;;  %4287 = vperm.xlu0 %5010, %v4284_v51  }
 0x8d3   :  { %v4198_v52 = vpop.permute.xlu1 %4197 }
 0x8d4   :  { %v4207_v30 = vsel %vm3524_vm7, %v4196_v7, %v4198_v52  ;;  %v4208_v59 = vsel %vm3524_vm7, %v4198_v52, %v4200_v24  ;;  %v4194_v1 = vpop.permute.xlu0 %4193  ;;  %v4184_v41 = vpop.permute.xlu2 %4183 }
 0x8d5   :  { %v4223_v2 = vsel %vm127_vm0, %v4207_v30, 0  ;;  %v4226_v63 = vsel %vm127_vm0, %v4208_v59, 0  ;;  %v4205_v10 = vsel %vm3524_vm7, %v4192_v9, %v4194_v1  ;;  %v4206_v26 = vsel %vm3524_vm7, %v4194_v1, %v4196_v7 }
 0x8d6   :  { %4260 = vmatpush.bf16.msrb.mxu2 %v4223_v2  ;;  %4273 = vmatpush.bf16.msrb.mxu3 %v4226_v63  ;;  %v4217_v27 = vsel %vm127_vm0, %v4205_v10, 0  ;;  %v4220_v54 = vsel %vm127_vm0, %v4206_v26, 0  ;;  %v4202_v36 = vsel %vm3524_vm7, %v4184_v41, %v4186_v47  ;;  %v8521_v26 = vld [vmem:[#allocation48_spill] sm:$0xff] }
 0x8da   :  { %4261 = vmatpush.bf16.msrb.mxu2 %v4203_v14 }
 0x8db   :  { %v3972_v33 = vpop.permute.xlu1 %3971 }
 0x8dc   :  { %v3989_v4 = vsel %vm3273_vm5, %v3970_v35, %v3972_v33  ;;  %v3990_v60 = vsel %vm3273_vm5, %v3972_v33, %v3974_v12 }
 0x8dd   :  { %4023 = vmatpush.bf16.msra.mxu0 %v3989_v4  ;;  %4036 = vmatpush.bf16.msra.mxu1 %v3990_v60 }
 0x8de   :  { %4956 = vmatmul.msk.bf16.vlgmr.msrb.gmra.mxu2 %vm3896_vm10, %v4953_v34 }
 0x8e0   :  { %4949 = vmatmul.msk.bf16.vlgmr.msra.gmra.mxu0 %vm3896_vm10, %v8098_v6  ;;  %4950 = vmatmul.msk.bf16.vlgmr.msra.gmra.mxu1 %vm3896_vm10, %v8098_v6 }
 0x8e1   :  { %4234 = vmatpush.bf16.msrb.mxu0 %v4217_v27  ;;  %4247 = vmatpush.bf16.msrb.mxu1 %v4220_v54  ;;  %v8523_v54 = vld [vmem:[#allocation11_spill] sm:$0xff] }
 0x8e3   :  { %v4190_v11 = vpop.permute.xlu1 %4189 }
 0x8e4   :  { %v4204_v22 = vsel %vm3524_vm7, %v4188_v19, %v4190_v11  ;;  %v8525_v11 = vld [vmem:[#allocation16_spill] sm:$0xff] }
 0x8e5   :  { %4248 = vmatpush.bf16.msrb.mxu1 %v4202_v36  ;;  %4274 = vmatpush.bf16.msrb.mxu3 %v4204_v22  ;;  %v250_v22 = vadd.f32 %v8525_v11, %v8523_v54 }
 0x8e8   :  { %4957 = vmatmul.msk.bf16.vlgmr.msrb.gmra.mxu3 %vm3896_vm10, %v4953_v34 }
 0x8eb   :  { %v4182_v61 = vpop.permute.xlu1 %4181 }
 0x8ec   :  { %v4201_v57 = vsel %vm3524_vm7, %v4182_v61, %v4184_v41  ;;  %v8524_v41 = vld [vmem:[#allocation15_spill] sm:$0xff] }
 0x8ed   :  { %4235 = vmatpush.bf16.msrb.mxu0 %v4201_v57  ;;  %v218_v36 = vadd.f32 %v8524_v41, %v8523_v54 }
 0x8f0   :  { %4954 = vmatmul.msk.bf16.vlgmr.msrb.gmra.mxu0 %vm3896_vm10, %v4953_v34  ;;  %4955 = vmatmul.msk.bf16.vlgmr.msrb.gmra.mxu1 %vm3896_vm10, %v4953_v34  ;;  %v4634_v53 = vpop.permute.xlu2 %4633  ;;  %v8522_v34 = vld [vmem:[#allocation45_spill] sm:$0xff] }
 0x8f1   :  { %v3947_v5 = vpop.f32.mrf.mxu2 }
 0x8f2   :  { %v3960_v62 = vpop.f32.mrf.mxu3 }
 0x8f3   :  { %v4630_v50 = vpop.permute.xlu0 %4629 }
 0x8f8   :  { %v3934_v3 = vpop.f32.mrf.mxu1  ;;  %v4618_v52 = vpop.permute.xlu2 %4617 }
 0x8f9   :  { %v3949_v25 = vpop.f32.mrf.mxu2 }
 0x8fa   :  { %v3962_v56 = vpop.f32.mrf.mxu3 }
 0x8fb   :  { %v8526_v56 = vld [vmem:[#allocation60_spill] sm:$0xff] }
 0x900   :  { %v3936_v6 = vpop.f32.mrf.mxu1 }
 0x909   :  { %v4632_v49 = vpop.permute.xlu1 %4631 }
 0x90a   :  { %v4637_v40 = vsel %vm3273_vm5, %v4630_v50, %v4632_v49  ;;  %v4638_v37 = vsel %vm3273_vm5, %v4632_v49, %v4634_v53  ;;  %v266_v49 = vmax.f32 %v218_v36, 0.0 }
 0x90b   :  { %4962 = vmatpush.msk.msra.mxu2 %vm127_vm0, %v4637_v40  ;;  %4964 = vmatpush.msk.msra.mxu3 %vm127_vm0, %v4638_v37  ;;  %v4734_v40 = vld [vmem:[%s8210_s12] sm:$0xff]  ;;  %s5105_s12 = smov [#allocation5]  }
 0x90c   :  { %4963 = vmatmul.msk.f32.vlgmr.msra.gmra.mxu2 %vm111_vm1, %v4613_v23  ;;  %4965 = vmatmul.msk.f32.vlgmr.msra.gmra.mxu3 %vm111_vm1, %v4613_v23  ;;  %s4867_s27 = sshll.u32 %s5105_s12, 4  ;;  %s4868_s27 = int_to_ptr.vmem [resolvable:$true] %s4867_s27 }
 0x925   :  { %v3921_v0 = vpop.f32.mrf.mxu0 }
 0x92c   :  { %v4064_v15 = vpop.f32.mrf.mxu3 }
 0x92d   :  { %v3923_v21 = vpop.f32.mrf.mxu0  ;;  %v4065_v12 = vadd.f32 %v4064_v15, %v3960_v62 }
 0x92e   :  { %v8527_v21 = vld [vmem:[#allocation62_spill] sm:$0xff] }
 0x934   :  { %v4066_v32 = vpop.f32.mrf.mxu3 }
 0x93b   :  { %v4628_v20 = vpop.permute.xlu1 %4627  ;;  %v4626_v38 = vpop.permute.xlu0 %4625 }
 0x93c   :  { %v4636_v45 = vsel %vm3273_vm5, %v4628_v20, %v4630_v50  ;;  %v4635_v7 = vsel %vm3273_vm5, %v4626_v38, %v4628_v20  ;;  %v4051_v39 = vpop.f32.mrf.mxu2  ;;  %v8528_v38 = vld [vmem:[#allocation13_spill] sm:$0xff] }
 0x93d   :  { %4958 = vmatpush.msk.msra.mxu0 %vm127_vm0, %v4635_v7  ;;  %4960 = vmatpush.msk.msra.mxu1 %vm127_vm0, %v4636_v45  ;;  %v4052_v24 = vadd.f32 %v4051_v39, %v3947_v5  ;;  %v154_v45 = vadd.f32 %v8528_v38, %v8523_v54  ;;  %v8529_v7 = vld [vmem:[#allocation14_spill] sm:$0xff] }
 0x93e   :  { %4959 = vmatmul.msk.f32.vlgmr.msra.gmra.mxu0 %vm111_vm1, %v4613_v23  ;;  %4961 = vmatmul.msk.f32.vlgmr.msra.gmra.mxu1 %vm111_vm1, %v4613_v23  ;;  %v267_v23 = vmax.f32 %v250_v22, 0.0  ;;  %v186_v39 = vadd.f32 %v8529_v7, %v8523_v54 }
 0x943   :  { %v2798_v30 = vpop.permute.xlu1 %2797  ;;  %v4288_v59 = vpop.permute.xlu0 %4287 }
 0x944   :  { %v4053_v43 = vpop.f32.mrf.mxu2  ;;  %v2802_v33 = vadd.f32 %v2798_v30, %v8521_v26  ;;  %v2803_v4 = vadd.f32 %v2798_v30, %v8522_v34  ;;  %v2800_v6 = vadd.f32 %v2798_v30, %v8526_v56  ;;  %v2801_v15 = vadd.f32 %v2798_v30, %v8527_v21 }
 0x946   :  { %v2806_v53 = vmax.f32 %v2802_v33, 0.0  ;;  %v2807_v50 = vmax.f32 %v2803_v4, 0.0  ;;  %v2804_v43 = vmax.f32 %v2800_v6, 0.0 }
 0x95d   :  { %v4025_v29 = vpop.f32.mrf.mxu0  ;;  %v4038_v8 = vpop.f32.mrf.mxu1 }
 0x95e   :  { %v4026_v13 = vadd.f32 %v4025_v29, %v3921_v0  ;;  %v4039_v17 = vadd.f32 %v4038_v8, %v3934_v3  ;;  %v2805_v29 = vmax.f32 %v2801_v15, 0.0  ;;  %v264_v8 = vmax.f32 %v154_v45, 0.0 }
 0x961   :  { %v4263_v35 = vpop.f32.mrf.mxu2 }
 0x962   :  { %v4282_v28 = vadd.f32 %v4263_v35, %v4052_v24 }
 0x964   :  { %v4292_v9 = vadd.f32 %v4288_v59, %v4282_v28 }
 0x965   :  { %v4027_v16 = vpop.f32.mrf.mxu0  ;;  %v4040_v46 = vpop.f32.mrf.mxu1 }
 0x966   :  { %v4296_v61 = vmax.f32 %v4292_v9, 0.0  ;;  %v4832_v9 = vld.sshfl [vmem:[#allocation1 + $0x8] sm:$0xff pattern:$0x75316420] }
 0x969   :  { %v4265_v48 = vpop.f32.mrf.mxu2 }
 0x96b   :  { %v4276_v18 = vpop.f32.mrf.mxu3 }
 0x96c   :  { %v4283_v51 = vadd.f32 %v4276_v18, %v4065_v12 }
 0x96d   :  { %v4237_v31 = vpop.f32.mrf.mxu0  ;;  %v4250_v42 = vpop.f32.mrf.mxu1 }
 0x96e   :  { %v4280_v58 = vadd.f32 %v4237_v31, %v4026_v13  ;;  %v4281_v44 = vadd.f32 %v4250_v42, %v4039_v17  ;;  %v4293_v1 = vadd.f32 %v4288_v59, %v4283_v51  ;;  %v265_v13 = vmax.f32 %v186_v39, 0.0  ;;  %v4739_v17 = vpop.permute.xlu2 %4738  ;;  %v4833_v42 = vld.sshfl [vmem:[#allocation1 + $0x10] sm:$0xff pattern:$0x75316420] }
 0x970   :  { %v4297_v57 = vmax.f32 %v4293_v1, 0.0  ;;  %v4290_v62 = vadd.f32 %v4288_v59, %v4280_v58  ;;  %v4291_v3 = vadd.f32 %v4288_v59, %v4281_v44  ;;  %v4834_v58 = vld.sshfl [vmem:[#allocation1 + $0x18] sm:$0xff pattern:$0x75316420] }
 0x972   :  { %v4294_v32 = vmax.f32 %v4290_v62, 0.0  ;;  %v4295_v24 = vmax.f32 %v4291_v3, 0.0 }
 0x973   :  { %v4278_v47 = vpop.f32.mrf.mxu3 }
 0x975   :  { %v4239_v55 = vpop.f32.mrf.mxu0  ;;  %v4252_v19 = vpop.f32.mrf.mxu1 }
 0x98f   :  { %v4707_v2 = vpop.f32.mrf.mxu2  ;;  %v4727_v63 = vpop.f32.mrf.mxu3 }
 0x990   :  { %v4708_v14 = vadd.f32 %v4707_v2, %v4618_v52  ;;  %v4728_v10 = vadd.f32 %v4727_v63, %v4618_v52  ;;  %v4831_v63 = vld.sshfl [vmem:[#allocation1] sm:$0xff pattern:$0x75316420] }
 0x992   :  { %v4732_v60 = vmax.f32 %v4708_v14, 0.0  ;;  %v4733_v27 = vmax.f32 %v4728_v10, 0.0 }
 0x994   :  { %4796 = vmatpush.msrb.mxu2 %v4732_v60  ;;  %4816 = vmatpush.msrb.mxu3 %v4733_v27 }
 0x996   :  { %4797 = vmatpush.msrb.mxu2 %v4296_v61  ;;  %4817 = vmatpush.msrb.mxu3 %v4297_v57 }
 0x998   :  { %4798 = vmatpush.msrb.mxu2 %v2806_v53  ;;  %4818 = vmatpush.msrb.mxu3 %v2807_v50 }
 0x99a   :  { %4799 = vmatpush.msrb.mxu2 %v266_v49  ;;  %4819 = vmatpush.msrb.mxu3 %v267_v23 }
 0x99b   :  { %4968 = vmatmul.msk.f32.vlgmr.msrb.gmra.mxu2 %vm1271_vm14, %v4734_v40  ;;  %4969 = vmatmul.msk.f32.vlgmr.msrb.gmra.mxu3 %vm1271_vm14, %v4734_v40 }
 0x9bb   :  { %v4667_v37 = vpop.f32.mrf.mxu0  ;;  %v4687_v5 = vpop.f32.mrf.mxu1 }
 0x9bc   :  { %v4668_v0 = vadd.f32 %v4667_v37, %v4618_v52  ;;  %v4688_v25 = vadd.f32 %v4687_v5, %v4618_v52 }
 0x9be   :  { %v4730_v12 = vmax.f32 %v4668_v0, 0.0  ;;  %v4731_v20 = vmax.f32 %v4688_v25, 0.0 }
 0x9c0   :  { %4756 = vmatpush.msrb.mxu0 %v4730_v12  ;;  %4776 = vmatpush.msrb.mxu1 %v4731_v20 }
 0x9c2   :  { %4757 = vmatpush.msrb.mxu0 %v4294_v32  ;;  %4777 = vmatpush.msrb.mxu1 %v4295_v24 }
 0x9c4   :  { %4758 = vmatpush.msrb.mxu0 %v2804_v43  ;;  %4778 = vmatpush.msrb.mxu1 %v2805_v29 }
 0x9c6   :  { %4759 = vmatpush.msrb.mxu0 %v264_v8  ;;  %4779 = vmatpush.msrb.mxu1 %v265_v13 }
 0x9c7   :  { %4966 = vmatmul.msk.f32.vlgmr.msrb.gmra.mxu0 %vm1271_vm14, %v4734_v40  ;;  %4967 = vmatmul.msk.f32.vlgmr.msrb.gmra.mxu1 %vm1271_vm14, %v4734_v40 }
 0xa1e   :  { %v4801_v35 = vpop.f32.mrf.mxu2  ;;  %v4821_v16 = vpop.f32.mrf.mxu3 }
 0xa1f   :  { %v4802_v46 = vadd.f32 %v4801_v35, %v4739_v17  ;;  %v4822_v48 = vadd.f32 %v4821_v16, %v4739_v17 }
 0xa21   :  { %v4826_v18 = vmax.f32 %v4802_v46, 0.0  ;;  %v4827_v31 = vmax.f32 %v4822_v48, 0.0 }
 0xa23   :  { %v4845_v44 = vrot.slane %v4826_v18, 4  ;;  %v4846_v47 = vrot.slane %v4827_v31, 4 }
 0xa25   :  { %v4853_v55 = vsel %vm127_vm0, %v4833_v42, %v4845_v44  ;;  %4861 = vst [vmem:[#allocation5 + $0x30] sm:$0xf] %v4845_v44  ;;  %v4854_v19 = vsel %vm127_vm0, %v4834_v58, %v4846_v47 }
 0xa26   :  { %4857 = vst [vmem:[#allocation5 + $0x10] sm:$0xff] %v4853_v55 }
 0xa27   :  { %4858 = vst [vmem:[#allocation5 + $0x18] sm:$0xff] %v4854_v19 }
 0xa28   :  { %4862 = vst [vmem:[#allocation5 + $0x38] sm:$0xf] %v4846_v47 }
 0xa44   :  { %v4761_v28 = vpop.f32.mrf.mxu0  ;;  %v4781_v51 = vpop.f32.mrf.mxu1 }
 0xa45   :  { %v4762_v52 = vadd.f32 %v4761_v28, %v4739_v17  ;;  %v4782_v30 = vadd.f32 %v4781_v51, %v4739_v17 }
 0xa47   :  { %v4824_v59 = vmax.f32 %v4762_v52, 0.0  ;;  %v4825_v2 = vmax.f32 %v4782_v30, 0.0 }
 0xa49   :  { %v4843_v1 = vrot.slane %v4824_v59, 4  ;;  %v4844_v14 = vrot.slane %v4825_v2, 4 }
 0xa4b   :  { %v4851_v10 = vsel %vm127_vm0, %v4831_v63, %v4843_v1  ;;  %4859 = vst [vmem:[#allocation5 + $0x20] sm:$0xf] %v4843_v1  ;;  %v4852_v26 = vsel %vm127_vm0, %v4832_v9, %v4844_v14 }
 0xa4c   :  { %4855 = vst [vmem:[#allocation5] sm:$0xff] %v4851_v10 }
 0xa4d   :  { %4856 = vst [vmem:[#allocation5 + $0x8] sm:$0xff] %v4852_v26 }
 0xa4e   :  { %4860 = vst [vmem:[#allocation5 + $0x28] sm:$0xf] %v4844_v14 }
 0xa4f   :  { %4875 = dma.vmem_to_hbm [thread:$0]  %s4868_s27, 1024, %s4870_s29, [#allocation4], %s5067_s18, %s5067_s18, %s5068_s19  }
 0xa50   :  { %5064 = dma.done.wait [#allocation4], 1024  }
 0xa51   :  { %5065 = vsyncadd [#allocation4], 4294966272 }
 0xa52   :  { %4880 = vsyncpa [#allocation3], 1 }
 0xa53   :  { %4881 = vsyncpa [#allocation4], 1 }

</bundles_post_ra>
